<compile_context>
chip_gen: v5e
topology: v5e:2x2
jax: 0.10.0
libtpu: 0.0.40
codegen_flags: <defaults>
</compile_context>

<pallas_src>
import functools

import jax
import jax.numpy as jnp
from jax.experimental import pallas as pl
from jax.experimental.pallas import tpu as pltpu

TM = 256     # row tile: even grid (2 steps at M=512) for v7x core sharding,
             # halves per-step overhead on v5e/v6e vs TM=128
LANE = 128   # TPU lane width; feature dims padded to this for dense vst stores


# ----------------------------- helpers ------------------------------------- #
def _round_up(n, m):
    return ((n + m - 1) // m) * m


def _gelu(x):
    # exact (erf) GELU, matching torch.nn.GELU() default.
    # TODO(synk): tanh-approx GELU (EUP slot) is faster on v6e/v7x but deviates
    # slightly from torch's exact-erf default; keeping erf for parity.
    return 0.5 * x * (1.0 + jax.lax.erf(x * 0.7071067811865476))


# ----------------------------- Pallas kernel -------------------------------- #
def _mlp_fused_kernel(x_ref, *refs, n_layers):
    """in_proj -> (n-2) hidden -> out_proj in one body; intermediates stay on-chip.

    refs = (w_0, b_0, w_1, b_1, ..., w_{L-1}, b_{L-1}, o_ref)
    Weights + activations are bf16 on the MXU; accumulation / bias / GELU in f32.
    """
    o_ref = refs[-1]
    h = x_ref[...]                                   # (TM, K) bf16 (cast in prep)
    for i in range(n_layers):
        w = refs[2 * i][...]                         # (K_i, N_i) bf16, VMEM resident
        b = refs[2 * i + 1][...]                     # (1, N_i)  f32
        y = jnp.dot(h, w, preferred_element_type=jnp.float32) + b
        if i < n_layers - 1:
            h = _gelu(y).astype(jnp.bfloat16)        # act in f32, feed MXU bf16
        else:
            o_ref[...] = y.astype(o_ref.dtype)       # no activation after out_proj


# ----------------------------- parameters ---------------------------------- #
def init_mlp_params(key, d_in, d_out, n_dense_layers, d_hidden=None):
    """Matches the torch MLP layer structure; weights stored as (in, out)."""
    d_hidden = d_out if d_hidden is None else d_hidden
    dims = [d_in] + [d_hidden] * (n_dense_layers - 1) + [d_out]
    keys = jax.random.split(key, n_dense_layers)
    params = []
    for i in range(n_dense_layers):
        kw, kb = jax.random.split(keys[i])
        bound = dims[i] ** -0.5
        w = jax.random.uniform(kw, (dims[i], dims[i + 1]), jnp.float32, -bound, bound)
        b = jax.random.uniform(kb, (dims[i + 1],), jnp.float32, -bound, bound)
        params.append({"w": w, "b": b})
    return params


def prepare_params(params):
    """One-time prep: zero-pad feature dims to multiples of 128 (lane-dense,
    MXU-friendly) and cast weights to bf16. Padded columns stay exactly zero
    through the whole chain (zero weight cols + zero bias, GELU(0)=0, zero weight
    rows in the next layer), so results are unchanged."""
    prepped = []
    for i, layer in enumerate(params):
        w, b = layer["w"], layer["b"]
        k, n = w.shape
        n_p = _round_up(n, LANE)
        k_p = k if i == 0 else _round_up(k, LANE)
        wp = jnp.zeros((k_p, n_p), jnp.float32).at[:k, :n].set(w).astype(jnp.bfloat16)
        bp = jnp.zeros((1, n_p), jnp.float32).at[0, :n].set(b)
        prepped.append((wp, bp))
    return prepped


def _resident_spec(shape):
    """Weights/biases: constant index_map -> single VMEM buffer (no pipelining)."""
    try:
        return pl.BlockSpec(shape, lambda i: (0, 0), pipeline_mode=pl.Buffered(1))
    except TypeError:  # older jax without pipeline_mode on BlockSpec
        return pl.BlockSpec(shape, lambda i: (0, 0))


# ----------------------------- forward -------------------------------------- #
@jax.jit
def mlp_forward(x_bf16, prepped):
    """x_bf16: (M, K) bf16 with M % TM == 0 (prep once, outside the hot path).
    Returns the lane-padded (M, Np) f32 output; consumers slice [:, :d_out]
    lazily — padded columns are exactly zero."""
    M, K = x_bf16.shape
    n_layers = len(prepped)
    Np = prepped[-1][0].shape[1]

    in_specs = [pl.BlockSpec((TM, K), lambda i: (i, 0))]
    flat_args = [x_bf16]
    for w, b in prepped:
        in_specs.append(_resident_spec(w.shape))
        in_specs.append(_resident_spec(b.shape))
        flat_args.extend([w, b])

    # advisory cost estimate for the XLA scheduler (kernel is overhead-dominated)
    flops = sum(2 * M * w.shape[0] * w.shape[1] for w, _ in prepped)
    transcendentals = sum(M * w.shape[1] for w, _ in prepped[:-1])  # erf per act elem
    bytes_accessed = (x_bf16.size * 2
                      + sum(w.size * 2 + b.size * 4 for w, b in prepped)
                      + M * Np * 4)

    return pl.pallas_call(
        functools.partial(_mlp_fused_kernel, n_layers=n_layers),
        out_shape=jax.ShapeDtypeStruct((M, Np), jnp.float32),
        grid=(M // TM,),
        in_specs=in_specs,
        out_specs=pl.BlockSpec((TM, Np), lambda i: (i, 0)),
        compiler_params=pltpu.CompilerParams(
            dimension_semantics=("parallel",)),
        cost_estimate=pl.CostEstimate(
            flops=flops,
            transcendentals=transcendentals,
            bytes_accessed=bytes_accessed),
    )(*flat_args)


# ----------------------------- main ----------------------------------------- #
if __name__ == "__main__":
    D_IN = 32          # d_in_feats
    D_OUT = 32         # d_out_feats
    D_HIDDEN = 64      # d_hidden_feats
    N_DENSE = 4        # n_dense_layers (in_proj + 2 hidden + out_proj)
    M = 512            # rows -> grid of 2 parallel row tiles (TM = 256)

    root = jax.random.PRNGKey(0)
    kp, kx = jax.random.split(root)

    params = init_mlp_params(kp, D_IN, D_OUT, N_DENSE, D_HIDDEN)
    prepped = prepare_params(params)

    x = jax.random.normal(kx, (M, D_IN), jnp.float32)

    # one-time data prep (outside the hot path): bf16 cast + row pad if ragged
    Mp = _round_up(M, TM)
    x_bf16 = x.astype(jnp.bfloat16)
    if Mp != M:
        x_bf16 = jnp.pad(x_bf16, ((0, Mp - M), (0, 0)))

    out_padded = mlp_forward(x_bf16, prepped)
    jax.block_until_ready(out_padded)
    out = out_padded[:M, :D_OUT]          # lazy consumer-side slice
    assert out.shape == (M, D_OUT)

    # reference 1: identical bf16-weight path in plain JAX (tight tolerance)
    ref = x.astype(jnp.bfloat16)
    for i, (w, b) in enumerate(prepped):
        y = jnp.dot(ref, w, preferred_element_type=jnp.float32) + b
        ref = _gelu(y).astype(jnp.bfloat16) if i < len(prepped) - 1 else y
    ref = ref[:, :D_OUT]
    assert jnp.allclose(out, ref, rtol=2e-3, atol=2e-3), \
        float(jnp.max(jnp.abs(out - ref)))

    # reference 2: original f32 torch-semantics MLP (loose tol: bf16 weight quant)
    ref32 = x
    for i, layer in enumerate(params):
        y = ref32 @ layer["w"] + layer["b"]
        ref32 = _gelu(y) if i < len(params) - 1 else y
    assert jnp.allclose(out, ref32, rtol=5e-2, atol=5e-2), \
        float(jnp.max(jnp.abs(out - ref32)))

    print("KERNEL_OK")
</pallas_src>

<mosaic_0001>
module attributes {stable_mosaic.version = 11 : i64} {
  func.func @_mlp_fused_kernel(%arg0: i32, %arg1: memref<256x32xbf16, #tpu.memory_space<vmem>>, %arg2: memref<32x128xbf16, #tpu.memory_space<vmem>>, %arg3: memref<1x128xf32, #tpu.memory_space<vmem>>, %arg4: memref<128x128xbf16, #tpu.memory_space<vmem>>, %arg5: memref<1x128xf32, #tpu.memory_space<vmem>>, %arg6: memref<128x128xbf16, #tpu.memory_space<vmem>>, %arg7: memref<1x128xf32, #tpu.memory_space<vmem>>, %arg8: memref<128x128xbf16, #tpu.memory_space<vmem>>, %arg9: memref<1x128xf32, #tpu.memory_space<vmem>>, %arg10: memref<256x128xf32, #tpu.memory_space<vmem>>) attributes {dimension_semantics = [#tpu.dimension_semantics<parallel>], iteration_bounds = array<i64: 2>, scalar_prefetch = 0 : i64, scratch_operands = 0 : i64, tpu.core_type = #tpu.core_type<tc>, window_params = [{transform_indices = @transform_0, window_bounds = array<i64: 256, 32>}, {pipeline_mode = #tpu.pipeline_mode<synchronous>, transform_indices = @transform_1, window_bounds = array<i64: 32, 128>}, {pipeline_mode = #tpu.pipeline_mode<synchronous>, transform_indices = @transform_2, window_bounds = array<i64: 1, 128>}, {pipeline_mode = #tpu.pipeline_mode<synchronous>, transform_indices = @transform_3, window_bounds = array<i64: 128, 128>}, {pipeline_mode = #tpu.pipeline_mode<synchronous>, transform_indices = @transform_4, window_bounds = array<i64: 1, 128>}, {pipeline_mode = #tpu.pipeline_mode<synchronous>, transform_indices = @transform_5, window_bounds = array<i64: 128, 128>}, {pipeline_mode = #tpu.pipeline_mode<synchronous>, transform_indices = @transform_6, window_bounds = array<i64: 1, 128>}, {pipeline_mode = #tpu.pipeline_mode<synchronous>, transform_indices = @transform_7, window_bounds = array<i64: 128, 128>}, {pipeline_mode = #tpu.pipeline_mode<synchronous>, transform_indices = @transform_8, window_bounds = array<i64: 1, 128>}, {transform_indices = @transform_9, window_bounds = array<i64: 256, 128>}]} {
    %c0 = arith.constant 0 : index
    %c0_0 = arith.constant 0 : index
    %0 = vector.load %arg1[%c0, %c0_0] : memref<256x32xbf16, #tpu.memory_space<vmem>>, vector<256x32xbf16>
    %c0_1 = arith.constant 0 : index
    %c0_2 = arith.constant 0 : index
    %1 = vector.load %arg2[%c0_1, %c0_2] : memref<32x128xbf16, #tpu.memory_space<vmem>>, vector<32x128xbf16>
    %c0_3 = arith.constant 0 : index
    %c0_4 = arith.constant 0 : index
    %2 = vector.load %arg3[%c0_3, %c0_4] : memref<1x128xf32, #tpu.memory_space<vmem>>, vector<1x128xf32>
    %cst = arith.constant dense<0.000000e+00> : vector<256x128xf32>
    %3 = tpu.matmul %0, %1, %cst {dimension_numbers = #tpu.dot_dimension_numbers<[1], [0], [0], [1], [0, 0, 1, 1], [], []>} : vector<256x32xbf16>, vector<32x128xbf16>, vector<256x128xf32> -> vector<256x128xf32>
    %4 = vector.broadcast %2 : vector<1x128xf32> to vector<256x128xf32>
    %5 = arith.addf %3, %4 : vector<256x128xf32>
    %cst_5 = arith.constant 5.000000e-01 : f32
    %6 = vector.broadcast %cst_5 : f32 to vector<256x128xf32>
    %7 = arith.mulf %6, %5 : vector<256x128xf32>
    %cst_6 = arith.constant 0.707106769 : f32
    %8 = vector.broadcast %cst_6 : f32 to vector<256x128xf32>
    %9 = arith.mulf %5, %8 : vector<256x128xf32>
    %10 = math.erf %9 : vector<256x128xf32>
    %cst_7 = arith.constant 1.000000e+00 : f32
    %11 = vector.broadcast %cst_7 : f32 to vector<256x128xf32>
    %12 = arith.addf %11, %10 : vector<256x128xf32>
    %13 = arith.mulf %7, %12 : vector<256x128xf32>
    %14 = arith.truncf %13 : vector<256x128xf32> to vector<256x128xbf16>
    %c0_8 = arith.constant 0 : index
    %c0_9 = arith.constant 0 : index
    %15 = vector.load %arg4[%c0_8, %c0_9] : memref<128x128xbf16, #tpu.memory_space<vmem>>, vector<128x128xbf16>
    %c0_10 = arith.constant 0 : index
    %c0_11 = arith.constant 0 : index
    %16 = vector.load %arg5[%c0_10, %c0_11] : memref<1x128xf32, #tpu.memory_space<vmem>>, vector<1x128xf32>
    %cst_12 = arith.constant dense<0.000000e+00> : vector<256x128xf32>
    %17 = tpu.matmul %14, %15, %cst_12 {dimension_numbers = #tpu.dot_dimension_numbers<[1], [0], [0], [1], [0, 0, 1, 1], [], []>} : vector<256x128xbf16>, vector<128x128xbf16>, vector<256x128xf32> -> vector<256x128xf32>
    %18 = vector.broadcast %16 : vector<1x128xf32> to vector<256x128xf32>
    %19 = arith.addf %17, %18 : vector<256x128xf32>
    %cst_13 = arith.constant 5.000000e-01 : f32
    %20 = vector.broadcast %cst_13 : f32 to vector<256x128xf32>
    %21 = arith.mulf %20, %19 : vector<256x128xf32>
    %cst_14 = arith.constant 0.707106769 : f32
    %22 = vector.broadcast %cst_14 : f32 to vector<256x128xf32>
    %23 = arith.mulf %19, %22 : vector<256x128xf32>
    %24 = math.erf %23 : vector<256x128xf32>
    %cst_15 = arith.constant 1.000000e+00 : f32
    %25 = vector.broadcast %cst_15 : f32 to vector<256x128xf32>
    %26 = arith.addf %25, %24 : vector<256x128xf32>
    %27 = arith.mulf %21, %26 : vector<256x128xf32>
    %28 = arith.truncf %27 : vector<256x128xf32> to vector<256x128xbf16>
    %c0_16 = arith.constant 0 : index
    %c0_17 = arith.constant 0 : index
    %29 = vector.load %arg6[%c0_16, %c0_17] : memref<128x128xbf16, #tpu.memory_space<vmem>>, vector<128x128xbf16>
    %c0_18 = arith.constant 0 : index
    %c0_19 = arith.constant 0 : index
    %30 = vector.load %arg7[%c0_18, %c0_19] : memref<1x128xf32, #tpu.memory_space<vmem>>, vector<1x128xf32>
    %cst_20 = arith.constant dense<0.000000e+00> : vector<256x128xf32>
    %31 = tpu.matmul %28, %29, %cst_20 {dimension_numbers = #tpu.dot_dimension_numbers<[1], [0], [0], [1], [0, 0, 1, 1], [], []>} : vector<256x128xbf16>, vector<128x128xbf16>, vector<256x128xf32> -> vector<256x128xf32>
    %32 = vector.broadcast %30 : vector<1x128xf32> to vector<256x128xf32>
    %33 = arith.addf %31, %32 : vector<256x128xf32>
    %cst_21 = arith.constant 5.000000e-01 : f32
    %34 = vector.broadcast %cst_21 : f32 to vector<256x128xf32>
    %35 = arith.mulf %34, %33 : vector<256x128xf32>
    %cst_22 = arith.constant 0.707106769 : f32
    %36 = vector.broadcast %cst_22 : f32 to vector<256x128xf32>
    %37 = arith.mulf %33, %36 : vector<256x128xf32>
    %38 = math.erf %37 : vector<256x128xf32>
    %cst_23 = arith.constant 1.000000e+00 : f32
    %39 = vector.broadcast %cst_23 : f32 to vector<256x128xf32>
    %40 = arith.addf %39, %38 : vector<256x128xf32>
    %41 = arith.mulf %35, %40 : vector<256x128xf32>
    %42 = arith.truncf %41 : vector<256x128xf32> to vector<256x128xbf16>
    %c0_24 = arith.constant 0 : index
    %c0_25 = arith.constant 0 : index
    %43 = vector.load %arg8[%c0_24, %c0_25] : memref<128x128xbf16, #tpu.memory_space<vmem>>, vector<128x128xbf16>
    %c0_26 = arith.constant 0 : index
    %c0_27 = arith.constant 0 : index
    %44 = vector.load %arg9[%c0_26, %c0_27] : memref<1x128xf32, #tpu.memory_space<vmem>>, vector<1x128xf32>
    %cst_28 = arith.constant dense<0.000000e+00> : vector<256x128xf32>
    %45 = tpu.matmul %42, %43, %cst_28 {dimension_numbers = #tpu.dot_dimension_numbers<[1], [0], [0], [1], [0, 0, 1, 1], [], []>} : vector<256x128xbf16>, vector<128x128xbf16>, vector<256x128xf32> -> vector<256x128xf32>
    %46 = vector.broadcast %44 : vector<1x128xf32> to vector<256x128xf32>
    %47 = arith.addf %45, %46 : vector<256x128xf32>
    %c0_29 = arith.constant 0 : index
    %c0_30 = arith.constant 0 : index
    %48 = vector.load %arg10[%c0_29, %c0_30] : memref<256x128xf32, #tpu.memory_space<vmem>>, vector<256x128xf32>
    tpu.vector_store %arg10[%c0_29, %c0_30], %47 {strides = array<i32>} : memref<256x128xf32, #tpu.memory_space<vmem>>, vector<256x128xf32>,
    return
  }
  func.func @transform_0(%arg0: i32) -> (i32, i32) {
    %c0_i32 = arith.constant 0 : i32
    %c0_i32_0 = arith.constant 0 : i32
    return %arg0, %c0_i32 : i32, i32
  }
  func.func @transform_1(%arg0: i32) -> (i32, i32) {
    %c0_i32 = arith.constant 0 : i32
    %c0_i32_0 = arith.constant 0 : i32
    %c0_i32_1 = arith.constant 0 : i32
    return %c0_i32, %c0_i32_0 : i32, i32
  }
  func.func @transform_2(%arg0: i32) -> (i32, i32) {
    %c0_i32 = arith.constant 0 : i32
    %c0_i32_0 = arith.constant 0 : i32
    %c0_i32_1 = arith.constant 0 : i32
    return %c0_i32, %c0_i32_0 : i32, i32
  }
  func.func @transform_3(%arg0: i32) -> (i32, i32) {
    %c0_i32 = arith.constant 0 : i32
    %c0_i32_0 = arith.constant 0 : i32
    %c0_i32_1 = arith.constant 0 : i32
    return %c0_i32, %c0_i32_0 : i32, i32
  }
  func.func @transform_4(%arg0: i32) -> (i32, i32) {
    %c0_i32 = arith.constant 0 : i32
    %c0_i32_0 = arith.constant 0 : i32
    %c0_i32_1 = arith.constant 0 : i32
    return %c0_i32, %c0_i32_0 : i32, i32
  }
  func.func @transform_5(%arg0: i32) -> (i32, i32) {
    %c0_i32 = arith.constant 0 : i32
    %c0_i32_0 = arith.constant 0 : i32
    %c0_i32_1 = arith.constant 0 : i32
    return %c0_i32, %c0_i32_0 : i32, i32
  }
  func.func @transform_6(%arg0: i32) -> (i32, i32) {
    %c0_i32 = arith.constant 0 : i32
    %c0_i32_0 = arith.constant 0 : i32
    %c0_i32_1 = arith.constant 0 : i32
    return %c0_i32, %c0_i32_0 : i32, i32
  }
  func.func @transform_7(%arg0: i32) -> (i32, i32) {
    %c0_i32 = arith.constant 0 : i32
    %c0_i32_0 = arith.constant 0 : i32
    %c0_i32_1 = arith.constant 0 : i32
    return %c0_i32, %c0_i32_0 : i32, i32
  }
  func.func @transform_8(%arg0: i32) -> (i32, i32) {
    %c0_i32 = arith.constant 0 : i32
    %c0_i32_0 = arith.constant 0 : i32
    %c0_i32_1 = arith.constant 0 : i32
    return %c0_i32, %c0_i32_0 : i32, i32
  }
  func.func @transform_9(%arg0: i32) -> (i32, i32) {
    %c0_i32 = arith.constant 0 : i32
    %c0_i32_0 = arith.constant 0 : i32
    return %arg0, %c0_i32 : i32, i32
  }
}

</mosaic_0001>

<bundles_post_ra>
// kernel: mlp_forward.1
= control target key start
LH: loop header
LB: loop body
LE: loop exit
PB: predicated region body
PF: predicated region fallthrough
CT: control target
= control target key end

     0   :  { %14 = vsyncpa [#allocation3], 0  ;;  %s10517_s0 = inlined_call_operand.vmem [shape: bf16[512,32], index: 0, kind: input, shape index: {}]   ;;  %s10518_s1 = inlined_call_operand.vmem [shape: bf16[32,128], index: 1, kind: input, shape index: {}]   ;;  %s10519_s2 = inlined_call_operand.vmem [shape: f32[1,128], index: 2, kind: input, shape index: {}]   ;;  %s10520_s3 = inlined_call_operand.vmem [shape: bf16[128,128], index: 3, kind: input, shape index: {}]   ;;  %s10521_s4 = inlined_call_operand.vmem [shape: f32[1,128], index: 4, kind: input, shape index: {}]   ;;  %s10522_s5 = inlined_call_operand.vmem [shape: bf16[128,128], index: 5, kind: input, shape index: {}]   ;;  %s10523_s6 = inlined_call_operand.vmem [shape: f32[1,128], index: 6, kind: input, shape index: {}]   ;;  %s10524_s7 = inlined_call_operand.vmem [shape: bf16[128,128], index: 7, kind: input, shape index: {}]   ;;  %s10525_s8 = inlined_call_operand.vmem [shape: f32[1,128], index: 8, kind: input, shape index: {}]   ;;  %s10526_s9 = inlined_call_operand.hbm [shape: f32[512,128], index: 9, kind: output, shape index: {}]  }
   0x1   :  { %16 = vsyncpa [#allocation3 + $0x1], 0  ;;  %s6155_s30 = smov 0   ;;  %s6157_s10 = smov 0  }
   0x2   :  { %s6159_s11 = smov 0   ;;  %s6161_s12 = smov 0  }
   0x3 LB: > { %s6176_s13 = sadd.s32 4294967295, %s6101_s12   ;;  %s5458_s14 = sadd.s32 4294967294, %s6101_s12   ;;  %s6101_s12 = sphi %s6161_s12, %s10694_s12   ;;  %s6097_s11 = sphi %s6159_s11, %s10693_s11   ;;  %s6093_s10 = sphi %s6157_s10, %s10692_s10   ;;  %s6089_s30 = sphi %s6155_s30, %s10691_s30  }
   0x4   : > { %s6180_s15 = sadd.s32 1, %s6101_s12   ;;  %s223_s16 = sadd.s32 1, %s6097_s11 }
   0x5   : > { %s220_s17 = ssub.s32 %s6101_s12, %s6180_s15  ;;  %p233_p0 = scmp.ne.s32.totalorder %s6097_s11, %s6093_s10 }
   0x6   : > { %p221_p1 = scmp.eq.s32.totalorder %s220_s17, 0  ;;  %p234_p2 = scmp.eq.s32.totalorder %s6176_s13, 1 }
   0x7   : > { %p239_p3 = scmp.ne.s32.totalorder %s6093_s10, %s6089_s30  ;;  %p240_p4 = scmp.eq.s32.totalorder %s5458_s14, 1 }
   0x8   : > { %s6191_s18 = scalar_select %p221_p1, %s6097_s11, %s223_s16  }
   0x9   : > { %p6193_p5 = por %p234_p2, %p233_p0  ;;  %p6197_p6 = por %p240_p4, %p239_p3 }
   0xa   : > { %p5461_p7 = scmp.ge.s32.totalorder %s6101_s12, 1  ;;  %p291_p8 = scmp.lt.s32.totalorder %s6101_s12, 3 }
   0xc   : > { %p292_p9 = pnand %p5461_p7, %p291_p8 }
   0xe   : > { %295 = sbr.rel (%p292_p9) target bundleno = 1390 (0x56e), region = 56 }
  0x13   : > { %v5767_v0 = vld [vmem:[%s10518_s1 + $0x8] sm:$0xff]  ;;  %s5463_s23 = sshll.u32 %s6176_s13, 5  ;;  %v5766_v1 = vld [vmem:[%s10518_s1] sm:$0xff]  ;;  %vm467_vm0 = vcmask 261120   ;;  %v5775_v13 = vld [vmem:[%s10520_s3 + $0x38] sm:$0xff]  ;;  %s5792_s24 = sshll.u32 %s6176_s13, 8 }
  0x14   : > { %p328_p10 = scmp.lt.s32.totalorder %s5463_s23, 63  ;;  %522 = vmatpush.bf16.msra.mxu0 %v5767_v0  ;;  %v6234_v10 = vld [vmem:[%s10519_s2] ss:$0 sm:$0xff]  ;;  %2097 = vmatpush.bf16.msra.mxu1 %v5775_v13  ;;  %v5774_v16 = vld [vmem:[%s10520_s3 + $0x30] sm:$0xff]  ;;  %v5773_v20 = vld [vmem:[%s10520_s3 + $0x28] sm:$0xff] }
  0x15   : > { %v5772_v25 = vld [vmem:[%s10520_s3 + $0x20] sm:$0xff]  ;;  %v5771_v33 = vld [vmem:[%s10520_s3 + $0x18] sm:$0xff]  ;;  %v5770_v42 = vld [vmem:[%s10520_s3 + $0x10] sm:$0xff] }
  0x16   : > { %s10696_s23 = smov (!%p328_p10, %s5463_s23), 63  ;;  %v5769_v52 = vld [vmem:[%s10520_s3 + $0x8] sm:$0xff]  ;;  %v5768_v61 = vld [vmem:[%s10520_s3] sm:$0xff] }
  0x17   : > { %s5464_s26 = sshll.u32 %s10696_s23, 2 }
  0x18   : > { %523 = vmatpush.bf16.msra.mxu0 %v5766_v1  ;;  %s6213_s29 = scalar_lea.vmem %s10517_s0, %s5464_s26  ;;  %2098 = vmatpush.bf16.msra.mxu1 %v5774_v16  ;;  %s324_s26 = sand.u32 1, %s6093_s10  }
  0x19   : > { %v5750_v2 = vld [vmem:[%s6213_s29] sm:$0xff]  ;;  %v5751_v3 = vld [vmem:[%s6213_s29 + $0x8] sm:$0xff]  ;;  %v5752_v4 = vld [vmem:[%s6213_s29 + $0x10] sm:$0xff]  ;;  %s5462_s27 = sshll.u32 %s324_s26, 8  ;;  %s5381_s17 = scalar_lea.sflag [#allocation3], %s324_s26 }
  0x1a   : > { %v5753_v5 = vld [vmem:[%s6213_s29 + $0x18] sm:$0xff]  ;;  %v5754_v6 = vld [vmem:[%s6213_s29 + $0x20] sm:$0xff]  ;;  %v5755_v7 = vld [vmem:[%s6213_s29 + $0x28] sm:$0xff]  ;;  %s9804_s16 = scalar_lea.vmem [#allocation2], %s5462_s27  ;;  %s5392_s27 = scalar_lea.hbm %s10526_s9, %s5792_s24 }
  0x1b   : > { %5537 = vmatmul.msk.bf16.vlgmr.msra.gmra.mxu0 %vm467_vm0, %v5750_v2  ;;  %v5756_v8 = vld [vmem:[%s6213_s29 + $0x30] sm:$0xff]  ;;  %v5757_v9 = vld [vmem:[%s6213_s29 + $0x38] sm:$0xff]  ;;  %v5758_v11 = vld [vmem:[%s6213_s29 + $0x40] sm:$0xff]  ;;  %s5393_s28 = sshll.u32 %s9804_s16, 4  ;;  %s5395_s14 = sshll.u32 %s5392_s27, 4  ;;  %s5394_s28 = int_to_ptr.vmem [resolvable:$true] %s5393_s28  ;;  %s5396_s14 = int_to_ptr.hbm [resolvable:$true] %s5395_s14 }
  0x1c   : > { %2099 = vmatpush.bf16.msra.mxu1 %v5773_v20  ;;  %v5759_v31 = vld [vmem:[%s6213_s29 + $0x48] sm:$0xff]  ;;  %s6053_s13 = sshra.s32 %s5396_s14, 4  ;;  %s6059_s24 = scalar_lea.hbm %s10526_s9, 512  ;;  %s6054_s13 = int_to_ptr.hbm [resolvable:$true] %s6053_s13 }
  0x1d   : > { %s6055_s21 = scalar_lea.hbm %s6054_s13, 256  ;;  %p6060_p0 = scmp.lt.s32.totalorder %s6054_s13, %s10526_s9 }
  0x1e   : > { %p6056_p11 = scmp.ne.s32.totalorder %s6054_s13, %s6055_s21  ;;  %p6061_p1 = scmp.lt.s32.totalorder %s6059_s24, %s6055_s21 }
  0x20   : > { %2100 = vmatpush.bf16.msra.mxu1 %v5772_v25  ;;  %p6057_p12 = pnand %p6056_p11, %p6193_p5  ;;  %p6062_p2 = por %p6061_p1, %p6060_p0 }
  0x22   : > { %p6058_p13 = pneg %p6057_p12 }
  0x24   : > { %2101 = vmatpush.bf16.msra.mxu1 %v5771_v33  ;;  %p6063_p3 = pnand %p6062_p2, %p6058_p13 }
  0x28   : > { %2102 = vmatpush.bf16.msra.mxu1 %v5770_v42 }
  0x2b   : > { %5538 = vmatmul.msk.bf16.gmra.mxu0 %vm467_vm0, %v5751_v3 }
  0x2c   : > { %2103 = vmatpush.bf16.msra.mxu1 %v5769_v52 }
  0x30   : > { %2104 = vmatpush.bf16.msra.mxu1 %v5768_v61 }
  0x3b   : > { %5539 = vmatmul.msk.bf16.gmra.mxu0 %vm467_vm0, %v5752_v4  ;;  %v5760_v4 = vld [vmem:[%s6213_s29 + $0x50] sm:$0xff] }
  0x4b   : > { %5540 = vmatmul.msk.bf16.gmra.mxu0 %vm467_vm0, %v5753_v5 }
  0x5b   : > { %5541 = vmatmul.msk.bf16.gmra.mxu0 %vm467_vm0, %v5754_v6 }
  0x6b   : > { %5542 = vmatmul.msk.bf16.gmra.mxu0 %vm467_vm0, %v5755_v7 }
  0x7b   : > { %5543 = vmatmul.msk.bf16.gmra.mxu0 %vm467_vm0, %v5756_v8 }
  0x8b   : > { %5544 = vmatmul.msk.bf16.gmra.mxu0 %vm467_vm0, %v5757_v9 }
  0x98   : > { %v525_v12 = vpop.f32.mrf.mxu0 }
  0x99   : > { %v6241_v14 = vadd.f32 %v6234_v10, %v525_v12 }
  0x9b   : > { %v6244_v15 = vmul.f32 0.70710677, %v6241_v14  ;;  %5545 = vmatmul.msk.bf16.gmra.mxu0 %vm467_vm0, %v5758_v11 }
  0x9d   : > { %v669_v17 = vmul.f32 %v6244_v15, %v6244_v15 }
  0x9f   : > { %v6252_v18 = vmin.f32 %v669_v17, 16.0 }
  0xa0   : > { %v527_v19 = vpop.f32.mrf.mxu0 }
  0xa1   : > { %v671_v21 = vmul.f32 2.1237322e-06, %v6252_v18  ;;  %v6259_v22 = vadd.f32 %v6234_v10, %v527_v19  ;;  %v682_v23 = vmul.f32 3.8918573e-05, %v6252_v18 }
  0xa3   : > { %v6263_v24 = vmul.f32 0.70710677, %v6259_v22  ;;  %v683_v26 = vadd.f32 0.001143296, %v682_v23  ;;  %v672_v27 = vadd.f32 0.00028619796, %v671_v21 }
  0xa5   : > { %v709_v28 = vmul.f32 %v6263_v24, %v6263_v24  ;;  %v684_v29 = vmul.f32 %v683_v26, %v6252_v18  ;;  %v673_v35 = vmul.f32 %v672_v27, %v6252_v18 }
  0xa7   : > { %v6271_v30 = vmin.f32 %v709_v28, 16.0  ;;  %v685_v34 = vadd.f32 0.014752088, %v684_v29  ;;  %v674_v44 = vadd.f32 0.0036580483, %v673_v35 }
  0xa8   : > { %v530_v32 = vpop.f32.mrf.mxu0 }
  0xa9   : > { %v711_v36 = vmul.f32 2.1237322e-06, %v6271_v30  ;;  %v6280_v37 = vadd.f32 %v6234_v10, %v530_v32  ;;  %v722_v38 = vmul.f32 3.8918573e-05, %v6271_v30  ;;  %v686_v39 = vmul.f32 %v685_v34, %v6252_v18 }
  0xaa   : > { %v675_v54 = vmul.f32 %v674_v44, %v6252_v18 }
  0xab   : > { %v712_v40 = vadd.f32 0.00028619796, %v711_v36  ;;  %5546 = vmatmul.msk.bf16.gmra.mxu0 %vm467_vm0, %v5759_v31  ;;  %v6286_v41 = vmul.f32 0.70710677, %v6280_v37  ;;  %v687_v43 = vadd.f32 0.112945676, %v686_v39 }
  0xac   : > { %v723_v46 = vadd.f32 0.001143296, %v722_v38  ;;  %v676_v63 = vadd.f32 0.05243302, %v675_v54 }
  0xad   : > { %v713_v45 = vmul.f32 %v712_v40, %v6271_v30  ;;  %v749_v47 = vmul.f32 %v6286_v41, %v6286_v41  ;;  %v688_v48 = vmul.f32 %v687_v43, %v6252_v18 }
  0xae   : > { %v724_v49 = vmul.f32 %v723_v46, %v6271_v30  ;;  %v677_v8 = vmul.f32 %v676_v63, %v6252_v18  ;;  %v606_v46 = vmul.f32 0.5, %v6259_v22 }
  0xaf   : > { %v6296_v50 = vmin.f32 %v749_v47, 16.0  ;;  %v689_v53 = vadd.f32 0.4994258, %v688_v48  ;;  %v714_v55 = vadd.f32 0.0036580483, %v713_v45 }
  0xb0   : > { %v532_v51 = vpop.f32.mrf.mxu0  ;;  %v725_v56 = vadd.f32 0.014752088, %v724_v49  ;;  %v678_v20 = vadd.f32 0.18741608, %v677_v8 }
  0xb1   : > { %v6303_v57 = vadd.f32 %v6234_v10, %v532_v51  ;;  %v690_v58 = vmul.f32 %v689_v53, %v6252_v18  ;;  %v762_v59 = vmul.f32 3.8918573e-05, %v6296_v50  ;;  %v715_v0 = vmul.f32 %v714_v55, %v6271_v30  ;;  %v5761_v55 = vld [vmem:[%s6213_s29 + $0x58] sm:$0xff] }
  0xb2   : > { %v726_v60 = vmul.f32 %v725_v56, %v6271_v30  ;;  %v751_v23 = vmul.f32 2.1237322e-06, %v6296_v50  ;;  %v679_v32 = vmul.f32 %v678_v20, %v6252_v18 }
  0xb3   : > { %v691_v62 = vadd.f32 1.0, %v690_v58  ;;  %v763_v2 = vadd.f32 0.001143296, %v762_v59  ;;  %v6313_v3 = vmul.f32 0.70710677, %v6303_v57 }
  0xb4   : > { %v727_v1 = vadd.f32 0.112945676, %v726_v60  ;;  %v716_v9 = vadd.f32 0.05243302, %v715_v0  ;;  %v752_v34 = vadd.f32 0.00028619796, %v751_v23 }
  0xb5   : > { %5838 = vrcp.f32 %v691_v62  ;;  %v764_v7 = vmul.f32 %v763_v2, %v6296_v50  ;;  %v789_v11 = vmul.f32 %v6313_v3, %v6313_v3  ;;  %v703_v43 = vand.u32 2147483648, %v691_v62 }
  0xb6   : > { %v728_v5 = vmul.f32 %v727_v1, %v6271_v30  ;;  %v717_v21 = vmul.f32 %v716_v9, %v6271_v30  ;;  %vm697_vm2 = vweird.f32 %v691_v62  ;;  %v701_v44 = vand.u32 2147483647, %v691_v62 }
  0xb7   : > { %v765_v13 = vadd.f32 0.014752088, %v764_v7  ;;  %v6326_v26 = vmin.f32 %v789_v11, 16.0  ;;  %v680_v45 = vadd.f32 1.1283791, %v679_v32  ;;  %v753_v18 = vmul.f32 %v752_v34, %v6296_v50 }
  0xb8   : > { %v535_v6 = vpop.f32.mrf.mxu0  ;;  %v729_v12 = vadd.f32 0.4994258, %v728_v5  ;;  %v718_v33 = vadd.f32 0.18741608, %v717_v21  ;;  %v704_v56 = vor.u32 1.1754944e-38, %v703_v43  ;;  %vm702_vm4 = vcmp.eq.f32.partialorder %v701_v44, 8.507059e+37 }
  0xb9   : > { %v766_v19 = vmul.f32 %v765_v13, %v6296_v50  ;;  %v6333_v36 = vadd.f32 %v6234_v10, %v535_v6  ;;  %v802_v39 = vmul.f32 3.8918573e-05, %v6326_v26  ;;  %v791_v40 = vmul.f32 2.1237322e-06, %v6326_v26 }
  0xba   : > { %v730_v17 = vmul.f32 %v729_v12, %v6271_v30  ;;  %v719_v49 = vmul.f32 %v718_v33, %v6271_v30  ;;  %v681_v30 = vmul.f32 %v680_v45, %v6244_v15  ;;  %v605_v43 = vmul.f32 0.5, %v6241_v14 }
  0xbb   : > { %5547 = vmatmul.msk.bf16.gmra.mxu0 %vm467_vm0, %v5760_v4  ;;  %v5839_v16 = vpop.eup %5838  ;;  %v767_v28 = vadd.f32 0.112945676, %v766_v19  ;;  %v6345_v51 = vmul.f32 0.70710677, %v6333_v36  ;;  %v803_v53 = vadd.f32 0.001143296, %v802_v39 }
  0xbc   : > { %v693_v25 = vmul.f32 %v5839_v16, %v691_v62  ;;  %v6328_v27 = vadd.f32 1.0, %v730_v17  ;;  %vm698_vm1 = vweird.f32 %v5839_v16  ;;  %v792_v54 = vadd.f32 0.00028619796, %v791_v40 }
  0xbd   : > { %v768_v38 = vmul.f32 %v767_v28, %v6296_v50  ;;  %vm6339_vm3 = vmor %vm697_vm2, %vm698_vm1  ;;  %v804_v61 = vmul.f32 %v803_v53, %v6326_v26  ;;  %v754_v62 = vadd.f32 0.0036580483, %v753_v18  ;;  %v720_v1 = vadd.f32 1.1283791, %v719_v49  ;;  %v5762_v53 = vld [vmem:[%s6213_s29 + $0x60] sm:$0xff] }
  0xbe   : > { %v694_v29 = vsub.f32 1.0, %v693_v25  ;;  %5840 = vrcp.f32 %v6328_v27  ;;  %v829_v2 = vmul.f32 %v6345_v51, %v6345_v51  ;;  %v793_v6 = vmul.f32 %v792_v54, %v6326_v26 }
  0xbf   : > { %v769_v47 = vadd.f32 0.4994258, %v768_v38  ;;  %v741_v7 = vand.u32 2147483647, %v6328_v27  ;;  %v743_v15 = vand.u32 2147483648, %v6328_v27  ;;  %v755_v12 = vmul.f32 %v754_v62, %v6296_v50 }
  0xc0   : > { %v537_v31 = vpop.f32.mrf.mxu0  ;;  %v695_v35 = vmul.f32 %v5839_v16, %v694_v29  ;;  %v805_v8 = vadd.f32 0.014752088, %v804_v61  ;;  %vm737_vm6 = vweird.f32 %v6328_v27  ;;  %v721_v19 = vmul.f32 %v720_v1, %v6263_v24 }
  0xc1   : > { %v770_v60 = vmul.f32 %v769_v47, %v6296_v50  ;;  %v6357_v63 = vadd.f32 %v6234_v10, %v537_v31  ;;  %v744_v20 = vor.u32 1.1754944e-38, %v743_v15  ;;  %v794_v23 = vadd.f32 0.0036580483, %v793_v6 }
  0xc2   : > { %v696_v42 = vadd.f32 %v5839_v16, %v695_v35  ;;  %v806_v21 = vmul.f32 %v805_v8, %v6326_v26  ;;  %vm742_vm8 = vcmp.eq.f32.partialorder %v741_v7, 8.507059e+37  ;;  %v756_v31 = vadd.f32 0.05243302, %v755_v12 }
  0xc3   : > { %v6361_v5 = vadd.f32 1.0, %v770_v60  ;;  %v6370_v13 = vmul.f32 0.70710677, %v6357_v63  ;;  %v795_v39 = vmul.f32 %v794_v23, %v6326_v26 }
  0xc4   : > { %v5841_v48 = vpop.eup %5840  ;;  %v700_v52 = vsel %vm6339_vm3, %v5839_v16, %v696_v42  ;;  %v6372_v16 = vmin.f32 %v829_v2, 16.0  ;;  %v757_v44 = vmul.f32 %v756_v31, %v6296_v50 }
  0xc5   : > { %v733_v58 = vmul.f32 %v5841_v48, %v6328_v27  ;;  %v705_v0 = vsel %vm702_vm4, %v704_v56, %v700_v52  ;;  %vm738_vm5 = vweird.f32 %v5841_v48  ;;  %5842 = vrcp.f32 %v6361_v5 }
  0xc6   : > { %v706_v9 = vmul.f32 %v705_v0, %v681_v30  ;;  %vm739_vm7 = vmor %vm737_vm6, %vm738_vm5  ;;  %v869_v32 = vmul.f32 %v6370_v13, %v6370_v13  ;;  %v807_v27 = vadd.f32 0.112945676, %v806_v21  ;;  %v842_v24 = vmul.f32 3.8918573e-05, %v6372_v16 }
  0xc7   : > { %v734_v4 = vsub.f32 1.0, %v733_v58  ;;  %v831_v52 = vmul.f32 2.1237322e-06, %v6372_v16  ;;  %v758_v61 = vadd.f32 0.18741608, %v757_v44  ;;  %vm777_vm10 = vweird.f32 %v6361_v5 }
  0xc8   : > { %v6351_v59 = vpop.f32.mrf.mxu0  ;;  %v5553_v28 = vclamps-f32 %v706_v9, 1.0  ;;  %v6387_v45 = vmin.f32 %v869_v32, 16.0  ;;  %v808_v18 = vmul.f32 %v807_v27, %v6326_v26  ;;  %v843_v49 = vadd.f32 0.001143296, %v842_v24 }
  0xc9   : > { %v735_v11 = vmul.f32 %v5841_v48, %v734_v4  ;;  %v6400_v22 = vadd.f32 %v6234_v10, %v6351_v59  ;;  %v832_v4 = vadd.f32 0.00028619796, %v831_v52  ;;  %v759_v15 = vmul.f32 %v758_v61, %v6296_v50 }
  0xca   : > { %v1949_v42 = vadd.f32 1.0, %v5553_v28  ;;  %v809_v54 = vadd.f32 0.4994258, %v808_v18  ;;  %v844_v60 = vmul.f32 %v843_v49, %v6372_v16  ;;  %v871_v30 = vmul.f32 2.1237322e-06, %v6387_v45 }
  0xcb   : > { %5548 = vmatmul.msk.bf16.gmra.mxu0 %vm467_vm0, %v5761_v55  ;;  %v736_v17 = vadd.f32 %v5841_v48, %v735_v11  ;;  %v6379_v34 = vpop.eup %5842  ;;  %v796_v55 = vadd.f32 0.05243302, %v795_v39  ;;  %v6410_v59 = vmul.f32 0.70710677, %v6400_v22  ;;  %v833_v12 = vmul.f32 %v832_v4, %v6372_v16 }
  0xcc   : > { %v773_v38 = vmul.f32 %v6379_v34, %v6361_v5  ;;  %v1981_v58 = vmul.f32 %v1949_v42, %v605_v43  ;;  %v810_v62 = vmul.f32 %v809_v54, %v6326_v26  ;;  %v845_v2 = vadd.f32 0.014752088, %v844_v60 }
  0xcd   : > { %v740_v29 = vsel %vm739_vm7, %v5841_v48, %v736_v17  ;;  %v797_v6 = vmul.f32 %v796_v55, %v6326_v26  ;;  %v872_v8 = vadd.f32 0.00028619796, %v871_v30  ;;  %vm778_vm9 = vweird.f32 %v6379_v34 }
  0xce   : > { %v745_v33 = vsel %vm742_vm8, %v744_v20, %v740_v29  ;;  %v774_v48 = vsub.f32 1.0, %v773_v38  ;;  %v6405_v7 = vadd.f32 1.0, %v810_v62  ;;  %v846_v9 = vmul.f32 %v845_v2, %v6372_v16  ;;  %vm779_vm11 = vmor %vm777_vm10, %vm778_vm9 }
  0xcf   : > { %v746_v35 = vmul.f32 %v745_v33, %v721_v19  ;;  %v783_v19 = vand.u32 2147483648, %v6361_v5  ;;  %v798_v50 = vadd.f32 0.18741608, %v797_v6  ;;  %v781_v21 = vand.u32 2147483647, %v6361_v5 }
  0xd0   : > { %v542_v25 = vpop.f32.mrf.mxu0  ;;  %v775_v1 = vmul.f32 %v6379_v34, %v774_v48  ;;  %5844 = vrcp.f32 %v6405_v7  ;;  %v847_v23 = vadd.f32 0.112945676, %v846_v9  ;;  %v760_v28 = vadd.f32 1.1283791, %v759_v15 }
  0xd1   : > { %v5554_v40 = vclamps-f32 %v746_v35, 1.0  ;;  %v6417_v17 = vadd.f32 %v6234_v10, %v542_v25  ;;  %v873_v29 = vmul.f32 %v872_v8, %v6387_v45  ;;  %v909_v31 = vmul.f32 %v6410_v59, %v6410_v59 }
  0xd2   : > { %v776_v11 = vadd.f32 %v6379_v34, %v775_v1  ;;  %v848_v32 = vmul.f32 %v847_v23, %v6372_v16  ;;  %v882_v33 = vmul.f32 3.8918573e-05, %v6387_v45  ;;  %v834_v35 = vadd.f32 0.0036580483, %v833_v12 }
  0xd3   : > { %v1950_v47 = vadd.f32 1.0, %v5554_v40  ;;  %v6431_v27 = vmul.f32 0.70710677, %v6417_v17  ;;  %v784_v5 = vor.u32 1.1754944e-38, %v783_v19  ;;  %v799_v38 = vmul.f32 %v798_v50, %v6326_v26  ;;  %v5763_v26 = vld [vmem:[%s6213_s29 + $0x68] sm:$0xff] }
  0xd4   : > { %v780_v25 = vsel %vm779_vm11, %v6379_v34, %v776_v11  ;;  %vm782_vm12 = vcmp.eq.f32.partialorder %v781_v21, 8.507059e+37  ;;  %v849_v39 = vadd.f32 0.4994258, %v848_v32  ;;  %v761_v40 = vmul.f32 %v760_v28, %v6286_v41 }
  0xd5   : > { %v1982_v14 = vmul.f32 %v1950_v47, %v606_v46  ;;  %v785_v42 = vsel %vm782_vm12, %v784_v5, %v780_v25  ;;  %v874_v43 = vadd.f32 0.0036580483, %v873_v29  ;;  %v6436_v44 = vmin.f32 %v909_v31, 16.0 }
  0xd6   : > { %v5845_v24 = vpop.eup %5844  ;;  %v850_v18 = vmul.f32 %v849_v39, %v6372_v16  ;;  %v883_v46 = vadd.f32 0.001143296, %v882_v33  ;;  %v835_v47 = vmul.f32 %v834_v35, %v6372_v16  ;;  %v949_v48 = vmul.f32 %v6431_v27, %v6431_v27 }
  0xd7   : > { %v2013_v0 = vpack.c.bf16 %v1982_v14, %v1981_v58  ;;  %v813_v34 = vmul.f32 %v5845_v24, %v6405_v7  ;;  %v800_v52 = vadd.f32 1.1283791, %v799_v38  ;;  %v786_v41 = vmul.f32 %v785_v42, %v761_v40 }
  0xd8   : > { %v6393_v56 = vpop.f32.mrf.mxu0  ;;  %v823_v54 = vand.u32 2147483648, %v6405_v7  ;;  %v6446_v55 = vadd.f32 1.0, %v850_v18  ;;  %vm818_vm13 = vweird.f32 %v5845_v24  ;;  %v821_v14 = vand.u32 2147483647, %v6405_v7 }
  0xd9   : > { %2105 = vmatmul.bf16.vlgmr.msra.gmra.mxu1 %v2013_v0  ;;  %v814_v49 = vsub.f32 1.0, %v813_v34  ;;  %v884_v60 = vmul.f32 %v883_v46, %v6387_v45  ;;  %v875_v61 = vmul.f32 %v874_v43, %v6387_v45  ;;  %v911_v30 = vmul.f32 2.1237322e-06, %v6436_v44 }
  0xda   : > { %5846 = vrcp.f32 %v6446_v55  ;;  %v6453_v62 = vmin.f32 %v949_v48, 16.0  ;;  %vm817_vm14 = vweird.f32 %v6405_v7  ;;  %v801_v1 = vmul.f32 %v800_v52, %v6313_v3 }
  0xdb   : > { %5549 = vmatmul.msk.bf16.gmra.mxu0 %vm467_vm0, %v5762_v53  ;;  %v815_v58 = vmul.f32 %v5845_v24, %v814_v49  ;;  %v836_v2 = vadd.f32 0.05243302, %v835_v47  ;;  %v5555_v4 = vclamps-f32 %v786_v41, 1.0  ;;  %vm819_vm15 = vmor %vm817_vm14, %vm818_vm13  ;;  %v824_v6 = vor.u32 1.1754944e-38, %v823_v54 }
  0xdc   : > { %vm822_vm1 = vcmp.eq.f32.partialorder %v821_v14, 8.507059e+37  ;;  %v885_v8 = vadd.f32 0.014752088, %v884_v60  ;;  %v922_v9 = vmul.f32 3.8918573e-05, %v6436_v44  ;;  %v6461_v50 = vadd.f32 %v6234_v10, %v6393_v56 }
  0xdd   : > { %v816_v0 = vadd.f32 %v5845_v24, %v815_v58  ;;  %v876_v11 = vadd.f32 0.05243302, %v875_v61  ;;  %v912_v12 = vadd.f32 0.00028619796, %v911_v30  ;;  %v962_v3 = vmul.f32 3.8918573e-05, %v6453_v62 }
  0xde   : > { %v886_v21 = vmul.f32 %v885_v8, %v6387_v45  ;;  %v607_v28 = vmul.f32 0.5, %v6280_v37  ;;  %v951_v29 = vmul.f32 2.1237322e-06, %v6453_v62  ;;  %v837_v31 = vmul.f32 %v836_v2, %v6372_v16  ;;  %v5764_v58 = vld [vmem:[%s6213_s29 + $0x70] sm:$0xff] }
  0xdf   : > { %v820_v15 = vsel %vm819_vm15, %v5845_v24, %v816_v0  ;;  %v1951_v32 = vadd.f32 1.0, %v5555_v4  ;;  %v923_v35 = vadd.f32 0.001143296, %v922_v9  ;;  %v877_v56 = vmul.f32 %v876_v11, %v6387_v45 }
  0xe0   : > { %v6420_v20 = vpop.f32.mrf.mxu0  ;;  %v825_v19 = vsel %vm822_vm1, %v824_v6, %v820_v15  ;;  %v6465_v23 = vpop.eup %5846  ;;  %v913_v5 = vmul.f32 %v912_v12, %v6436_v44  ;;  %v887_v38 = vadd.f32 0.112945676, %v886_v21  ;;  %v608_v39 = vmul.f32 0.5, %v6303_v57 }
  0xe1   : > { %v826_v7 = vmul.f32 %v825_v19, %v801_v1  ;;  %v853_v24 = vmul.f32 %v6465_v23, %v6446_v55  ;;  %v6478_v37 = vmul.f32 0.70710677, %v6461_v50  ;;  %v963_v42 = vadd.f32 0.001143296, %v962_v3 }
  0xe2   : > { %v952_v34 = vadd.f32 0.00028619796, %v951_v29  ;;  %v888_v18 = vmul.f32 %v887_v38, %v6387_v45  ;;  %v838_v46 = vadd.f32 0.18741608, %v837_v31  ;;  %v1983_v47 = vmul.f32 %v1951_v32, %v607_v28 }
  0xe3   : > { %v5556_v25 = vclamps-f32 %v826_v7, 1.0  ;;  %v854_v43 = vsub.f32 1.0, %v853_v24  ;;  %v924_v49 = vmul.f32 %v923_v35, %v6436_v44  ;;  %v914_v52 = vadd.f32 0.0036580483, %v913_v5 }
  0xe4   : > { %v889_v41 = vadd.f32 0.4994258, %v888_v18  ;;  %v989_v57 = vmul.f32 %v6478_v37, %v6478_v37  ;;  %v964_v60 = vmul.f32 %v963_v42, %v6453_v62  ;;  %v953_v61 = vmul.f32 %v952_v34, %v6453_v62 }
  0xe5   : > { %v1952_v40 = vadd.f32 1.0, %v5556_v25  ;;  %v925_v14 = vadd.f32 0.014752088, %v924_v49  ;;  %v855_v30 = vmul.f32 %v6465_v23, %v854_v43  ;;  %v6491_v1 = vadd.f32 %v6234_v10, %v6420_v20 }
  0xe6   : > { %v890_v0 = vmul.f32 %v889_v41, %v6387_v45  ;;  %v839_v2 = vmul.f32 %v838_v46, %v6372_v16  ;;  %v915_v15 = vmul.f32 %v914_v52, %v6436_v44  ;;  %v6498_v8 = vmin.f32 %v989_v57, 16.0 }
  0xe7   : > { %v1984_v48 = vmul.f32 %v1952_v40, %v608_v39  ;;  %v926_v11 = vmul.f32 %v925_v14, %v6436_v44  ;;  %v965_v12 = vadd.f32 0.014752088, %v964_v60  ;;  %v954_v20 = vadd.f32 0.0036580483, %v953_v61 }
  0xe8   : > { %v6443_v53 = vpop.f32.mrf.mxu0  ;;  %v6495_v6 = vadd.f32 1.0, %v890_v0  ;;  %v856_v19 = vadd.f32 %v6465_v23, %v855_v30  ;;  %vm858_vm2 = vweird.f32 %v6465_v23  ;;  %v6508_v16 = vmul.f32 0.70710677, %v6491_v1 }
  0xe9   : > { %v2014_v54 = vpack.c.bf16 %v1984_v48, %v1983_v47  ;;  %v840_v7 = vadd.f32 1.1283791, %v839_v2  ;;  %vm857_vm3 = vweird.f32 %v6446_v55  ;;  %v861_v21 = vand.u32 2147483647, %v6446_v55 }
  0xea   : > { %5848 = vrcp.f32 %v6495_v6  ;;  %vm6513_vm4 = vmor %vm857_vm3, %vm858_vm2  ;;  %v927_v29 = vadd.f32 0.112945676, %v926_v11  ;;  %v966_v31 = vmul.f32 %v965_v12, %v6453_v62  ;;  %v916_v25 = vadd.f32 0.05243302, %v915_v15 }
  0xeb   : > { %5550 = vmatmul.msk.bf16.gmra.mxu0 %vm467_vm0, %v5763_v26  ;;  %v878_v26 = vadd.f32 0.18741608, %v877_v56  ;;  %2110 = vmatmul.bf16.gmra.mxu1 %v2014_v54  ;;  %v955_v32 = vmul.f32 %v954_v20, %v6453_v62  ;;  %v991_v35 = vmul.f32 2.1237322e-06, %v6498_v8  ;;  %v860_v56 = vsel %vm6513_vm4, %v6465_v23, %v856_v19 }
  0xec   : > { %v928_v24 = vmul.f32 %v927_v29, %v6436_v44  ;;  %v967_v38 = vadd.f32 0.112945676, %v966_v31  ;;  %v841_v40 = vmul.f32 %v840_v7, %v6345_v51  ;;  %vm862_vm5 = vcmp.eq.f32.partialorder %v861_v21, 8.507059e+37  ;;  %v5765_v7 = vld [vmem:[%s6213_s29 + $0x78] sm:$0xff] }
  0xed   : > { %v879_v4 = vmul.f32 %v878_v26, %v6387_v45  ;;  %v863_v45 = vand.u32 2147483648, %v6446_v55  ;;  %v1029_v55 = vmul.f32 %v6508_v16, %v6508_v16  ;;  %v1002_v18 = vmul.f32 3.8918573e-05, %v6498_v8 }
  0xee   : > { %v917_v23 = vmul.f32 %v916_v25, %v6436_v44  ;;  %v956_v46 = vadd.f32 0.05243302, %v955_v32  ;;  %v992_v47 = vadd.f32 0.00028619796, %v991_v35  ;;  %v968_v48 = vmul.f32 %v967_v38, %v6453_v62 }
  0xef   : > { %v880_v3 = vadd.f32 1.1283791, %v879_v4  ;;  %v864_v5 = vor.u32 1.1754944e-38, %v863_v45  ;;  %v6532_v49 = vmin.f32 %v1029_v55, 16.0  ;;  %v6536_v26 = vadd.f32 %v6234_v10, %v6443_v53 }
  0xf0   : > { %v6470_v33 = vpop.f32.mrf.mxu0  ;;  %v5849_v39 = vpop.eup %5848  ;;  %v901_v57 = vand.u32 2147483647, %v6495_v6  ;;  %v903_v54 = vand.u32 2147483648, %v6495_v6  ;;  %v1003_v61 = vadd.f32 0.001143296, %v1002_v18  ;;  %v957_v53 = vmul.f32 %v956_v46, %v6453_v62 }
  0xf1   : > { %v881_v42 = vmul.f32 %v880_v3, %v6370_v13  ;;  %v865_v34 = vsel %vm862_vm5, %v864_v5, %v860_v56  ;;  %v893_v43 = vmul.f32 %v5849_v39, %v6495_v6  ;;  %v929_v13 = vadd.f32 0.4994258, %v928_v24 }
  0xf2   : > { %v866_v41 = vmul.f32 %v865_v34, %v841_v40  ;;  %vm898_vm6 = vweird.f32 %v5849_v39  ;;  %v918_v30 = vadd.f32 0.18741608, %v917_v23  ;;  %v993_v0 = vmul.f32 %v992_v47, %v6498_v8 }
  0xf3   : > { %v894_v51 = vsub.f32 1.0, %v893_v43  ;;  %v930_v60 = vmul.f32 %v929_v13, %v6436_v44  ;;  %v1031_v4 = vmul.f32 2.1237322e-06, %v6532_v49  ;;  %vm897_vm7 = vweird.f32 %v6495_v6 }
  0xf4   : > { %v6551_v12 = vmul.f32 0.70710677, %v6536_v26  ;;  %v6555_v20 = vadd.f32 %v6234_v10, %v6470_v33  ;;  %v5557_v19 = vclamps-f32 %v866_v41, 1.0  ;;  %vm899_vm8 = vmor %vm897_vm7, %vm898_vm6  ;;  %v904_v45 = vor.u32 1.1754944e-38, %v903_v54 }
  0xf5   : > { %v895_v14 = vmul.f32 %v5849_v39, %v894_v51  ;;  %v6548_v11 = vadd.f32 1.0, %v930_v60  ;;  %vm902_vm9 = vcmp.eq.f32.partialorder %v901_v57, 8.507059e+37  ;;  %v1004_v28 = vmul.f32 %v1003_v61, %v6498_v8 }
  0xf6   : > { %v919_v6 = vmul.f32 %v918_v30, %v6436_v44  ;;  %v994_v29 = vadd.f32 0.0036580483, %v993_v0  ;;  %v958_v33 = vadd.f32 0.18741608, %v957_v53  ;;  %v1032_v32 = vadd.f32 0.00028619796, %v1031_v4 }
  0xf7   : > { %v896_v15 = vadd.f32 %v5849_v39, %v895_v14  ;;  %5850 = vrcp.f32 %v6548_v11  ;;  %v1069_v35 = vmul.f32 %v6551_v12, %v6551_v12  ;;  %v6567_v56 = vmul.f32 0.70710677, %v6555_v20 }
  0xf8   : > { %v6500_v9 = vpop.f32.mrf.mxu0  ;;  %v1953_v5 = vadd.f32 1.0, %v5557_v19  ;;  %v1005_v44 = vadd.f32 0.014752088, %v1004_v28  ;;  %v920_v38 = vadd.f32 1.1283791, %v919_v6  ;;  %v609_v40 = vmul.f32 0.5, %v6333_v36 }
  0xf9   : > { %v900_v21 = vsel %vm899_vm8, %v5849_v39, %v896_v15  ;;  %v995_v39 = vmul.f32 %v994_v29, %v6498_v8  ;;  %v959_v34 = vmul.f32 %v958_v33, %v6453_v62  ;;  %v1033_v23 = vmul.f32 %v1032_v32, %v6532_v49 }
  0xfa   : > { %v905_v31 = vsel %vm902_vm9, %v904_v45, %v900_v21  ;;  %v6577_v46 = vmin.f32 %v1069_v35, 16.0  ;;  %v1109_v47 = vmul.f32 %v6567_v56, %v6567_v56  ;;  %v1006_v41 = vmul.f32 %v1005_v44, %v6498_v8 }
  0xfb   : > { %5551 = vmatmul.msk.bf16.gmra.mxu0 %vm467_vm0, %v5764_v58  ;;  %v969_v58 = vadd.f32 0.4994258, %v968_v48  ;;  %v906_v25 = vmul.f32 %v905_v31, %v881_v42  ;;  %v610_v42 = vmul.f32 0.5, %v6357_v63  ;;  %v1985_v48 = vmul.f32 %v1953_v5, %v609_v40 }
  0xfc   : > { %v921_v36 = vmul.f32 %v920_v38, %v6410_v59  ;;  %v996_v63 = vadd.f32 0.05243302, %v995_v39  ;;  %v960_v54 = vadd.f32 1.1283791, %v959_v34  ;;  %v943_v60 = vand.u32 2147483648, %v6548_v11 }
  0xfd   : > { %v970_v2 = vmul.f32 %v969_v58, %v6453_v62  ;;  %v5558_v55 = vclamps-f32 %v906_v25, 1.0  ;;  %v5851_v18 = vpop.eup %5850  ;;  %v1042_v62 = vmul.f32 3.8918573e-05, %v6532_v49  ;;  %v1034_v61 = vadd.f32 0.0036580483, %v1033_v23 }
  0xfe   : > { %v933_v13 = vmul.f32 %v5851_v18, %v6548_v11  ;;  %v1071_v30 = vmul.f32 2.1237322e-06, %v6577_v46  ;;  %v6587_v53 = vmin.f32 %v1109_v47, 16.0  ;;  %v941_v59 = vand.u32 2147483647, %v6548_v11 }
  0xff   : > { %v6558_v3 = vadd.f32 1.0, %v970_v2  ;;  %v1954_v43 = vadd.f32 1.0, %v5558_v55  ;;  %v1007_v4 = vadd.f32 0.112945676, %v1006_v41  ;;  %v6593_v15 = vadd.f32 %v6234_v10, %v6500_v9 }
 0x100   : > { %v6538_v52 = vpop.f32.mrf.mxu0  ;;  %v934_v14 = vsub.f32 1.0, %v933_v13  ;;  %vm937_vm10 = vweird.f32 %v6548_v11  ;;  %v1043_v45 = vadd.f32 0.001143296, %v1042_v62  ;;  %v944_v21 = vor.u32 1.1754944e-38, %v943_v60 }
 0x101   : > { %5852 = vrcp.f32 %v6558_v3  ;;  %v1986_v51 = vmul.f32 %v1954_v43, %v610_v42  ;;  %v981_v28 = vand.u32 2147483647, %v6558_v3  ;;  %v983_v6 = vand.u32 2147483648, %v6558_v3 }
 0x102   : > { %v935_v2 = vmul.f32 %v5851_v18, %v934_v14  ;;  %v1008_v33 = vmul.f32 %v1007_v4, %v6498_v8  ;;  %v1044_v9 = vmul.f32 %v1043_v45, %v6532_v49  ;;  %v1035_v25 = vmul.f32 %v1034_v61, %v6532_v49 }
 0x103   : > { %v2015_v58 = vpack.c.bf16 %v1986_v51, %v1985_v48  ;;  %v1072_v11 = vadd.f32 0.00028619796, %v1071_v30  ;;  %vm942_vm13 = vcmp.eq.f32.partialorder %v941_v59, 8.507059e+37  ;;  %v1111_v35 = vmul.f32 2.1237322e-06, %v6587_v53 }
 0x104   : > { %vm977_vm14 = vweird.f32 %v6558_v3  ;;  %v6606_v44 = vmul.f32 0.70710677, %v6593_v15  ;;  %v984_v39 = vor.u32 1.1754944e-38, %v983_v6  ;;  %v1009_v40 = vadd.f32 0.4994258, %v1008_v33 }
 0x105   : > { %2115 = vmatmul.bf16.gmra.mxu1 %v2015_v58  ;;  %v961_v42 = vmul.f32 %v960_v54, %v6431_v27  ;;  %vm982_vm1 = vcmp.eq.f32.partialorder %v981_v28, 8.507059e+37  ;;  %v1045_v43 = vadd.f32 0.014752088, %v1044_v9  ;;  %v1036_v23 = vadd.f32 0.05243302, %v1035_v25 }
 0x106   : > { %v1073_v51 = vmul.f32 %v1072_v11, %v6577_v46  ;;  %v1010_v13 = vmul.f32 %v1009_v40, %v6498_v8  ;;  %v1149_v62 = vmul.f32 %v6606_v44, %v6606_v44  ;;  %v6617_v27 = vadd.f32 %v6234_v10, %v6538_v52 }
 0x107   : > { %v5853_v57 = vpop.eup %5852  ;;  %v1046_v41 = vmul.f32 %v1045_v43, %v6532_v49  ;;  %v611_v60 = vmul.f32 0.5, %v6400_v22  ;;  %v1037_v61 = vmul.f32 %v1036_v23, %v6532_v49 }
 0x108   : > { %v6569_v24 = vpop.f32.mrf.mxu0  ;;  %v973_v0 = vmul.f32 %v5853_v57, %v6558_v3  ;;  %vm978_vm12 = vweird.f32 %v5853_v57  ;;  %v6620_v58 = vadd.f32 1.0, %v1010_v13  ;;  %v1074_v59 = vadd.f32 0.0036580483, %v1073_v51 }
 0x109   : > { %vm979_vm15 = vmor %vm977_vm14, %vm978_vm12  ;;  %v1047_v14 = vadd.f32 0.112945676, %v1046_v41  ;;  %v6632_v45 = vmul.f32 0.70710677, %v6617_v27  ;;  %v1038_v6 = vadd.f32 0.18741608, %v1037_v61 }
 0x10a   : > { %v974_v19 = vsub.f32 1.0, %v973_v0  ;;  %5854 = vrcp.f32 %v6620_v58  ;;  %vm1017_vm3 = vweird.f32 %v6620_v58 }
 0x10b   : > { %5552 = vmatmul.msk.bf16.gmra.mxu0 %vm467_vm0, %v5765_v7  ;;  %vm938_vm0 = vweird.f32 %v5851_v18  ;;  %v936_v7 = vadd.f32 %v5851_v18, %v935_v2  ;;  %v612_v2 = vmul.f32 0.5, %v6417_v17  ;;  %v1122_v17 = vmul.f32 3.8918573e-05, %v6587_v53 }
 0x10c   : > { %vm939_vm11 = vmor %vm937_vm10, %vm938_vm0  ;;  %v975_v31 = vmul.f32 %v5853_v57, %v974_v19  ;;  %v6629_v19 = vmin.f32 %v1149_v62, 16.0  ;;  %v1039_v43 = vmul.f32 %v1038_v6, %v6532_v49 }
 0x10d   : > { %v940_v32 = vsel %vm939_vm11, %v5851_v18, %v936_v7  ;;  %v997_v18 = vmul.f32 %v996_v63, %v6498_v8  ;;  %v1082_v63 = vmul.f32 3.8918573e-05, %v6577_v46 }
 0x10e   : > { %v945_v55 = vsel %vm942_vm13, %v944_v21, %v940_v32  ;;  %v976_v5 = vadd.f32 %v5853_v57, %v975_v31  ;;  %v1048_v21 = vmul.f32 %v1047_v14, %v6532_v49  ;;  %v1075_v31 = vmul.f32 %v1074_v59, %v6577_v46 }
 0x10f   : > { %v946_v38 = vmul.f32 %v945_v55, %v921_v36  ;;  %v1112_v36 = vadd.f32 0.00028619796, %v1111_v35  ;;  %v1083_v0 = vadd.f32 0.001143296, %v1082_v63  ;;  %v998_v10 = vadd.f32 0.18741608, %v997_v18 }
 0x110   : > { %v6598_v29 = vpop.f32.mrf.mxu0  ;;  %v980_v34 = vsel %vm979_vm15, %v5853_v57, %v976_v5  ;;  %v1049_v9 = vadd.f32 0.4994258, %v1048_v21  ;;  %v1123_v35 = vadd.f32 0.001143296, %v1122_v17  ;;  %v5855_v55 = vpop.eup %5854  ;;  %v1151_v5 = vmul.f32 2.1237322e-06, %v6629_v19 }
 0x111   : > { %v5559_v47 = vclamps-f32 %v946_v38, 1.0  ;;  %v985_v48 = vsel %vm982_vm1, %v984_v39, %v980_v34  ;;  %v1113_v52 = vmul.f32 %v1112_v36, %v6587_v53  ;;  %v1084_v28 = vmul.f32 %v1083_v0, %v6577_v46 }
 0x112   : > { %v986_v3 = vmul.f32 %v985_v48, %v961_v42  ;;  %v999_v11 = vmul.f32 %v998_v10, %v6498_v8  ;;  %v1189_v38 = vmul.f32 %v6632_v45, %v6632_v45  ;;  %v1050_v39 = vmul.f32 %v1049_v9, %v6532_v49 }
 0x113   : > { %v1955_v54 = vadd.f32 1.0, %v5559_v47  ;;  %v1085_v25 = vadd.f32 0.014752088, %v1084_v28  ;;  %v1114_v32 = vadd.f32 0.0036580483, %v1113_v52  ;;  %v1013_v42 = vmul.f32 %v5855_v55, %v6620_v58 }
 0x114   : > { %v5560_v57 = vclamps-f32 %v986_v3, 1.0  ;;  %v1124_v34 = vmul.f32 %v1123_v35, %v6587_v53  ;;  %v1076_v8 = vadd.f32 0.05243302, %v1075_v31  ;;  %v6647_v18 = vadd.f32 1.0, %v1050_v39 }
 0x115   : > { %v1987_v22 = vmul.f32 %v1955_v54, %v611_v60  ;;  %v1086_v40 = vmul.f32 %v1085_v25, %v6577_v46  ;;  %v1115_v23 = vmul.f32 %v1114_v32, %v6587_v53  ;;  %v1014_v47 = vsub.f32 1.0, %v1013_v42 }
 0x116   : > { %v1956_v4 = vadd.f32 1.0, %v5560_v57  ;;  %v1125_v3 = vadd.f32 0.014752088, %v1124_v34  ;;  %v1000_v13 = vadd.f32 1.1283791, %v999_v11  ;;  %v6652_v36 = vmin.f32 %v1189_v38, 16.0 }
 0x117   : > { %v1087_v51 = vadd.f32 0.112945676, %v1086_v40  ;;  %v1152_v41 = vadd.f32 0.00028619796, %v1151_v5  ;;  %5856 = vrcp.f32 %v6647_v18  ;;  %v1015_v62 = vmul.f32 %v5855_v55, %v1014_v47 }
 0x118   : > { %v6624_v30 = vpop.f32.mrf.mxu0  ;;  %v1988_v7 = vmul.f32 %v1956_v4, %v612_v2  ;;  %vm1018_vm2 = vweird.f32 %v5855_v55  ;;  %v1023_v49 = vand.u32 2147483648, %v6620_v58  ;;  %v1162_v63 = vmul.f32 3.8918573e-05, %v6629_v19  ;;  %v6666_v4 = vld [vmem:[%s10519_s2] ss:$0 sm:$0xff] }
 0x119   : > { %v1040_v57 = vadd.f32 1.1283791, %v1039_v43  ;;  %v1021_v54 = vand.u32 2147483647, %v6620_v58  ;;  %v1088_v14 = vmul.f32 %v1087_v51, %v6577_v46  ;;  %v1126_v60 = vmul.f32 %v1125_v3, %v6587_v53  ;;  %vm1019_vm4 = vmor %vm1017_vm3, %vm1018_vm2 }
 0x11a   : > { %v2016_v33 = vpack.c.bf16 %v1988_v7, %v1987_v22  ;;  %v1077_v61 = vmul.f32 %v1076_v8, %v6577_v46  ;;  %v1116_v0 = vadd.f32 0.05243302, %v1115_v23  ;;  %v1016_v2 = vadd.f32 %v5855_v55, %v1015_v62 }
 0x11b   : > { %v1191_v59 = vmul.f32 2.1237322e-06, %v6652_v36  ;;  %v6670_v10 = vadd.f32 %v6666_v4, %v6569_v24  ;;  %v1089_v52 = vadd.f32 0.4994258, %v1088_v14  ;;  %v1127_v22 = vadd.f32 0.112945676, %v1126_v60 }
 0x11c   : > { %2120 = vmatmul.bf16.gmra.mxu1 %v2016_v33  ;;  %v1153_v7 = vmul.f32 %v1152_v41, %v6629_v19  ;;  %v1020_v21 = vsel %vm1019_vm4, %v5855_v55, %v1016_v2  ;;  %v1024_v28 = vor.u32 1.1754944e-38, %v1023_v49  ;;  %v1163_v6 = vadd.f32 0.001143296, %v1162_v63 }
 0x11d   : > { %v5857_v58 = vpop.eup %5856  ;;  %v1001_v17 = vmul.f32 %v1000_v13, %v6478_v37  ;;  %vm1022_vm5 = vcmp.eq.f32.partialorder %v1021_v54, 8.507059e+37  ;;  %v1041_v31 = vmul.f32 %v1040_v57, %v6508_v16  ;;  %v1078_v33 = vadd.f32 0.18741608, %v1077_v61 }
 0x11e   : > { %v1025_v9 = vsel %vm1022_vm5, %v1024_v28, %v1020_v21  ;;  %v1053_v25 = vmul.f32 %v5857_v58, %v6647_v18  ;;  %v1192_v24 = vadd.f32 0.00028619796, %v1191_v59  ;;  %v6677_v11 = vmul.f32 0.70710677, %v6670_v10 }
 0x11f   : > { %v1090_v32 = vmul.f32 %v1089_v52, %v6577_v46  ;;  %v1128_v35 = vmul.f32 %v1127_v22, %v6587_v53  ;;  %v1117_v55 = vmul.f32 %v1116_v0, %v6587_v53  ;;  %v1154_v5 = vadd.f32 0.0036580483, %v1153_v7 }
 0x120   : > { %v6650_v48 = vpop.f32.mrf.mxu0  ;;  %v1054_v38 = vsub.f32 1.0, %v1053_v25  ;;  %v1164_v16 = vmul.f32 %v1163_v6, %v6629_v19  ;;  %v1026_v39 = vmul.f32 %v1025_v9, %v1001_v17  ;;  %v1063_v40 = vand.u32 2147483648, %v6647_v18 }
 0x121   : > { %v6686_v42 = vadd.f32 1.0, %v1090_v32  ;;  %v1129_v34 = vadd.f32 0.4994258, %v1128_v35  ;;  %vm1058_vm6 = vweird.f32 %v5857_v58  ;;  %v1061_v8 = vand.u32 2147483647, %v6647_v18 }
 0x122   : > { %v1055_v43 = vmul.f32 %v5857_v58, %v1054_v38  ;;  %v1165_v23 = vadd.f32 0.014752088, %v1164_v16  ;;  %v1079_v47 = vmul.f32 %v1078_v33, %v6577_v46  ;;  %v1193_v51 = vmul.f32 %v1192_v24, %v6652_v36 }
 0x123   : > { %v1229_v3 = vmul.f32 %v6677_v11, %v6677_v11  ;;  %5858 = vrcp.f32 %v6686_v42  ;;  %v1118_v13 = vadd.f32 0.18741608, %v1117_v55  ;;  %v6696_v41 = vadd.f32 %v6666_v4, %v6598_v29 }
 0x124   : > { %v1056_v62 = vadd.f32 %v5857_v58, %v1055_v43  ;;  %vm1057_vm7 = vweird.f32 %v6647_v18  ;;  %v5561_v49 = vclamps-f32 %v1026_v39, 1.0  ;;  %v1064_v63 = vor.u32 1.1754944e-38, %v1063_v40 }
 0x125   : > { %vm1059_vm8 = vmor %vm1057_vm7, %vm1058_vm6  ;;  %v1130_v46 = vmul.f32 %v1129_v34, %v6587_v53  ;;  %v1202_v57 = vmul.f32 3.8918573e-05, %v6652_v36  ;;  %v1155_v54 = vmul.f32 %v1154_v5, %v6629_v19  ;;  %vm1062_vm9 = vcmp.eq.f32.partialorder %v1061_v8, 8.507059e+37 }
 0x126   : > { %v1060_v14 = vsel %vm1059_vm8, %v5857_v58, %v1056_v62  ;;  %v1166_v60 = vmul.f32 %v1165_v23, %v6629_v19  ;;  %v1194_v61 = vadd.f32 0.0036580483, %v1193_v51  ;;  %v6703_v0 = vmin.f32 %v1229_v3, 16.0 }
 0x127   : > { %v1065_v29 = vsel %vm1062_vm9, %v1064_v63, %v1060_v14  ;;  %v6705_v2 = vadd.f32 1.0, %v1130_v46  ;;  %v6708_v18 = vmul.f32 0.70710677, %v6696_v41  ;;  %v613_v7 = vmul.f32 0.5, %v6461_v50 }
 0x128   : > { %v6682_v37 = vpop.f32.mrf.mxu0  ;;  %v1066_v59 = vmul.f32 %v1065_v29, %v1041_v31  ;;  %v1167_v52 = vadd.f32 0.112945676, %v1166_v60  ;;  %v1957_v21 = vadd.f32 1.0, %v5561_v49  ;;  %v1203_v28 = vadd.f32 0.001143296, %v1202_v57 }
 0x129   : > { %v5859_v22 = vpop.eup %5858  ;;  %5860 = vrcp.f32 %v6705_v2  ;;  %v614_v6 = vmul.f32 0.5, %v6491_v1  ;;  %v1080_v58 = vadd.f32 1.1283791, %v1079_v47  ;;  %v1119_v25 = vmul.f32 %v1118_v13, %v6587_v53 }
 0x12a   : > { %v5562_v17 = vclamps-f32 %v1066_v59, 1.0  ;;  %v1093_v33 = vmul.f32 %v5859_v22, %v6686_v42  ;;  %v1156_v24 = vadd.f32 0.05243302, %v1155_v54  ;;  %v1195_v31 = vmul.f32 %v1194_v61, %v6652_v36 }
 0x12b   : > { %v1231_v32 = vmul.f32 2.1237322e-06, %v6703_v0  ;;  %v1269_v50 = vmul.f32 %v6708_v18, %v6708_v18  ;;  %v1168_v1 = vmul.f32 %v1167_v52, %v6629_v19  ;;  %v1989_v5 = vmul.f32 %v1957_v21, %v613_v7 }
 0x12c   : > { %v1958_v35 = vadd.f32 1.0, %v5562_v17  ;;  %v1094_v55 = vsub.f32 1.0, %v1093_v33  ;;  %v1101_v38 = vand.u32 2147483647, %v6686_v42  ;;  %v1103_v16 = vand.u32 2147483648, %v6686_v42 }
 0x12d   : > { %v1204_v39 = vmul.f32 %v1203_v28, %v6652_v36  ;;  %vm1098_vm0 = vweird.f32 %v5859_v22  ;;  %v1169_v34 = vadd.f32 0.4994258, %v1168_v1  ;;  %v1081_v8 = vmul.f32 %v1080_v58, %v6551_v12 }
 0x12e   : > { %v1990_v53 = vmul.f32 %v1958_v35, %v614_v6  ;;  %v1095_v40 = vmul.f32 %v5859_v22, %v1094_v55  ;;  %v1120_v23 = vadd.f32 1.1283791, %v1119_v25  ;;  %v1196_v47 = vadd.f32 0.05243302, %v1195_v31 }
 0x12f   : > { %v5861_v43 = vpop.eup %5860  ;;  %v1232_v51 = vadd.f32 0.00028619796, %v1231_v32  ;;  %vm1097_vm10 = vweird.f32 %v6686_v42  ;;  %v6728_v49 = vmin.f32 %v1269_v50, 16.0  ;;  %v6732_v63 = vadd.f32 %v6666_v4, %v6624_v30 }
 0x130   : > { %v6714_v9 = vpop.f32.mrf.mxu0  ;;  %v2017_v3 = vpack.c.bf16 %v1990_v53, %v1989_v5  ;;  %v1096_v13 = vadd.f32 %v5859_v22, %v1095_v40  ;;  %v1133_v62 = vmul.f32 %v5861_v43, %v6705_v2  ;;  %vm1099_vm11 = vmor %vm1097_vm10, %vm1098_vm0  ;;  %vm1102_vm12 = vcmp.eq.f32.partialorder %v1101_v38, 8.507059e+37 }
 0x131   : > { %v1104_v46 = vor.u32 1.1754944e-38, %v1103_v16  ;;  %v1170_v54 = vmul.f32 %v1169_v34, %v6629_v19  ;;  %v1205_v14 = vadd.f32 0.014752088, %v1204_v39  ;;  %vm1138_vm13 = vweird.f32 %v5861_v43 }
 0x132   : > { %2125 = vmatmul.bf16.gmra.mxu1 %v2017_v3  ;;  %v1100_v12 = vsel %vm1099_vm11, %v5859_v22, %v1096_v13  ;;  %v1134_v57 = vsub.f32 1.0, %v1133_v62  ;;  %v1141_v42 = vand.u32 2147483647, %v6705_v2  ;;  %v1143_v61 = vand.u32 2147483648, %v6705_v2 }
 0x133   : > { %v1105_v60 = vsel %vm1102_vm12, %v1104_v46, %v1100_v12  ;;  %v6739_v30 = vadd.f32 1.0, %v1170_v54  ;;  %v1206_v7 = vmul.f32 %v1205_v14, %v6652_v36  ;;  %v1157_v22 = vmul.f32 %v1156_v24, %v6629_v19 }
 0x134   : > { %v1106_v29 = vmul.f32 %v1105_v60, %v1081_v8  ;;  %v1135_v59 = vmul.f32 %v5861_v43, %v1134_v57  ;;  %v6744_v21 = vmul.f32 0.70710677, %v6732_v63  ;;  %v1233_v28 = vmul.f32 %v1232_v51, %v6703_v0 }
 0x135   : > { %vm1137_vm14 = vweird.f32 %v6705_v2  ;;  %5862 = vrcp.f32 %v6739_v30  ;;  %v1121_v58 = vmul.f32 %v1120_v23, %v6567_v56  ;;  %v1197_v17 = vmul.f32 %v1196_v47, %v6652_v36 }
 0x136   : > { %v1136_v6 = vadd.f32 %v5861_v43, %v1135_v59  ;;  %v1271_v33 = vmul.f32 2.1237322e-06, %v6728_v49  ;;  %vm1139_vm15 = vmor %vm1137_vm14, %vm1138_vm13  ;;  %v1144_v25 = vor.u32 1.1754944e-38, %v1143_v61  ;;  %v5563_v24 = vclamps-f32 %v1106_v29, 1.0 }
 0x137   : > { %vm1142_vm1 = vcmp.eq.f32.partialorder %v1141_v42, 8.507059e+37  ;;  %v1207_v32 = vadd.f32 0.112945676, %v1206_v7  ;;  %v1158_v50 = vadd.f32 0.18741608, %v1157_v22  ;;  %v1309_v35 = vmul.f32 %v6744_v21, %v6744_v21 }
 0x138   : > { %v6737_v52 = vpop.f32.mrf.mxu0  ;;  %v1140_v31 = vsel %vm1139_vm15, %v5861_v43, %v1136_v6  ;;  %v615_v55 = vmul.f32 0.5, %v6536_v26  ;;  %v1234_v1 = vadd.f32 0.0036580483, %v1233_v28  ;;  %v1198_v38 = vadd.f32 0.18741608, %v1197_v17 }
 0x139   : > { %v1145_v2 = vsel %vm1142_vm1, %v1144_v25, %v1140_v31  ;;  %v1208_v5 = vmul.f32 %v1207_v32, %v6652_v36  ;;  %v1272_v16 = vadd.f32 0.00028619796, %v1271_v33  ;;  %v1242_v39 = vmul.f32 3.8918573e-05, %v6703_v0 }
 0x13a   : > { %v1146_v56 = vmul.f32 %v1145_v2, %v1121_v58  ;;  %v1959_v34 = vadd.f32 1.0, %v5563_v24  ;;  %v1282_v8 = vmul.f32 3.8918573e-05, %v6728_v49  ;;  %v616_v23 = vmul.f32 0.5, %v6555_v20 }
 0x13b   : > { %v5863_v53 = vpop.eup %5862  ;;  %v1209_v43 = vadd.f32 0.4994258, %v1208_v5  ;;  %v1159_v47 = vmul.f32 %v1158_v50, %v6629_v19  ;;  %v6761_v51 = vmin.f32 %v1309_v35, 16.0  ;;  %v6766_v3 = vadd.f32 %v6666_v4, %v6650_v48 }
 0x13c   : > { %v5564_v40 = vclamps-f32 %v1146_v56, 1.0  ;;  %v1173_v26 = vmul.f32 %v5863_v53, %v6739_v30  ;;  %v1243_v12 = vadd.f32 0.001143296, %v1242_v39  ;;  %v1199_v57 = vmul.f32 %v1198_v38, %v6652_v36 }
 0x13d   : > { %v1210_v62 = vmul.f32 %v1209_v43, %v6652_v36  ;;  %v1235_v20 = vmul.f32 %v1234_v1, %v6703_v0  ;;  %v1273_v19 = vmul.f32 %v1272_v16, %v6728_v49  ;;  %v1991_v14 = vmul.f32 %v1959_v34, %v615_v55 }
 0x13e   : > { %v1960_v13 = vadd.f32 1.0, %v5564_v40  ;;  %v1174_v54 = vsub.f32 1.0, %v1173_v26  ;;  %v1283_v61 = vadd.f32 0.001143296, %v1282_v8  ;;  %v1311_v48 = vmul.f32 2.1237322e-06, %v6761_v51 }
 0x13f   : > { %v6774_v42 = vadd.f32 1.0, %v1210_v62  ;;  %v1244_v59 = vmul.f32 %v1243_v12, %v6703_v0  ;;  %v1322_v7 = vmul.f32 3.8918573e-05, %v6761_v51  ;;  %v1160_v22 = vadd.f32 1.1283791, %v1159_v47 }
 0x140   : > { %v6769_v46 = vpop.f32.mrf.mxu0  ;;  %v1992_v60 = vmul.f32 %v1960_v13, %v616_v23  ;;  %v1175_v29 = vmul.f32 %v5863_v53, %v1174_v54  ;;  %v6780_v36 = vmul.f32 0.70710677, %v6766_v3  ;;  %v1236_v6 = vadd.f32 0.05243302, %v1235_v20 }
 0x141   : > { %5864 = vrcp.f32 %v6774_v42  ;;  %v1274_v58 = vadd.f32 0.0036580483, %v1273_v19  ;;  %vm1178_vm2 = vweird.f32 %v5863_v53  ;;  %v1200_v33 = vadd.f32 1.1283791, %v1199_v57 }
 0x142   : > { %v2018_v28 = vpack.c.bf16 %v1992_v60, %v1991_v14  ;;  %v1176_v17 = vadd.f32 %v5863_v53, %v1175_v29  ;;  %v1183_v25 = vand.u32 2147483648, %v6739_v30  ;;  %v1245_v24 = vadd.f32 0.014752088, %v1244_v59 }
 0x143   : > { %v1284_v31 = vmul.f32 %v1283_v61, %v6728_v49  ;;  %v1312_v32 = vadd.f32 0.00028619796, %v1311_v48  ;;  %vm1177_vm3 = vweird.f32 %v6739_v30  ;;  %v1181_v50 = vand.u32 2147483647, %v6739_v30 }
 0x144   : > { %2130 = vmatmul.bf16.gmra.mxu1 %v2018_v28  ;;  %v1323_v35 = vadd.f32 0.001143296, %v1322_v7  ;;  %v1349_v2 = vmul.f32 %v6780_v36, %v6780_v36  ;;  %vm6789_vm4 = vmor %vm1177_vm3, %vm1178_vm2  ;;  %v1246_v1 = vmul.f32 %v1245_v24, %v6703_v0  ;;  %v1275_v56 = vmul.f32 %v1274_v58, %v6728_v49 }
 0x145   : > { %v1180_v5 = vsel %vm6789_vm4, %v5863_v53, %v1176_v17  ;;  %v1285_v38 = vadd.f32 0.014752088, %v1284_v31  ;;  %v1161_v30 = vmul.f32 %v1160_v22, %v6606_v44  ;;  %v1237_v40 = vmul.f32 %v1236_v6, %v6703_v0 }
 0x146   : > { %v1324_v16 = vmul.f32 %v1323_v35, %v6761_v51  ;;  %v1184_v34 = vor.u32 1.1754944e-38, %v1183_v25  ;;  %v1201_v8 = vmul.f32 %v1200_v33, %v6632_v45  ;;  %v1313_v23 = vmul.f32 %v1312_v32, %v6761_v51 }
 0x147   : > { %v5865_v39 = vpop.eup %5864  ;;  %vm1182_vm5 = vcmp.eq.f32.partialorder %v1181_v50, 8.507059e+37  ;;  %v6805_v26 = vmin.f32 %v1349_v2, 16.0  ;;  %v1247_v13 = vadd.f32 0.112945676, %v1246_v1  ;;  %v1286_v62 = vmul.f32 %v1285_v38, %v6728_v49 }
 0x148   : > { %v6800_v43 = vpop.f32.mrf.mxu0  ;;  %v1213_v47 = vmul.f32 %v5865_v39, %v6774_v42  ;;  %v1185_v53 = vsel %vm1182_vm5, %v1184_v34, %v1180_v5  ;;  %v1276_v12 = vadd.f32 0.05243302, %v1275_v56  ;;  %v6810_v44 = vadd.f32 %v6666_v4, %v6682_v37 }
 0x149   : > { %v1325_v20 = vadd.f32 0.014752088, %v1324_v16  ;;  %v1221_v45 = vand.u32 2147483647, %v6774_v42  ;;  %v1223_v19 = vand.u32 2147483648, %v6774_v42  ;;  %v1248_v54 = vmul.f32 %v1247_v13, %v6703_v0 }
 0x14a   : > { %v1214_v57 = vsub.f32 1.0, %v1213_v47  ;;  %v1287_v14 = vadd.f32 0.112945676, %v1286_v62  ;;  %v1186_v60 = vmul.f32 %v1185_v53, %v1161_v30  ;;  %vm1218_vm6 = vweird.f32 %v5865_v39 }
 0x14b   : > { %v1326_v48 = vmul.f32 %v1325_v20, %v6761_v51  ;;  %v1238_v29 = vadd.f32 0.18741608, %v1237_v40  ;;  %v1351_v59 = vmul.f32 2.1237322e-06, %v6805_v26  ;;  %v1249_v7 = vadd.f32 0.4994258, %v1248_v54 }
 0x14c   : > { %v1215_v61 = vmul.f32 %v5865_v39, %v1214_v57  ;;  %v1288_v37 = vmul.f32 %v1287_v14, %v6728_v49  ;;  %v1314_v22 = vadd.f32 0.0036580483, %v1313_v23  ;;  %vm1217_vm7 = vweird.f32 %v6774_v42 }
 0x14d   : > { %v1327_v6 = vadd.f32 0.112945676, %v1326_v48  ;;  %v1277_v58 = vmul.f32 %v1276_v12, %v6728_v49  ;;  %vm1219_vm8 = vmor %vm1217_vm7, %vm1218_vm6  ;;  %v1224_v17 = vor.u32 1.1754944e-38, %v1223_v19  ;;  %v1250_v33 = vmul.f32 %v1249_v7, %v6703_v0 }
 0x14e   : > { %v1216_v28 = vadd.f32 %v5865_v39, %v1215_v61  ;;  %v1289_v25 = vadd.f32 0.4994258, %v1288_v37  ;;  %v6822_v24 = vmul.f32 0.70710677, %v6810_v44  ;;  %v5565_v31 = vclamps-f32 %v1186_v60, 1.0 }
 0x14f   : > { %vm1222_vm9 = vcmp.eq.f32.partialorder %v1221_v45, 8.507059e+37  ;;  %v1352_v50 = vadd.f32 0.00028619796, %v1351_v59  ;;  %v6824_v2 = vadd.f32 1.0, %v1250_v33  ;;  %v1328_v42 = vmul.f32 %v1327_v6, %v6761_v51 }
 0x150   : > { %v1220_v32 = vsel %vm1219_vm8, %v5865_v39, %v1216_v28  ;;  %v6826_v55 = vpop.f32.mrf.mxu0  ;;  %v1290_v56 = vmul.f32 %v1289_v25, %v6728_v49  ;;  %v1239_v5 = vmul.f32 %v1238_v29, %v6703_v0  ;;  %v1278_v38 = vadd.f32 0.18741608, %v1277_v58 }
 0x151   : > { %v1225_v35 = vsel %vm1222_vm9, %v1224_v17, %v1220_v32  ;;  %v1315_v16 = vmul.f32 %v1314_v22, %v6761_v51  ;;  %5866 = vrcp.f32 %v6824_v2  ;;  %v1389_v39 = vmul.f32 %v6822_v24, %v6822_v24 }
 0x152   : > { %v1226_v1 = vmul.f32 %v1225_v35, %v1201_v8  ;;  %v1961_v40 = vadd.f32 1.0, %v5565_v31  ;;  %v6835_v34 = vadd.f32 1.0, %v1290_v56  ;;  %v617_v23 = vmul.f32 0.5, %v6593_v15 }
 0x153   : > { %v1353_v8 = vmul.f32 %v1352_v50, %v6805_v26  ;;  %v6841_v47 = vadd.f32 %v6666_v4, %v6714_v9  ;;  %v1329_v0 = vadd.f32 0.4994258, %v1328_v42  ;;  %v618_v53 = vmul.f32 0.5, %v6617_v27 }
 0x154   : > { %v5566_v30 = vclamps-f32 %v1226_v1, 1.0  ;;  %5868 = vrcp.f32 %v6835_v34  ;;  %v1362_v62 = vmul.f32 3.8918573e-05, %v6805_v26  ;;  %v1240_v12 = vadd.f32 1.1283791, %v1239_v5 }
 0x155   : > { %v1279_v57 = vmul.f32 %v1278_v38, %v6728_v49  ;;  %v1316_v20 = vadd.f32 0.05243302, %v1315_v16  ;;  %v6847_v45 = vmin.f32 %v1389_v39, 16.0  ;;  %v1993_v15 = vmul.f32 %v1961_v40, %v617_v23 }
 0x156   : > { %v1962_v13 = vadd.f32 1.0, %v5566_v30  ;;  %v1354_v14 = vadd.f32 0.0036580483, %v1353_v8  ;;  %v6850_v9 = vmul.f32 0.70710677, %v6841_v47  ;;  %v1330_v27 = vmul.f32 %v1329_v0, %v6761_v51 }
 0x157   : > { %v5867_v54 = vpop.eup %5866  ;;  %v1363_v29 = vadd.f32 0.001143296, %v1362_v62  ;;  %v6855_v59 = vmul.f32 0.5, %v6670_v10  ;;  %v1241_v49 = vmul.f32 %v1240_v12, %v6677_v11  ;;  %v1280_v7 = vadd.f32 1.1283791, %v1279_v57 }
 0x158   : > { %v1994_v19 = vmul.f32 %v1962_v13, %v618_v53  ;;  %v585_v60 = vpop.f32.mrf.mxu0  ;;  %v1253_v48 = vmul.f32 %v5867_v54, %v6824_v2  ;;  %v1317_v37 = vmul.f32 %v1316_v20, %v6761_v51  ;;  %v1391_v28 = vmul.f32 2.1237322e-06, %v6847_v45 }
 0x159   : > { %v6861_v58 = vadd.f32 %v6666_v4, %v585_v60  ;;  %v6863_v17 = vadd.f32 1.0, %v1330_v27  ;;  %v1355_v33 = vmul.f32 %v1354_v14, %v6805_v26  ;;  %v1429_v10 = vmul.f32 %v6850_v9, %v6850_v9 }
 0x15a   : > { %v2019_v61 = vpack.c.bf16 %v1994_v19, %v1993_v15  ;;  %v5869_v22 = vpop.eup %5868  ;;  %v1254_v6 = vsub.f32 1.0, %v1253_v48  ;;  %v1263_v11 = vand.u32 2147483648, %v6824_v2  ;;  %vm1258_vm0 = vweird.f32 %v5867_v54 }
 0x15b   : > { %v1293_v25 = vmul.f32 %v5869_v22, %v6835_v34  ;;  %v1261_v32 = vand.u32 2147483647, %v6824_v2  ;;  %v1364_v50 = vmul.f32 %v1363_v29, %v6805_v26  ;;  %v6874_v35 = vadd.f32 %v6666_v4, %v6737_v52 }
 0x15c   : > { %2135 = vmatmul.bf16.gmra.mxu1 %v2019_v61  ;;  %v1255_v31 = vmul.f32 %v5867_v54, %v1254_v6  ;;  %v6878_v42 = vadd.f32 %v6666_v4, %v6769_v46  ;;  %5870 = vrcp.f32 %v6863_v17  ;;  %vm1257_vm10 = vweird.f32 %v6824_v2 }
 0x15d   : > { %v1294_v1 = vsub.f32 1.0, %v1293_v25  ;;  %v1303_v5 = vand.u32 2147483648, %v6835_v34  ;;  %v6884_v38 = vmul.f32 0.70710677, %v6861_v58  ;;  %vm1259_vm11 = vmor %vm1257_vm10, %vm1258_vm0  ;;  %v1264_v16 = vor.u32 1.1754944e-38, %v1263_v11 }
 0x15e   : > { %v1256_v56 = vadd.f32 %v5867_v54, %v1255_v31  ;;  %vm1298_vm12 = vweird.f32 %v5869_v22  ;;  %v1301_v52 = vand.u32 2147483647, %v6835_v34  ;;  %v6887_v30 = vmin.f32 %v1429_v10, 16.0 }
 0x15f   : > { %v1295_v39 = vmul.f32 %v5869_v22, %v1294_v1  ;;  %vm1262_vm13 = vcmp.eq.f32.partialorder %v1261_v32, 8.507059e+37  ;;  %v1365_v40 = vadd.f32 0.014752088, %v1364_v50  ;;  %v6890_v23 = vmul.f32 0.70710677, %v6874_v35 }
 0x160   : > { %v1260_v46 = vsel %vm1259_vm11, %v5867_v54, %v1256_v56  ;;  %vm1297_vm14 = vweird.f32 %v6835_v34  ;;  %v1281_v0 = vmul.f32 %v1280_v7, %v6708_v18  ;;  %v1304_v13 = vor.u32 1.1754944e-38, %v1303_v5 }
 0x161   : > { %v1265_v2 = vsel %vm1262_vm13, %v1264_v16, %v1260_v46  ;;  %v1296_v8 = vadd.f32 %v5869_v22, %v1295_v39  ;;  %vm1299_vm15 = vmor %vm1297_vm14, %vm1298_vm12  ;;  %v1629_v62 = vmul.f32 %v6884_v38, %v6884_v38  ;;  %v6899_v57 = vmul.f32 0.70710677, %v6878_v42 }
 0x162   : > { %v1266_v53 = vmul.f32 %v1265_v2, %v1241_v49  ;;  %v6896_v12 = vpop.eup %5870  ;;  %v6903_v20 = vadd.f32 %v6666_v4, %v6800_v43  ;;  %vm1302_vm1 = vcmp.eq.f32.partialorder %v1301_v52, 8.507059e+37  ;;  %v1392_v34 = vadd.f32 0.00028619796, %v1391_v28 }
 0x163   : > { %v1300_v15 = vsel %vm1299_vm15, %v5869_v22, %v1296_v8  ;;  %v1366_v54 = vmul.f32 %v1365_v40, %v6805_v26  ;;  %v1356_v14 = vadd.f32 0.05243302, %v1355_v33  ;;  %v1431_v60 = vmul.f32 2.1237322e-06, %v6887_v30 }
 0x164   : > { %v5567_v19 = vclamps-f32 %v1266_v53, 1.0  ;;  %v1305_v18 = vsel %vm1302_vm1, %v1304_v13, %v1300_v15  ;;  %v1469_v27 = vmul.f32 %v6890_v23, %v6890_v23  ;;  %v620_v48 = vmul.f32 0.5, %v6696_v41 }
 0x165   : > { %v1306_v61 = vmul.f32 %v1305_v18, %v1281_v0  ;;  %v6910_v29 = vmin.f32 %v1629_v62, 16.0  ;;  %v1333_v43 = vmul.f32 %v6896_v12, %v6863_v17  ;;  %v1402_v49 = vmul.f32 3.8918573e-05, %v6847_v45 }
 0x166   : > { %v1509_v7 = vmul.f32 %v6899_v57, %v6899_v57  ;;  %v6918_v22 = vmul.f32 0.70710677, %v6903_v20  ;;  %v1963_v6 = vadd.f32 1.0, %v5567_v19  ;;  %v1318_v33 = vadd.f32 0.18741608, %v1317_v37 }
 0x167   : > { %v5568_v28 = vclamps-f32 %v1306_v61, 1.0  ;;  %v1393_v10 = vmul.f32 %v1392_v34, %v6847_v45  ;;  %v6923_v41 = vadd.f32 %v6666_v4, %v6826_v55  ;;  %v1367_v11 = vadd.f32 0.112945676, %v1366_v54 }
 0x168   : > { %v1357_v25 = vmul.f32 %v1356_v14, %v6805_v26  ;;  %v1432_v31 = vadd.f32 0.00028619796, %v1431_v60  ;;  %v6926_v32 = vmin.f32 %v1469_v27, 16.0  ;;  %v1642_v1 = vmul.f32 3.8918573e-05, %v6910_v29 }
 0x169   : > { %v1964_v50 = vadd.f32 1.0, %v5568_v28  ;;  %v1334_v56 = vsub.f32 1.0, %v1333_v43  ;;  %v1368_v5 = vmul.f32 %v1367_v11, %v6805_v26  ;;  %v1403_v16 = vadd.f32 0.001143296, %v1402_v49 }
 0x16a   : > { %v6930_v37 = vmin.f32 %v1509_v7, 16.0  ;;  %v1549_v39 = vmul.f32 %v6918_v22, %v6918_v22  ;;  %v1995_v55 = vmul.f32 %v1963_v6, %v6855_v59  ;;  %v1319_v46 = vmul.f32 %v1318_v33, %v6761_v51  ;;  %v2106_v7 = vpop.f32.mrf.mxu1 }
 0x16b   : > { %v1996_v52 = vmul.f32 %v1964_v50, %v620_v48  ;;  %v1394_v40 = vadd.f32 0.0036580483, %v1393_v10  ;;  %v6937_v2 = vmul.f32 0.70710677, %v6923_v41  ;;  %v1369_v8 = vadd.f32 0.4994258, %v1368_v5 }
 0x16c   : > { %v1358_v0 = vadd.f32 0.18741608, %v1357_v25  ;;  %v1433_v53 = vmul.f32 %v1432_v31, %v6887_v30  ;;  %v1471_v13 = vmul.f32 2.1237322e-06, %v6926_v32  ;;  %v1643_v15 = vadd.f32 0.001143296, %v1642_v1  ;;  %v587_v31 = vpop.f32.mrf.mxu0 }
 0x16d   : > { %v2020_v62 = vpack.c.bf16 %v1996_v52, %v1995_v55  ;;  %v1335_v34 = vmul.f32 %v6896_v12, %v1334_v56  ;;  %v1370_v19 = vmul.f32 %v1369_v8, %v6805_v26  ;;  %v1404_v59 = vmul.f32 %v1403_v16, %v6847_v45  ;;  %v6959_v48 = vld [vmem:[%s10521_s4] ss:$0 sm:$0xff] }
 0x16e   : > { %v6945_v51 = vmul.f32 0.5, %v6732_v63  ;;  %v6948_v18 = vmul.f32 0.5, %v6766_v3  ;;  %v1511_v54 = vmul.f32 2.1237322e-06, %v6930_v37  ;;  %v6951_v14 = vmin.f32 %v1549_v39, 16.0 }
 0x16f   : > { %2140 = vmatmul.bf16.gmra.mxu1 %v2020_v62  ;;  %v1320_v60 = vadd.f32 1.1283791, %v1319_v46  ;;  %v1395_v27 = vmul.f32 %v1394_v40, %v6847_v45  ;;  %v1589_v61 = vmul.f32 %v6937_v2, %v6937_v2  ;;  %v6961_v63 = vadd.f32 1.0, %v1370_v19 }
 0x170   : > { %v1359_v3 = vmul.f32 %v1358_v0, %v6805_v26  ;;  %v1434_v43 = vadd.f32 0.0036580483, %v1433_v53  ;;  %v1472_v49 = vadd.f32 0.00028619796, %v1471_v13  ;;  %vm1338_vm2 = vweird.f32 %v6896_v12 }
 0x171   : > { %v1644_v28 = vmul.f32 %v1643_v15, %v6910_v29  ;;  %v1336_v6 = vadd.f32 %v6896_v12, %v1335_v34  ;;  %5872 = vrcp.f32 %v6961_v63  ;;  %v1405_v33 = vadd.f32 0.014752088, %v1404_v59 }
 0x172   : > { %v6969_v10 = vmul.f32 0.5, %v6810_v44  ;;  %v1512_v11 = vadd.f32 0.00028619796, %v1511_v54  ;;  %v1551_v25 = vmul.f32 2.1237322e-06, %v6951_v14  ;;  %v1343_v26 = vand.u32 2147483648, %v6863_v17 }
 0x173   : > { %v6973_v50 = vmin.f32 %v1589_v61, 16.0  ;;  %v6976_v1 = vadd.f32 %v6959_v48, %v2106_v7  ;;  %vm1337_vm3 = vweird.f32 %v6863_v17  ;;  %v1341_v56 = vand.u32 2147483647, %v6863_v17 }
 0x174   : > { %v1321_v5 = vmul.f32 %v1320_v60, %v6744_v21  ;;  %v1360_v16 = vadd.f32 1.1283791, %v1359_v3  ;;  %v1396_v44 = vadd.f32 0.05243302, %v1395_v27  ;;  %v1473_v39 = vmul.f32 %v1472_v49, %v6926_v32  ;;  %vm6984_vm4 = vmor %vm1337_vm3, %vm1338_vm2 }
 0x175   : > { %v1645_v52 = vadd.f32 0.014752088, %v1644_v28  ;;  %v1340_v46 = vsel %vm6984_vm4, %v6896_v12, %v1336_v6  ;;  %v6992_v40 = vadd.f32 %v6666_v4, %v587_v31  ;;  %v1406_v21 = vmul.f32 %v1405_v33, %v6847_v45 }
 0x176   : > { %v1435_v17 = vmul.f32 %v1434_v43, %v6887_v30  ;;  %v1513_v8 = vmul.f32 %v1512_v11, %v6930_v37  ;;  %v1552_v0 = vadd.f32 0.00028619796, %v1551_v25  ;;  %v1344_v53 = vor.u32 1.1754944e-38, %v1343_v26  ;;  %v2108_v26 = vpop.f32.mrf.mxu1 }
 0x177   : > { %v5873_v13 = vpop.eup %5872  ;;  %v6998_v62 = vmul.f32 0.5, %v6841_v47  ;;  %v1591_v15 = vmul.f32 2.1237322e-06, %v6973_v50  ;;  %v7002_v34 = vmul.f32 0.70710677, %v6976_v1  ;;  %vm1342_vm5 = vcmp.eq.f32.partialorder %v1341_v56, 8.507059e+37 }
 0x178   : > { %v1397_v12 = vmul.f32 %v1396_v44, %v6847_v45  ;;  %v1345_v19 = vsel %vm1342_vm5, %v1344_v53, %v1340_v46  ;;  %v1373_v59 = vmul.f32 %v5873_v13, %v6961_v63  ;;  %v1407_v54 = vadd.f32 0.112945676, %v1406_v21 }
 0x179   : > { %v1361_v60 = vmul.f32 %v1360_v16, %v6780_v36  ;;  %v1474_v27 = vadd.f32 0.0036580483, %v1473_v39  ;;  %v1646_v61 = vmul.f32 %v1645_v52, %v6910_v29  ;;  %v7009_v47 = vmul.f32 0.70710677, %v6992_v40 }
 0x17a   : > { %v1436_v3 = vadd.f32 0.05243302, %v1435_v17  ;;  %v1514_v43 = vadd.f32 0.0036580483, %v1513_v8  ;;  %v1553_v49 = vmul.f32 %v1552_v0, %v6951_v14  ;;  %v1374_v7 = vsub.f32 1.0, %v1373_v59  ;;  %v590_v0 = vpop.f32.mrf.mxu0 }
 0x17b   : > { %v1592_v28 = vadd.f32 0.00028619796, %v1591_v15  ;;  %v2250_v6 = vmul.f32 %v7002_v34, %v7002_v34  ;;  %v1346_v33 = vmul.f32 %v1345_v19, %v1321_v5  ;;  %v1383_v11 = vand.u32 2147483648, %v6961_v63 }
 0x17c   : > { %v1375_v25 = vmul.f32 %v5873_v13, %v1374_v7  ;;  %vm1378_vm6 = vweird.f32 %v5873_v13  ;;  %v1381_v36 = vand.u32 2147483647, %v6961_v63  ;;  %v1408_v31 = vmul.f32 %v1407_v54, %v6847_v45 }
 0x17d   : > { %v1475_v56 = vmul.f32 %v1474_v27, %v6926_v32  ;;  %v1631_v16 = vmul.f32 2.1237322e-06, %v6910_v29  ;;  %v1647_v44 = vadd.f32 0.112945676, %v1646_v61  ;;  %v1669_v39 = vmul.f32 %v7009_v47, %v7009_v47 }
 0x17e   : > { %v1515_v55 = vmul.f32 %v1514_v43, %v6930_v37  ;;  %v1554_v5 = vadd.f32 0.0036580483, %v1553_v49  ;;  %v1376_v52 = vadd.f32 %v5873_v13, %v1375_v25  ;;  %vm1377_vm7 = vweird.f32 %v6961_v63 }
 0x17f   : > { %v1593_v46 = vmul.f32 %v1592_v28, %v6973_v50  ;;  %v7024_v21 = vmin.f32 %v2250_v6, 16.0  ;;  %vm1379_vm8 = vmor %vm1377_vm7, %vm1378_vm6  ;;  %v1384_v17 = vor.u32 1.1754944e-38, %v1383_v11  ;;  %v7027_v8 = vadd.f32 %v6959_v48, %v2108_v26 }
 0x180   : > { %v5569_v53 = vclamps-f32 %v1346_v33, 1.0  ;;  %v1380_v15 = vsel %vm1379_vm8, %v5873_v13, %v1376_v52  ;;  %vm1382_vm9 = vcmp.eq.f32.partialorder %v1381_v36, 8.507059e+37  ;;  %v1409_v19 = vadd.f32 0.4994258, %v1408_v31 }
 0x181   : > { %v1632_v59 = vadd.f32 0.00028619796, %v1631_v16  ;;  %v1648_v54 = vmul.f32 %v1647_v44, %v6910_v29  ;;  %v1385_v27 = vsel %vm1382_vm9, %v1384_v17, %v1380_v15  ;;  %v7030_v61 = vmin.f32 %v1669_v39, 16.0 }
 0x182   : > { %v1398_v63 = vadd.f32 0.18741608, %v1397_v12  ;;  %v1476_v43 = vadd.f32 0.05243302, %v1475_v56  ;;  %v1386_v49 = vmul.f32 %v1385_v27, %v1361_v60  ;;  %v7033_v7 = vadd.f32 %v6666_v4, %v590_v0 }
 0x183   : > { %v1437_v28 = vmul.f32 %v1436_v3, %v6887_v30  ;;  %v1516_v6 = vadd.f32 0.05243302, %v1515_v55  ;;  %v1594_v11 = vadd.f32 0.0036580483, %v1593_v46  ;;  %v2252_v13 = vmul.f32 2.1237322e-06, %v7024_v21 }
 0x184   : > { %v5570_v33 = vclamps-f32 %v1386_v49, 1.0  ;;  %v1965_v25 = vadd.f32 1.0, %v5569_v53  ;;  %v7038_v36 = vmul.f32 0.70710677, %v7027_v8  ;;  %v1410_v26 = vmul.f32 %v1409_v19, %v6847_v45 }
 0x185   : > { %v1555_v12 = vmul.f32 %v1554_v5, %v6951_v14  ;;  %v1633_v60 = vmul.f32 %v1632_v59, %v6910_v29  ;;  %v1649_v31 = vadd.f32 0.4994258, %v1648_v54  ;;  %v1682_v4 = vmul.f32 3.8918573e-05, %v7030_v61 }
 0x186   : > { %v1399_v3 = vmul.f32 %v1398_v63, %v6847_v45  ;;  %v1966_v56 = vadd.f32 1.0, %v5570_v33  ;;  %v7046_v16 = vmul.f32 0.70710677, %v7033_v7  ;;  %v1442_v44 = vmul.f32 3.8918573e-05, %v6887_v30 }
 0x187   : > { %v1438_v39 = vadd.f32 0.18741608, %v1437_v28  ;;  %v1477_v55 = vmul.f32 %v1476_v43, %v6926_v32  ;;  %v1595_v52 = vmul.f32 %v1594_v11, %v6973_v50  ;;  %v2253_v46 = vadd.f32 0.00028619796, %v2252_v13 }
 0x188   : > { %v1997_v5 = vmul.f32 %v1965_v25, %v6945_v51  ;;  %v1998_v17 = vmul.f32 %v1966_v56, %v6948_v18  ;;  %v2290_v0 = vmul.f32 %v7038_v36, %v7038_v36  ;;  %v7055_v45 = vadd.f32 1.0, %v1410_v26 }
 0x189   : > { %v1517_v53 = vmul.f32 %v1516_v6, %v6930_v37  ;;  %v1556_v15 = vadd.f32 0.05243302, %v1555_v12  ;;  %v1634_v19 = vadd.f32 0.0036580483, %v1633_v60  ;;  %v1683_v59 = vadd.f32 0.001143296, %v1682_v4  ;;  %v2111_v60 = vpop.f32.mrf.mxu1 }
 0x18a   : > { %v1650_v54 = vmul.f32 %v1649_v31, %v6910_v29  ;;  %v2021_v27 = vpack.c.bf16 %v1998_v17, %v1997_v5  ;;  %v1709_v63 = vmul.f32 %v7046_v16, %v7046_v16  ;;  %v1443_v43 = vadd.f32 0.001143296, %v1442_v44 }
 0x18b   : > { %v1439_v51 = vmul.f32 %v1438_v39, %v6887_v30  ;;  %v1478_v18 = vadd.f32 0.18741608, %v1477_v55  ;;  %v1596_v49 = vadd.f32 0.05243302, %v1595_v52  ;;  %v2254_v28 = vmul.f32 %v2253_v46, %v7024_v21 }
 0x18c   : > { %v1400_v11 = vadd.f32 1.1283791, %v1399_v3  ;;  %2145 = vmatmul.bf16.gmra.mxu1 %v2021_v27  ;;  %v7063_v13 = vmin.f32 %v2290_v0, 16.0  ;;  %5874 = vrcp.f32 %v7055_v45  ;;  %v1482_v6 = vmul.f32 3.8918573e-05, %v6926_v32 }
 0x18d   : > { %v7068_v33 = vmul.f32 0.5, %v6874_v35  ;;  %v1518_v25 = vadd.f32 0.18741608, %v1517_v53  ;;  %v1557_v26 = vmul.f32 %v1556_v15, %v6951_v14  ;;  %v1684_v12 = vmul.f32 %v1683_v59, %v7030_v61 }
 0x18e   : > { %v1635_v31 = vmul.f32 %v1634_v19, %v6910_v29  ;;  %v7073_v4 = vadd.f32 1.0, %v1650_v54  ;;  %v7075_v3 = vmin.f32 %v1709_v63, 16.0  ;;  %v1444_v56 = vmul.f32 %v1443_v43, %v6887_v30 }
 0x18f   : > { %v1440_v44 = vadd.f32 1.1283791, %v1439_v51  ;;  %v1479_v39 = vmul.f32 %v1478_v18, %v6926_v32  ;;  %v1597_v35 = vmul.f32 %v1596_v49, %v6973_v50  ;;  %v2255_v55 = vadd.f32 0.0036580483, %v2254_v28 }
 0x190   : > { %v7081_v52 = vmul.f32 %v1400_v11, %v6822_v24  ;;  %v2292_v46 = vmul.f32 2.1237322e-06, %v7063_v13  ;;  %v7085_v5 = vadd.f32 %v6959_v48, %v2111_v60  ;;  %v1483_v17 = vadd.f32 0.001143296, %v1482_v6 }
 0x191   : > { %v7088_v0 = vmul.f32 0.5, %v6878_v42  ;;  %v1519_v53 = vmul.f32 %v1518_v25, %v6930_v37  ;;  %v1558_v15 = vadd.f32 0.18741608, %v1557_v26  ;;  %v1685_v19 = vadd.f32 0.014752088, %v1684_v12 }
 0x192   : > { %v7091_v59 = vpop.eup %5874  ;;  %v1636_v54 = vadd.f32 0.05243302, %v1635_v31  ;;  %5876 = vrcp.f32 %v7073_v4  ;;  %v1722_v24 = vmul.f32 3.8918573e-05, %v7075_v3  ;;  %v1445_v27 = vadd.f32 0.014752088, %v1444_v56 }
 0x193   : > { %v7096_v63 = vmul.f32 %v1440_v44, %v6850_v9  ;;  %v1480_v43 = vadd.f32 1.1283791, %v1479_v39  ;;  %v1598_v51 = vadd.f32 0.18741608, %v1597_v35  ;;  %v2256_v42 = vmul.f32 %v2255_v55, %v7024_v21 }
 0x194   : > { %v2293_v18 = vadd.f32 0.00028619796, %v2292_v46  ;;  %v7100_v49 = vmul.f32 0.70710677, %v7085_v5  ;;  %v1446_v28 = vmul.f32 %v1445_v27, %v6887_v30  ;;  %v1484_v11 = vmul.f32 %v1483_v17, %v6926_v32 }
 0x195   : > { %v1520_v6 = vadd.f32 1.1283791, %v1519_v53  ;;  %v7105_v25 = vmul.f32 0.5, %v6903_v20  ;;  %v1686_v26 = vmul.f32 %v1685_v19, %v7030_v61  ;;  %v1413_v9 = vmul.f32 %v7091_v59, %v7055_v45 }
 0x196   : > { %v1559_v12 = vmul.f32 %v1558_v15, %v6951_v14  ;;  %v1637_v60 = vmul.f32 %v1636_v54, %v6910_v29  ;;  %v1723_v31 = vadd.f32 0.001143296, %v1722_v24  ;;  %v1447_v56 = vadd.f32 0.112945676, %v1446_v28 }
 0x197   : > { %10541 = vst [vmem:[#allocation5_spill] sm:$0xff] %v7105_v25  ;;  %v7113_v44 = vmul.f32 %v1480_v43, %v6890_v23  ;;  %v1599_v39 = vmul.f32 %v1598_v51, %v6973_v50  ;;  %v2257_v35 = vadd.f32 0.05243302, %v2256_v42  ;;  %v1671_v20 = vmul.f32 2.1237322e-06, %v7030_v61 }
 0x198   : > { %v7117_v55 = vpop.eup %5876  ;;  %v2294_v46 = vmul.f32 %v2293_v18, %v7063_v13  ;;  %v2330_v17 = vmul.f32 %v7100_v49, %v7100_v49  ;;  %v1448_v53 = vmul.f32 %v1447_v56, %v6887_v30  ;;  %v1485_v15 = vadd.f32 0.014752088, %v1484_v11 }
 0x199   : > { %v7124_v19 = vmul.f32 %v1520_v6, %v6899_v57  ;;  %v7127_v23 = vmul.f32 0.5, %v6923_v41  ;;  %v1687_v54 = vadd.f32 0.112945676, %v1686_v26  ;;  %v1414_v24 = vsub.f32 1.0, %v1413_v9 }
 0x19a   : > { %v1560_v27 = vadd.f32 1.1283791, %v1559_v12  ;;  %v1638_v43 = vadd.f32 0.18741608, %v1637_v60  ;;  %v1724_v51 = vmul.f32 %v1723_v31, %v7075_v3  ;;  %v1449_v42 = vadd.f32 0.4994258, %v1448_v53 }
 0x19b   : > { %10542 = vst [vmem:[#allocation6_spill] sm:$0xff] %v7127_v23  ;;  %v1600_v18 = vadd.f32 1.1283791, %v1599_v39  ;;  %v2258_v28 = vmul.f32 %v2257_v35, %v7024_v21  ;;  %v1653_v56 = vmul.f32 %v7117_v55, %v7073_v4  ;;  %v1672_v11 = vadd.f32 0.00028619796, %v1671_v20 }
 0x19c   : > { %v2295_v25 = vadd.f32 0.0036580483, %v2294_v46  ;;  %v7133_v57 = vmin.f32 %v2330_v17, 16.0  ;;  %v1450_v41 = vmul.f32 %v1449_v42, %v6887_v30  ;;  %v1486_v6 = vmul.f32 %v1485_v15, %v6926_v32  ;;  %v592_v17 = vpop.f32.mrf.mxu0 }
 0x19d   : > { %v7138_v26 = vmul.f32 0.5, %v6976_v1  ;;  %v7141_v9 = vmul.f32 0.5, %v6861_v58  ;;  %v1688_v12 = vmul.f32 %v1687_v54, %v7030_v61  ;;  %v1415_v60 = vmul.f32 %v7091_v59, %v1414_v24 }
 0x19e   : > { %v7146_v31 = vmul.f32 %v1560_v27, %v6918_v22  ;;  %v1639_v39 = vmul.f32 %v1638_v43, %v6910_v29  ;;  %v1725_v35 = vadd.f32 0.014752088, %v1724_v51  ;;  %v7149_v20 = vadd.f32 1.0, %v1450_v41 }
 0x19f   : > { %10543 = vst [vmem:[#allocation7_spill] sm:$0xff] %v7138_v26  ;;  %v7152_v30 = vmul.f32 %v1600_v18, %v6937_v2  ;;  %v2259_v1 = vadd.f32 0.18741608, %v2258_v28  ;;  %v1673_v46 = vmul.f32 %v1672_v11, %v7030_v61  ;;  %v1711_v58 = vmul.f32 2.1237322e-06, %v7075_v3 }
 0x1a0   : > { %v1654_v53 = vsub.f32 1.0, %v1653_v56  ;;  %v2296_v15 = vmul.f32 %v2295_v25, %v7063_v13  ;;  %v2332_v22 = vmul.f32 2.1237322e-06, %v7133_v57  ;;  %v1487_v54 = vadd.f32 0.112945676, %v1486_v6 }
 0x1a1   : > { %v1689_v24 = vadd.f32 0.4994258, %v1688_v12  ;;  %v1416_v29 = vadd.f32 %v7091_v59, %v1415_v60  ;;  %vm1418_vm0 = vweird.f32 %v7091_v59  ;;  %5878 = vrcp.f32 %v7149_v20  ;;  %v7168_v25 = vld [vmem:[%s10519_s2] ss:$0 sm:$0xff] }
 0x1a2   : > { %v7161_v2 = vadd.f32 1.1283791, %v1639_v39  ;;  %v1726_v27 = vmul.f32 %v1725_v35, %v7075_v3  ;;  %v1423_v43 = vand.u32 2147483648, %v7055_v45  ;;  %v7171_v51 = vadd.f32 %v7168_v25, %v592_v17 }
 0x1a3   : > { %v1674_v42 = vadd.f32 0.0036580483, %v1673_v46  ;;  %v1712_v18 = vadd.f32 0.00028619796, %v1711_v58  ;;  %vm1417_vm10 = vweird.f32 %v7055_v45  ;;  %v1421_v28 = vand.u32 2147483647, %v7055_v45 }
 0x1a4   : > { %v1655_v56 = vmul.f32 %v7117_v55, %v1654_v53  ;;  %v1661_v11 = vand.u32 2147483647, %v7073_v4  ;;  %v1663_v41 = vand.u32 2147483648, %v7073_v4  ;;  %vm7178_vm11 = vmor %vm1417_vm10, %vm1418_vm0  ;;  %v1488_v12 = vmul.f32 %v1487_v54, %v6926_v32 }
 0x1a5   : > { %v2297_v60 = vadd.f32 0.05243302, %v2296_v15  ;;  %v1690_v39 = vmul.f32 %v1689_v24, %v7030_v61  ;;  %v2333_v35 = vadd.f32 0.00028619796, %v2332_v22  ;;  %v1420_v45 = vsel %vm7178_vm11, %v7091_v59, %v1416_v29 }
 0x1a6   : > { %v7188_v46 = vmul.f32 %v2259_v1, %v7024_v21  ;;  %v1727_v58 = vadd.f32 0.112945676, %v1726_v27  ;;  %v1424_v17 = vor.u32 1.1754944e-38, %v1423_v43  ;;  %v7191_v53 = vmul.f32 0.70710677, %v7171_v51 }
 0x1a7   : > { %v5879_v26 = vpop.eup %5878  ;;  %vm1657_vm12 = vweird.f32 %v7073_v4  ;;  %v1675_v15 = vmul.f32 %v1674_v42, %v7030_v61  ;;  %v1713_v54 = vmul.f32 %v1712_v18, %v7075_v3  ;;  %vm1422_vm13 = vcmp.eq.f32.partialorder %v1421_v28, 8.507059e+37  ;;  %v5783_v18 = vld [vmem:[%s10522_s5 + $0x38] sm:$0xff] }
 0x1a8   : > { %v1664_v22 = vor.u32 1.1754944e-38, %v1663_v41  ;;  %v1425_v24 = vsel %vm1422_vm13, %v1424_v17, %v1420_v45  ;;  %v1453_v59 = vmul.f32 %v5879_v26, %v7149_v20  ;;  %v1489_v29 = vadd.f32 0.4994258, %v1488_v12  ;;  %3678 = vmatpush.bf16.msra.mxu2 %v5783_v18 }
 0x1a9   : > { %v1656_v1 = vadd.f32 %v7117_v55, %v1655_v56  ;;  %vm1658_vm14 = vweird.f32 %v7117_v55  ;;  %vm7199_vm15 = vcmp.eq.f32.partialorder %v1661_v11, 8.507059e+37  ;;  %v7203_v43 = vadd.f32 1.0, %v1690_v39 }
 0x1aa   : > { %v2334_v42 = vmul.f32 %v2333_v35, %v7133_v57  ;;  %v2298_v28 = vmul.f32 %v2297_v60, %v7063_v13  ;;  %v1728_v41 = vmul.f32 %v1727_v58, %v7075_v3  ;;  %v1454_v6 = vsub.f32 1.0, %v1453_v59  ;;  %vm7217_vm1 = vmor %vm1657_vm12, %vm1658_vm14  ;;  %v2113_v35 = vpop.f32.mrf.mxu1 }
 0x1ab   : > { %v1749_v56 = vmul.f32 %v7191_v53, %v7191_v53  ;;  %v1676_v11 = vadd.f32 0.05243302, %v1675_v15  ;;  %v1714_v12 = vadd.f32 0.0036580483, %v1713_v54  ;;  %v1426_v45 = vmul.f32 %v1425_v24, %v7081_v52  ;;  %v595_v54 = vpop.f32.mrf.mxu0 }
 0x1ac   : > { %v1463_v39 = vand.u32 2147483648, %v7149_v20  ;;  %v1455_v60 = vmul.f32 %v5879_v26, %v1454_v6  ;;  %vm1458_vm2 = vweird.f32 %v5879_v26  ;;  %v1461_v58 = vand.u32 2147483647, %v7149_v20 }
 0x1ad   : > { %v1490_v17 = vmul.f32 %v1489_v29, %v6926_v32  ;;  %v1660_v15 = vsel %vm7217_vm1, %v7117_v55, %v1656_v1  ;;  %5880 = vrcp.f32 %v7203_v43  ;;  %v2335_v52 = vadd.f32 0.0036580483, %v2334_v42 }
 0x1ae   : > { %v1522_v4 = vmul.f32 3.8918573e-05, %v6930_v37  ;;  %v1729_v24 = vadd.f32 0.4994258, %v1728_v41  ;;  %v1456_v59 = vadd.f32 %v5879_v26, %v1455_v60  ;;  %vm1457_vm3 = vweird.f32 %v7149_v20 }
 0x1af   : > { %v7229_v18 = vmin.f32 %v1749_v56, 16.0  ;;  %v1677_v6 = vmul.f32 %v1676_v11, %v7030_v61  ;;  %v1715_v32 = vmul.f32 %v1714_v12, %v7075_v3  ;;  %vm1459_vm4 = vmor %vm1457_vm3, %vm1458_vm2  ;;  %v1464_v29 = vor.u32 1.1754944e-38, %v1463_v39 }
 0x1b0   : > { %v7234_v55 = vadd.f32 %v7168_v25, %v595_v54  ;;  %v5571_v1 = vclamps-f32 %v1426_v45, 1.0  ;;  %v1460_v42 = vsel %vm1459_vm4, %v5879_v26, %v1456_v59  ;;  %vm1462_vm5 = vcmp.eq.f32.partialorder %v1461_v58, 8.507059e+37 }
 0x1b1   : > { %v7236_v23 = vadd.f32 1.0, %v1490_v17  ;;  %v2299_v41 = vadd.f32 0.18741608, %v2298_v28  ;;  %v2336_v20 = vmul.f32 %v2335_v52, %v7133_v57  ;;  %v1465_v56 = vsel %vm1462_vm5, %v1464_v29, %v1460_v42 }
 0x1b2   : > { %v1523_v60 = vadd.f32 0.001143296, %v1522_v4  ;;  %v1665_v11 = vsel %vm7199_vm15, %v1664_v22, %v1660_v15  ;;  %v1730_v12 = vmul.f32 %v1729_v24, %v7075_v3  ;;  %v1466_v39 = vmul.f32 %v1465_v56, %v7096_v63 }
 0x1b3   : > { %v1762_v54 = vmul.f32 3.8918573e-05, %v7229_v18  ;;  %v7244_v45 = vpop.eup %5880  ;;  %v1641_v26 = vmul.f32 %v7161_v2, %v6884_v38  ;;  %v1716_v58 = vadd.f32 0.05243302, %v1715_v32  ;;  %v7249_v28 = vadd.f32 %v6959_v48, %v2113_v35 }
 0x1b4   : > { %v7252_v17 = vmul.f32 0.70710677, %v7234_v55  ;;  %v1678_v27 = vadd.f32 0.18741608, %v1677_v6  ;;  %v5572_v22 = vclamps-f32 %v1466_v39, 1.0  ;;  %v1967_v15 = vadd.f32 1.0, %v5571_v1 }
 0x1b5   : > { %5882 = vrcp.f32 %v7236_v23  ;;  %v1666_v63 = vmul.f32 %v1665_v11, %v1641_v26  ;;  %v2337_v52 = vadd.f32 0.05243302, %v2336_v20  ;;  %v1524_v24 = vmul.f32 %v1523_v60, %v6930_v37 }
 0x1b6   : > { %v1789_v4 = vmul.f32 %v7252_v17, %v7252_v17  ;;  %v2300_v38 = vmul.f32 %v2299_v41, %v7063_v13  ;;  %v7259_v2 = vadd.f32 1.0, %v1730_v12  ;;  %v1968_v59 = vadd.f32 1.0, %v5572_v22 }
 0x1b7   : > { %v1763_v32 = vadd.f32 0.001143296, %v1762_v54  ;;  %v2261_v29 = vadd.f32 1.1283791, %v7188_v46  ;;  %v1693_v6 = vmul.f32 %v7244_v45, %v7203_v43  ;;  %v1717_v1 = vmul.f32 %v1716_v58, %v7075_v3 }
 0x1b8   : > { %v7266_v42 = vmul.f32 0.70710677, %v7249_v28  ;;  %v1679_v35 = vmul.f32 %v1678_v27, %v7030_v61  ;;  %v1999_v20 = vmul.f32 %v1967_v15, %v6969_v10  ;;  %v2000_v41 = vmul.f32 %v1968_v59, %v6998_v62 }
 0x1b9   : > { %v7271_v56 = vmin.f32 %v1789_v4, 16.0  ;;  %v5577_v60 = vclamps-f32 %v1666_v63, 1.0  ;;  %v7274_v11 = vmul.f32 0.5, %v7027_v8  ;;  %v2338_v46 = vmul.f32 %v2337_v52, %v7133_v57 }
 0x1ba   : > { %v1525_v12 = vadd.f32 0.014752088, %v1524_v24  ;;  %v2301_v54 = vadd.f32 1.1283791, %v2300_v38  ;;  %5884 = vrcp.f32 %v7259_v2  ;;  %v2022_v26 = vpack.c.bf16 %v2000_v41, %v1999_v20 }
 0x1bb   : > { %10550 = vst [vmem:[#allocation8_spill] sm:$0xff] %v7274_v11  ;;  %v7277_v39 = vpop.eup %5882  ;;  %v1764_v61 = vmul.f32 %v1763_v32, %v7229_v18  ;;  %v7282_v10 = vmul.f32 0.5, %v6992_v40  ;;  %v1694_v62 = vsub.f32 1.0, %v1693_v6  ;;  %v1718_v58 = vadd.f32 0.18741608, %v1717_v1 }
 0x1bc   : > { %v2370_v8 = vmul.f32 %v7266_v42, %v7266_v42  ;;  %v7287_v27 = vmul.f32 %v2261_v29, %v7002_v34  ;;  %v1680_v22 = vadd.f32 1.1283791, %v1679_v35  ;;  %2150 = vmatmul.bf16.gmra.mxu1 %v2022_v26  ;;  %v1802_v15 = vmul.f32 3.8918573e-05, %v7271_v56  ;;  %v2116_v29 = vpop.f32.mrf.mxu1 }
 0x1bd   : > { %v1562_v63 = vmul.f32 3.8918573e-05, %v6951_v14  ;;  %v7292_v52 = vmul.f32 0.5, %v7085_v5  ;;  %v2339_v4 = vadd.f32 0.18741608, %v2338_v46  ;;  %v1493_v40 = vmul.f32 %v7277_v39, %v7236_v23 }
 0x1be   : > { %10551 = vst [vmem:[#allocation9_spill] sm:$0xff] %v7287_v27  ;;  %v1526_v24 = vmul.f32 %v1525_v12, %v6930_v37  ;;  %v7297_v38 = vadd.f32 1.0, %v5577_v60  ;;  %v7300_v34 = vmul.f32 %v2301_v54, %v7038_v36  ;;  %v7303_v59 = vmul.f32 0.5, %v7033_v7 }
 0x1bf   : > { %10552 = vst [vmem:[#allocation10_spill] sm:$0xff] %v7292_v52  ;;  %v1765_v32 = vadd.f32 0.014752088, %v1764_v61  ;;  %v1695_v6 = vmul.f32 %v7244_v45, %v1694_v62  ;;  %v1701_v5 = vand.u32 2147483647, %v7203_v43  ;;  %v1719_v1 = vmul.f32 %v1718_v58, %v7075_v3  ;;  %v597_v52 = vpop.f32.mrf.mxu0 }
 0x1c0   : > { %10553 = vst [vmem:[#allocation11_spill] sm:$0xff] %v7300_v34  ;;  %v7308_v35 = vmin.f32 %v2370_v8, 16.0  ;;  %v7310_v20 = vpop.eup %5884  ;;  %v7313_v41 = vmul.f32 %v1680_v22, %v7009_v47  ;;  %v1803_v36 = vadd.f32 0.001143296, %v1802_v15  ;;  %v1527_v60 = vadd.f32 0.112945676, %v1526_v24 }
 0x1c1   : > { %v1563_v46 = vadd.f32 0.001143296, %v1562_v63  ;;  %v1703_v7 = vand.u32 2147483648, %v7203_v43  ;;  %v2340_v12 = vmul.f32 %v2339_v4, %v7133_v57  ;;  %v7318_v54 = vadd.f32 %v6959_v48, %v2116_v29 }
 0x1c2   : > { %v1494_v26 = vsub.f32 1.0, %v1493_v40  ;;  %vm1698_vm6 = vweird.f32 %v7244_v45  ;;  %v1766_v3 = vmul.f32 %v1765_v32, %v7229_v18  ;;  %v1528_v61 = vmul.f32 %v1527_v60, %v6930_v37 }
 0x1c3   : > { %v1564_v47 = vmul.f32 %v1563_v46, %v6951_v14  ;;  %v1696_v62 = vadd.f32 %v7244_v45, %v1695_v6  ;;  %v1720_v58 = vadd.f32 1.1283791, %v1719_v1  ;;  %v1733_v8 = vmul.f32 %v7310_v20, %v7259_v2 }
 0x1c4   : > { %v1751_v22 = vmul.f32 2.1237322e-06, %v7229_v18  ;;  %v2372_v15 = vmul.f32 2.1237322e-06, %v7308_v35  ;;  %v1804_v63 = vmul.f32 %v1803_v36, %v7271_v56  ;;  %v1529_v4 = vadd.f32 0.4994258, %v1528_v61 }
 0x1c5   : > { %v1565_v40 = vadd.f32 0.014752088, %v1564_v47  ;;  %vm1697_vm7 = vweird.f32 %v7203_v43  ;;  %vm7331_vm8 = vcmp.eq.f32.partialorder %v1701_v5, 8.507059e+37  ;;  %v7336_v32 = vmul.f32 0.70710677, %v7318_v54  ;;  %v5782_v43 = vld [vmem:[%s10522_s5 + $0x30] sm:$0xff] }
 0x1c6   : > { %v1495_v29 = vmul.f32 %v7277_v39, %v1494_v26  ;;  %vm7341_vm9 = vmor %vm1697_vm7, %vm1698_vm6  ;;  %v1704_v1 = vor.u32 1.1754944e-38, %v1703_v7  ;;  %v1767_v36 = vadd.f32 0.112945676, %v1766_v3  ;;  %v1530_v60 = vmul.f32 %v1529_v4, %v6930_v37  ;;  %3679 = vmatpush.bf16.msra.mxu2 %v5782_v43 }
 0x1c7   : > { %v1566_v5 = vmul.f32 %v1565_v40, %v6951_v14  ;;  %v1700_v46 = vsel %vm7341_vm9, %v7244_v45, %v1696_v62  ;;  %v7353_v26 = vadd.f32 1.1283791, %v2340_v12  ;;  %v1734_v61 = vsub.f32 1.0, %v1733_v8  ;;  %v5781_v40 = vld [vmem:[%s10522_s5 + $0x28] sm:$0xff] }
 0x1c8   : > { %v1752_v47 = vadd.f32 0.00028619796, %v1751_v22  ;;  %v7356_v7 = vmul.f32 %v1720_v58, %v7046_v16  ;;  %v2373_v3 = vadd.f32 0.00028619796, %v2372_v15  ;;  %v1805_v37 = vadd.f32 0.014752088, %v1804_v63 }
 0x1c9   : > { %v7358_v4 = vadd.f32 1.0, %v1530_v60  ;;  %v2410_v45 = vmul.f32 %v7336_v32, %v7336_v32  ;;  %v1496_v12 = vadd.f32 %v7277_v39, %v1495_v29  ;;  %vm1498_vm0 = vweird.f32 %v7277_v39 }
 0x1ca   : > { %v1503_v62 = vand.u32 2147483648, %v7236_v23  ;;  %v1768_v16 = vmul.f32 %v1767_v36, %v7229_v18  ;;  %v7371_v58 = vadd.f32 %v7168_v25, %v597_v52  ;;  %v1567_v8 = vadd.f32 0.112945676, %v1566_v5  ;;  %3680 = vmatpush.bf16.msra.mxu2 %v5781_v40 }
 0x1cb   : > { %5886 = vrcp.f32 %v7358_v4  ;;  %v1753_v22 = vmul.f32 %v1752_v47, %v7229_v18  ;;  %v1791_v15 = vmul.f32 2.1237322e-06, %v7271_v56  ;;  %vm1497_vm10 = vweird.f32 %v7236_v23 }
 0x1cc   : > { %10558 = vst [vmem:[#allocation12_spill] sm:$0xff] %v7371_v58  ;;  %v1501_v63 = vand.u32 2147483647, %v7236_v23  ;;  %v7379_v29 = vsel %vm7331_vm8, %v1704_v1, %v1700_v46  ;;  %v1741_v6 = vand.u32 2147483647, %v7259_v2  ;;  %v1743_v36 = vand.u32 2147483648, %v7259_v2  ;;  %vm7384_vm11 = vmor %vm1497_vm10, %vm1498_vm0 }
 0x1cd   : > { %v1806_v52 = vmul.f32 %v1805_v37, %v7271_v56  ;;  %v1735_v43 = vmul.f32 %v7310_v20, %v1734_v61  ;;  %v2374_v5 = vmul.f32 %v2373_v3, %v7308_v35  ;;  %v1500_v23 = vsel %vm7384_vm11, %v7277_v39, %v1496_v12  ;;  %v5780_v37 = vld [vmem:[%s10522_s5 + $0x20] sm:$0xff] }
 0x1ce   : > { %v1504_v24 = vor.u32 1.1754944e-38, %v1503_v62  ;;  %v1769_v1 = vadd.f32 0.4994258, %v1768_v16  ;;  %v7393_v46 = vmin.f32 %v2410_v45, 16.0  ;;  %v7396_v47 = vmul.f32 0.70710677, %v7371_v58  ;;  %3681 = vmatpush.bf16.msra.mxu2 %v5780_v37 }
 0x1cf   : > { %v1568_v40 = vmul.f32 %v1567_v8, %v6951_v14  ;;  %vm1737_vm12 = vweird.f32 %v7259_v2  ;;  %v1754_v61 = vadd.f32 0.0036580483, %v1753_v22  ;;  %v1792_v3 = vadd.f32 0.00028619796, %v1791_v15  ;;  %v2118_v8 = vpop.f32.mrf.mxu1 }
 0x1d0   : > { %10561 = vst [vmem:[#allocation13_spill] sm:$0xff] %v7396_v47  ;;  %vm1502_vm13 = vcmp.eq.f32.partialorder %v1501_v63, 8.507059e+37  ;;  %v1744_v39 = vor.u32 1.1754944e-38, %v1743_v36  ;;  %v1807_v12 = vadd.f32 0.112945676, %v1806_v52  ;;  %v1736_v16 = vadd.f32 %v7310_v20, %v1735_v43  ;;  %v5779_v36 = vld [vmem:[%s10522_s5 + $0x18] sm:$0xff] }
 0x1d1   : > { %v5887_v60 = vpop.eup %5886  ;;  %v1505_v62 = vsel %vm1502_vm13, %v1504_v24, %v1500_v23  ;;  %v1602_v45 = vmul.f32 3.8918573e-05, %v6973_v50  ;;  %vm1738_vm14 = vweird.f32 %v7310_v20  ;;  %v2375_v11 = vadd.f32 0.0036580483, %v2374_v5 }
 0x1d2   : > { %v1533_v34 = vmul.f32 %v5887_v60, %v7358_v4  ;;  %vm7407_vm15 = vcmp.eq.f32.partialorder %v1741_v6, 8.507059e+37  ;;  %v1770_v22 = vmul.f32 %v1769_v1, %v7229_v18  ;;  %v2412_v15 = vmul.f32 2.1237322e-06, %v7393_v46  ;;  %3682 = vmatpush.bf16.msra.mxu2 %v5779_v36  ;;  %vm7430_vm1 = vmor %vm1737_vm12, %vm1738_vm14 }
 0x1d3   : > { %v1829_v63 = vmul.f32 %v7396_v47, %v7396_v47  ;;  %v1569_v52 = vadd.f32 0.4994258, %v1568_v40  ;;  %v1755_v43 = vmul.f32 %v1754_v61, %v7229_v18  ;;  %v1793_v5 = vmul.f32 %v1792_v3, %v7271_v56 }
 0x1d4   : > { %v1506_v6 = vmul.f32 %v1505_v62, %v7113_v44  ;;  %v1534_v23 = vsub.f32 1.0, %v1533_v34  ;;  %v1808_v24 = vmul.f32 %v1807_v12, %v7271_v56  ;;  %v1543_v1 = vand.u32 2147483648, %v7358_v4 }
 0x1d5   : > { %v7424_v37 = vadd.f32 %v6959_v48, %v2118_v8  ;;  %v1603_v47 = vadd.f32 0.001143296, %v1602_v45  ;;  %vm1538_vm2 = vweird.f32 %v5887_v60  ;;  %v1541_v44 = vand.u32 2147483647, %v7358_v4 }
 0x1d6   : > { %v1535_v61 = vmul.f32 %v5887_v60, %v1534_v23  ;;  %v1570_v34 = vmul.f32 %v1569_v52, %v6951_v14  ;;  %v1740_v48 = vsel %vm7430_vm1, %v7310_v20, %v1736_v16  ;;  %v7439_v3 = vadd.f32 1.0, %v1770_v22 }
 0x1d7   : > { %v2413_v12 = vadd.f32 0.00028619796, %v2412_v15  ;;  %v7441_v62 = vmin.f32 %v1829_v63, 16.0  ;;  %v1756_v2 = vadd.f32 0.05243302, %v1755_v43  ;;  %vm1537_vm3 = vweird.f32 %v7358_v4 }
 0x1d8   : > { %v1794_v45 = vadd.f32 0.0036580483, %v1793_v5  ;;  %v1536_v8 = vadd.f32 %v5887_v60, %v1535_v61  ;;  %v1809_v36 = vadd.f32 0.4994258, %v1808_v24  ;;  %vm1539_vm4 = vmor %vm1537_vm3, %vm1538_vm2  ;;  %v1544_v23 = vor.u32 1.1754944e-38, %v1543_v1  ;;  %v600_v1 = vpop.f32.mrf.mxu0 }
 0x1d9   : > { %v7445_v58 = vmul.f32 0.70710677, %v7424_v37  ;;  %v1604_v14 = vmul.f32 %v1603_v47, %v6973_v50  ;;  %v5573_v52 = vclamps-f32 %v1506_v6, 1.0  ;;  %vm1542_vm5 = vcmp.eq.f32.partialorder %v1541_v44, 8.507059e+37 }
 0x1da   : > { %v1540_v20 = vsel %vm1539_vm4, %v5887_v60, %v1536_v8  ;;  %v7448_v16 = vadd.f32 1.0, %v1570_v34  ;;  %5888 = vrcp.f32 %v7439_v3  ;;  %v2414_v22 = vmul.f32 %v2413_v12, %v7393_v46 }
 0x1db   : > { %v1545_v15 = vsel %vm1542_vm5, %v1544_v23, %v1540_v20  ;;  %v1842_v4 = vmul.f32 3.8918573e-05, %v7441_v62  ;;  %v1706_v63 = vmul.f32 %v7379_v29, %v7313_v41  ;;  %v1745_v43 = vsel %vm7407_vm15, %v1744_v39, %v1740_v48 }
 0x1dc   : > { %v2376_v47 = vmul.f32 %v2375_v11, %v7308_v35  ;;  %v1546_v60 = vmul.f32 %v1545_v15, %v7124_v19  ;;  %v1795_v5 = vmul.f32 %v1794_v45, %v7271_v56  ;;  %v1810_v6 = vmul.f32 %v1809_v36, %v7271_v56 }
 0x1dd   : > { %v2450_v24 = vmul.f32 %v7445_v58, %v7445_v58  ;;  %v1605_v40 = vadd.f32 0.014752088, %v1604_v14  ;;  %v1757_v61 = vmul.f32 %v1756_v2, %v7229_v18  ;;  %v1969_v41 = vadd.f32 1.0, %v5573_v52 }
 0x1de   : > { %v5574_v44 = vclamps-f32 %v1546_v60, 1.0  ;;  %5890 = vrcp.f32 %v7448_v16  ;;  %v7467_v11 = vmul.f32 %v7297_v38, %v7141_v9  ;;  %v1746_v19 = vmul.f32 %v1745_v43, %v7356_v7 }
 0x1df   : > { %v2415_v27 = vadd.f32 0.0036580483, %v2414_v22  ;;  %v1843_v29 = vadd.f32 0.001143296, %v1842_v4  ;;  %v7472_v39 = vmul.f32 %v7353_v26, %v7100_v49  ;;  %v2377_v34 = vadd.f32 0.05243302, %v2376_v47 }
 0x1e0   : > { %v1970_v48 = vadd.f32 1.0, %v5574_v44  ;;  %v7475_v12 = vadd.f32 %v7168_v25, %v600_v1  ;;  %v7477_v2 = vpop.eup %5888  ;;  %v1796_v45 = vadd.f32 0.05243302, %v1795_v5  ;;  %v7479_v8 = vadd.f32 1.0, %v1810_v6 }
 0x1e1   : > { %v7481_v9 = vmin.f32 %v2450_v24, 16.0  ;;  %v1606_v38 = vmul.f32 %v1605_v40, %v6973_v50  ;;  %v5578_v7 = vclamps-f32 %v1706_v63, 1.0  ;;  %v1758_v36 = vadd.f32 0.18741608, %v1757_v61 }
 0x1e2   : > { %v2001_v23 = vmul.f32 %v1969_v41, %v7068_v33  ;;  %v2002_v49 = vmul.f32 %v1970_v48, %v7088_v0  ;;  %v5579_v26 = vclamps-f32 %v1746_v19, 1.0  ;;  %v7487_v14 = vmul.f32 0.5, %v7249_v28  ;;  %v2121_v48 = vpop.f32.mrf.mxu1 }
 0x1e3   : > { %v2416_v52 = vmul.f32 %v2415_v27, %v7393_v46  ;;  %v1844_v20 = vmul.f32 %v1843_v29, %v7441_v62  ;;  %v2378_v15 = vmul.f32 %v2377_v34, %v7308_v35  ;;  %v1773_v4 = vmul.f32 %v7477_v2, %v7439_v3 }
 0x1e4   : > { %v7491_v22 = vpop.eup %5890  ;;  %v2023_v63 = vpack.c.bf16 %v2002_v49, %v2001_v23  ;;  %v7497_v33 = vmul.f32 0.70710677, %v7475_v12  ;;  %v1797_v0 = vmul.f32 %v1796_v45, %v7271_v56  ;;  %5892 = vrcp.f32 %v7479_v8 }
 0x1e5   : > { %v2452_v28 = vmul.f32 2.1237322e-06, %v7481_v9  ;;  %v1607_v43 = vadd.f32 0.112945676, %v1606_v38  ;;  %v1974_v47 = vadd.f32 1.0, %v5578_v7  ;;  %v1759_v60 = vmul.f32 %v1758_v36, %v7229_v18 }
 0x1e6   : > { %2155 = vmatmul.bf16.gmra.mxu1 %v2023_v63  ;;  %v1831_v5 = vmul.f32 2.1237322e-06, %v7441_v62  ;;  %v2263_v6 = vmul.f32 3.8918573e-05, %v7024_v21  ;;  %v7506_v24 = vmul.f32 0.5, %v7171_v51  ;;  %v1573_v61 = vmul.f32 %v7491_v22, %v7448_v16 }
 0x1e7   : > { %v2417_v1 = vadd.f32 0.05243302, %v2416_v52  ;;  %v1845_v40 = vadd.f32 0.014752088, %v1844_v20  ;;  %v7510_v44 = vadd.f32 1.0, %v5579_v26  ;;  %v7513_v19 = vmul.f32 0.5, %v7318_v54 }
 0x1e8   : > { %v2379_v41 = vadd.f32 0.18741608, %v2378_v15  ;;  %v1869_v18 = vmul.f32 %v7497_v33, %v7497_v33  ;;  %v1774_v27 = vsub.f32 1.0, %v1773_v4  ;;  %v1798_v29 = vadd.f32 0.18741608, %v1797_v0 }
 0x1e9   : > { %v2453_v34 = vadd.f32 0.00028619796, %v2452_v28  ;;  %v1608_v51 = vmul.f32 %v1607_v43, %v6973_v50  ;;  %v7519_v45 = vmul.f32 %v1974_v47, %v7282_v10  ;;  %v1760_v38 = vadd.f32 1.1283791, %v1759_v60  ;;  %v7533_v10 = vld [vmem:[%s10521_s4] ss:$0 sm:$0xff] }
 0x1ea   : > { %v1832_v7 = vadd.f32 0.00028619796, %v1831_v5  ;;  %v2264_v36 = vadd.f32 0.001143296, %v2263_v6  ;;  %v7521_v23 = vpop.eup %5892  ;;  %v1781_v54 = vand.u32 2147483647, %v7439_v3  ;;  %v2418_v49 = vmul.f32 %v2417_v1, %v7393_v46 }
 0x1eb   : > { %v1846_v26 = vmul.f32 %v1845_v40, %v7441_v62  ;;  %v1574_v52 = vsub.f32 1.0, %v1573_v61  ;;  %v7527_v20 = vmul.f32 %v2379_v41, %v7308_v35  ;;  %v1783_v15 = vand.u32 2147483648, %v7439_v3 }
 0x1ec   : > { %v7536_v4 = vadd.f32 %v7533_v10, %v2121_v48  ;;  %v7538_v63 = vmin.f32 %v1869_v18, 16.0  ;;  %v1775_v0 = vmul.f32 %v7477_v2, %v1774_v27  ;;  %v1799_v28 = vmul.f32 %v1798_v29, %v7271_v56 }
 0x1ed   : > { %v2454_v43 = vmul.f32 %v2453_v34, %v7481_v9  ;;  %v1609_v47 = vadd.f32 0.4994258, %v1608_v51  ;;  %v7544_v60 = vmul.f32 %v1760_v38, %v7191_v53  ;;  %v1813_v5 = vmul.f32 %v7521_v23, %v7479_v8  ;;  %v5778_v34 = vld [vmem:[%s10522_s5 + $0x10] sm:$0xff] }
 0x1ee   : > { %10566 = vst [vmem:[#allocation14_spill] sm:$0xff] %v7536_v4  ;;  %v1833_v6 = vmul.f32 %v1832_v7, %v7441_v62  ;;  %v2265_v1 = vmul.f32 %v2264_v36, %v7024_v21  ;;  %vm7550_vm6 = vcmp.eq.f32.partialorder %v1781_v54, 8.507059e+37  ;;  %v2419_v61 = vadd.f32 0.18741608, %v2418_v49  ;;  %3683 = vmatpush.bf16.msra.mxu2 %v5778_v34  ;;  %v5777_v54 = vld [vmem:[%s10522_s5 + $0x8] sm:$0xff] }
 0x1ef   : > { %v1847_v41 = vadd.f32 0.112945676, %v1846_v26  ;;  %v1575_v56 = vmul.f32 %v7491_v22, %v1574_v52  ;;  %v1610_v18 = vmul.f32 %v1609_v47, %v6973_v50  ;;  %vm1778_vm7 = vweird.f32 %v7477_v2 }
 0x1f0   : > { %v1784_v53 = vor.u32 1.1754944e-38, %v1783_v15  ;;  %v7558_v27 = vmul.f32 0.70710677, %v7536_v4  ;;  %v1882_v29 = vmul.f32 3.8918573e-05, %v7538_v63  ;;  %v1776_v48 = vadd.f32 %v7477_v2, %v1775_v0  ;;  %v602_v15 = vpop.f32.mrf.mxu0 }
 0x1f1   : > { %v1800_v51 = vadd.f32 1.1283791, %v1799_v28  ;;  %v2455_v38 = vadd.f32 0.0036580483, %v2454_v43  ;;  %v7565_v7 = vadd.f32 1.0, %v1610_v18  ;;  %vm1777_vm8 = vweird.f32 %v7439_v3 }
 0x1f2   : > { %v1814_v50 = vsub.f32 1.0, %v1813_v5  ;;  %v1834_v36 = vadd.f32 0.0036580483, %v1833_v6  ;;  %v2266_v49 = vadd.f32 0.014752088, %v2265_v1  ;;  %v1848_v26 = vmul.f32 %v1847_v41, %v7441_v62  ;;  %vm7577_vm0 = vmor %vm1777_vm8, %vm1778_vm7  ;;  %3684 = vmatpush.bf16.msra.mxu2 %v5777_v54  ;;  %v5776_v54 = vld [vmem:[%s10522_s5] sm:$0xff] }
 0x1f3   : > { %v1576_v52 = vadd.f32 %v7491_v22, %v1575_v56  ;;  %vm1578_vm9 = vweird.f32 %v7491_v22  ;;  %5894 = vrcp.f32 %v7565_v7  ;;  %v7582_v0 = vmul.f32 %v2419_v61, %v7393_v46 }
 0x1f4   : > { %v2490_v28 = vmul.f32 %v7558_v27, %v7558_v27  ;;  %v1883_v43 = vadd.f32 0.001143296, %v1882_v29  ;;  %v1583_v47 = vand.u32 2147483648, %v7448_v16  ;;  %v1780_v5 = vsel %vm7577_vm0, %v7477_v2, %v1776_v48 }
 0x1f5   : > { %v7591_v6 = vmul.f32 %v1800_v51, %v7252_v17  ;;  %vm1577_vm10 = vweird.f32 %v7448_v16  ;;  %v1581_v1 = vand.u32 2147483647, %v7448_v16  ;;  %v1815_v61 = vmul.f32 %v7521_v23, %v1814_v50 }
 0x1f6   : > { %v1821_v41 = vand.u32 2147483647, %v7479_v8  ;;  %vm7597_vm11 = vmor %vm1577_vm10, %vm1578_vm9  ;;  %v7602_v18 = vadd.f32 %v7168_v25, %v602_v15  ;;  %v2267_v2 = vmul.f32 %v2266_v49, %v7024_v21  ;;  %v2456_v17 = vmul.f32 %v2455_v38, %v7481_v9  ;;  %3685 = vmatpush.bf16.msra.mxu2 %v5776_v54 }
 0x1f7   : > { %v1835_v29 = vmul.f32 %v1834_v36, %v7441_v62  ;;  %v1849_v34 = vadd.f32 0.4994258, %v1848_v26  ;;  %v1580_v16 = vsel %vm7597_vm11, %v7491_v22, %v1576_v52  ;;  %v1785_v48 = vsel %vm7550_vm6, %v1784_v53, %v1780_v5 }
 0x1f8   : > { %v7612_v51 = vmin.f32 %v2490_v28, 16.0  ;;  %v1884_v50 = vmul.f32 %v1883_v43, %v7538_v63  ;;  %v1584_v25 = vor.u32 1.1754944e-38, %v1583_v47  ;;  %vm1817_vm12 = vweird.f32 %v7479_v8 }
 0x1f9   : > { %v5895_v38 = vpop.eup %5894  ;;  %v1823_v36 = vand.u32 2147483648, %v7479_v8  ;;  %vm1582_vm13 = vcmp.eq.f32.partialorder %v1581_v1, 8.507059e+37  ;;  %v7621_v22 = vmul.f32 0.70710677, %v7602_v18  ;;  %vm1818_vm14 = vweird.f32 %v7521_v23 }
 0x1fa   : > { %v1585_v40 = vsel %vm1582_vm13, %v1584_v25, %v1580_v16  ;;  %v1613_v53 = vmul.f32 %v5895_v38, %v7565_v7  ;;  %v2268_v49 = vadd.f32 0.112945676, %v2267_v2  ;;  %v1816_v26 = vadd.f32 %v7521_v23, %v1815_v61  ;;  %vm7645_vm2 = vmor %vm1817_vm12, %vm1818_vm14 }
 0x1fb   : > { %vm7626_vm15 = vcmp.eq.f32.partialorder %v1821_v41, 8.507059e+37  ;;  %v2457_v15 = vadd.f32 0.05243302, %v2456_v17  ;;  %v1836_v3 = vadd.f32 0.05243302, %v1835_v29  ;;  %v1850_v28 = vmul.f32 %v1849_v34, %v7441_v62 }
 0x1fc   : > { %v2492_v43 = vmul.f32 2.1237322e-06, %v7612_v51  ;;  %v1885_v47 = vadd.f32 0.014752088, %v1884_v50  ;;  %v1614_v5 = vsub.f32 1.0, %v1613_v53  ;;  %v1909_v1 = vmul.f32 %v7621_v22, %v7621_v22 }
 0x1fd   : > { %v1586_v56 = vmul.f32 %v1585_v40, %v7146_v31  ;;  %v1623_v2 = vand.u32 2147483648, %v7565_v7  ;;  %v2269_v61 = vmul.f32 %v2268_v49, %v7024_v21  ;;  %v2303_v41 = vmul.f32 3.8918573e-05, %v7063_v13 }
 0x1fe   : > { %v1615_v16 = vmul.f32 %v5895_v38, %v1614_v5  ;;  %vm1618_vm1 = vweird.f32 %v5895_v38  ;;  %v1621_v17 = vand.u32 2147483647, %v7565_v7  ;;  %v7639_v29 = vmin.f32 %v1909_v1, 16.0 }
 0x1ff   : > { %v1824_v31 = vor.u32 1.1754944e-38, %v1823_v36  ;;  %v7649_v50 = vadd.f32 1.0, %v1850_v28  ;;  %v1871_v25 = vmul.f32 2.1237322e-06, %v7538_v63  ;;  %v2270_v54 = vadd.f32 0.4994258, %v2269_v61 }
 0x200   : > { %v1820_v40 = vsel %vm7645_vm2, %v7521_v23, %v1816_v26  ;;  %v1886_v53 = vmul.f32 %v1885_v47, %v7538_v63  ;;  %v1616_v49 = vadd.f32 %v5895_v38, %v1615_v16  ;;  %vm1617_vm3 = vweird.f32 %v7565_v7 }
 0x201   : > { %v2493_v8 = vadd.f32 0.00028619796, %v2492_v43  ;;  %vm1619_vm4 = vmor %vm1617_vm3, %vm1618_vm1  ;;  %v1624_v5 = vor.u32 1.1754944e-38, %v1623_v2  ;;  %v1922_v1 = vmul.f32 3.8918573e-05, %v7639_v29  ;;  %v2271_v36 = vmul.f32 %v2270_v54, %v7024_v21 }
 0x202   : > { %v5575_v28 = vclamps-f32 %v1586_v56, 1.0  ;;  %v1620_v4 = vsel %vm1619_vm4, %v5895_v38, %v1616_v49  ;;  %vm1622_vm5 = vcmp.eq.f32.partialorder %v1621_v17, 8.507059e+37  ;;  %v2304_v61 = vadd.f32 0.001143296, %v2303_v41 }
 0x203   : > { %5896 = vrcp.f32 %v7649_v50  ;;  %v1872_v34 = vadd.f32 0.00028619796, %v1871_v25  ;;  %v1625_v23 = vsel %vm1622_vm5, %v1624_v5, %v1620_v4  ;;  %v1923_v26 = vadd.f32 0.001143296, %v1922_v1 }
 0x204   : > { %v1825_v47 = vsel %vm7626_vm15, %v1824_v31, %v1820_v40  ;;  %v1887_v7 = vadd.f32 0.112945676, %v1886_v53  ;;  %v1626_v43 = vmul.f32 %v1625_v23, %v7152_v30  ;;  %v7663_v2 = vadd.f32 1.0, %v2271_v36 }
 0x205   : > { %v1786_v16 = vmul.f32 %v1785_v48, %v7544_v60  ;;  %v2458_v21 = vmul.f32 %v2457_v15, %v7481_v9  ;;  %v1837_v38 = vmul.f32 %v1836_v3, %v7441_v62  ;;  %v1924_v56 = vmul.f32 %v1923_v26, %v7639_v29 }
 0x206   : > { %v5576_v41 = vclamps-f32 %v1626_v43, 1.0  ;;  %v1971_v17 = vadd.f32 1.0, %v5575_v28  ;;  %5898 = vrcp.f32 %v7663_v2  ;;  %v2305_v4 = vmul.f32 %v2304_v61, %v7063_v13 }
 0x207   : > { %v2381_v52 = vadd.f32 1.1283791, %v7527_v20  ;;  %v1826_v30 = vmul.f32 %v1825_v47, %v7591_v6  ;;  %v2494_v31 = vmul.f32 %v2493_v8, %v7612_v51  ;;  %v1873_v60 = vmul.f32 %v1872_v34, %v7538_v63  ;;  %v10577_v6 = vld [vmem:[#allocation5_spill] sm:$0xff]  ;;  %v10578_v8 = vld [vmem:[#allocation6_spill] sm:$0xff] }
 0x208   : > { %v2421_v48 = vadd.f32 1.1283791, %v7582_v0  ;;  %v1888_v15 = vmul.f32 %v1887_v7, %v7538_v63  ;;  %v1972_v3 = vadd.f32 1.0, %v5576_v41  ;;  %v2343_v25 = vmul.f32 3.8918573e-05, %v7133_v57 }
 0x209   : > { %v7678_v54 = vpop.eup %5896  ;;  %v5580_v40 = vclamps-f32 %v1786_v16, 1.0  ;;  %v633_v53 = vmul.f32 0.5, %v7234_v55  ;;  %v1838_v49 = vadd.f32 0.18741608, %v1837_v38  ;;  %v1925_v20 = vadd.f32 0.014752088, %v1924_v56 }
 0x20a   : > { %v2459_v5 = vadd.f32 0.18741608, %v2458_v21  ;;  %v2003_v1 = vmul.f32 %v1971_v17, %v10577_v6  ;;  %v2004_v36 = vmul.f32 %v1972_v3, %v10578_v8  ;;  %v2306_v28 = vadd.f32 0.014752088, %v2305_v4  ;;  %v10579_v56 = vld [vmem:[#allocation12_spill] sm:$0xff] }
 0x20b   : > { %v7685_v0 = vmul.f32 %v7510_v44, %v7303_v59  ;;  %v5581_v61 = vclamps-f32 %v1826_v30, 1.0  ;;  %v2495_v34 = vadd.f32 0.0036580483, %v2494_v31  ;;  %v1874_v23 = vadd.f32 0.0036580483, %v1873_v60  ;;  %v2123_v31 = vpop.f32.mrf.mxu1 }
 0x20c   : > { %v7687_v26 = vpop.eup %5898  ;;  %v1853_v55 = vmul.f32 %v7678_v54, %v7649_v50  ;;  %v1889_v47 = vadd.f32 0.4994258, %v1888_v15  ;;  %v2024_v7 = vpack.c.bf16 %v2004_v36, %v2003_v1  ;;  %v2344_v43 = vadd.f32 0.001143296, %v2343_v25 }
 0x20d   : > { %v7692_v16 = vmul.f32 %v2381_v52, %v7266_v42  ;;  %v1976_v21 = vadd.f32 1.0, %v5580_v40  ;;  %v1839_v38 = vmul.f32 %v1838_v49, %v7441_v62  ;;  %v1926_v59 = vmul.f32 %v1925_v20, %v7639_v29 }
 0x20e   : > { %v7697_v44 = vmul.f32 %v2421_v48, %v7336_v32  ;;  %v7700_v41 = vmul.f32 0.5, %v10579_v56  ;;  %2160 = vmatmul.bf16.gmra.mxu1 %v2024_v7  ;;  %v2274_v17 = vmul.f32 %v7687_v26, %v7663_v2  ;;  %v2307_v4 = vmul.f32 %v2306_v28, %v7063_v13 }
 0x20f   : > { %v1977_v30 = vadd.f32 1.0, %v5581_v61  ;;  %v2460_v42 = vmul.f32 %v2459_v5, %v7481_v9  ;;  %v2496_v52 = vmul.f32 %v2495_v34, %v7612_v51  ;;  %v1875_v62 = vmul.f32 %v1874_v23, %v7538_v63 }
 0x210   : > { %v1854_v60 = vsub.f32 1.0, %v1853_v55  ;;  %v1890_v32 = vmul.f32 %v1889_v47, %v7538_v63  ;;  %v2308_v48 = vadd.f32 0.112945676, %v2307_v4  ;;  %v2345_v15 = vmul.f32 %v2344_v43, %v7133_v57 }
 0x211   : > { %v7711_v3 = vmul.f32 %v1976_v21, %v7506_v24  ;;  %v1840_v25 = vadd.f32 1.1283791, %v1839_v38  ;;  %v1911_v40 = vmul.f32 2.1237322e-06, %v7639_v29  ;;  %v1927_v49 = vadd.f32 0.112945676, %v1926_v59 }
 0x212   : > { %v7715_v20 = vmul.f32 0.5, %v7475_v12  ;;  %v2275_v5 = vsub.f32 1.0, %v2274_v17  ;;  %v2309_v6 = vmul.f32 %v2308_v48, %v7063_v13  ;;  %v2346_v1 = vadd.f32 0.014752088, %v2345_v15  ;;  %v10580_v12 = vld [vmem:[#allocation13_spill] sm:$0xff] }
 0x213   : > { %v7718_v8 = vmul.f32 %v1977_v30, %v633_v53  ;;  %v7720_v36 = vadd.f32 1.1283791, %v2460_v42  ;;  %v2497_v28 = vadd.f32 0.05243302, %v2496_v52  ;;  %v1876_v61 = vadd.f32 0.05243302, %v1875_v62 }
 0x214   : > { %v1855_v24 = vmul.f32 %v7678_v54, %v1854_v60  ;;  %v7723_v34 = vadd.f32 1.0, %v1890_v32  ;;  %v7726_v23 = vadd.f32 %v7533_v10, %v2123_v31  ;;  %v2310_v55 = vadd.f32 0.4994258, %v2309_v6  ;;  %v2126_v31 = vpop.f32.mrf.mxu1  ;;  %v10587_v6 = vld [vmem:[#allocation9_spill] sm:$0xff] }
 0x215   : > { %v7729_v47 = vmul.f32 %v1840_v25, %v10580_v12  ;;  %v1912_v7 = vadd.f32 0.00028619796, %v1911_v40  ;;  %v1928_v43 = vmul.f32 %v1927_v49, %v7639_v29  ;;  %v2347_v53 = vmul.f32 %v2346_v1, %v7133_v57 }
 0x216   : > { %vm1857_vm6 = vweird.f32 %v7649_v50  ;;  %v1861_v21 = vand.u32 2147483647, %v7649_v50  ;;  %v2276_v38 = vmul.f32 %v7687_v26, %v2275_v5  ;;  %v2311_v59 = vmul.f32 %v2310_v55, %v7063_v13 }
 0x217   : > { %vm1858_vm7 = vweird.f32 %v7678_v54  ;;  %v1863_v56 = vand.u32 2147483648, %v7649_v50  ;;  %v2498_v17 = vmul.f32 %v2497_v28, %v7612_v51  ;;  %v1877_v4 = vmul.f32 %v1876_v61, %v7538_v63 }
 0x218   : > { %v1856_v30 = vadd.f32 %v7678_v54, %v1855_v24  ;;  %5900 = vrcp.f32 %v7723_v34  ;;  %v7744_v42 = vmul.f32 0.70710677, %v7726_v23  ;;  %v7746_v52 = vadd.f32 1.0, %v2311_v59  ;;  %vm7762_vm9 = vmor %vm1857_vm6, %vm1858_vm7 }
 0x219   : > { %v1913_v62 = vmul.f32 %v1912_v7, %v7639_v29  ;;  %v1929_v13 = vadd.f32 0.4994258, %v1928_v43  ;;  %vm2279_vm8 = vweird.f32 %v7687_v26  ;;  %v2348_v60 = vadd.f32 0.112945676, %v2347_v53 }
 0x21a   : > { %v2277_v32 = vadd.f32 %v7687_v26, %v2276_v38  ;;  %5902 = vrcp.f32 %v7746_v52  ;;  %v2025_v48 = vpack.c.bf16 %v7519_v45, %v7467_v11  ;;  %v2383_v15 = vmul.f32 3.8918573e-05, %v7308_v35 }
 0x21b   : > { %v1878_v25 = vadd.f32 0.18741608, %v1877_v4  ;;  %v2284_v40 = vand.u32 2147483648, %v7663_v2  ;;  %v2349_v49 = vmul.f32 %v2348_v60, %v7133_v57  ;;  %v2423_v5 = vmul.f32 3.8918573e-05, %v7393_v46 }
 0x21c   : > { %vm7766_vm0 = vcmp.eq.f32.partialorder %v1861_v21, 8.507059e+37  ;;  %v2530_v11 = vmul.f32 %v7744_v42, %v7744_v42  ;;  %vm2278_vm10 = vweird.f32 %v7663_v2  ;;  %v2282_v45 = vand.u32 2147483647, %v7663_v2 }
 0x21d   : > { %v1860_v28 = vsel %vm7762_vm9, %v7678_v54, %v1856_v30  ;;  %v1864_v50 = vor.u32 1.1754944e-38, %v1863_v56  ;;  %v7777_v61 = vadd.f32 0.18741608, %v2498_v17  ;;  %vm7781_vm11 = vmor %vm2278_vm10, %vm2279_vm8  ;;  %v2350_v55 = vadd.f32 0.4994258, %v2349_v49 }
 0x21e   : > { %v7785_v12 = vpop.eup %5900  ;;  %v1914_v7 = vadd.f32 0.0036580483, %v1913_v62  ;;  %v1930_v43 = vmul.f32 %v1929_v13, %v7639_v29  ;;  %v2281_v2 = vsel %vm7781_vm11, %v7687_v26, %v2277_v32  ;;  %2165 = vmatmul.bf16.gmra.mxu1 %v2025_v48  ;;  %v2384_v54 = vadd.f32 0.001143296, %v2383_v15 }
 0x21f   : > { %v1879_v53 = vmul.f32 %v1878_v25, %v7538_v63  ;;  %v2285_v21 = vor.u32 1.1754944e-38, %v2284_v40  ;;  %v2351_v38 = vmul.f32 %v2350_v55, %v7133_v57  ;;  %v2424_v59 = vadd.f32 0.001143296, %v2423_v5  ;;  %v7811_v40 = vpop.f32.mrf.mxu1 }
 0x220   : > { %v5903_v56 = vpop.eup %5902  ;;  %v1865_v17 = vsel %vm7766_vm0, %v1864_v50, %v1860_v28  ;;  %v7795_v4 = vmin.f32 %v2530_v11, 16.0  ;;  %vm2283_vm12 = vcmp.eq.f32.partialorder %v2282_v45, 8.507059e+37  ;;  %v2385_v30 = vmul.f32 %v2384_v54, %v7308_v35 }
 0x221   : > { %v7799_v62 = vadd.f32 %v7533_v10, %v2126_v31  ;;  %v2286_v26 = vsel %vm2283_vm12, %v2285_v21, %v2281_v2  ;;  %v2314_v13 = vmul.f32 %v5903_v56, %v7746_v52  ;;  %v7802_v63 = vadd.f32 1.0, %v2351_v38 }
 0x222   : > { %v1893_v57 = vmul.f32 %v7785_v12, %v7723_v34  ;;  %v1915_v60 = vmul.f32 %v1914_v7, %v7639_v29  ;;  %v7807_v32 = vadd.f32 1.0, %v1930_v43  ;;  %v2386_v48 = vadd.f32 0.014752088, %v2385_v30 }
 0x223   : > { %v7809_v15 = vadd.f32 1.1283791, %v1879_v53  ;;  %v2315_v25 = vsub.f32 1.0, %v2314_v13  ;;  %5904 = vrcp.f32 %v7802_v63  ;;  %v2425_v31 = vmul.f32 %v2424_v59, %v7393_v46 }
 0x224   : > { %v1866_v49 = vmul.f32 %v1865_v17, %v7729_v47  ;;  %v2532_v5 = vmul.f32 2.1237322e-06, %v7795_v4  ;;  %v2287_v1 = vmul.f32 %v2286_v26, %v10587_v6  ;;  %v2324_v11 = vand.u32 2147483648, %v7746_v52 }
 0x225   : > { %v2316_v45 = vmul.f32 %v5903_v56, %v2315_v25  ;;  %vm2319_vm13 = vweird.f32 %v5903_v56  ;;  %v2322_v28 = vand.u32 2147483647, %v7746_v52  ;;  %v2387_v50 = vmul.f32 %v2386_v48, %v7308_v35 }
 0x226   : > { %v1894_v24 = vsub.f32 1.0, %v1893_v57  ;;  %v1916_v55 = vadd.f32 0.05243302, %v1915_v60  ;;  %5906 = vrcp.f32 %v7807_v32  ;;  %v7823_v7 = vmul.f32 0.70710677, %v7799_v62 }
 0x227   : > { %v2317_v47 = vadd.f32 %v5903_v56, %v2316_v45  ;;  %vm2318_vm14 = vweird.f32 %v7746_v52  ;;  %v2388_v43 = vadd.f32 0.112945676, %v2387_v50  ;;  %v2426_v2 = vadd.f32 0.014752088, %v2425_v31  ;;  %v10588_v31 = vld [vmem:[#allocation11_spill] sm:$0xff] }
 0x228   : > { %v1901_v54 = vand.u32 2147483647, %v7723_v34  ;;  %v5617_v53 = vclamps-f32 %v2287_v1, 1.0  ;;  %vm2320_vm15 = vmor %vm2318_vm14, %vm2319_vm13  ;;  %v2325_v21 = vor.u32 1.1754944e-38, %v2324_v11  ;;  %v2463_v38 = vmul.f32 3.8918573e-05, %v7481_v9 }
 0x229   : > { %v7828_v59 = vpop.eup %5904  ;;  %v2533_v17 = vadd.f32 0.00028619796, %v2532_v5  ;;  %v2321_v30 = vsel %vm2320_vm15, %v5903_v56, %v2317_v47  ;;  %vm2323_vm1 = vcmp.eq.f32.partialorder %v2322_v28, 8.507059e+37  ;;  %v2389_v26 = vmul.f32 %v2388_v43, %v7308_v35  ;;  %v7845_v43 = vpop.f32.mrf.mxu1 }
 0x22a   : > { %vm1897_vm2 = vweird.f32 %v7723_v34  ;;  %v2570_v52 = vmul.f32 %v7823_v7, %v7823_v7  ;;  %v2326_v13 = vsel %vm2323_vm1, %v2325_v21, %v2321_v30  ;;  %v2354_v57 = vmul.f32 %v7828_v59, %v7802_v63 }
 0x22b   : > { %v2427_v60 = vmul.f32 %v2426_v2, %v7393_v46  ;;  %v1895_v48 = vmul.f32 %v7785_v12, %v1894_v24  ;;  %v1917_v25 = vmul.f32 %v1916_v55, %v7639_v29  ;;  %v2327_v56 = vmul.f32 %v2326_v13, %v10588_v31 }
 0x22c   : > { %v2390_v5 = vadd.f32 0.4994258, %v2389_v26  ;;  %v7840_v6 = vpop.eup %5906  ;;  %v3530_v1 = vadd.f32 1.0, %v5617_v53  ;;  %v2355_v11 = vsub.f32 1.0, %v2354_v57  ;;  %v2026_v45 = vpack.c.bf16 %v7711_v3, %v7685_v0  ;;  %v10589_v26 = vld [vmem:[#allocation7_spill] sm:$0xff] }
 0x22d   : > { %v2464_v28 = vadd.f32 0.001143296, %v2463_v38  ;;  %v5582_v50 = vclamps-f32 %v1866_v49, 1.0  ;;  %vm1898_vm3 = vweird.f32 %v7785_v12  ;;  %v5618_v47 = vclamps-f32 %v2327_v56, 1.0 }
 0x22e   : > { %v2391_v24 = vmul.f32 %v2390_v5, %v7308_v35  ;;  %v2534_v55 = vmul.f32 %v2533_v17, %v7795_v4  ;;  %v7849_v2 = vmin.f32 %v2570_v52, 16.0  ;;  %v2356_v21 = vmul.f32 %v7828_v59, %v2355_v11  ;;  %2170 = vmatmul.bf16.gmra.mxu1 %v2026_v45  ;;  %v10590_v17 = vld [vmem:[#allocation8_spill] sm:$0xff]  ;;  %vm7870_vm5 = vmor %vm1897_vm2, %vm1898_vm3 }
 0x22f   : > { %v2428_v53 = vadd.f32 0.112945676, %v2427_v60  ;;  %v1896_v30 = vadd.f32 %v7785_v12, %v1895_v48  ;;  %v1933_v0 = vmul.f32 %v7840_v6, %v7807_v32  ;;  %v3531_v3 = vadd.f32 1.0, %v5618_v47 }
 0x230   : > { %v7855_v49 = vadd.f32 1.0, %v2391_v24  ;;  %v1918_v38 = vadd.f32 0.18741608, %v1917_v25  ;;  %v3562_v13 = vmul.f32 %v3530_v1, %v10589_v26  ;;  %vm2359_vm4 = vweird.f32 %v7828_v59 }
 0x231   : > { %v2465_v35 = vmul.f32 %v2464_v28, %v7481_v9  ;;  %v3563_v52 = vmul.f32 %v3531_v3, %v10590_v17  ;;  %v2357_v57 = vadd.f32 %v7828_v59, %v2356_v21  ;;  %v2429_v60 = vmul.f32 %v2428_v53, %v7393_v46 }
 0x232   : > { %5908 = vrcp.f32 %v7855_v49  ;;  %v1978_v48 = vadd.f32 1.0, %v5582_v50  ;;  %v1903_v31 = vand.u32 2147483648, %v7723_v34  ;;  %v2535_v56 = vadd.f32 0.0036580483, %v2534_v55 }
 0x233   : > { %v2364_v25 = vand.u32 2147483648, %v7802_v63  ;;  %v1934_v1 = vsub.f32 1.0, %v1933_v0  ;;  %v3594_v11 = vpack.c.bf16 %v3563_v52, %v3562_v13  ;;  %vm2358_vm6 = vweird.f32 %v7802_v63 }
 0x234   : > { %v2362_v45 = vand.u32 2147483647, %v7802_v63  ;;  %v7878_v28 = vmul.f32 %v7809_v15, %v7497_v33  ;;  %v1900_v50 = vsel %vm7870_vm5, %v7785_v12, %v1896_v30  ;;  %vm7883_vm7 = vcmp.eq.f32.partialorder %v1901_v54, 8.507059e+37  ;;  %vm7890_vm8 = vmor %vm2358_vm6, %vm2359_vm4 }
 0x235   : > { %v2572_v47 = vmul.f32 2.1237322e-06, %v7849_v2  ;;  %v1919_v63 = vmul.f32 %v1918_v38, %v7639_v29  ;;  %3686 = vmatmul.bf16.vlgmr.msra.gmra.mxu2 %v3594_v11  ;;  %v2361_v33 = vsel %vm7890_vm8, %v7828_v59, %v2357_v57  ;;  %v2430_v12 = vadd.f32 0.4994258, %v2429_v60  ;;  %v7902_v29 = vpop.f32.mrf.mxu1 }
 0x236   : > { %v2466_v15 = vadd.f32 0.014752088, %v2465_v35  ;;  %v2010_v54 = vmul.f32 %v1978_v48, %v7700_v41  ;;  %v1904_v55 = vor.u32 1.1754944e-38, %v1903_v31  ;;  %v2365_v21 = vor.u32 1.1754944e-38, %v2364_v25 }
 0x237   : > { %v2503_v53 = vmul.f32 3.8918573e-05, %v7612_v51  ;;  %v2536_v0 = vmul.f32 %v2535_v56, %v7795_v4  ;;  %v1935_v3 = vmul.f32 %v7840_v6, %v1934_v1  ;;  %vm2363_vm9 = vcmp.eq.f32.partialorder %v2362_v45, 8.507059e+37 }
 0x238   : > { %v5909_v30 = vpop.eup %5908  ;;  %v2431_v38 = vmul.f32 %v2430_v12, %v7393_v46  ;;  %v1905_v59 = vsel %vm7883_vm7, %v1904_v55, %v1900_v50  ;;  %v2573_v26 = vadd.f32 0.00028619796, %v2572_v47  ;;  %v2366_v13 = vsel %vm2363_vm9, %v2365_v21, %v2361_v33 }
 0x239   : > { %v2394_v41 = vmul.f32 %v5909_v30, %v7855_v49  ;;  %v1920_v35 = vadd.f32 1.1283791, %v1919_v63  ;;  %v1941_v17 = vand.u32 2147483647, %v7807_v32  ;;  %v2467_v57 = vmul.f32 %v2466_v15, %v7481_v9 }
 0x23a   : > { %v7909_v52 = vadd.f32 1.0, %v2431_v38  ;;  %vm1938_vm0 = vweird.f32 %v7840_v6  ;;  %v1943_v60 = vand.u32 2147483648, %v7807_v32  ;;  %v2504_v46 = vadd.f32 0.001143296, %v2503_v53 }
 0x23b   : > { %v2395_v48 = vsub.f32 1.0, %v2394_v41  ;;  %v1936_v31 = vadd.f32 %v7840_v6, %v1935_v3  ;;  %v2367_v56 = vmul.f32 %v2366_v13, %v7472_v39  ;;  %v2404_v25 = vand.u32 2147483648, %v7855_v49 }
 0x23c   : > { %5910 = vrcp.f32 %v7909_v52  ;;  %vm2399_vm10 = vweird.f32 %v5909_v30  ;;  %v2402_v1 = vand.u32 2147483647, %v7855_v49  ;;  %v2468_v11 = vadd.f32 0.112945676, %v2467_v57 }
 0x23d   : > { %v2396_v5 = vmul.f32 %v5909_v30, %v2395_v48  ;;  %vm1937_vm11 = vweird.f32 %v7807_v32  ;;  %v7922_v45 = vadd.f32 %v7533_v10, %v7811_v40  ;;  %v2505_v50 = vmul.f32 %v2504_v46, %v7612_v51  ;;  %v7945_v38 = vpop.f32.mrf.mxu1 }
 0x23e   : > { %v2543_v34 = vmul.f32 3.8918573e-05, %v7795_v4  ;;  %vm7928_vm12 = vmor %vm1937_vm11, %vm1938_vm0  ;;  %vm7932_vm13 = vcmp.eq.f32.partialorder %v1941_v17, 8.507059e+37  ;;  %vm2398_vm14 = vweird.f32 %v7855_v49  ;;  %v2469_v32 = vmul.f32 %v2468_v11, %v7481_v9 }
 0x23f   : > { %v2397_v24 = vadd.f32 %v5909_v30, %v2396_v5  ;;  %v1940_v40 = vsel %vm7928_vm12, %v7840_v6, %v1936_v31  ;;  %v1944_v63 = vor.u32 1.1754944e-38, %v1943_v60  ;;  %v5619_v33 = vclamps-f32 %v2367_v56, 1.0  ;;  %vm2400_vm15 = vmor %vm2398_vm14, %vm2399_vm10 }
 0x240   : > { %v2405_v12 = vor.u32 1.1754944e-38, %v2404_v25  ;;  %vm2403_vm1 = vcmp.eq.f32.partialorder %v2402_v1, 8.507059e+37  ;;  %v2470_v55 = vadd.f32 0.4994258, %v2469_v32  ;;  %v2506_v21 = vadd.f32 0.014752088, %v2505_v50 }
 0x241   : > { %v2401_v15 = vsel %vm2400_vm15, %v5909_v30, %v2397_v24  ;;  %v7943_v3 = vmul.f32 0.70710677, %v7922_v45  ;;  %v2027_v13 = vpack.c.bf16 %v2010_v54, %v7718_v8  ;;  %v2544_v41 = vadd.f32 0.001143296, %v2543_v34 }
 0x242   : > { %v5911_v53 = vpop.eup %5910  ;;  %v2406_v49 = vsel %vm2403_vm1, %v2405_v12, %v2401_v15  ;;  %v1945_v6 = vsel %vm7932_vm13, %v1944_v63, %v1940_v40  ;;  %v2471_v57 = vmul.f32 %v2470_v55, %v7481_v9  ;;  %v2537_v60 = vadd.f32 0.05243302, %v2536_v0 }
 0x243   : > { %v2407_v17 = vmul.f32 %v2406_v49, %v7692_v16  ;;  %v2434_v30 = vmul.f32 %v5911_v53, %v7909_v52  ;;  %v1921_v48 = vmul.f32 %v1920_v35, %v7621_v22  ;;  %v2574_v46 = vmul.f32 %v2573_v26, %v7849_v2  ;;  %2175 = vmatmul.bf16.gmra.mxu1 %v2027_v13  ;;  %v10601_v35 = vld [vmem:[#allocation10_spill] sm:$0xff] }
 0x244   : > { %v3532_v31 = vadd.f32 1.0, %v5619_v33  ;;  %v7955_v8 = vadd.f32 1.0, %v2471_v57  ;;  %v2507_v54 = vmul.f32 %v2506_v21, %v7612_v51  ;;  %v1906_v5 = vmul.f32 %v1905_v59, %v7878_v28 }
 0x245   : > { %v5620_v56 = vclamps-f32 %v2407_v17, 1.0  ;;  %v2435_v25 = vsub.f32 1.0, %v2434_v30  ;;  %v1946_v16 = vmul.f32 %v1945_v6, %v1921_v48  ;;  %v2610_v1 = vmul.f32 %v7943_v3, %v7943_v3  ;;  %v7985_v15 = vpop.f32.mrf.mxu1 }
 0x246   : > { %v2545_v9 = vmul.f32 %v2544_v41, %v7795_v4  ;;  %vm2439_vm2 = vweird.f32 %v5911_v53  ;;  %5912 = vrcp.f32 %v7955_v8  ;;  %v2575_v26 = vadd.f32 0.0036580483, %v2574_v46 }
 0x247   : > { %v3533_v0 = vadd.f32 1.0, %v5620_v56  ;;  %v2436_v22 = vmul.f32 %v5911_v53, %v2435_v25  ;;  %v3564_v11 = vmul.f32 %v3532_v31, %v10601_v35  ;;  %vm2438_vm3 = vweird.f32 %v7909_v52 }
 0x248   : > { %v2444_v50 = vand.u32 2147483648, %v7909_v52  ;;  %v2442_v34 = vand.u32 2147483647, %v7909_v52  ;;  %v2508_v39 = vadd.f32 0.112945676, %v2507_v54  ;;  %v7970_v47 = vmul.f32 %v7720_v36, %v7445_v58  ;;  %vm7978_vm4 = vmor %vm2438_vm3, %vm2439_vm2 }
 0x249   : > { %v3565_v28 = vmul.f32 %v3533_v0, %v7487_v14  ;;  %v2437_v59 = vadd.f32 %v5911_v53, %v2436_v22  ;;  %v5583_v24 = vclamps-f32 %v1906_v5, 1.0  ;;  %v7972_v32 = vmin.f32 %v2610_v1, 16.0 }
 0x24a   : > { %v7976_v40 = vadd.f32 %v7533_v10, %v7845_v43  ;;  %v5584_v14 = vclamps-f32 %v1946_v16, 1.0  ;;  %v2546_v12 = vadd.f32 0.014752088, %v2545_v9  ;;  %v2576_v58 = vmul.f32 %v2575_v26, %v7849_v2 }
 0x24b   : > { %v3595_v33 = vpack.c.bf16 %v3565_v28, %v3564_v11  ;;  %v2441_v52 = vsel %vm7978_vm4, %v5911_v53, %v2437_v59  ;;  %v2445_v36 = vor.u32 1.1754944e-38, %v2444_v50  ;;  %v2509_v55 = vmul.f32 %v2508_v39, %v7612_v51 }
 0x24c   : > { %v2583_v43 = vmul.f32 3.8918573e-05, %v7849_v2  ;;  %v5913_v21 = vpop.eup %5912  ;;  %v2500_v49 = vmul.f32 %v7777_v61, %v7612_v51  ;;  %v2538_v13 = vmul.f32 %v2537_v60, %v7795_v4  ;;  %v636_v41 = vmul.f32 0.5, %v7602_v18 }
 0x24d   : > { %3691 = vmatmul.bf16.gmra.mxu2 %v3595_v33  ;;  %vm2443_vm5 = vcmp.eq.f32.partialorder %v2442_v34, 8.507059e+37  ;;  %v1979_v53 = vadd.f32 1.0, %v5583_v24  ;;  %v2474_v17 = vmul.f32 %v5913_v21, %v7955_v8  ;;  %v2510_v30 = vadd.f32 0.4994258, %v2509_v55  ;;  %v8017_v63 = vpop.f32.mrf.mxu1 }
 0x24e   : > { %v2446_v6 = vsel %vm2443_vm5, %v2445_v36, %v2441_v52  ;;  %v1980_v57 = vadd.f32 1.0, %v5584_v14  ;;  %v2612_v48 = vmul.f32 2.1237322e-06, %v7972_v32  ;;  %v7996_v46 = vmul.f32 0.70710677, %v7976_v40 }
 0x24f   : > { %v2547_v31 = vmul.f32 %v2546_v12, %v7795_v4  ;;  %v2577_v61 = vadd.f32 0.05243302, %v2576_v58  ;;  %v2475_v56 = vsub.f32 1.0, %v2474_v17  ;;  %v2511_v60 = vmul.f32 %v2510_v30, %v7612_v51 }
 0x250   : > { %v2584_v18 = vadd.f32 0.001143296, %v2583_v43  ;;  %v2447_v25 = vmul.f32 %v2446_v6, %v7697_v44  ;;  %v2482_v54 = vand.u32 2147483647, %v7955_v8  ;;  %v2484_v5 = vand.u32 2147483648, %v7955_v8 }
 0x251   : > { %v2548_v16 = vadd.f32 0.112945676, %v2547_v31  ;;  %v2476_v1 = vmul.f32 %v5913_v21, %v2475_v56  ;;  %vm2479_vm6 = vweird.f32 %v5913_v21  ;;  %v8003_v9 = vadd.f32 1.0, %v2511_v60 }
 0x252   : > { %v2585_v0 = vmul.f32 %v2584_v18, %v7849_v2  ;;  %v2012_v22 = vmul.f32 %v1980_v57, %v636_v41  ;;  %v2613_v26 = vadd.f32 0.00028619796, %v2612_v48  ;;  %v2650_v35 = vmul.f32 %v7996_v46, %v7996_v46 }
 0x253   : > { %v2549_v51 = vmul.f32 %v2548_v16, %v7795_v4  ;;  %v8011_v44 = vadd.f32 %v7533_v10, %v7902_v29  ;;  %v2477_v11 = vadd.f32 %v5913_v21, %v2476_v1  ;;  %vm2478_vm7 = vweird.f32 %v7955_v8 }
 0x254   : > { %5914 = vrcp.f32 %v8003_v9  ;;  %v2011_v50 = vmul.f32 %v1979_v53, %v7715_v20  ;;  %vm2480_vm8 = vmor %vm2478_vm7, %vm2479_vm6  ;;  %v2485_v28 = vor.u32 1.1754944e-38, %v2484_v5  ;;  %v2623_v34 = vmul.f32 3.8918573e-05, %v7972_v32 }
 0x255   : > { %v2550_v59 = vadd.f32 0.4994258, %v2549_v51  ;;  %v5621_v39 = vclamps-f32 %v2447_v25, 1.0  ;;  %v2481_v24 = vsel %vm2480_vm8, %v5913_v21, %v2477_v11  ;;  %vm2483_vm9 = vcmp.eq.f32.partialorder %v2482_v54, 8.507059e+37 }
 0x256   : > { %v2586_v14 = vadd.f32 0.014752088, %v2585_v0  ;;  %v2539_v29 = vadd.f32 0.18741608, %v2538_v13  ;;  %v2614_v33 = vmul.f32 %v2613_v26, %v7972_v32  ;;  %v8020_v52 = vmin.f32 %v2650_v35, 16.0  ;;  %v8052_v35 = vpop.f32.mrf.mxu1 }
 0x257   : > { %v2486_v8 = vsel %vm2483_vm9, %v2485_v28, %v2481_v24  ;;  %v8023_v12 = vmul.f32 0.70710677, %v8011_v44  ;;  %v2551_v58 = vmul.f32 %v2550_v59, %v7795_v4  ;;  %v2028_v36 = vpack.c.bf16 %v2012_v22, %v2011_v50 }
 0x258   : > { %v2487_v20 = vmul.f32 %v2486_v8, %v7970_v47  ;;  %v2191_v55 = vmul.f32 0.5, %v7424_v37  ;;  %v2578_v43 = vmul.f32 %v2577_v61, %v7849_v2  ;;  %v8031_v21 = vadd.f32 %v7533_v10, %v7945_v38 }
 0x259   : > { %v2624_v13 = vadd.f32 0.001143296, %v2623_v34  ;;  %v3534_v6 = vadd.f32 1.0, %v5621_v39  ;;  %v8033_v17 = vadd.f32 1.0, %v2551_v58  ;;  %2180 = vmatmul.bf16.gmra.mxu1 %v2028_v36  ;;  %v2587_v47 = vmul.f32 %v2586_v14, %v7849_v2 }
 0x25a   : > { %v5915_v41 = vpop.eup %5914  ;;  %v5622_v53 = vclamps-f32 %v2487_v20, 1.0  ;;  %v2501_v30 = vadd.f32 1.1283791, %v2500_v49  ;;  %v2540_v57 = vmul.f32 %v2539_v29, %v7795_v4  ;;  %v2615_v48 = vadd.f32 0.0036580483, %v2614_v33 }
 0x25b   : > { %v2514_v37 = vmul.f32 %v5915_v41, %v8003_v9  ;;  %v2652_v31 = vmul.f32 2.1237322e-06, %v8020_v52  ;;  %v2690_v10 = vmul.f32 %v8023_v12, %v8023_v12  ;;  %5916 = vrcp.f32 %v8033_v17 }
 0x25c   : > { %v3535_v38 = vadd.f32 1.0, %v5622_v53  ;;  %v2579_v61 = vadd.f32 0.18741608, %v2578_v43  ;;  %v8043_v56 = vmul.f32 0.70710677, %v8031_v21  ;;  %v2625_v49 = vmul.f32 %v2624_v13, %v7972_v32 }
 0x25d   : > { %v2515_v60 = vsub.f32 1.0, %v2514_v37  ;;  %v3566_v4 = vmul.f32 %v3534_v6, %v7513_v19  ;;  %v2524_v25 = vand.u32 2147483648, %v8003_v9  ;;  %v2588_v54 = vadd.f32 0.112945676, %v2587_v47 }
 0x25e   : > { %v3567_v18 = vmul.f32 %v3535_v38, %v2191_v55  ;;  %v2616_v5 = vmul.f32 %v2615_v48, %v7972_v32  ;;  %vm2519_vm0 = vweird.f32 %v5915_v41  ;;  %v2522_v1 = vand.u32 2147483647, %v8003_v9 }
 0x25f   : > { %v2516_v16 = vmul.f32 %v5915_v41, %v2515_v60  ;;  %v2653_v0 = vadd.f32 0.00028619796, %v2652_v31  ;;  %v8050_v22 = vmin.f32 %v2690_v10, 16.0  ;;  %v2589_v51 = vmul.f32 %v2588_v54, %v7849_v2 }
 0x260   : > { %v3596_v26 = vpack.c.bf16 %v3567_v18, %v3566_v4  ;;  %v2730_v19 = vmul.f32 %v8043_v56, %v8043_v56  ;;  %vm2518_vm10 = vweird.f32 %v8003_v9  ;;  %v2626_v50 = vadd.f32 0.014752088, %v2625_v49  ;;  %v8089_v18 = vpop.f32.mrf.mxu1 }
 0x261   : > { %v2517_v11 = vadd.f32 %v5915_v41, %v2516_v16  ;;  %v5917_v28 = vpop.eup %5916  ;;  %v2502_v59 = vmul.f32 %v2501_v30, %v7558_v27  ;;  %v2541_v34 = vadd.f32 1.1283791, %v2540_v57  ;;  %v2580_v39 = vmul.f32 %v2579_v61, %v7849_v2  ;;  %vm2520_vm11 = vmor %vm2518_vm10, %vm2519_vm0  ;;  %v8069_v27 = vld [vmem:[%s10521_s4] ss:$0 sm:$0xff] }
 0x262   : > { %3696 = vmatmul.bf16.gmra.mxu2 %v3596_v26  ;;  %v2525_v24 = vor.u32 1.1754944e-38, %v2524_v25  ;;  %v2617_v14 = vadd.f32 0.05243302, %v2616_v5  ;;  %vm2523_vm12 = vcmp.eq.f32.partialorder %v2522_v1, 8.507059e+37  ;;  %v2554_v33 = vmul.f32 %v5917_v28, %v8033_v17 }
 0x263   : > { %v2521_v29 = vsel %vm2520_vm11, %v5915_v41, %v2517_v11  ;;  %v2654_v8 = vmul.f32 %v2653_v0, %v8020_v52  ;;  %v2692_v9 = vmul.f32 2.1237322e-06, %v8050_v22  ;;  %v2590_v58 = vadd.f32 0.4994258, %v2589_v51 }
 0x264   : > { %v2526_v20 = vsel %vm2523_vm12, %v2525_v24, %v2521_v29  ;;  %v8064_v36 = vmin.f32 %v2730_v19, 16.0  ;;  %v8073_v55 = vadd.f32 %v8069_v27, %v7985_v15  ;;  %v2555_v43 = vsub.f32 1.0, %v2554_v33 }
 0x265   : > { %v2627_v13 = vmul.f32 %v2626_v50, %v7972_v32  ;;  %v2562_v41 = vand.u32 2147483647, %v8033_v17  ;;  %v2564_v53 = vand.u32 2147483648, %v8033_v17  ;;  %v2591_v6 = vmul.f32 %v2590_v58, %v7849_v2 }
 0x266   : > { %v2663_v47 = vmul.f32 3.8918573e-05, %v8020_v52  ;;  %v2527_v30 = vmul.f32 %v2526_v20, %v2502_v59  ;;  %v2556_v57 = vmul.f32 %v5917_v28, %v2555_v43  ;;  %vm2559_vm13 = vweird.f32 %v5917_v28 }
 0x267   : > { %v2628_v48 = vadd.f32 0.112945676, %v2627_v13  ;;  %v2618_v37 = vmul.f32 %v2617_v14, %v7972_v32  ;;  %v2655_v31 = vadd.f32 0.0036580483, %v2654_v8  ;;  %v2693_v15 = vadd.f32 0.00028619796, %v2692_v9 }
 0x268   : > { %v8081_v10 = vadd.f32 1.0, %v2591_v6  ;;  %v2557_v38 = vadd.f32 %v5917_v28, %v2556_v57  ;;  %vm2558_vm14 = vweird.f32 %v8033_v17  ;;  %v2664_v60 = vadd.f32 0.001143296, %v2663_v47 }
 0x269   : > { %v2629_v61 = vmul.f32 %v2628_v48, %v7972_v32  ;;  %v2732_v2 = vmul.f32 2.1237322e-06, %v8064_v36  ;;  %v8087_v49 = vmul.f32 0.70710677, %v8073_v55  ;;  %vm2560_vm15 = vmor %vm2558_vm14, %vm2559_vm13  ;;  %v2565_v4 = vor.u32 1.1754944e-38, %v2564_v53 }
 0x26a   : > { %5918 = vrcp.f32 %v8081_v10  ;;  %v2542_v25 = vmul.f32 %v2541_v34, %v7744_v42  ;;  %v5623_v54 = vclamps-f32 %v2527_v30, 1.0  ;;  %v2561_v5 = vsel %vm2560_vm15, %v5917_v28, %v2557_v38  ;;  %v10604_v34 = vld [vmem:[#allocation14_spill] sm:$0xff] }
 0x26b   : > { %vm2563_vm1 = vcmp.eq.f32.partialorder %v2562_v41, 8.507059e+37  ;;  %v2619_v17 = vadd.f32 0.18741608, %v2618_v37  ;;  %v2694_v16 = vmul.f32 %v2693_v15, %v8050_v22  ;;  %v2630_v0 = vadd.f32 0.4994258, %v2629_v61 }
 0x26c   : > { %v2566_v1 = vsel %vm2563_vm1, %v2565_v4, %v2561_v5  ;;  %v2581_v26 = vadd.f32 1.1283791, %v2580_v39  ;;  %v2656_v51 = vmul.f32 %v2655_v31, %v8020_v52  ;;  %v2665_v11 = vmul.f32 %v2664_v60, %v8020_v52  ;;  %v8117_v31 = vpop.f32.mrf.mxu1 }
 0x26d   : > { %v2567_v19 = vmul.f32 %v2566_v1, %v2542_v25  ;;  %v2733_v50 = vadd.f32 0.00028619796, %v2732_v2  ;;  %v2770_v59 = vmul.f32 %v8087_v49, %v8087_v49  ;;  %v2631_v42 = vmul.f32 %v2630_v0, %v7972_v32 }
 0x26e   : > { %v2192_v28 = vmul.f32 0.5, %v10604_v34  ;;  %v2193_v24 = vmul.f32 0.5, %v7726_v23  ;;  %v3536_v29 = vadd.f32 1.0, %v5623_v54  ;;  %v2620_v39 = vmul.f32 %v2619_v17, %v7972_v32 }
 0x26f   : > { %v5624_v14 = vclamps-f32 %v2567_v19, 1.0  ;;  %v2695_v8 = vadd.f32 0.0036580483, %v2694_v16  ;;  %v8102_v9 = vadd.f32 1.0, %v2631_v42  ;;  %v2666_v20 = vadd.f32 0.014752088, %v2665_v11 }
 0x270   : > { %v5919_v33 = vpop.eup %5918  ;;  %v2582_v58 = vmul.f32 %v2581_v26, %v7823_v7  ;;  %v2657_v43 = vadd.f32 0.05243302, %v2656_v51  ;;  %v2734_v53 = vmul.f32 %v2733_v50, %v8064_v36  ;;  %v8107_v6 = vmin.f32 %v2770_v59, 16.0 }
 0x271   : > { %v3537_v13 = vadd.f32 1.0, %v5624_v14  ;;  %v2594_v41 = vmul.f32 %v5919_v33, %v8081_v10  ;;  %v8111_v23 = vadd.f32 %v8069_v27, %v8017_v63  ;;  %5920 = vrcp.f32 %v8102_v9 }
 0x272   : > { %v3568_v32 = vmul.f32 %v3536_v29, %v2192_v28  ;;  %v2703_v57 = vmul.f32 3.8918573e-05, %v8050_v22  ;;  %v2621_v7 = vadd.f32 1.1283791, %v2620_v39  ;;  %v2696_v48 = vmul.f32 %v2695_v8, %v8050_v22 }
 0x273   : > { %v3569_v47 = vmul.f32 %v3537_v13, %v2193_v24  ;;  %v2595_v30 = vsub.f32 1.0, %v2594_v41  ;;  %v2604_v37 = vand.u32 2147483648, %v8081_v10  ;;  %v2667_v15 = vmul.f32 %v2666_v20, %v8020_v52 }
 0x274   : > { %vm2599_vm2 = vweird.f32 %v5919_v33  ;;  %v2602_v63 = vand.u32 2147483647, %v8081_v10  ;;  %v2658_v60 = vmul.f32 %v2657_v43, %v8020_v52  ;;  %v2735_v2 = vadd.f32 0.0036580483, %v2734_v53  ;;  %v8146_v53 = vpop.f32.mrf.mxu1 }
 0x275   : > { %v3597_v38 = vpack.c.bf16 %v3569_v47, %v3568_v32  ;;  %v2596_v61 = vmul.f32 %v5919_v33, %v2595_v30  ;;  %v2772_v4 = vmul.f32 2.1237322e-06, %v8107_v6  ;;  %v8124_v25 = vmul.f32 0.70710677, %v8111_v23 }
 0x276   : > { %vm2598_vm3 = vweird.f32 %v8081_v10  ;;  %v2668_v5 = vadd.f32 0.112945676, %v2667_v15  ;;  %v2704_v17 = vadd.f32 0.001143296, %v2703_v57  ;;  %v2622_v1 = vmul.f32 %v2621_v7, %v7943_v3 }
 0x277   : > { %3701 = vmatmul.bf16.gmra.mxu2 %v3597_v38  ;;  %v2597_v54 = vadd.f32 %v5919_v33, %v2596_v61  ;;  %v5921_v16 = vpop.eup %5920  ;;  %v2697_v0 = vadd.f32 0.05243302, %v2696_v48  ;;  %vm2600_vm4 = vmor %vm2598_vm3, %vm2599_vm2  ;;  %v2605_v26 = vor.u32 1.1754944e-38, %v2604_v37  ;;  %v2743_v51 = vmul.f32 3.8918573e-05, %v8064_v36 }
 0x278   : > { %vm2603_vm5 = vcmp.eq.f32.partialorder %v2602_v63, 8.507059e+37  ;;  %v2634_v11 = vmul.f32 %v5921_v16, %v8102_v9  ;;  %v2669_v50 = vmul.f32 %v2668_v5, %v8020_v52  ;;  %v2736_v59 = vmul.f32 %v2735_v2, %v8064_v36 }
 0x279   : > { %v2601_v19 = vsel %vm2600_vm4, %v5919_v33, %v2597_v54  ;;  %v2773_v42 = vadd.f32 0.00028619796, %v2772_v4  ;;  %v8134_v10 = vadd.f32 %v8069_v27, %v8052_v35  ;;  %v2810_v3 = vmul.f32 %v8124_v25, %v8124_v25 }
 0x27a   : > { %v2606_v34 = vsel %vm2603_vm5, %v2605_v26, %v2601_v19  ;;  %v2635_v28 = vsub.f32 1.0, %v2634_v11  ;;  %v2670_v24 = vadd.f32 0.4994258, %v2669_v50  ;;  %v2705_v14 = vmul.f32 %v2704_v17, %v8050_v22 }
 0x27b   : > { %vm2639_vm6 = vweird.f32 %v5921_v16  ;;  %v2642_v29 = vand.u32 2147483647, %v8102_v9  ;;  %v2644_v33 = vand.u32 2147483648, %v8102_v9  ;;  %v2744_v39 = vadd.f32 0.001143296, %v2743_v51 }
 0x27c   : > { %v2607_v8 = vmul.f32 %v2606_v34, %v2582_v58  ;;  %v2636_v20 = vmul.f32 %v5921_v16, %v2635_v28  ;;  %v2671_v43 = vmul.f32 %v2670_v24, %v8020_v52  ;;  %v2706_v35 = vadd.f32 0.014752088, %v2705_v14 }
 0x27d   : > { %v2774_v13 = vmul.f32 %v2773_v42, %v8107_v6  ;;  %v8144_v41 = vmul.f32 0.70710677, %v8134_v10  ;;  %v2745_v32 = vmul.f32 %v2744_v39, %v8064_v36  ;;  %v2783_v47 = vmul.f32 3.8918573e-05, %v8107_v6 }
 0x27e   : > { %v2637_v30 = vadd.f32 %v5921_v16, %v2636_v20  ;;  %vm2638_vm7 = vweird.f32 %v8102_v9  ;;  %v8151_v57 = vadd.f32 1.0, %v2671_v43  ;;  %v2707_v58 = vmul.f32 %v2706_v35, %v8050_v22  ;;  %v8174_v43 = vpop.f32.mrf.mxu1 }
 0x27f   : > { %v8154_v7 = vmin.f32 %v2810_v3, 16.0  ;;  %vm2640_vm8 = vmor %vm2638_vm7, %vm2639_vm6  ;;  %v2645_v48 = vor.u32 1.1754944e-38, %v2644_v33  ;;  %v2746_v37 = vadd.f32 0.014752088, %v2745_v32  ;;  %v2784_v15 = vadd.f32 0.001143296, %v2783_v47 }
 0x280   : > { %v5625_v38 = vclamps-f32 %v2607_v8, 1.0  ;;  %v2641_v61 = vsel %vm2640_vm8, %v5921_v16, %v2637_v30  ;;  %vm2643_vm9 = vcmp.eq.f32.partialorder %v2642_v29, 8.507059e+37  ;;  %5922 = vrcp.f32 %v8151_v57 }
 0x281   : > { %v2659_v63 = vadd.f32 0.18741608, %v2658_v60  ;;  %v2698_v2 = vmul.f32 %v2697_v0, %v8050_v22  ;;  %v2737_v9 = vadd.f32 0.05243302, %v2736_v59  ;;  %v2646_v4 = vsel %vm2643_vm9, %v2645_v48, %v2641_v61 }
 0x282   : > { %v2194_v54 = vmul.f32 0.5, %v7799_v62  ;;  %v2647_v5 = vmul.f32 %v2646_v4, %v2622_v1  ;;  %v2708_v17 = vadd.f32 0.112945676, %v2707_v58  ;;  %v2747_v26 = vmul.f32 %v2746_v37, %v8064_v36 }
 0x283   : > { %v2775_v51 = vadd.f32 0.0036580483, %v2774_v13  ;;  %v2812_v19 = vmul.f32 2.1237322e-06, %v8154_v7  ;;  %v2850_v16 = vmul.f32 %v8144_v41, %v8144_v41  ;;  %v2785_v11 = vmul.f32 %v2784_v15, %v8107_v6 }
 0x284   : > { %v5626_v50 = vclamps-f32 %v2647_v5, 1.0  ;;  %v3538_v60 = vadd.f32 1.0, %v5625_v38  ;;  %v2709_v0 = vmul.f32 %v2708_v17, %v8050_v22  ;;  %v2748_v59 = vadd.f32 0.112945676, %v2747_v26 }
 0x285   : > { %v2195_v42 = vmul.f32 0.5, %v7922_v45  ;;  %v2660_v62 = vmul.f32 %v2659_v63, %v8020_v52  ;;  %v2699_v1 = vadd.f32 0.18741608, %v2698_v2  ;;  %v2738_v34 = vmul.f32 %v2737_v9, %v8064_v36 }
 0x286   : > { %v5923_v3 = vpop.eup %5922  ;;  %v3539_v28 = vadd.f32 1.0, %v5626_v50  ;;  %v2710_v24 = vadd.f32 0.4994258, %v2709_v0  ;;  %v2749_v14 = vmul.f32 %v2748_v59, %v8064_v36  ;;  %v2786_v29 = vadd.f32 0.014752088, %v2785_v11 }
 0x287   : > { %v2776_v33 = vmul.f32 %v2775_v51, %v8107_v6  ;;  %v2813_v39 = vadd.f32 0.00028619796, %v2812_v19  ;;  %v8171_v8 = vmin.f32 %v2850_v16, 16.0  ;;  %v2674_v20 = vmul.f32 %v5923_v3, %v8151_v57 }
 0x288   : > { %v3570_v45 = vmul.f32 %v3538_v60, %v2194_v54  ;;  %v3571_v52 = vmul.f32 %v3539_v28, %v2195_v42  ;;  %v2711_v35 = vmul.f32 %v2710_v24, %v8050_v22  ;;  %v2750_v13 = vadd.f32 0.4994258, %v2749_v14 }
 0x289   : > { %v2661_v32 = vadd.f32 1.1283791, %v2660_v62  ;;  %v8179_v47 = vadd.f32 %v8069_v27, %v8089_v18  ;;  %v2675_v30 = vsub.f32 1.0, %v2674_v20  ;;  %v2700_v58 = vmul.f32 %v2699_v1, %v8050_v22  ;;  %v8209_v62 = vpop.f32.mrf.mxu1 }
 0x28a   : > { %v3598_v48 = vpack.c.bf16 %v3571_v52, %v3570_v45  ;;  %v8182_v37 = vadd.f32 1.0, %v2711_v35  ;;  %v2787_v15 = vmul.f32 %v2786_v29, %v8107_v6  ;;  %v2739_v38 = vadd.f32 0.18741608, %v2738_v34 }
 0x28b   : > { %v2777_v61 = vadd.f32 0.05243302, %v2776_v33  ;;  %v2676_v63 = vmul.f32 %v5923_v3, %v2675_v30  ;;  %v2751_v2 = vmul.f32 %v2750_v13, %v8064_v36  ;;  %v2814_v9 = vmul.f32 %v2813_v39, %v8154_v7 }
 0x28c   : > { %v2852_v4 = vmul.f32 2.1237322e-06, %v8171_v8  ;;  %3706 = vmatmul.bf16.gmra.mxu2 %v3598_v48  ;;  %5924 = vrcp.f32 %v8182_v37  ;;  %v2823_v18 = vmul.f32 3.8918573e-05, %v8154_v7  ;;  %v8191_v22 = vmul.f32 0.70710677, %v8179_v47 }
 0x28d   : > { %v2677_v54 = vadd.f32 %v5923_v3, %v2676_v63  ;;  %vm2679_vm0 = vweird.f32 %v5923_v3  ;;  %v8193_v5 = vadd.f32 1.0, %v2751_v2  ;;  %v2701_v17 = vadd.f32 1.1283791, %v2700_v58 }
 0x28e   : > { %v2684_v26 = vand.u32 2147483648, %v8151_v57  ;;  %v2788_v51 = vadd.f32 0.112945676, %v2787_v15  ;;  %v2740_v19 = vmul.f32 %v2739_v38, %v8064_v36  ;;  %vm2678_vm10 = vweird.f32 %v8151_v57 }
 0x28f   : > { %v2682_v16 = vand.u32 2147483647, %v8151_v57  ;;  %5926 = vrcp.f32 %v8193_v5  ;;  %v2853_v11 = vadd.f32 0.00028619796, %v2852_v4  ;;  %vm8200_vm11 = vmor %vm2678_vm10, %vm2679_vm0  ;;  %v2824_v60 = vadd.f32 0.001143296, %v2823_v18 }
 0x290   : > { %v2778_v0 = vmul.f32 %v2777_v61, %v8107_v6  ;;  %v2815_v59 = vadd.f32 0.0036580483, %v2814_v9  ;;  %v2890_v42 = vmul.f32 %v8191_v22, %v8191_v22  ;;  %v2681_v36 = vsel %vm8200_vm11, %v5923_v3, %v2677_v54 }
 0x291   : > { %v8212_v1 = vmul.f32 0.5, %v7976_v40  ;;  %v2662_v34 = vmul.f32 %v2661_v32, %v7996_v46  ;;  %v2685_v28 = vor.u32 1.1754944e-38, %v2684_v26  ;;  %v2789_v24 = vmul.f32 %v2788_v51, %v8107_v6 }
 0x292   : > { %v5925_v57 = vpop.eup %5924  ;;  %v2702_v14 = vmul.f32 %v2701_v17, %v8023_v12  ;;  %v2741_v29 = vadd.f32 1.1283791, %v2740_v19  ;;  %vm2683_vm12 = vcmp.eq.f32.partialorder %v2682_v16, 8.507059e+37  ;;  %v2854_v39 = vmul.f32 %v2853_v11, %v8171_v8  ;;  %v8237_v16 = vpop.f32.mrf.mxu1 }
 0x293   : > { %v2714_v33 = vmul.f32 %v5925_v57, %v8182_v37  ;;  %v2686_v3 = vsel %vm2683_vm12, %v2685_v28, %v2681_v36  ;;  %v2790_v20 = vadd.f32 0.4994258, %v2789_v24  ;;  %v2825_v45 = vmul.f32 %v2824_v60, %v8154_v7 }
 0x294   : > { %v2779_v40 = vadd.f32 0.18741608, %v2778_v0  ;;  %v2816_v35 = vmul.f32 %v2815_v59, %v8154_v7  ;;  %v8221_v46 = vmin.f32 %v2890_v42, 16.0  ;;  %v2722_v32 = vand.u32 2147483647, %v8182_v37 }
 0x295   : > { %v5927_v52 = vpop.eup %5926  ;;  %v2715_v13 = vsub.f32 1.0, %v2714_v33  ;;  %v2724_v12 = vand.u32 2147483648, %v8182_v37  ;;  %v2791_v58 = vmul.f32 %v2790_v20, %v8107_v6  ;;  %v2687_v48 = vmul.f32 %v2686_v3, %v2662_v34 }
 0x296   : > { %v2754_v30 = vmul.f32 %v5927_v52, %v8193_v5  ;;  %vm2719_vm13 = vweird.f32 %v5925_v57  ;;  %v2863_v38 = vmul.f32 3.8918573e-05, %v8171_v8  ;;  %v2855_v61 = vadd.f32 0.0036580483, %v2854_v39 }
 0x297   : > { %v2716_v15 = vmul.f32 %v5925_v57, %v2715_v13  ;;  %v8228_v2 = vadd.f32 1.0, %v2791_v58  ;;  %v2826_v9 = vadd.f32 0.014752088, %v2825_v45  ;;  %v2892_v4 = vmul.f32 2.1237322e-06, %v8221_v46 }
 0x298   : > { %v2755_v63 = vsub.f32 1.0, %v2754_v30  ;;  %v8233_v18 = vadd.f32 %v8069_v27, %v8117_v31  ;;  %vm2718_vm14 = vweird.f32 %v8182_v37  ;;  %vm2723_vm1 = vcmp.eq.f32.partialorder %v2722_v32, 8.507059e+37 }
 0x299   : > { %v2717_v54 = vadd.f32 %v5925_v57, %v2716_v15  ;;  %vm2720_vm15 = vmor %vm2718_vm14, %vm2719_vm13  ;;  %v2725_v17 = vor.u32 1.1754944e-38, %v2724_v12  ;;  %5928 = vrcp.f32 %v8228_v2  ;;  %v5627_v51 = vclamps-f32 %v2687_v48, 1.0 }
 0x29a   : > { %v2756_v26 = vmul.f32 %v5927_v52, %v2755_v63  ;;  %vm2759_vm2 = vweird.f32 %v5927_v52  ;;  %v2864_v11 = vadd.f32 0.001143296, %v2863_v38  ;;  %v2764_v31 = vand.u32 2147483648, %v8193_v5 }
 0x29b   : > { %v2721_v19 = vsel %vm2720_vm15, %v5925_v57, %v2717_v54  ;;  %v2827_v0 = vmul.f32 %v2826_v9, %v8154_v7  ;;  %v2780_v37 = vmul.f32 %v2779_v40, %v8107_v6  ;;  %vm2758_vm3 = vweird.f32 %v8193_v5 }
 0x29c   : > { %v2726_v50 = vsel %vm2723_vm1, %v2725_v17, %v2721_v19  ;;  %v2757_v60 = vadd.f32 %v5927_v52, %v2756_v26  ;;  %v2762_v42 = vand.u32 2147483647, %v8193_v5  ;;  %v2197_v36 = vmul.f32 0.5, %v8011_v44  ;;  %vm8247_vm4 = vmor %vm2758_vm3, %vm2759_vm2  ;;  %v8267_v17 = vpop.f32.mrf.mxu1 }
 0x29d   : > { %v2727_v59 = vmul.f32 %v2726_v50, %v2702_v14  ;;  %v2817_v57 = vadd.f32 0.05243302, %v2816_v35  ;;  %v2856_v34 = vmul.f32 %v2855_v61, %v8171_v8  ;;  %v2893_v28 = vadd.f32 0.00028619796, %v2892_v4 }
 0x29e   : > { %v3540_v39 = vadd.f32 1.0, %v5627_v51  ;;  %v2761_v6 = vsel %vm8247_vm4, %v5927_v52, %v2757_v60  ;;  %v2865_v14 = vmul.f32 %v2864_v11, %v8171_v8  ;;  %v2742_v5 = vmul.f32 %v2741_v29, %v8043_v56 }
 0x29f   : > { %v5628_v33 = vclamps-f32 %v2727_v59, 1.0  ;;  %v5929_v3 = vpop.eup %5928  ;;  %v8256_v44 = vmul.f32 0.70710677, %v8233_v18  ;;  %v2765_v20 = vor.u32 1.1754944e-38, %v2764_v31  ;;  %v2828_v45 = vadd.f32 0.112945676, %v2827_v0 }
 0x2a0   : > { %v2781_v40 = vadd.f32 1.1283791, %v2780_v37  ;;  %vm2763_vm5 = vcmp.eq.f32.partialorder %v2762_v42, 8.507059e+37  ;;  %v2794_v13 = vmul.f32 %v5929_v3, %v8228_v2  ;;  %v2818_v32 = vmul.f32 %v2817_v57, %v8154_v7 }
 0x2a1   : > { %v3541_v35 = vadd.f32 1.0, %v5628_v33  ;;  %v2857_v12 = vadd.f32 0.05243302, %v2856_v34  ;;  %v2894_v52 = vmul.f32 %v2893_v28, %v8221_v46  ;;  %v2766_v30 = vsel %vm2763_vm5, %v2765_v20, %v2761_v6 }
 0x2a2   : > { %v3572_v58 = vmul.f32 %v3540_v39, %v8212_v1  ;;  %v2795_v56 = vsub.f32 1.0, %v2794_v13  ;;  %v2866_v29 = vadd.f32 0.014752088, %v2865_v14  ;;  %v2930_v15 = vmul.f32 %v8256_v44, %v8256_v44 }
 0x2a3   : > { %v3573_v48 = vmul.f32 %v3541_v35, %v2197_v36  ;;  %v2802_v38 = vand.u32 2147483647, %v8228_v2  ;;  %v2804_v61 = vand.u32 2147483648, %v8228_v2  ;;  %v2829_v63 = vmul.f32 %v2828_v45, %v8154_v7 }
 0x2a4   : > { %v2767_v4 = vmul.f32 %v2766_v30, %v2742_v5  ;;  %v2796_v54 = vmul.f32 %v5929_v3, %v2795_v56  ;;  %vm2799_vm6 = vweird.f32 %v5929_v3  ;;  %v2782_v1 = vmul.f32 %v2781_v40, %v8087_v49  ;;  %v8295_v30 = vpop.f32.mrf.mxu1 }
 0x2a5   : > { %v3599_v9 = vpack.c.bf16 %v3573_v48, %v3572_v58  ;;  %v2858_v26 = vmul.f32 %v2857_v12, %v8171_v8  ;;  %v2895_v51 = vadd.f32 0.0036580483, %v2894_v52  ;;  %v2830_v19 = vadd.f32 0.4994258, %v2829_v63 }
 0x2a6   : > { %v2797_v11 = vadd.f32 %v5929_v3, %v2796_v54  ;;  %vm2798_vm7 = vweird.f32 %v8228_v2  ;;  %v2867_v50 = vmul.f32 %v2866_v29, %v8171_v8  ;;  %v2903_v60 = vmul.f32 3.8918573e-05, %v8221_v46 }
 0x2a7   : > { %3711 = vmatmul.bf16.gmra.mxu2 %v3599_v9  ;;  %v8274_v31 = vmin.f32 %v2930_v15, 16.0  ;;  %vm2800_vm8 = vmor %vm2798_vm7, %vm2799_vm6  ;;  %vm2803_vm9 = vcmp.eq.f32.partialorder %v2802_v38, 8.507059e+37  ;;  %v2805_v0 = vor.u32 1.1754944e-38, %v2804_v61  ;;  %v2831_v37 = vmul.f32 %v2830_v19, %v8154_v7 }
 0x2a8   : > { %v5629_v49 = vclamps-f32 %v2767_v4, 1.0  ;;  %v2801_v59 = vsel %vm2800_vm8, %v5929_v3, %v2797_v11  ;;  %v2868_v42 = vadd.f32 0.112945676, %v2867_v50  ;;  %v2904_v36 = vadd.f32 0.001143296, %v2903_v60 }
 0x2a9   : > { %v2819_v57 = vadd.f32 0.18741608, %v2818_v32  ;;  %v2806_v34 = vsel %vm2803_vm9, %v2805_v0, %v2801_v59  ;;  %v8277_v28 = vadd.f32 1.0, %v2831_v37  ;;  %v8281_v2 = vadd.f32 %v8069_v27, %v8146_v53 }
 0x2aa   : > { %v2807_v24 = vmul.f32 %v2806_v34, %v2782_v1  ;;  %v2869_v33 = vmul.f32 %v2868_v42, %v8171_v8  ;;  %v2905_v39 = vmul.f32 %v2904_v36, %v8221_v46  ;;  %v2932_v6 = vmul.f32 2.1237322e-06, %v8274_v31 }
 0x2ab   : > { %5930 = vrcp.f32 %v8277_v28  ;;  %v2859_v14 = vadd.f32 0.18741608, %v2858_v26  ;;  %v2896_v3 = vmul.f32 %v2895_v51, %v8221_v46  ;;  %v3542_v20 = vadd.f32 1.0, %v5629_v49 }
 0x2ac   : > { %v5630_v5 = vclamps-f32 %v2807_v24, 1.0  ;;  %v2820_v45 = vmul.f32 %v2819_v57, %v8154_v7  ;;  %v2870_v40 = vadd.f32 0.4994258, %v2869_v33  ;;  %v2906_v35 = vadd.f32 0.014752088, %v2905_v39 }
 0x2ad   : > { %v2943_v53 = vmul.f32 3.8918573e-05, %v8274_v31  ;;  %v2198_v13 = vmul.f32 0.5, %v8031_v21  ;;  %v2199_v32 = vmul.f32 0.5, %v8073_v55  ;;  %v8293_v12 = vmul.f32 0.70710677, %v8281_v2 }
 0x2ae   : > { %v3543_v52 = vadd.f32 1.0, %v5630_v5  ;;  %v2933_v58 = vadd.f32 0.00028619796, %v2932_v6  ;;  %v2871_v48 = vmul.f32 %v2870_v40, %v8171_v8  ;;  %v2860_v56 = vmul.f32 %v2859_v14, %v8171_v8 }
 0x2af   : > { %v2897_v7 = vadd.f32 0.05243302, %v2896_v3  ;;  %v3574_v29 = vmul.f32 %v3542_v20, %v2198_v13  ;;  %v2821_v61 = vadd.f32 1.1283791, %v2820_v45  ;;  %v2907_v21 = vmul.f32 %v2906_v35, %v8221_v46 }
 0x2b0   : > { %v3575_v15 = vmul.f32 %v3543_v52, %v2199_v32  ;;  %v8299_v63 = vadd.f32 1.0, %v2871_v48  ;;  %v2944_v55 = vadd.f32 0.001143296, %v2943_v53  ;;  %v2970_v9 = vmul.f32 %v8293_v12, %v8293_v12 }
 0x2b1   : > { %v5931_v38 = vpop.eup %5930  ;;  %v2934_v1 = vmul.f32 %v2933_v58, %v8274_v31  ;;  %v8308_v8 = vmul.f32 0.5, %v8111_v23  ;;  %v2861_v26 = vadd.f32 1.1283791, %v2860_v56  ;;  %v2898_v51 = vmul.f32 %v2897_v7, %v8221_v46  ;;  %v2166_v23 = vpop.f32.mrf.mxu1 }
 0x2b2   : > { %v3600_v4 = vpack.c.bf16 %v3575_v15, %v3574_v29  ;;  %v2834_v54 = vmul.f32 %v5931_v38, %v8277_v28  ;;  %5932 = vrcp.f32 %v8299_v63  ;;  %v2822_v11 = vmul.f32 %v2821_v61, %v8124_v25 }
 0x2b3   : > { %v2844_v50 = vand.u32 2147483648, %v8277_v28  ;;  %v2908_v60 = vadd.f32 0.112945676, %v2907_v21  ;;  %v2945_v0 = vmul.f32 %v2944_v55, %v8274_v31  ;;  %v8314_v37 = vmin.f32 %v2970_v9, 16.0 }
 0x2b4   : > { %v2835_v19 = vsub.f32 1.0, %v2834_v54  ;;  %vm2839_vm0 = vweird.f32 %v5931_v38  ;;  %v2842_v59 = vand.u32 2147483647, %v8277_v28  ;;  %v2935_v42 = vadd.f32 0.0036580483, %v2934_v1 }
 0x2b5   : > { %v8319_v36 = vadd.f32 %v8069_v27, %v8174_v43  ;;  %v2909_v25 = vmul.f32 %v2908_v60, %v8221_v46  ;;  %v2946_v57 = vadd.f32 0.014752088, %v2945_v0  ;;  %v2862_v34 = vmul.f32 %v2861_v26, %v8144_v41 }
 0x2b6   : > { %v2836_v49 = vmul.f32 %v5931_v38, %v2835_v19  ;;  %v8323_v24 = vadd.f32 0.18741608, %v2898_v51  ;;  %vm2838_vm10 = vweird.f32 %v8277_v28  ;;  %v2845_v6 = vor.u32 1.1754944e-38, %v2844_v50 }
 0x2b7   : > { %3716 = vmatmul.bf16.gmra.mxu2 %v3600_v4  ;;  %vm2840_vm11 = vmor %vm2838_vm10, %vm2839_vm0  ;;  %v8327_v14 = vadd.f32 %v8069_v27, %v2166_v23  ;;  %v2910_v3 = vadd.f32 0.4994258, %v2909_v25  ;;  %v2947_v43 = vmul.f32 %v2946_v57, %v8274_v31  ;;  %v2972_v5 = vmul.f32 2.1237322e-06, %v8314_v37 }
 0x2b8   : > { %v2837_v33 = vadd.f32 %v5931_v38, %v2836_v49  ;;  %v5933_v39 = vpop.eup %5932  ;;  %vm2843_vm12 = vcmp.eq.f32.partialorder %v2842_v59, 8.507059e+37  ;;  %v2936_v45 = vmul.f32 %v2935_v42, %v8274_v31  ;;  %v8334_v40 = vmul.f32 0.70710677, %v8319_v36 }
 0x2b9   : > { %v2874_v41 = vmul.f32 %v5933_v39, %v8299_v63  ;;  %v2911_v35 = vmul.f32 %v2910_v3, %v8221_v46  ;;  %v8339_v53 = vadd.f32 %v8069_v27, %v8209_v62  ;;  %v8343_v13 = vadd.f32 %v8069_v27, %v8237_v16 }
 0x2ba   : > { %v2841_v20 = vsel %vm2840_vm11, %v5931_v38, %v2837_v33  ;;  %v2948_v52 = vadd.f32 0.112945676, %v2947_v43  ;;  %v2882_v58 = vand.u32 2147483647, %v8299_v63  ;;  %v2884_v48 = vand.u32 2147483648, %v8299_v63 }
 0x2bb   : > { %v2846_v28 = vsel %vm2843_vm12, %v2845_v6, %v2841_v20  ;;  %v2875_v32 = vsub.f32 1.0, %v2874_v41  ;;  %v8348_v56 = vmul.f32 0.70710677, %v8327_v14  ;;  %v8350_v7 = vadd.f32 1.0, %v2911_v35 }
 0x2bc   : > { %v2847_v29 = vmul.f32 %v2846_v28, %v2822_v11  ;;  %vm2879_vm13 = vweird.f32 %v5933_v39  ;;  %v2949_v62 = vmul.f32 %v2948_v52, %v8274_v31  ;;  %v2937_v38 = vadd.f32 0.05243302, %v2936_v45 }
 0x2bd   : > { %v2876_v15 = vmul.f32 %v5933_v39, %v2875_v32  ;;  %v2973_v61 = vadd.f32 0.00028619796, %v2972_v5  ;;  %5934 = vrcp.f32 %v8350_v7  ;;  %v2983_v16 = vmul.f32 3.8918573e-05, %v8314_v37 }
 0x2be   : > { %v3010_v21 = vmul.f32 %v8334_v40, %v8334_v40  ;;  %v8358_v55 = vmul.f32 0.70710677, %v8339_v53  ;;  %vm2878_vm14 = vweird.f32 %v8299_v63  ;;  %v8362_v4 = vmul.f32 0.70710677, %v8343_v13 }
 0x2bf   : > { %v2877_v9 = vadd.f32 %v5933_v39, %v2876_v15  ;;  %v8366_v54 = vadd.f32 %v8069_v27, %v8267_v17  ;;  %vm2880_vm15 = vmor %vm2878_vm14, %vm2879_vm13  ;;  %v2885_v1 = vor.u32 1.1754944e-38, %v2884_v48  ;;  %v3210_v26 = vmul.f32 %v8348_v56, %v8348_v56 }
 0x2c0   : > { %v5631_v51 = vclamps-f32 %v2847_v29, 1.0  ;;  %vm2883_vm1 = vcmp.eq.f32.partialorder %v2882_v58, 8.507059e+37  ;;  %v2950_v11 = vadd.f32 0.4994258, %v2949_v62  ;;  %v2938_v50 = vmul.f32 %v2937_v38, %v8274_v31 }
 0x2c1   : > { %v2881_v19 = vsel %vm2880_vm15, %v5933_v39, %v2877_v9  ;;  %v2974_v63 = vmul.f32 %v2973_v61, %v8314_v37  ;;  %v2984_v0 = vadd.f32 0.001143296, %v2983_v16  ;;  %v2201_v49 = vmul.f32 0.5, %v8134_v10 }
 0x2c2   : > { %v2886_v60 = vsel %vm2883_vm1, %v2885_v1, %v2881_v19  ;;  %v8373_v59 = vmin.f32 %v3010_v21, 16.0  ;;  %v2951_v23 = vmul.f32 %v2950_v11, %v8274_v31  ;;  %v3050_v25 = vmul.f32 %v8358_v55, %v8358_v55 }
 0x2c3   : > { %v2887_v17 = vmul.f32 %v2886_v60, %v2862_v34  ;;  %v5935_v42 = vpop.eup %5934  ;;  %v3090_v57 = vmul.f32 %v8362_v4, %v8362_v4  ;;  %v8381_v33 = vmul.f32 0.70710677, %v8366_v54  ;;  %v8383_v39 = vmin.f32 %v3210_v26, 16.0 }
 0x2c4   : > { %v3544_v3 = vadd.f32 1.0, %v5631_v51  ;;  %v2914_v10 = vmul.f32 %v5935_v42, %v8350_v7  ;;  %v8386_v43 = vadd.f32 1.0, %v2951_v23  ;;  %v2900_v34 = vmul.f32 %v8323_v24, %v8221_v46 }
 0x2c5   : > { %v5632_v6 = vclamps-f32 %v2887_v17, 1.0  ;;  %v2939_v5 = vadd.f32 0.18741608, %v2938_v50  ;;  %v2975_v20 = vadd.f32 0.0036580483, %v2974_v63  ;;  %v2985_v41 = vmul.f32 %v2984_v0, %v8314_v37 }
 0x2c6   : > { %v3012_v45 = vmul.f32 2.1237322e-06, %v8373_v59  ;;  %v2915_v35 = vsub.f32 1.0, %v2914_v10  ;;  %5936 = vrcp.f32 %v8386_v43  ;;  %v8393_v32 = vmin.f32 %v3050_v25, 16.0 }
 0x2c7   : > { %v3545_v28 = vadd.f32 1.0, %v5632_v6  ;;  %v8395_v52 = vmin.f32 %v3090_v57, 16.0  ;;  %v3130_v58 = vmul.f32 %v8381_v33, %v8381_v33  ;;  %v3223_v48 = vmul.f32 3.8918573e-05, %v8383_v39 }
 0x2c8   : > { %v3576_v46 = vmul.f32 %v3544_v3, %v8308_v8  ;;  %v2916_v29 = vmul.f32 %v5935_v42, %v2915_v35  ;;  %vm2919_vm2 = vweird.f32 %v5935_v42  ;;  %v2976_v15 = vmul.f32 %v2975_v20, %v8314_v37 }
 0x2c9   : > { %v3577_v24 = vmul.f32 %v3545_v28, %v2201_v49  ;;  %v8404_v62 = vadd.f32 %v8069_v27, %v8295_v30  ;;  %v2924_v38 = vand.u32 2147483648, %v8350_v7  ;;  %v2986_v61 = vadd.f32 0.014752088, %v2985_v41 }
 0x2ca   : > { %v2917_v21 = vadd.f32 %v5935_v42, %v2916_v29  ;;  %vm2918_vm3 = vweird.f32 %v8350_v7  ;;  %v2922_v9 = vand.u32 2147483647, %v8350_v7  ;;  %v2901_v1 = vadd.f32 1.1283791, %v2900_v34 }
 0x2cb   : > { %v3601_v16 = vpack.c.bf16 %v3577_v24, %v3576_v46  ;;  %v2940_v8 = vmul.f32 %v2939_v5, %v8274_v31  ;;  %v3052_v26 = vmul.f32 2.1237322e-06, %v8393_v32  ;;  %v8411_v51 = vmin.f32 %v3130_v58, 16.0  ;;  %vm8413_vm4 = vmor %vm2918_vm3, %vm2919_vm2 }
 0x2cc   : > { %v5937_v30 = vpop.eup %5936  ;;  %v3013_v11 = vadd.f32 0.00028619796, %v3012_v45  ;;  %v3092_v50 = vmul.f32 2.1237322e-06, %v8395_v52  ;;  %v3224_v63 = vadd.f32 0.001143296, %v3223_v48  ;;  %v2921_v7 = vsel %vm8413_vm4, %v5935_v42, %v2917_v21 }
 0x2cd   : > { %3721 = vmatmul.bf16.gmra.mxu2 %v3601_v16  ;;  %v8421_v60 = vmul.f32 0.70710677, %v8404_v62  ;;  %v2925_v31 = vor.u32 1.1754944e-38, %v2924_v38  ;;  %v2954_v0 = vmul.f32 %v5937_v30, %v8386_v43  ;;  %v2987_v49 = vmul.f32 %v2986_v61, %v8314_v37  ;;  %v2168_v38 = vpop.f32.mrf.mxu1 }
 0x2ce   : > { %v2977_v17 = vadd.f32 0.05243302, %v2976_v15  ;;  %vm2923_vm5 = vcmp.eq.f32.partialorder %v2922_v9, 8.507059e+37  ;;  %v3053_v23 = vadd.f32 0.00028619796, %v3052_v26  ;;  %v2902_v3 = vmul.f32 %v2901_v1, %v8191_v22 }
 0x2cf   : > { %v3132_v25 = vmul.f32 2.1237322e-06, %v8411_v51  ;;  %v2926_v57 = vsel %vm2923_vm5, %v2925_v31, %v2921_v7  ;;  %v2955_v6 = vsub.f32 1.0, %v2954_v0  ;;  %v2941_v10 = vadd.f32 1.1283791, %v2940_v8 }
 0x2d0   : > { %v3014_v42 = vmul.f32 %v3013_v11, %v8373_v59  ;;  %v3225_v34 = vmul.f32 %v3224_v63, %v8383_v39  ;;  %v3093_v5 = vadd.f32 0.00028619796, %v3092_v50  ;;  %v3170_v20 = vmul.f32 %v8421_v60, %v8421_v60 }
 0x2d1   : > { %v2964_v41 = vand.u32 2147483648, %v8386_v43  ;;  %v2988_v45 = vadd.f32 0.112945676, %v2987_v49  ;;  %v2927_v28 = vmul.f32 %v2926_v57, %v2902_v3  ;;  %v2956_v35 = vmul.f32 %v5937_v30, %v2955_v6  ;;  %v3687_v57 = vpop.f32.mrf.mxu2 }
 0x2d2   : > { %vm2959_vm6 = vweird.f32 %v5937_v30  ;;  %v2962_v58 = vand.u32 2147483647, %v8386_v43  ;;  %v2978_v48 = vmul.f32 %v2977_v17, %v8314_v37  ;;  %v3054_v22 = vmul.f32 %v3053_v23, %v8393_v32 }
 0x2d3   : > { %v3133_v46 = vadd.f32 0.00028619796, %v3132_v25  ;;  %v2942_v24 = vmul.f32 %v2941_v10, %v8256_v44  ;;  %v3226_v29 = vadd.f32 0.014752088, %v3225_v34  ;;  %v2957_v15 = vadd.f32 %v5937_v30, %v2956_v35 }
 0x2d4   : > { %vm2958_vm7 = vweird.f32 %v8386_v43  ;;  %v3015_v61 = vadd.f32 0.0036580483, %v3014_v42  ;;  %v3094_v16 = vmul.f32 %v3093_v5, %v8395_v52  ;;  %v2965_v21 = vor.u32 1.1754944e-38, %v2964_v41  ;;  %v8458_v5 = vld [vmem:[%s10523_s6] ss:$0 sm:$0xff] }
 0x2d5   : > { %vm2960_vm8 = vmor %vm2958_vm7, %vm2959_vm6  ;;  %v2989_v9 = vmul.f32 %v2988_v45, %v8314_v37  ;;  %v8439_v1 = vmin.f32 %v3170_v20, 16.0  ;;  %v5633_v8 = vclamps-f32 %v2927_v28, 1.0  ;;  %vm2963_vm9 = vcmp.eq.f32.partialorder %v2962_v58, 8.507059e+37 }
 0x2d6   : > { %v2961_v26 = vsel %vm2960_vm8, %v5937_v30, %v2957_v15  ;;  %v3055_v19 = vadd.f32 0.0036580483, %v3054_v22  ;;  %v3134_v44 = vmul.f32 %v3133_v46, %v8411_v51  ;;  %v8443_v50 = vadd.f32 %v8069_v27, %v2168_v38 }
 0x2d7   : > { %v2966_v11 = vsel %vm2963_vm9, %v2965_v21, %v2961_v26  ;;  %v2202_v43 = vmul.f32 0.5, %v8179_v47  ;;  %v3227_v63 = vmul.f32 %v3226_v29, %v8383_v39  ;;  %v3095_v31 = vadd.f32 0.0036580483, %v3094_v16  ;;  %v2171_v29 = vpop.f32.mrf.mxu1 }
 0x2d8   : > { %v2967_v7 = vmul.f32 %v2966_v11, %v2942_v24  ;;  %v3212_v0 = vmul.f32 2.1237322e-06, %v8383_v39  ;;  %v2990_v49 = vadd.f32 0.4994258, %v2989_v9  ;;  %v3016_v17 = vmul.f32 %v3015_v61, %v8373_v59 }
 0x2d9   : > { %v3172_v30 = vmul.f32 2.1237322e-06, %v8439_v1  ;;  %v3546_v25 = vadd.f32 1.0, %v5633_v8  ;;  %v2979_v6 = vadd.f32 0.18741608, %v2978_v48  ;;  %v3056_v27 = vmul.f32 %v3055_v19, %v8393_v32 }
 0x2da   : > { %v5634_v23 = vclamps-f32 %v2967_v7, 1.0  ;;  %v3135_v3 = vadd.f32 0.0036580483, %v3134_v44  ;;  %v8452_v47 = vmul.f32 0.70710677, %v8443_v50  ;;  %v2203_v10 = vmul.f32 0.5, %v8233_v18 }
 0x2db   : > { %v3228_v42 = vadd.f32 0.112945676, %v3227_v63  ;;  %v3096_v20 = vmul.f32 %v3095_v31, %v8395_v52  ;;  %v3213_v41 = vadd.f32 0.00028619796, %v3212_v0  ;;  %v2991_v45 = vmul.f32 %v2990_v49, %v8314_v37  ;;  %v8479_v44 = vld [vmem:[%s10521_s4] ss:$0 sm:$0xff] }
 0x2dc   : > { %v3547_v34 = vadd.f32 1.0, %v5634_v23  ;;  %v3023_v28 = vmul.f32 3.8918573e-05, %v8373_v59  ;;  %v3017_v35 = vadd.f32 0.05243302, %v3016_v17  ;;  %v3578_v48 = vmul.f32 %v3546_v25, %v2202_v43  ;;  %v3689_v17 = vpop.f32.mrf.mxu2 }
 0x2dd   : > { %v3173_v58 = vadd.f32 0.00028619796, %v3172_v30  ;;  %v2980_v18 = vmul.f32 %v2979_v6, %v8314_v37  ;;  %v3057_v46 = vadd.f32 0.05243302, %v3056_v27  ;;  %v3250_v24 = vmul.f32 %v8452_v47, %v8452_v47 }
 0x2de   : > { %v3579_v22 = vmul.f32 %v3547_v34, %v2203_v10  ;;  %v3136_v15 = vmul.f32 %v3135_v3, %v8411_v51  ;;  %v3229_v38 = vmul.f32 %v3228_v42, %v8383_v39  ;;  %v8469_v16 = vadd.f32 %v8458_v5, %v3687_v57 }
 0x2df   : > { %v3097_v21 = vadd.f32 0.05243302, %v3096_v20  ;;  %v3214_v9 = vmul.f32 %v3213_v41, %v8383_v39  ;;  %v8472_v8 = vadd.f32 1.0, %v2991_v45  ;;  %v3024_v26 = vadd.f32 0.001143296, %v3023_v28 }
 0x2e0   : > { %v3602_v61 = vpack.c.bf16 %v3579_v22, %v3578_v48  ;;  %v3018_v37 = vmul.f32 %v3017_v35, %v8373_v59  ;;  %v3174_v19 = vmul.f32 %v3173_v58, %v8439_v1  ;;  %v8482_v11 = vadd.f32 %v8479_v44, %v2171_v29 }
 0x2e1   : > { %v2981_v43 = vadd.f32 1.1283791, %v2980_v18  ;;  %v8484_v63 = vmin.f32 %v3250_v24, 16.0  ;;  %v3058_v7 = vmul.f32 %v3057_v46, %v8393_v32  ;;  %v3137_v31 = vadd.f32 0.05243302, %v3136_v15 }
 0x2e2   : > { %3726 = vmatmul.bf16.gmra.mxu2 %v3602_v61  ;;  %v3230_v0 = vadd.f32 0.4994258, %v3229_v38  ;;  %v8488_v49 = vmul.f32 0.70710677, %v8469_v16  ;;  %v3098_v30 = vmul.f32 %v3097_v21, %v8395_v52  ;;  %v3215_v23 = vadd.f32 0.0036580483, %v3214_v9 }
 0x2e3   : > { %5938 = vrcp.f32 %v8472_v8  ;;  %v3025_v25 = vmul.f32 %v3024_v26, %v8373_v59  ;;  %v3019_v57 = vadd.f32 0.18741608, %v3018_v37  ;;  %v3175_v6 = vadd.f32 0.0036580483, %v3174_v19 }
 0x2e4   : > { %v8494_v27 = vmul.f32 0.70710677, %v8482_v11  ;;  %v8497_v3 = vmul.f32 0.5, %v8281_v2  ;;  %v8500_v10 = vmul.f32 0.5, %v8319_v36  ;;  %v3263_v42 = vmul.f32 3.8918573e-05, %v8484_v63 }
 0x2e5   : > { %v8504_v34 = vadd.f32 %v8458_v5, %v3689_v17  ;;  %v3059_v20 = vadd.f32 0.18741608, %v3058_v7  ;;  %v3138_v41 = vmul.f32 %v3137_v31, %v8411_v51  ;;  %v3231_v45 = vmul.f32 %v3230_v0, %v8383_v39 }
 0x2e6   : > { %v3831_v28 = vmul.f32 %v8488_v49, %v8488_v49  ;;  %v3099_v35 = vadd.f32 0.18741608, %v3098_v30  ;;  %v3216_v2 = vmul.f32 %v3215_v23, %v8383_v39  ;;  %v3026_v58 = vadd.f32 0.014752088, %v3025_v25 }
 0x2e7   : > { %v3063_v36 = vmul.f32 3.8918573e-05, %v8393_v32  ;;  %v8513_v48 = vmul.f32 %v2981_v43, %v8293_v12  ;;  %v3020_v22 = vmul.f32 %v3019_v57, %v8373_v59  ;;  %v3176_v18 = vmul.f32 %v3175_v6, %v8439_v1 }
 0x2e8   : > { %v3290_v46 = vmul.f32 %v8494_v27, %v8494_v27  ;;  %v8522_v29 = vmul.f32 0.5, %v8339_v53  ;;  %v8525_v15 = vmul.f32 0.5, %v8343_v13  ;;  %v3264_v38 = vadd.f32 0.001143296, %v3263_v42 }
 0x2e9   : > { %v8519_v24 = vpop.eup %5938  ;;  %v8528_v61 = vmul.f32 0.70710677, %v8504_v34  ;;  %v3060_v12 = vmul.f32 %v3059_v20, %v8393_v32  ;;  %v3139_v21 = vadd.f32 0.18741608, %v3138_v41  ;;  %v8531_v9 = vadd.f32 1.0, %v3231_v45 }
 0x2ea   : > { %v8533_v26 = vmin.f32 %v3831_v28, 16.0  ;;  %v3100_v37 = vmul.f32 %v3099_v35, %v8395_v52  ;;  %v3217_v19 = vadd.f32 0.05243302, %v3216_v2  ;;  %v3027_v53 = vmul.f32 %v3026_v58, %v8373_v59 }
 0x2eb   : > { %v3064_v43 = vadd.f32 0.001143296, %v3063_v36  ;;  %v3021_v7 = vadd.f32 1.1283791, %v3020_v22  ;;  %v3177_v13 = vadd.f32 0.05243302, %v3176_v18  ;;  %v2994_v0 = vmul.f32 %v8519_v24, %v8472_v8 }
 0x2ec   : > { %v8537_v31 = vmin.f32 %v3290_v46, 16.0  ;;  %v3265_v17 = vmul.f32 %v3264_v38, %v8484_v63  ;;  %v3871_v30 = vmul.f32 %v8528_v61, %v8528_v61  ;;  %v3028_v23 = vadd.f32 0.112945676, %v3027_v53 }
 0x2ed   : > { %v3065_v25 = vmul.f32 %v3064_v43, %v8393_v32  ;;  %v3061_v57 = vadd.f32 1.1283791, %v3060_v12  ;;  %v3140_v6 = vmul.f32 %v3139_v21, %v8411_v51  ;;  %5940 = vrcp.f32 %v8531_v9 }
 0x2ee   : > { %v3833_v42 = vmul.f32 2.1237322e-06, %v8533_v26  ;;  %v3101_v20 = vadd.f32 1.1283791, %v3100_v37  ;;  %v3218_v41 = vmul.f32 %v3217_v19, %v8383_v39  ;;  %v3029_v45 = vmul.f32 %v3028_v23, %v8373_v59 }
 0x2ef   : > { %v3066_v28 = vadd.f32 0.014752088, %v3065_v25  ;;  %v8551_v35 = vmul.f32 0.5, %v8366_v54  ;;  %v3252_v2 = vmul.f32 2.1237322e-06, %v8484_v63  ;;  %v2995_v36 = vsub.f32 1.0, %v2994_v0  ;;  %v2173_v0 = vpop.f32.mrf.mxu1 }
 0x2f0   : > { %v3303_v58 = vmul.f32 3.8918573e-05, %v8537_v31  ;;  %v3178_v22 = vmul.f32 %v3177_v13, %v8439_v1  ;;  %v3266_v18 = vadd.f32 0.014752088, %v3265_v17  ;;  %v8556_v46 = vmin.f32 %v3871_v30, 16.0 }
 0x2f1   : > { %10611 = vst [vmem:[#allocation5_spill] sm:$0xff] %v8551_v35  ;;  %v3030_v38 = vadd.f32 0.4994258, %v3029_v45  ;;  %v8559_v12 = vmul.f32 %v3021_v7, %v8334_v40  ;;  %v8562_v21 = vmul.f32 %v3061_v57, %v8358_v55  ;;  %v3141_v37 = vadd.f32 1.1283791, %v3140_v6 }
 0x2f2   : > { %v3834_v54 = vadd.f32 0.00028619796, %v3833_v42  ;;  %v8565_v19 = vmul.f32 0.5, %v8404_v62  ;;  %v3219_v53 = vadd.f32 0.18741608, %v3218_v41  ;;  %v3067_v13 = vmul.f32 %v3066_v28, %v8393_v32 }
 0x2f3   : > { %v3031_v43 = vmul.f32 %v3030_v38, %v8373_v59  ;;  %v8569_v17 = vpop.eup %5940  ;;  %v8572_v30 = vmul.f32 %v3101_v20, %v8362_v4  ;;  %v3253_v40 = vadd.f32 0.00028619796, %v3252_v2  ;;  %v3304_v7 = vadd.f32 0.001143296, %v3303_v58 }
 0x2f4   : > { %10612 = vst [vmem:[#allocation6_spill] sm:$0xff] %v8565_v19  ;;  %v2996_v55 = vmul.f32 %v8519_v24, %v2995_v36  ;;  %v3179_v23 = vadd.f32 0.18741608, %v3178_v22  ;;  %v3267_v25 = vmul.f32 %v3266_v18, %v8484_v63  ;;  %v3873_v62 = vmul.f32 2.1237322e-06, %v8556_v46 }
 0x2f5   : > { %v8577_v57 = vadd.f32 1.0, %v3031_v43  ;;  %v8580_v59 = vmul.f32 %v3141_v37, %v8381_v33  ;;  %v8583_v6 = vmul.f32 0.5, %v8327_v14  ;;  %v3835_v4 = vmul.f32 %v3834_v54, %v8533_v26 }
 0x2f6   : > { %v8587_v42 = vadd.f32 %v8479_v44, %v2173_v0  ;;  %v3220_v20 = vmul.f32 %v3219_v53, %v8383_v39  ;;  %v3234_v41 = vmul.f32 %v8569_v17, %v8531_v9  ;;  %v3068_v45 = vadd.f32 0.112945676, %v3067_v13 }
 0x2f7   : > { %10613 = vst [vmem:[#allocation12_spill] sm:$0xff] %v8580_v59  ;;  %5942 = vrcp.f32 %v8577_v57  ;;  %v3254_v28 = vmul.f32 %v3253_v40, %v8484_v63  ;;  %v3305_v33 = vmul.f32 %v3304_v7, %v8537_v31  ;;  %v2997_v14 = vadd.f32 %v8519_v24, %v2996_v55 }
 0x2f8   : > { %vm2999_vm0 = vweird.f32 %v8519_v24  ;;  %v8598_v2 = vmul.f32 %v3179_v23, %v8439_v1  ;;  %v3268_v58 = vadd.f32 0.112945676, %v3267_v25  ;;  %v3874_v36 = vadd.f32 0.00028619796, %v3873_v62 }
 0x2f9   : > { %v3004_v39 = vand.u32 2147483648, %v8472_v8  ;;  %v3836_v22 = vadd.f32 0.0036580483, %v3835_v4  ;;  %vm2998_vm10 = vweird.f32 %v8472_v8  ;;  %v3002_v18 = vand.u32 2147483647, %v8472_v8 }
 0x2fa   : > { %v8604_v38 = vmul.f32 0.70710677, %v8587_v42  ;;  %v8606_v37 = vadd.f32 1.1283791, %v3220_v20  ;;  %v3235_v54 = vsub.f32 1.0, %v3234_v41  ;;  %vm8608_vm11 = vmor %vm2998_vm10, %vm2999_vm0  ;;  %v3069_v43 = vmul.f32 %v3068_v45, %v8393_v32 }
 0x2fb   : > { %v3103_v0 = vmul.f32 3.8918573e-05, %v8395_v52  ;;  %v3255_v13 = vadd.f32 0.0036580483, %v3254_v28  ;;  %v3306_v40 = vadd.f32 0.014752088, %v3305_v33  ;;  %v3001_v8 = vsel %vm8608_vm11, %v8519_v24, %v2997_v14 }
 0x2fc   : > { %v3330_v7 = vmul.f32 %v8604_v38, %v8604_v38  ;;  %v3269_v23 = vmul.f32 %v3268_v58, %v8484_v63  ;;  %v3875_v25 = vmul.f32 %v3874_v36, %v8556_v46  ;;  %v3005_v62 = vor.u32 1.1754944e-38, %v3004_v39 }
 0x2fd   : > { %v5943_v55 = vpop.eup %5942  ;;  %v3070_v4 = vadd.f32 0.4994258, %v3069_v43  ;;  %vm3239_vm12 = vweird.f32 %v8569_v17  ;;  %v3837_v20 = vmul.f32 %v3836_v22, %v8533_v26  ;;  %vm3003_vm13 = vcmp.eq.f32.partialorder %v3002_v18, 8.507059e+37 }
 0x2fe   : > { %v3034_v41 = vmul.f32 %v5943_v55, %v8577_v57  ;;  %v3236_v45 = vmul.f32 %v8569_v17, %v3235_v54  ;;  %vm3238_vm14 = vweird.f32 %v8531_v9  ;;  %v3006_v24 = vsel %vm3003_vm13, %v3005_v62, %v3001_v8 }
 0x2ff   : > { %v8626_v28 = vmin.f32 %v3330_v7, 16.0  ;;  %v3104_v33 = vadd.f32 0.001143296, %v3103_v0  ;;  %v3256_v14 = vmul.f32 %v3255_v13, %v8484_v63  ;;  %v3292_v58 = vmul.f32 2.1237322e-06, %v8537_v31  ;;  %vm8650_vm4 = vmor %vm3238_vm14, %vm3239_vm12 }
 0x300   : > { %v3307_v36 = vmul.f32 %v3306_v40, %v8537_v31  ;;  %v3035_v39 = vsub.f32 1.0, %v3034_v41  ;;  %v3270_v53 = vadd.f32 0.4994258, %v3269_v23  ;;  %v3876_v22 = vadd.f32 0.0036580483, %v3875_v25  ;;  %v2176_v41 = vpop.f32.mrf.mxu1 }
 0x301   : > { %v3044_v18 = vand.u32 2147483648, %v8577_v57  ;;  %v3071_v43 = vmul.f32 %v3070_v4, %v8393_v32  ;;  %v3007_v54 = vmul.f32 %v3006_v24, %v8513_v48  ;;  %vm3039_vm15 = vweird.f32 %v5943_v55  ;;  %v3692_v24 = vpop.f32.mrf.mxu2 }
 0x302   : > { %v3036_v19 = vmul.f32 %v5943_v55, %v3035_v39  ;;  %v3042_v8 = vand.u32 2147483647, %v8577_v57  ;;  %v3237_v0 = vadd.f32 %v8569_v17, %v3236_v45  ;;  %v3838_v13 = vadd.f32 0.05243302, %v3837_v20 }
 0x303   : > { %v3343_v7 = vmul.f32 3.8918573e-05, %v8626_v28  ;;  %v3105_v40 = vmul.f32 %v3104_v33, %v8395_v52  ;;  %v3293_v62 = vadd.f32 0.00028619796, %v3292_v58  ;;  %v3308_v23 = vadd.f32 0.112945676, %v3307_v36 }
 0x304   : > { %v3037_v25 = vadd.f32 %v5943_v55, %v3036_v19  ;;  %vm3038_vm1 = vweird.f32 %v8577_v57  ;;  %v3257_v32 = vadd.f32 0.05243302, %v3256_v14  ;;  %v3877_v48 = vmul.f32 %v3876_v22, %v8556_v46 }
 0x305   : > { %vm3040_vm2 = vmor %vm3038_vm1, %vm3039_vm15  ;;  %v3045_v4 = vor.u32 1.1754944e-38, %v3044_v18  ;;  %v8640_v39 = vadd.f32 1.0, %v3071_v43  ;;  %v3271_v20 = vmul.f32 %v3270_v53, %v8484_v63  ;;  %v5635_v45 = vclamps-f32 %v3007_v54, 1.0 }
 0x306   : > { %v3041_v35 = vsel %vm3040_vm2, %v5943_v55, %v3037_v25  ;;  %vm3043_vm3 = vcmp.eq.f32.partialorder %v3042_v8, 8.507059e+37  ;;  %v3344_v58 = vadd.f32 0.001143296, %v3343_v7  ;;  %v8644_v19 = vadd.f32 %v8479_v44, %v2176_v41 }
 0x307   : > { %v3046_v33 = vsel %vm3043_vm3, %v3045_v4, %v3041_v35  ;;  %v3106_v57 = vadd.f32 0.014752088, %v3105_v40  ;;  %v3244_v36 = vand.u32 2147483648, %v8531_v9  ;;  %v3294_v53 = vmul.f32 %v3293_v62, %v8537_v31 }
 0x308   : > { %v3309_v55 = vmul.f32 %v3308_v23, %v8537_v31  ;;  %v3047_v35 = vmul.f32 %v3046_v33, %v8559_v12  ;;  %v3241_v22 = vsel %vm8650_vm4, %v8569_v17, %v3237_v0  ;;  %v3242_v18 = vand.u32 2147483647, %v8531_v9 }
 0x309   : > { %v3839_v43 = vmul.f32 %v3838_v13, %v8533_v26  ;;  %5944 = vrcp.f32 %v8640_v39  ;;  %v3258_v54 = vmul.f32 %v3257_v32, %v8484_v63  ;;  %v3878_v8 = vadd.f32 0.05243302, %v3877_v48  ;;  %v3694_v14 = vpop.f32.mrf.mxu2 }
 0x30a   : > { %v5636_v7 = vclamps-f32 %v3047_v35, 1.0  ;;  %v3548_v40 = vadd.f32 1.0, %v5635_v45  ;;  %v8665_v62 = vadd.f32 1.0, %v3271_v20  ;;  %v3345_v23 = vmul.f32 %v3344_v58, %v8626_v28 }
 0x30b   : > { %v8669_v12 = vmul.f32 0.70710677, %v8644_v19  ;;  %v3107_v17 = vmul.f32 %v3106_v57, %v8395_v52  ;;  %v3245_v0 = vor.u32 1.1754944e-38, %v3244_v36  ;;  %v3295_v9 = vadd.f32 0.0036580483, %v3294_v53 }
 0x30c   : > { %v3310_v25 = vadd.f32 0.4994258, %v3309_v55  ;;  %v3549_v13 = vadd.f32 1.0, %v5636_v7  ;;  %v3222_v41 = vmul.f32 %v8606_v37, %v8348_v56  ;;  %vm3243_vm5 = vcmp.eq.f32.partialorder %v3242_v18, 8.507059e+37 }
 0x30d   : > { %v3840_v32 = vadd.f32 0.18741608, %v3839_v43  ;;  %v8675_v48 = vadd.f32 %v8458_v5, %v3692_v24  ;;  %v3246_v4 = vsel %vm3243_vm5, %v3245_v0, %v3241_v22  ;;  %v3259_v20 = vadd.f32 0.18741608, %v3258_v54 }
 0x30e   : > { %v3580_v45 = vmul.f32 %v3548_v40, %v8497_v3  ;;  %v3581_v33 = vmul.f32 %v3549_v13, %v8500_v10  ;;  %5946 = vrcp.f32 %v8665_v62  ;;  %v3346_v57 = vadd.f32 0.014752088, %v3345_v23 }
 0x30f   : > { %v8679_v58 = vpop.eup %5944  ;;  %v3370_v56 = vmul.f32 %v8669_v12, %v8669_v12  ;;  %v3108_v37 = vadd.f32 0.112945676, %v3107_v17  ;;  %v3879_v36 = vmul.f32 %v3878_v8, %v8556_v46  ;;  %v3296_v24 = vmul.f32 %v3295_v9, %v8537_v31 }
 0x310   : > { %v3311_v53 = vmul.f32 %v3310_v25, %v8537_v31  ;;  %v3603_v55 = vpack.c.bf16 %v3581_v33, %v3580_v45  ;;  %v3181_v3 = vadd.f32 1.1283791, %v8598_v2  ;;  %v8689_v10 = vmul.f32 0.5, %v8469_v16 }
 0x311   : > { %v3841_v35 = vmul.f32 %v3840_v32, %v8533_v26  ;;  %v8693_v22 = vmul.f32 0.70710677, %v8675_v48  ;;  %v3247_v18 = vmul.f32 %v3246_v4, %v3222_v41  ;;  %v3260_v43 = vmul.f32 %v3259_v20, %v8484_v63 }
 0x312   : > { %10618 = vst [vmem:[#allocation13_spill] sm:$0xff] %v8689_v10  ;;  %3731 = vmatmul.bf16.gmra.mxu2 %v3603_v55  ;;  %v8697_v54 = vadd.f32 %v8458_v5, %v3694_v14  ;;  %v3074_v8 = vmul.f32 %v8679_v58, %v8640_v39  ;;  %v8702_v2 = vmul.f32 0.5, %v8443_v50  ;;  %v3347_v16 = vmul.f32 %v3346_v57, %v8626_v28 }
 0x313   : > { %v8705_v7 = vmin.f32 %v3370_v56, 16.0  ;;  %v3109_v40 = vmul.f32 %v3108_v37, %v8395_v52  ;;  %v8709_v23 = vmul.f32 0.5, %v8504_v34  ;;  %v3880_v63 = vadd.f32 0.18741608, %v3879_v36 }
 0x314   : > { %v3297_v17 = vadd.f32 0.05243302, %v3296_v24  ;;  %v8711_v0 = vadd.f32 1.0, %v3311_v53  ;;  %v8713_v9 = vpop.eup %5946  ;;  %v3842_v25 = vadd.f32 1.1283791, %v3841_v35  ;;  %v8716_v13 = vmul.f32 0.5, %v8482_v11 }
 0x315   : > { %10619 = vst [vmem:[#allocation9_spill] sm:$0xff] %v8709_v23  ;;  %v3911_v50 = vmul.f32 %v8693_v22, %v8693_v22  ;;  %v3143_v41 = vmul.f32 3.8918573e-05, %v8411_v51  ;;  %v5641_v32 = vclamps-f32 %v3247_v18, 1.0  ;;  %v3261_v4 = vadd.f32 1.1283791, %v3260_v43 }
 0x316   : > { %v8722_v34 = vmul.f32 0.70710677, %v8697_v54  ;;  %v3075_v20 = vsub.f32 1.0, %v3074_v8  ;;  %v8725_v45 = vmul.f32 %v3181_v3, %v8421_v60  ;;  %v3348_v33 = vadd.f32 0.112945676, %v3347_v16 }
 0x317   : > { %v3383_v57 = vmul.f32 3.8918573e-05, %v8705_v7  ;;  %v3110_v14 = vadd.f32 0.4994258, %v3109_v40  ;;  %v3274_v11 = vmul.f32 %v8713_v9, %v8665_v62  ;;  %v3881_v56 = vmul.f32 %v3880_v63, %v8556_v46 }
 0x318   : > { %10620 = vst [vmem:[#allocation11_spill] sm:$0xff] %v8725_v45  ;;  %v3298_v37 = vmul.f32 %v3297_v17, %v8537_v31  ;;  %5948 = vrcp.f32 %v8711_v0  ;;  %v3284_v36 = vand.u32 2147483648, %v8665_v62  ;;  %v8734_v24 = vmin.f32 %v3911_v50, 16.0 }
 0x319   : > { %v3111_v60 = vmul.f32 %v3110_v14, %v8395_v52  ;;  %v3144_v53 = vadd.f32 0.001143296, %v3143_v41  ;;  %v8737_v55 = vadd.f32 1.0, %v5641_v32  ;;  %v8740_v3 = vmul.f32 %v3842_v25, %v8488_v49  ;;  %v5791_v52 = vld [vmem:[%s10524_s7 + $0x38] sm:$0xff]  ;;  %v2178_v32 = vpop.f32.mrf.mxu1 }
 0x31a   : > { %v3951_v35 = vmul.f32 %v8722_v34, %v8722_v34  ;;  %v3076_v18 = vmul.f32 %v8679_v58, %v3075_v20  ;;  %v3282_v43 = vand.u32 2147483647, %v8665_v62  ;;  %v3349_v8 = vmul.f32 %v3348_v33, %v8626_v28  ;;  %5259 = vmatpush.bf16.msra.mxu3 %v5791_v52 }
 0x31b   : > { %10621 = vst [vmem:[#allocation7_spill] sm:$0xff] %v8740_v3  ;;  %v3384_v16 = vadd.f32 0.001143296, %v3383_v57  ;;  %v8747_v40 = vadd.f32 1.0, %v3111_v60  ;;  %v8753_v63 = vmul.f32 %v3261_v4, %v8452_v47  ;;  %v3275_v49 = vsub.f32 1.0, %v3274_v11 }
 0x31c   : > { %v8755_v17 = vadd.f32 1.1283791, %v3881_v56  ;;  %v3299_v25 = vadd.f32 0.18741608, %v3298_v37  ;;  %v8757_v50 = vor.u32 1.1754944e-38, %v3284_v36  ;;  %v3145_v20 = vmul.f32 %v3144_v53, %v8411_v51  ;;  %v5790_v36 = vld [vmem:[%s10524_s7 + $0x30] sm:$0xff] }
 0x31d   : > { %v3913_v41 = vmul.f32 2.1237322e-06, %v8734_v24  ;;  %5950 = vrcp.f32 %v8747_v40  ;;  %v3332_v57 = vmul.f32 2.1237322e-06, %v8626_v28  ;;  %v8765_v47 = vmin.f32 %v3951_v35, 16.0 }
 0x31e   : > { %v8762_v33 = vpop.eup %5948  ;;  %v3077_v4 = vadd.f32 %v8679_v58, %v3076_v18  ;;  %vm3079_vm6 = vweird.f32 %v8679_v58  ;;  %vm3278_vm7 = vweird.f32 %v8665_v62  ;;  %v3350_v14 = vadd.f32 0.4994258, %v3349_v8  ;;  %5260 = vmatpush.bf16.msra.mxu3 %v5790_v36 }
 0x31f   : > { %v3385_v11 = vmul.f32 %v3384_v16, %v8705_v7  ;;  %v3084_v56 = vand.u32 2147483648, %v8640_v39  ;;  %v8773_v37 = vadd.f32 %v8479_v44, %v2178_v32  ;;  %v3276_v60 = vmul.f32 %v8713_v9, %v3275_v49 }
 0x320   : > { %v3300_v53 = vmul.f32 %v3299_v25, %v8537_v31  ;;  %vm3078_vm8 = vweird.f32 %v8640_v39  ;;  %v3082_v35 = vand.u32 2147483647, %v8640_v39  ;;  %vm3279_vm9 = vweird.f32 %v8713_v9 }
 0x321   : > { %10622 = vst [vmem:[#allocation8_spill] sm:$0xff] %v8773_v37  ;;  %v3314_v18 = vmul.f32 %v8762_v33, %v8711_v0  ;;  %v3914_v8 = vadd.f32 0.00028619796, %v3913_v41  ;;  %vm8785_vm0 = vmor %vm3078_vm8, %vm3079_vm6  ;;  %v3146_v52 = vadd.f32 0.014752088, %v3145_v20  ;;  %v3351_v23 = vmul.f32 %v3350_v14, %v8626_v28  ;;  %v5789_v20 = vld [vmem:[%s10524_s7 + $0x28] sm:$0xff] }
 0x322   : > { %v3333_v32 = vadd.f32 0.00028619796, %v3332_v57  ;;  %v3953_v49 = vmul.f32 2.1237322e-06, %v8765_v47  ;;  %v3372_v31 = vmul.f32 2.1237322e-06, %v8705_v7  ;;  %v3081_v39 = vsel %vm8785_vm0, %v8679_v58, %v3077_v4  ;;  %5261 = vmatpush.bf16.msra.mxu3 %v5789_v20  ;;  %vm8822_vm12 = vmor %vm3278_vm7, %vm3279_vm9 }
 0x323   : > { %v5951_v25 = vpop.eup %5950  ;;  %v3386_v10 = vadd.f32 0.014752088, %v3385_v11  ;;  %v3085_v41 = vor.u32 1.1754944e-38, %v3084_v56  ;;  %v8796_v3 = vmul.f32 0.70710677, %v8773_v37  ;;  %v3277_v57 = vadd.f32 %v8713_v9, %v3276_v60 }
 0x324   : > { %v8802_v36 = vadd.f32 1.1283791, %v3300_v53  ;;  %vm3083_vm10 = vcmp.eq.f32.partialorder %v3082_v35, 8.507059e+37  ;;  %v3114_v16 = vmul.f32 %v5951_v25, %v8747_v40  ;;  %vm8805_vm11 = vcmp.eq.f32.partialorder %v3282_v43, 8.507059e+37 }
 0x325   : > { %v3315_v4 = vsub.f32 1.0, %v3314_v18  ;;  %v3915_v14 = vmul.f32 %v3914_v8, %v8734_v24  ;;  %v3086_v11 = vsel %vm3083_vm10, %v3085_v41, %v3081_v39  ;;  %v3147_v56 = vmul.f32 %v3146_v52, %v8411_v51 }
 0x326   : > { %v3334_v37 = vmul.f32 %v3333_v32, %v8626_v28  ;;  %v3954_v45 = vadd.f32 0.00028619796, %v3953_v49  ;;  %v3373_v60 = vadd.f32 0.00028619796, %v3372_v31  ;;  %v3115_v53 = vsub.f32 1.0, %v3114_v16 }
 0x327   : > { %v8812_v59 = vadd.f32 1.0, %v3351_v23  ;;  %v3387_v35 = vmul.f32 %v3386_v10, %v8705_v7  ;;  %v3124_v43 = vand.u32 2147483648, %v8747_v40  ;;  %v3410_v18 = vmul.f32 %v8796_v3, %v8796_v3 }
 0x328   : > { %v3087_v52 = vmul.f32 %v3086_v11, %v8562_v21  ;;  %v3116_v32 = vmul.f32 %v5951_v25, %v3115_v53  ;;  %vm3119_vm13 = vweird.f32 %v5951_v25  ;;  %v3122_v23 = vand.u32 2147483647, %v8747_v40 }
 0x329   : > { %v3281_v10 = vsel %vm8822_vm12, %v8713_v9, %v3277_v57  ;;  %v3316_v49 = vmul.f32 %v8762_v33, %v3315_v4  ;;  %v3916_v31 = vadd.f32 0.0036580483, %v3915_v14  ;;  %v3148_v39 = vadd.f32 0.112945676, %v3147_v56 }
 0x32a   : > { %v3335_v41 = vadd.f32 0.0036580483, %v3334_v37  ;;  %v3955_v62 = vmul.f32 %v3954_v45, %v8765_v47  ;;  %v3117_v20 = vadd.f32 %v5951_v25, %v3116_v32  ;;  %vm3118_vm14 = vweird.f32 %v8747_v40 }
 0x32b   : > { %5952 = vrcp.f32 %v8812_v59  ;;  %v3374_v21 = vmul.f32 %v3373_v60, %v8705_v7  ;;  %vm3120_vm15 = vmor %vm3118_vm14, %vm3119_vm13  ;;  %v3125_v16 = vor.u32 1.1754944e-38, %v3124_v43  ;;  %v8836_v11 = vmin.f32 %v3410_v18, 16.0  ;;  %v3697_v18 = vpop.f32.mrf.mxu2 }
 0x32c   : > { %v3388_v53 = vadd.f32 0.112945676, %v3387_v35  ;;  %v5637_v9 = vclamps-f32 %v3087_v52, 1.0  ;;  %v3121_v57 = vsel %vm3120_vm15, %v5951_v25, %v3117_v20  ;;  %vm3123_vm1 = vcmp.eq.f32.partialorder %v3122_v23, 8.507059e+37 }
 0x32d   : > { %v3322_v4 = vand.u32 2147483647, %v8711_v0  ;;  %v3324_v37 = vand.u32 2147483648, %v8711_v0  ;;  %v3126_v45 = vsel %vm3123_vm1, %v3125_v16, %v3121_v57  ;;  %v3149_v14 = vmul.f32 %v3148_v39, %v8411_v51 }
 0x32e   : > { %v3286_v40 = vsel %vm8805_vm11, %v8757_v50, %v3281_v10  ;;  %vm3319_vm2 = vweird.f32 %v8762_v33  ;;  %v3956_v56 = vadd.f32 0.0036580483, %v3955_v62  ;;  %v3127_v60 = vmul.f32 %v3126_v45, %v8572_v30 }
 0x32f   : > { %v3317_v35 = vadd.f32 %v8762_v33, %v3316_v49  ;;  %v3917_v25 = vmul.f32 %v3916_v31, %v8734_v24  ;;  %v3336_v43 = vmul.f32 %v3335_v41, %v8626_v28  ;;  %v3423_v8 = vmul.f32 3.8918573e-05, %v8836_v11 }
 0x330   : > { %v3375_v52 = vadd.f32 0.0036580483, %v3374_v21  ;;  %v3389_v32 = vmul.f32 %v3388_v53, %v8705_v7  ;;  %v5638_v23 = vclamps-f32 %v3127_v60, 1.0  ;;  %v3550_v58 = vadd.f32 1.0, %v5637_v9 }
 0x331   : > { %v8851_v50 = vpop.eup %5952  ;;  %v3287_v10 = vmul.f32 %v3286_v40, %v8753_v63  ;;  %vm3318_vm3 = vweird.f32 %v8711_v0  ;;  %vm8855_vm4 = vcmp.eq.f32.partialorder %v3322_v4, 8.507059e+37  ;;  %v3150_v49 = vadd.f32 0.4994258, %v3149_v14  ;;  %v2181_v63 = vpop.f32.mrf.mxu1 }
 0x332   : > { %vm8861_vm5 = vmor %vm3318_vm3, %vm3319_vm2  ;;  %v3325_v39 = vor.u32 1.1754944e-38, %v3324_v37  ;;  %v3957_v41 = vmul.f32 %v3956_v56, %v8765_v47  ;;  %v3551_v62 = vadd.f32 1.0, %v5638_v23  ;;  %v8867_v20 = vadd.f32 %v8458_v5, %v3697_v18 }
 0x333   : > { %v3321_v0 = vsel %vm8861_vm5, %v8762_v33, %v3317_v35  ;;  %v3918_v21 = vadd.f32 0.05243302, %v3917_v25  ;;  %v3337_v16 = vadd.f32 0.05243302, %v3336_v43  ;;  %v3424_v53 = vadd.f32 0.001143296, %v3423_v8 }
 0x334   : > { %v3376_v9 = vmul.f32 %v3375_v52, %v8705_v7  ;;  %v3390_v57 = vadd.f32 0.4994258, %v3389_v32  ;;  %v3582_v4 = vmul.f32 %v3550_v58, %v8522_v29  ;;  %v3583_v37 = vmul.f32 %v3551_v62, %v8525_v15 }
 0x335   : > { %v5642_v45 = vclamps-f32 %v3287_v10, 1.0  ;;  %v3354_v14 = vmul.f32 %v8851_v50, %v8812_v59  ;;  %v8878_v40 = vadd.f32 %v8479_v44, %v2181_v63  ;;  %v3151_v56 = vmul.f32 %v3150_v49, %v8411_v51 }
 0x336   : > { %v3326_v33 = vsel %vm8855_vm4, %v3325_v39, %v3321_v0  ;;  %v3958_v60 = vadd.f32 0.05243302, %v3957_v41  ;;  %v3604_v35 = vpack.c.bf16 %v3583_v37, %v3582_v4  ;;  %v8884_v25 = vmul.f32 0.70710677, %v8867_v20 }
 0x337   : > { %v3302_v29 = vmul.f32 %v8802_v36, %v8494_v27  ;;  %v3919_v15 = vmul.f32 %v3918_v21, %v8734_v24  ;;  %v3425_v43 = vmul.f32 %v3424_v53, %v8836_v11  ;;  %v3183_v18 = vmul.f32 3.8918573e-05, %v8439_v1  ;;  %v3699_v53 = vpop.f32.mrf.mxu2 }
 0x338   : > { %v8893_v51 = vmul.f32 %v8737_v55, %v8583_v6  ;;  %v3338_v8 = vmul.f32 %v3337_v16, %v8626_v28  ;;  %v3377_v52 = vadd.f32 0.05243302, %v3376_v9  ;;  %v3391_v32 = vmul.f32 %v3390_v57, %v8705_v7  ;;  %3736 = vmatmul.bf16.gmra.mxu2 %v3604_v35 }
 0x339   : > { %v3327_v23 = vmul.f32 %v3326_v33, %v3302_v29  ;;  %v3355_v58 = vsub.f32 1.0, %v3354_v14  ;;  %v8898_v27 = vmul.f32 0.70710677, %v8878_v40  ;;  %v8900_v36 = vadd.f32 1.0, %v3151_v56 }
 0x33a   : > { %v3555_v10 = vadd.f32 1.0, %v5642_v45  ;;  %v8903_v30 = vmul.f32 0.5, %v8675_v48  ;;  %v3959_v6 = vmul.f32 %v3958_v60, %v8765_v47  ;;  %v3991_v55 = vmul.f32 %v8884_v25, %v8884_v25 }
 0x33b   : > { %v8910_v49 = vmul.f32 %v8755_v17, %v8528_v61  ;;  %v3920_v31 = vadd.f32 0.18741608, %v3919_v15  ;;  %v3426_v39 = vadd.f32 0.014752088, %v3425_v43  ;;  %v3184_v41 = vadd.f32 0.001143296, %v3183_v18 }
 0x33c   : > { %v8913_v62 = vmul.f32 0.5, %v8587_v42  ;;  %v3339_v63 = vadd.f32 0.18741608, %v3338_v8  ;;  %v3378_v0 = vmul.f32 %v3377_v52, %v8705_v7  ;;  %v8916_v48 = vadd.f32 1.0, %v3391_v32 }
 0x33d   : > { %v5643_v21 = vclamps-f32 %v3327_v23, 1.0  ;;  %v3356_v16 = vmul.f32 %v8851_v50, %v3355_v58  ;;  %v3450_v9 = vmul.f32 %v8898_v27, %v8898_v27  ;;  %5954 = vrcp.f32 %v8900_v36 }
 0x33e   : > { %v8923_v61 = vmul.f32 %v3555_v10, %v8702_v2  ;;  %v8926_v42 = vmul.f32 0.5, %v8697_v54  ;;  %v3960_v17 = vadd.f32 0.18741608, %v3959_v6  ;;  %v8928_v57 = vmin.f32 %v3991_v55, 16.0 }
 0x33f   : > { %v3921_v4 = vmul.f32 %v3920_v31, %v8734_v24  ;;  %v8932_v37 = vmul.f32 0.5, %v8644_v19  ;;  %v3427_v45 = vmul.f32 %v3426_v39, %v8836_v11  ;;  %v3185_v14 = vmul.f32 %v3184_v41, %v8439_v1 }
 0x340   : > { %v3340_v56 = vmul.f32 %v3339_v63, %v8626_v28  ;;  %v3379_v33 = vadd.f32 0.18741608, %v3378_v0  ;;  %5956 = vrcp.f32 %v8916_v48  ;;  %v8939_v54 = vadd.f32 %v8458_v5, %v3699_v53 }
 0x341   : > { %v3556_v2 = vadd.f32 1.0, %v5643_v21  ;;  %v3357_v60 = vadd.f32 %v8851_v50, %v3356_v16  ;;  %vm3359_vm6 = vweird.f32 %v8851_v50  ;;  %v8943_v35 = vmin.f32 %v3450_v9, 16.0 }
 0x342   : > { %v3362_v19 = vand.u32 2147483647, %v8812_v59  ;;  %v3364_v29 = vand.u32 2147483648, %v8812_v59  ;;  %v3961_v15 = vmul.f32 %v3960_v17, %v8765_v47  ;;  %v3993_v28 = vmul.f32 2.1237322e-06, %v8928_v57 }
 0x343   : > { %v8949_v43 = vpop.eup %5954  ;;  %vm3358_vm7 = vweird.f32 %v8812_v59  ;;  %v3428_v5 = vadd.f32 0.112945676, %v3427_v45  ;;  %v3186_v18 = vadd.f32 0.014752088, %v3185_v14  ;;  %v3844_v8 = vmul.f32 3.8918573e-05, %v8533_v26 }
 0x344   : > { %v3922_v52 = vadd.f32 1.1283791, %v3921_v4  ;;  %v3341_v32 = vadd.f32 1.1283791, %v3340_v56  ;;  %vm8953_vm8 = vmor %vm3358_vm7, %vm3359_vm6  ;;  %v3380_v58 = vmul.f32 %v3379_v33, %v8705_v7  ;;  %v8959_v10 = vmul.f32 0.70710677, %v8939_v54 }
 0x345   : > { %v3361_v6 = vsel %vm8953_vm8, %v8851_v50, %v3357_v60  ;;  %v3463_v59 = vmul.f32 3.8918573e-05, %v8943_v35  ;;  %v3187_v55 = vmul.f32 %v3186_v18, %v8439_v1  ;;  %v3845_v31 = vadd.f32 0.001143296, %v3844_v8 }
 0x346   : > { %v8966_v39 = vpop.eup %5956  ;;  %vm3363_vm9 = vcmp.eq.f32.partialorder %v3362_v19, 8.507059e+37  ;;  %v3365_v41 = vor.u32 1.1754944e-38, %v3364_v29  ;;  %v3962_v63 = vadd.f32 1.1283791, %v3961_v15  ;;  %v3154_v7 = vmul.f32 %v8949_v43, %v8900_v36 }
 0x347   : > { %v3994_v0 = vadd.f32 0.00028619796, %v3993_v28  ;;  %v3429_v21 = vmul.f32 %v3428_v5, %v8836_v11  ;;  %v3188_v16 = vadd.f32 0.112945676, %v3187_v55  ;;  %v3846_v53 = vmul.f32 %v3845_v31, %v8533_v26  ;;  %v5788_v28 = vld [vmem:[%s10524_s7 + $0x20] sm:$0xff] }
 0x348   : > { %v3366_v50 = vsel %vm3363_vm9, %v3365_v41, %v3361_v6  ;;  %v3381_v9 = vadd.f32 1.1283791, %v3380_v58  ;;  %v3412_v17 = vmul.f32 2.1237322e-06, %v8836_v11  ;;  %v4031_v4 = vmul.f32 %v8959_v10, %v8959_v10  ;;  %5262 = vmatpush.bf16.msra.mxu3 %v5788_v28 }
 0x349   : > { %v3394_v45 = vmul.f32 %v8966_v39, %v8916_v48  ;;  %v3464_v14 = vadd.f32 0.001143296, %v3463_v59  ;;  %v3189_v56 = vmul.f32 %v3188_v16, %v8439_v1  ;;  %v3847_v33 = vadd.f32 0.014752088, %v3846_v53 }
 0x34a   : > { %v8979_v60 = vmul.f32 %v3556_v2, %v8716_v13  ;;  %v8982_v19 = vmul.f32 %v3922_v52, %v8693_v22  ;;  %v3342_v29 = vmul.f32 %v3341_v32, %v8604_v38  ;;  %v3155_v15 = vsub.f32 1.0, %v3154_v7  ;;  %v5787_v2 = vld [vmem:[%s10524_s7 + $0x18] sm:$0xff]  ;;  %v2183_v52 = vpop.f32.mrf.mxu1 }
 0x34b   : > { %v3995_v5 = vmul.f32 %v3994_v0, %v8928_v57  ;;  %v3430_v18 = vadd.f32 0.4994258, %v3429_v21  ;;  %v3190_v8 = vadd.f32 0.4994258, %v3189_v56  ;;  %v3848_v23 = vmul.f32 %v3847_v33, %v8533_v26 }
 0x34c   : > { %v8990_v58 = vmul.f32 %v3366_v50, %v3342_v29  ;;  %v8993_v13 = vmul.f32 %v3962_v63, %v8722_v34  ;;  %v8996_v22 = vmul.f32 %v3381_v9, %v8669_v12  ;;  %v3413_v38 = vadd.f32 0.00028619796, %v3412_v17  ;;  %5263 = vmatpush.bf16.msra.mxu3 %v5787_v2 }
 0x34d   : > { %v3395_v32 = vsub.f32 1.0, %v3394_v45  ;;  %v9001_v6 = vmin.f32 %v4031_v4, 16.0  ;;  %v3465_v59 = vmul.f32 %v3464_v14, %v8943_v35  ;;  %v3191_v55 = vmul.f32 %v3190_v8, %v8439_v1  ;;  %v5786_v14 = vld [vmem:[%s10524_s7 + $0x10] sm:$0xff] }
 0x34e   : > { %v3402_v34 = vand.u32 2147483647, %v8916_v48  ;;  %v3156_v31 = vmul.f32 %v8949_v43, %v3155_v15  ;;  %v9008_v12 = vadd.f32 %v8479_v44, %v2183_v52  ;;  %v3849_v41 = vadd.f32 0.112945676, %v3848_v23 }
 0x34f   : > { %v3996_v63 = vadd.f32 0.0036580483, %v3995_v5  ;;  %v3431_v7 = vmul.f32 %v3430_v18, %v8836_v11  ;;  %v3452_v0 = vmul.f32 2.1237322e-06, %v8943_v35  ;;  %v9012_v21 = vadd.f32 1.0, %v3191_v55 }
 0x350   : > { %v5644_v16 = vclamps-f32 %v8990_v58, 1.0  ;;  %vm3398_vm0 = vweird.f32 %v8916_v48  ;;  %v3404_v1 = vand.u32 2147483648, %v8916_v48  ;;  %v3414_v53 = vmul.f32 %v3413_v38, %v8836_v11  ;;  %5264 = vmatpush.bf16.msra.mxu3 %v5786_v14  ;;  %v5784_v48 = vld [vmem:[%s10524_s7] sm:$0xff] }
 0x351   : > { %v9019_v44 = vmul.f32 0.70710677, %v9008_v12  ;;  %v3396_v50 = vmul.f32 %v8966_v39, %v3395_v32  ;;  %v4033_v9 = vmul.f32 2.1237322e-06, %v9001_v6  ;;  %v3466_v17 = vadd.f32 0.014752088, %v3465_v59 }
 0x352   : > { %5958 = vrcp.f32 %v9012_v21  ;;  %v3157_v4 = vadd.f32 %v8949_v43, %v3156_v31  ;;  %vm3159_vm10 = vweird.f32 %v8949_v43  ;;  %v3850_v56 = vmul.f32 %v3849_v41, %v8533_v26 }
 0x353   : > { %v3490_v45 = vmul.f32 %v9019_v44, %v9019_v44  ;;  %v3997_v33 = vmul.f32 %v3996_v63, %v8928_v57  ;;  %v9033_v29 = vadd.f32 1.0, %v3431_v7  ;;  %v3453_v15 = vadd.f32 0.00028619796, %v3452_v0  ;;  %v5785_v7 = vld [vmem:[%s10524_s7 + $0x8] sm:$0xff] }
 0x354   : > { %v3164_v28 = vand.u32 2147483648, %v8900_v36  ;;  %vm9036_vm11 = vcmp.eq.f32.partialorder %v3402_v34, 8.507059e+37  ;;  %vm3158_vm12 = vweird.f32 %v8900_v36  ;;  %v3162_v18 = vand.u32 2147483647, %v8900_v36  ;;  %5265 = vmatpush.bf16.msra.mxu3 %v5785_v7 }
 0x355   : > { %v9042_v8 = vmin.f32 %v3490_v45, 16.0  ;;  %v3851_v23 = vadd.f32 0.4994258, %v3850_v56  ;;  %vm3399_vm13 = vweird.f32 %v8966_v39  ;;  %v3415_v38 = vadd.f32 0.0036580483, %v3414_v53  ;;  %vm9048_vm14 = vmor %vm3158_vm12, %vm3159_vm10 }
 0x356   : > { %v3467_v2 = vmul.f32 %v3466_v17, %v8943_v35  ;;  %v3884_v32 = vmul.f32 3.8918573e-05, %v8556_v46  ;;  %v3397_v59 = vadd.f32 %v8966_v39, %v3396_v50  ;;  %v4034_v36 = vadd.f32 0.00028619796, %v4033_v9  ;;  %vm9069_vm1 = vmor %vm3398_vm0, %vm3399_vm13 }
 0x357   : > { %v3161_v55 = vsel %vm9048_vm14, %v8949_v43, %v3157_v4  ;;  %v3503_v34 = vmul.f32 3.8918573e-05, %v9042_v8  ;;  %5960 = vrcp.f32 %v9033_v29  ;;  %v3454_v41 = vmul.f32 %v3453_v15, %v8943_v35 }
 0x358   : > { %v5959_v31 = vpop.eup %5958  ;;  %v3165_v63 = vor.u32 1.1754944e-38, %v3164_v28  ;;  %v3852_v0 = vmul.f32 %v3851_v23, %v8533_v26  ;;  %v3405_v53 = vor.u32 1.1754944e-38, %v3404_v1  ;;  %v3998_v50 = vadd.f32 0.05243302, %v3997_v33  ;;  %5266 = vmatpush.bf16.msra.mxu3 %v5784_v48 }
 0x359   : > { %vm3163_vm15 = vcmp.eq.f32.partialorder %v3162_v18, 8.507059e+37  ;;  %v3194_v9 = vmul.f32 %v5959_v31, %v9012_v21  ;;  %v3468_v17 = vadd.f32 0.112945676, %v3467_v2  ;;  %v3504_v45 = vadd.f32 0.001143296, %v3503_v34  ;;  %v10641_v2 = vld [vmem:[#allocation12_spill] sm:$0xff] }
 0x35a   : > { %v3166_v4 = vsel %vm3163_vm15, %v3165_v63, %v3161_v55  ;;  %v3885_v14 = vadd.f32 0.001143296, %v3884_v32  ;;  %v3401_v26 = vsel %vm9069_vm1, %v8966_v39, %v3397_v59  ;;  %v3416_v1 = vmul.f32 %v3415_v38, %v8836_v11 }
 0x35b   : > { %v4035_v56 = vmul.f32 %v4034_v36, %v9001_v6  ;;  %v3195_v33 = vsub.f32 1.0, %v3194_v9  ;;  %v3455_v15 = vadd.f32 0.0036580483, %v3454_v41  ;;  %v3204_v28 = vand.u32 2147483648, %v9012_v21 }
 0x35c   : > { %v3505_v18 = vmul.f32 %v3504_v45, %v9042_v8  ;;  %v9083_v23 = vadd.f32 1.0, %v3852_v0  ;;  %v3167_v52 = vmul.f32 %v3166_v4, %v10641_v2  ;;  %vm3199_vm2 = vweird.f32 %v5959_v31  ;;  %v10643_v2 = vld [vmem:[#allocation8_spill] sm:$0xff] }
 0x35d   : > { %v3196_v32 = vmul.f32 %v5959_v31, %v3195_v33  ;;  %v3202_v39 = vand.u32 2147483647, %v9012_v21  ;;  %v9087_v38 = vpop.eup %5960  ;;  %v3406_v59 = vsel %vm9036_vm11, %v3405_v53, %v3401_v26  ;;  %v3469_v36 = vmul.f32 %v3468_v17, %v8943_v35 }
 0x35e   : > { %v3506_v55 = vadd.f32 0.014752088, %v3505_v18  ;;  %v3886_v34 = vmul.f32 %v3885_v14, %v8556_v46  ;;  %v3417_v41 = vadd.f32 0.05243302, %v3416_v1  ;;  %v4036_v63 = vadd.f32 0.0036580483, %v4035_v56 }
 0x35f   : > { %v3197_v7 = vadd.f32 %v5959_v31, %v3196_v32  ;;  %vm3198_vm3 = vweird.f32 %v9012_v21  ;;  %v3456_v0 = vmul.f32 %v3455_v15, %v8943_v35  ;;  %v3205_v9 = vor.u32 1.1754944e-38, %v3204_v28  ;;  %v10642_v56 = vld [vmem:[#allocation11_spill] sm:$0xff] }
 0x360   : > { %vm3200_vm4 = vmor %vm3198_vm3, %vm3199_vm2  ;;  %v3507_v43 = vmul.f32 %v3506_v55, %v9042_v8  ;;  %5962 = vrcp.f32 %v9083_v23  ;;  %v3434_v5 = vmul.f32 %v9087_v38, %v9033_v29  ;;  %v5639_v53 = vclamps-f32 %v3167_v52, 1.0 }
 0x361   : > { %v3201_v17 = vsel %vm3200_vm4, %v5959_v31, %v3197_v7  ;;  %vm3203_vm5 = vcmp.eq.f32.partialorder %v3202_v39, 8.507059e+37  ;;  %v3470_v4 = vadd.f32 0.4994258, %v3469_v36  ;;  %v3887_v14 = vadd.f32 0.014752088, %v3886_v34 }
 0x362   : > { %v3206_v45 = vsel %vm3203_vm5, %v3205_v9, %v3201_v17  ;;  %v3924_v26 = vmul.f32 3.8918573e-05, %v8734_v24  ;;  %v3407_v21 = vmul.f32 %v3406_v59, %v8996_v22  ;;  %v3418_v1 = vmul.f32 %v3417_v41, %v8836_v11  ;;  %v10645_v17 = vld [vmem:[#allocation6_spill] sm:$0xff] }
 0x363   : > { %v3207_v33 = vmul.f32 %v3206_v45, %v10642_v56  ;;  %v3508_v48 = vadd.f32 0.112945676, %v3507_v43  ;;  %v3557_v15 = vadd.f32 1.0, %v5644_v16  ;;  %v9106_v28 = vmul.f32 0.5, %v8867_v20  ;;  %v3702_v45 = vpop.f32.mrf.mxu2 }
 0x364   : > { %v4037_v31 = vmul.f32 %v4036_v63, %v9001_v6  ;;  %v3457_v18 = vadd.f32 0.05243302, %v3456_v0  ;;  %v9110_v52 = vmul.f32 0.5, %v10643_v2  ;;  %v3435_v32 = vsub.f32 1.0, %v3434_v5  ;;  %v10644_v5 = vld [vmem:[#allocation5_spill] sm:$0xff] }
 0x365   : > { %v5640_v39 = vclamps-f32 %v3207_v33, 1.0  ;;  %v3552_v22 = vadd.f32 1.0, %v5639_v53  ;;  %v3999_v36 = vmul.f32 %v3998_v50, %v8928_v57  ;;  %v3471_v55 = vmul.f32 %v3470_v4, %v8943_v35  ;;  %v9141_v2 = vld [vmem:[%s10523_s6] ss:$0 sm:$0xff] }
 0x366   : > { %v9112_v59 = vpop.eup %5962  ;;  %v3888_v58 = vmul.f32 %v3887_v14, %v8556_v46  ;;  %v3925_v16 = vadd.f32 0.001143296, %v3924_v26  ;;  %v5645_v20 = vclamps-f32 %v3407_v21, 1.0  ;;  %v3419_v34 = vadd.f32 0.18741608, %v3418_v1 }
 0x367   : > { %v3553_v41 = vadd.f32 1.0, %v5640_v39  ;;  %v3509_v63 = vmul.f32 %v3508_v48, %v9042_v8  ;;  %v9119_v7 = vmul.f32 %v3557_v15, %v8913_v62  ;;  %v9122_v0 = vmul.f32 0.5, %v8939_v54 }
 0x368   : > { %v4038_v9 = vadd.f32 0.05243302, %v4037_v31  ;;  %v3458_v43 = vmul.f32 %v3457_v18, %v8943_v35  ;;  %v3436_v50 = vmul.f32 %v9087_v38, %v3435_v32  ;;  %v3584_v53 = vmul.f32 %v3552_v22, %v10644_v5 }
 0x369   : > { %v3585_v4 = vmul.f32 %v3553_v41, %v10645_v17  ;;  %v3855_v14 = vmul.f32 %v9112_v59, %v9083_v23  ;;  %v9130_v26 = vadd.f32 0.18741608, %v3999_v36  ;;  %v9132_v62 = vadd.f32 1.0, %v3471_v55 }
 0x36a   : > { %v3889_v21 = vadd.f32 0.112945676, %v3888_v58  ;;  %v3926_v54 = vmul.f32 %v3925_v16, %v8734_v24  ;;  %v3558_v1 = vadd.f32 1.0, %v5645_v20  ;;  %v3420_v56 = vmul.f32 %v3419_v34, %v8836_v11 }
 0x36b   : > { %v3605_v33 = vpack.c.bf16 %v3585_v4, %v3584_v53  ;;  %v3510_v48 = vadd.f32 0.4994258, %v3509_v63  ;;  %v3444_v15 = vand.u32 2147483648, %v9033_v29  ;;  %v4039_v31 = vmul.f32 %v4038_v9, %v9001_v6 }
 0x36c   : > { %v3459_v18 = vadd.f32 0.18741608, %v3458_v43  ;;  %v9144_v32 = vadd.f32 %v9141_v2, %v3702_v45  ;;  %v3437_v39 = vadd.f32 %v9087_v38, %v3436_v50  ;;  %vm3439_vm6 = vweird.f32 %v9087_v38 }
 0x36d   : > { %3741 = vmatmul.bf16.gmra.mxu2 %v3605_v33  ;;  %v3856_v11 = vsub.f32 1.0, %v3855_v14  ;;  %v3964_v22 = vmul.f32 3.8918573e-05, %v8765_v47  ;;  %5964 = vrcp.f32 %v9132_v62  ;;  %v3492_v36 = vmul.f32 2.1237322e-06, %v9042_v8 }
 0x36e   : > { %v3890_v55 = vmul.f32 %v3889_v21, %v8556_v46  ;;  %v3927_v58 = vadd.f32 0.014752088, %v3926_v54  ;;  %v3421_v16 = vadd.f32 1.1283791, %v3420_v56  ;;  %vm3438_vm7 = vweird.f32 %v9033_v29 }
 0x36f   : > { %v3442_v20 = vand.u32 2147483647, %v9033_v29  ;;  %v3511_v34 = vmul.f32 %v3510_v48, %v9042_v8  ;;  %v9156_v41 = vmul.f32 %v3558_v1, %v8932_v37  ;;  %vm9158_vm8 = vmor %vm3438_vm7, %vm3439_vm6  ;;  %v9163_v9 = vmul.f32 0.70710677, %v9144_v32 }
 0x370   : > { %v3891_v43 = vadd.f32 0.4994258, %v3890_v55  ;;  %v3928_v50 = vmul.f32 %v3927_v58, %v8734_v24  ;;  %v3441_v5 = vsel %vm9158_vm8, %v9087_v38, %v3437_v39  ;;  %v3445_v29 = vor.u32 1.1754944e-38, %v3444_v15 }
 0x371   : > { %v3857_v53 = vmul.f32 %v9112_v59, %v3856_v11  ;;  %v3965_v17 = vadd.f32 0.001143296, %v3964_v22  ;;  %v3460_v37 = vmul.f32 %v3459_v18, %v8943_v35  ;;  %v3493_v4 = vadd.f32 0.00028619796, %v3492_v36  ;;  %v3704_v22 = vpop.f32.mrf.mxu2 }
 0x372   : > { %v3892_v45 = vmul.f32 %v3891_v43, %v8556_v46  ;;  %v3929_v14 = vadd.f32 0.112945676, %v3928_v50  ;;  %v3422_v21 = vmul.f32 %v3421_v16, %v8796_v3  ;;  %vm3443_vm9 = vcmp.eq.f32.partialorder %v3442_v20, 8.507059e+37 }
 0x373   : > { %v9173_v54 = vadd.f32 0.18741608, %v4039_v31  ;;  %v9175_v1 = vadd.f32 1.0, %v3511_v34  ;;  %v9177_v56 = vpop.eup %5964  ;;  %v3446_v38 = vsel %vm3443_vm9, %v3445_v29, %v3441_v5  ;;  %v4071_v33 = vmul.f32 %v9163_v9, %v9163_v9 }
 0x374   : > { %vm3860_vm0 = vweird.f32 %v9112_v59  ;;  %v9182_v35 = vadd.f32 1.0, %v3892_v45  ;;  %v3858_v46 = vadd.f32 %v9112_v59, %v3857_v53  ;;  %v3930_v48 = vmul.f32 %v3929_v14, %v8734_v24 }
 0x375   : > { %v3966_v3 = vmul.f32 %v3965_v17, %v8765_v47  ;;  %v4004_v15 = vmul.f32 3.8918573e-05, %v8928_v57  ;;  %v3461_v31 = vadd.f32 1.1283791, %v3460_v37  ;;  %v3494_v18 = vmul.f32 %v3493_v4, %v9042_v8 }
 0x376   : > { %v3865_v39 = vand.u32 2147483648, %v9083_v23  ;;  %5966 = vrcp.f32 %v9182_v35  ;;  %v3474_v11 = vmul.f32 %v9177_v56, %v9132_v62  ;;  %vm3859_vm10 = vweird.f32 %v9083_v23 }
 0x377   : > { %5968 = vrcp.f32 %v9175_v1  ;;  %v3863_v36 = vand.u32 2147483647, %v9083_v23  ;;  %v3447_v55 = vmul.f32 %v3446_v38, %v3422_v21  ;;  %v3484_v58 = vand.u32 2147483648, %v9132_v62  ;;  %vm9201_vm11 = vmor %vm3859_vm10, %vm3860_vm0 }
 0x378   : > { %v9197_v16 = vmin.f32 %v4071_v33, 16.0  ;;  %v3931_v34 = vadd.f32 0.4994258, %v3930_v48  ;;  %v3606_v63 = vpack.c.bf16 %v8923_v61, %v8893_v51  ;;  %v3862_v43 = vsel %vm9201_vm11, %v9112_v59, %v3858_v46 }
 0x379   : > { %v3967_v23 = vadd.f32 0.014752088, %v3966_v3  ;;  %v4005_v50 = vadd.f32 0.001143296, %v4004_v15  ;;  %v3495_v5 = vadd.f32 0.0036580483, %v3494_v18  ;;  %v9211_v29 = vadd.f32 %v9141_v2, %v3704_v22 }
 0x37a   : > { %v3866_v53 = vor.u32 1.1754944e-38, %v3865_v39  ;;  %v3932_v17 = vmul.f32 %v3931_v34, %v8734_v24  ;;  %v3475_v37 = vsub.f32 1.0, %v3474_v11  ;;  %vm3864_vm12 = vcmp.eq.f32.partialorder %v3863_v36, 8.507059e+37  ;;  %v10650_v18 = vld [vmem:[#allocation7_spill] sm:$0xff] }
 0x37b   : > { %v3968_v4 = vmul.f32 %v3967_v23, %v8765_v47  ;;  %v4006_v45 = vmul.f32 %v4005_v50, %v8928_v57  ;;  %v5646_v61 = vclamps-f32 %v3447_v55, 1.0  ;;  %v9217_v14 = vmul.f32 %v3461_v31, %v8898_v27 }
 0x37c   : > { %v5967_v51 = vpop.eup %5966  ;;  %v3482_v59 = vand.u32 2147483647, %v9132_v62  ;;  %v3867_v21 = vsel %vm3864_vm12, %v3866_v53, %v3862_v43  ;;  %vm3478_vm13 = vweird.f32 %v9132_v62  ;;  %vm3479_vm14 = vweird.f32 %v9177_v56 }
 0x37d   : > { %v9220_v38 = vpop.eup %5968  ;;  %v9224_v24 = vor.u32 1.1754944e-38, %v3484_v58  ;;  %v4073_v33 = vmul.f32 2.1237322e-06, %v9197_v16  ;;  %3746 = vmatmul.bf16.gmra.mxu2 %v3606_v63  ;;  %v3895_v46 = vmul.f32 %v5967_v51, %v9182_v35  ;;  %v3496_v48 = vmul.f32 %v3495_v5, %v9042_v8  ;;  %vm9259_vm4 = vmor %vm3478_vm13, %vm3479_vm14 }
 0x37e   : > { %v9230_v27 = vmul.f32 0.70710677, %v9211_v29  ;;  %v9232_v3 = vadd.f32 1.0, %v3932_v17  ;;  %v3969_v15 = vadd.f32 0.112945676, %v3968_v4  ;;  %v3476_v31 = vmul.f32 %v9177_v56, %v3475_v37 }
 0x37f   : > { %v3868_v39 = vmul.f32 %v3867_v21, %v10650_v18  ;;  %v3896_v11 = vsub.f32 1.0, %v3895_v46  ;;  %v4007_v22 = vadd.f32 0.014752088, %v4006_v45  ;;  %v3559_v36 = vadd.f32 1.0, %v5646_v61 }
 0x380   : > { %v3514_v55 = vmul.f32 %v9220_v38, %v9175_v1  ;;  %v3905_v58 = vand.u32 2147483648, %v9182_v35  ;;  %5970 = vrcp.f32 %v9232_v3  ;;  %v4074_v20 = vadd.f32 0.00028619796, %v4073_v33 }
 0x381   : > { %v3897_v34 = vmul.f32 %v5967_v51, %v3896_v11  ;;  %vm3900_vm15 = vweird.f32 %v5967_v51  ;;  %v3903_v63 = vand.u32 2147483647, %v9182_v35  ;;  %v3497_v43 = vadd.f32 0.05243302, %v3496_v48  ;;  %v3707_v48 = vpop.f32.mrf.mxu2 }
 0x382   : > { %v4111_v23 = vmul.f32 %v9230_v27, %v9230_v27  ;;  %v3970_v50 = vmul.f32 %v3969_v15, %v8765_v47  ;;  %v4008_v5 = vmul.f32 %v4007_v22, %v8928_v57  ;;  %v9246_v53 = vadd.f32 %v9177_v56, %v3476_v31 }
 0x383   : > { %v5681_v17 = vclamps-f32 %v3868_v39, 1.0  ;;  %v3898_v37 = vadd.f32 %v5967_v51, %v3897_v34  ;;  %vm3899_vm1 = vweird.f32 %v9182_v35  ;;  %v3515_v4 = vsub.f32 1.0, %v3514_v55 }
 0x384   : > { %vm3901_vm2 = vmor %vm3899_vm1, %vm3900_vm15  ;;  %v3906_v45 = vor.u32 1.1754944e-38, %v3905_v58  ;;  %v3971_v61 = vadd.f32 0.4994258, %v3970_v50  ;;  %v4009_v21 = vadd.f32 0.112945676, %v4008_v5  ;;  %v9250_v33 = vmul.f32 %v3559_v36, %v9110_v52 }
 0x385   : > { %v9253_v46 = vmul.f32 %v4074_v20, %v9197_v16  ;;  %v3902_v15 = vsel %vm3901_vm2, %v5967_v51, %v3898_v37  ;;  %vm3904_vm3 = vcmp.eq.f32.partialorder %v3903_v63, 8.507059e+37  ;;  %v3498_v18 = vmul.f32 %v3497_v43, %v9042_v8  ;;  %v10655_v37 = vld [vmem:[#allocation13_spill] sm:$0xff] }
 0x386   : > { %v5971_v31 = vpop.eup %5970  ;;  %v9264_v39 = vmin.f32 %v4111_v23, 16.0  ;;  %v3907_v52 = vsel %vm3904_vm3, %v3906_v45, %v3902_v15  ;;  %v3972_v11 = vmul.f32 %v3971_v61, %v8765_v47  ;;  %v3481_v51 = vsel %vm9259_vm4, %v9177_v56, %v9246_v53 }
 0x387   : > { %vm9271_vm5 = vcmp.eq.f32.partialorder %v3482_v59, 8.507059e+37  ;;  %v3908_v62 = vmul.f32 %v3907_v52, %v8910_v49  ;;  %v3935_v36 = vmul.f32 %v5971_v31, %v9232_v3  ;;  %v4044_v55 = vmul.f32 3.8918573e-05, %v9001_v6 }
 0x388   : > { %v3516_v58 = vmul.f32 %v9220_v38, %v3515_v4  ;;  %v5111_v20 = vadd.f32 1.0, %v5681_v17  ;;  %v9279_v34 = vadd.f32 1.0, %v3972_v11  ;;  %v4010_v47 = vmul.f32 %v4009_v21, %v8928_v57 }
 0x389   : > { %v9283_v63 = vadd.f32 %v9141_v2, %v3707_v48  ;;  %v5682_v56 = vclamps-f32 %v3908_v62, 1.0  ;;  %v3607_v59 = vpack.c.bf16 %v9119_v7, %v8979_v60  ;;  %v3936_v43 = vsub.f32 1.0, %v3935_v36  ;;  %v10656_v60 = vld [vmem:[#allocation9_spill] sm:$0xff]  ;;  %v3709_v62 = vpop.f32.mrf.mxu2 }
 0x38a   : > { %v3499_v49 = vadd.f32 0.18741608, %v3498_v18  ;;  %vm3519_vm6 = vweird.f32 %v9220_v38  ;;  %v4113_v23 = vmul.f32 2.1237322e-06, %v9264_v39  ;;  %5972 = vrcp.f32 %v9279_v34 }
 0x38b   : > { %v5112_v50 = vadd.f32 1.0, %v5682_v56  ;;  %v3937_v5 = vmul.f32 %v5971_v31, %v3936_v43  ;;  %vm3940_vm7 = vweird.f32 %v5971_v31  ;;  %v4045_v53 = vadd.f32 0.001143296, %v4044_v55 }
 0x38c   : > { %v3517_v17 = vadd.f32 %v9220_v38, %v3516_v58  ;;  %v5143_v4 = vmul.f32 %v5111_v20, %v10655_v37  ;;  %v3945_v45 = vand.u32 2147483648, %v9232_v3  ;;  %v4011_v61 = vadd.f32 0.4994258, %v4010_v47 }
 0x38d   : > { %v5144_v7 = vmul.f32 %v5112_v50, %v10656_v60  ;;  %3751 = vmatmul.bf16.gmra.mxu2 %v3607_v59  ;;  %v3938_v21 = vadd.f32 %v5971_v31, %v3937_v5  ;;  %vm3939_vm8 = vweird.f32 %v9232_v3  ;;  %v3943_v48 = vand.u32 2147483647, %v9232_v3 }
 0x38e   : > { %v3500_v15 = vmul.f32 %v3499_v49, %v9042_v8  ;;  %vm3518_vm9 = vweird.f32 %v9175_v1  ;;  %v3522_v35 = vand.u32 2147483647, %v9175_v1  ;;  %v3524_v18 = vand.u32 2147483648, %v9175_v1  ;;  %vm9301_vm0 = vmor %vm3939_vm8, %vm3940_vm7 }
 0x38f   : > { %v5175_v11 = vpack.c.bf16 %v5144_v7, %v5143_v4  ;;  %v3942_v36 = vsel %vm9301_vm0, %v5971_v31, %v3938_v21  ;;  %v4012_v3 = vmul.f32 %v4011_v61, %v8928_v57  ;;  %v4046_v8 = vmul.f32 %v4045_v53, %v9001_v6  ;;  %vm9314_vm10 = vmor %vm3518_vm9, %vm3519_vm6 }
 0x390   : > { %v5973_v55 = vpop.eup %5972  ;;  %v3486_v58 = vsel %vm9271_vm5, %v9224_v24, %v3481_v51  ;;  %v4114_v20 = vadd.f32 0.00028619796, %v4113_v23  ;;  %v3946_v47 = vor.u32 1.1754944e-38, %v3945_v45  ;;  %v4084_v56 = vmul.f32 3.8918573e-05, %v9197_v16 }
 0x391   : > { %v3521_v31 = vsel %vm9314_vm10, %v9220_v38, %v3517_v17  ;;  %v9323_v59 = vmul.f32 0.70710677, %v9283_v63  ;;  %5267 = vmatmul.bf16.vlgmr.msra.gmra.mxu3 %v5175_v11  ;;  %vm3944_vm11 = vcmp.eq.f32.partialorder %v3943_v48, 8.507059e+37  ;;  %v3975_v24 = vmul.f32 %v5973_v55, %v9279_v34 }
 0x392   : > { %v3501_v51 = vadd.f32 1.1283791, %v3500_v15  ;;  %v3525_v22 = vor.u32 1.1754944e-38, %v3524_v18  ;;  %v3947_v43 = vsel %vm3944_vm11, %v3946_v47, %v3942_v36  ;;  %v9326_v49 = vadd.f32 1.0, %v4012_v3  ;;  %v9346_v18 = vpop.f32.mrf.mxu2 }
 0x393   : > { %v4076_v23 = vadd.f32 0.0036580483, %v9253_v46  ;;  %vm3523_vm12 = vcmp.eq.f32.partialorder %v3522_v35, 8.507059e+37  ;;  %v3976_v50 = vsub.f32 1.0, %v3975_v24  ;;  %v4047_v5 = vadd.f32 0.014752088, %v4046_v8 }
 0x394   : > { %v3526_v53 = vsel %vm3523_vm12, %v3525_v22, %v3521_v31  ;;  %v3985_v38 = vand.u32 2147483648, %v9279_v34  ;;  %5974 = vrcp.f32 %v9326_v49  ;;  %v4085_v17 = vadd.f32 0.001143296, %v4084_v56 }
 0x395   : > { %v3948_v37 = vmul.f32 %v3947_v43, %v8982_v19  ;;  %v3977_v4 = vmul.f32 %v5973_v55, %v3976_v50  ;;  %vm3980_vm13 = vweird.f32 %v5973_v55  ;;  %v3983_v45 = vand.u32 2147483647, %v9279_v34 }
 0x396   : > { %v3487_v61 = vmul.f32 %v3486_v58, %v9217_v14  ;;  %v3502_v60 = vmul.f32 %v3501_v51, %v9019_v44  ;;  %v4115_v46 = vmul.f32 %v4114_v20, %v9264_v39  ;;  %v4151_v7 = vmul.f32 %v9323_v59, %v9323_v59 }
 0x397   : > { %v9339_v21 = vadd.f32 %v9141_v2, %v3709_v62  ;;  %v3978_v48 = vadd.f32 %v5973_v55, %v3977_v4  ;;  %vm3979_vm14 = vweird.f32 %v9279_v34  ;;  %v4048_v19 = vmul.f32 %v4047_v5, %v9001_v6 }
 0x398   : > { %v3527_v15 = vmul.f32 %v3526_v53, %v3502_v60  ;;  %vm3981_vm15 = vmor %vm3979_vm14, %vm3980_vm13  ;;  %v3986_v35 = vor.u32 1.1754944e-38, %v3985_v38  ;;  %v3608_v14 = vpack.c.bf16 %v9250_v33, %v9156_v41  ;;  %v4086_v44 = vmul.f32 %v4085_v17, %v9197_v16 }
 0x399   : > { %v5683_v52 = vclamps-f32 %v3948_v37, 1.0  ;;  %v3982_v11 = vsel %vm3981_vm15, %v5973_v55, %v3978_v48  ;;  %vm3984_vm1 = vcmp.eq.f32.partialorder %v3983_v45, 8.507059e+37  ;;  %v4049_v62 = vadd.f32 0.112945676, %v4048_v19 }
 0x39a   : > { %v9348_v36 = vpop.eup %5974  ;;  %v9350_v3 = vmin.f32 %v4151_v7, 16.0  ;;  %v3987_v34 = vsel %vm3984_vm1, %v3986_v35, %v3982_v11  ;;  %v4087_v8 = vadd.f32 0.014752088, %v4086_v44  ;;  %v4124_v58 = vmul.f32 3.8918573e-05, %v9264_v39 }
 0x39b   : > { %v5647_v1 = vclamps-f32 %v3487_v61, 1.0  ;;  %v3988_v20 = vmul.f32 %v3987_v34, %v8993_v13  ;;  %v4015_v41 = vmul.f32 %v9348_v36, %v9326_v49  ;;  %v4050_v33 = vmul.f32 %v4049_v62, %v9001_v6 }
 0x39c   : > { %v5648_v47 = vclamps-f32 %v3527_v15, 1.0  ;;  %v4116_v55 = vadd.f32 0.0036580483, %v4115_v46  ;;  %v9358_v56 = vmul.f32 0.70710677, %v9339_v21  ;;  %v4088_v31 = vmul.f32 %v4087_v8, %v9197_v16 }
 0x39d   : > { %v5684_v24 = vclamps-f32 %v3988_v20, 1.0  ;;  %v5113_v51 = vadd.f32 1.0, %v5683_v52  ;;  %3756 = vmatmul.bf16.gmra.mxu2 %v3608_v14  ;;  %v4016_v22 = vsub.f32 1.0, %v4015_v41  ;;  %v4051_v43 = vadd.f32 0.4994258, %v4050_v33 }
 0x39e   : > { %v4001_v13 = vmul.f32 %v9130_v26, %v8928_v57  ;;  %v4089_v50 = vadd.f32 0.112945676, %v4088_v31  ;;  %v4125_v5 = vadd.f32 0.001143296, %v4124_v58  ;;  %v4164_v53 = vmul.f32 3.8918573e-05, %v9350_v3 }
 0x39f   : > { %v4041_v38 = vmul.f32 %v9173_v54, %v9001_v6  ;;  %v5114_v17 = vadd.f32 1.0, %v5684_v24  ;;  %v4017_v37 = vmul.f32 %v9348_v36, %v4016_v22  ;;  %v4052_v4 = vmul.f32 %v4051_v43, %v9001_v6 }
 0x3a0   : > { %v4077_v45 = vmul.f32 %v4076_v23, %v9197_v16  ;;  %v2217_v61 = vmul.f32 0.5, %v9008_v12  ;;  %v3561_v60 = vadd.f32 1.0, %v5648_v47  ;;  %v4191_v57 = vmul.f32 %v9358_v56, %v9358_v56  ;;  %v3714_v12 = vpop.f32.mrf.mxu2 }
 0x3a1   : > { %v5145_v26 = vmul.f32 %v5113_v51, %v8903_v30  ;;  %v5146_v46 = vmul.f32 %v5114_v17, %v8926_v42  ;;  %v9374_v7 = vadd.f32 1.0, %v4052_v4  ;;  %v4090_v54 = vmul.f32 %v4089_v50, %v9197_v16 }
 0x3a2   : > { %v3560_v48 = vadd.f32 1.0, %v5647_v1  ;;  %v4117_v19 = vmul.f32 %v4116_v55, %v9264_v39  ;;  %v4126_v6 = vmul.f32 %v4125_v5, %v9264_v39  ;;  %v4165_v23 = vadd.f32 0.001143296, %v4164_v53 }
 0x3a3   : > { %v5176_v15 = vpack.c.bf16 %v5146_v46, %v5145_v26  ;;  %v4018_v35 = vadd.f32 %v9348_v36, %v4017_v37  ;;  %vm4020_vm2 = vweird.f32 %v9348_v36  ;;  %5976 = vrcp.f32 %v9374_v7 }
 0x3a4   : > { %v4002_v30 = vadd.f32 1.1283791, %v4001_v13  ;;  %v2216_v42 = vmul.f32 0.5, %v8878_v40  ;;  %v9383_v14 = vmin.f32 %v4191_v57, 16.0  ;;  %v4025_v44 = vand.u32 2147483648, %v9326_v49 }
 0x3a5   : > { %v3593_v52 = vmul.f32 %v3561_v60, %v2217_v61  ;;  %5272 = vmatmul.bf16.gmra.mxu3 %v5176_v15  ;;  %vm4019_vm3 = vweird.f32 %v9326_v49  ;;  %v4023_v11 = vand.u32 2147483647, %v9326_v49  ;;  %v4091_v62 = vadd.f32 0.4994258, %v4090_v54 }
 0x3a6   : > { %v4042_v34 = vadd.f32 1.1283791, %v4041_v38  ;;  %v4078_v8 = vadd.f32 0.05243302, %v4077_v45  ;;  %vm9388_vm4 = vmor %vm4019_vm3, %vm4020_vm2  ;;  %v4127_v1 = vadd.f32 0.014752088, %v4126_v6  ;;  %v4166_v40 = vmul.f32 %v4165_v23, %v9350_v3 }
 0x3a7   : > { %v3592_v20 = vmul.f32 %v3560_v48, %v2216_v42  ;;  %v4118_v41 = vadd.f32 0.05243302, %v4117_v19  ;;  %v4153_v33 = vmul.f32 2.1237322e-06, %v9350_v3  ;;  %v4022_v47 = vsel %vm9388_vm4, %v9348_v36, %v4018_v35 }
 0x3a8   : > { %v9399_v49 = vadd.f32 %v9141_v2, %v9346_v18  ;;  %v4026_v55 = vor.u32 1.1754944e-38, %v4025_v44  ;;  %v4092_v31 = vmul.f32 %v4091_v62, %v9197_v16  ;;  %v4128_v24 = vmul.f32 %v4127_v1, %v9264_v39  ;;  %v3717_v60 = vpop.f32.mrf.mxu2 }
 0x3a9   : > { %v5977_v51 = vpop.eup %5976  ;;  %v4003_v22 = vmul.f32 %v4002_v30, %v8884_v25  ;;  %v4193_v43 = vmul.f32 2.1237322e-06, %v9383_v14  ;;  %vm4024_vm5 = vcmp.eq.f32.partialorder %v4023_v11, 8.507059e+37  ;;  %v3609_v13 = vpack.c.bf16 %v3593_v52, %v3592_v20 }
 0x3aa   : > { %v4027_v50 = vsel %vm4024_vm5, %v4026_v55, %v4022_v47  ;;  %v4055_v5 = vmul.f32 %v5977_v51, %v9374_v7  ;;  %v9406_v36 = vadd.f32 1.0, %v4092_v31  ;;  %v4167_v53 = vadd.f32 0.014752088, %v4166_v40 }
 0x3ab   : > { %v4043_v18 = vmul.f32 %v4042_v34, %v8959_v10  ;;  %v4079_v38 = vmul.f32 %v4078_v8, %v9197_v16  ;;  %v4154_v17 = vadd.f32 0.00028619796, %v4153_v33  ;;  %v4129_v37 = vadd.f32 0.112945676, %v4128_v24 }
 0x3ac   : > { %v4119_v4 = vmul.f32 %v4118_v41, %v9264_v39  ;;  %v9412_v25 = vmul.f32 0.70710677, %v9399_v49  ;;  %v4056_v45 = vsub.f32 1.0, %v4055_v5  ;;  %5978 = vrcp.f32 %v9406_v36 }
 0x3ad   : > { %v4194_v61 = vadd.f32 0.00028619796, %v4193_v43  ;;  %v4028_v57 = vmul.f32 %v4027_v50, %v4003_v22  ;;  %v4063_v26 = vand.u32 2147483647, %v9374_v7  ;;  %v4065_v46 = vand.u32 2147483648, %v9374_v7  ;;  %3761 = vmatmul.bf16.gmra.mxu2 %v3609_v13 }
 0x3ae   : > { %v4057_v10 = vmul.f32 %v5977_v51, %v4056_v45  ;;  %vm4060_vm6 = vweird.f32 %v5977_v51  ;;  %v4130_v54 = vmul.f32 %v4129_v37, %v9264_v39  ;;  %v4168_v48 = vmul.f32 %v4167_v53, %v9350_v3 }
 0x3af   : > { %v9420_v19 = vmul.f32 0.5, %v9144_v32  ;;  %v4080_v6 = vadd.f32 0.18741608, %v4079_v38  ;;  %v4155_v23 = vmul.f32 %v4154_v17, %v9350_v3  ;;  %v9424_v15 = vadd.f32 %v9141_v2, %v3714_v12 }
 0x3b0   : > { %v4058_v35 = vadd.f32 %v5977_v51, %v4057_v10  ;;  %vm4059_vm7 = vweird.f32 %v9374_v7  ;;  %v4131_v30 = vadd.f32 0.4994258, %v4130_v54  ;;  %v4169_v42 = vadd.f32 0.112945676, %v4168_v48  ;;  %v9445_v5 = vpop.f32.mrf.mxu2 }
 0x3b1   : > { %v4120_v44 = vadd.f32 0.18741608, %v4119_v4  ;;  %v4195_v52 = vmul.f32 %v4194_v61, %v9383_v14  ;;  %v4231_v11 = vmul.f32 %v9412_v25, %v9412_v25  ;;  %vm4061_vm8 = vmor %vm4059_vm7, %vm4060_vm6  ;;  %v4066_v32 = vor.u32 1.1754944e-38, %v4065_v46 }
 0x3b2   : > { %v5979_v62 = vpop.eup %5978  ;;  %v5685_v34 = vclamps-f32 %v4028_v57, 1.0  ;;  %v4062_v8 = vsel %vm4061_vm8, %v5977_v51, %v4058_v35  ;;  %vm4064_vm9 = vcmp.eq.f32.partialorder %v4063_v26, 8.507059e+37  ;;  %v4132_v12 = vmul.f32 %v4131_v30, %v9264_v39 }
 0x3b3   : > { %v4156_v58 = vadd.f32 0.0036580483, %v4155_v23  ;;  %v4067_v1 = vsel %vm4064_vm9, %v4066_v32, %v4062_v8  ;;  %v4095_v7 = vmul.f32 %v5979_v62, %v9406_v36  ;;  %v4204_v40 = vmul.f32 3.8918573e-05, %v9383_v14 }
 0x3b4   : > { %v9434_v20 = vmul.f32 0.70710677, %v9424_v15  ;;  %v4068_v41 = vmul.f32 %v4067_v1, %v4043_v18  ;;  %v9436_v33 = vadd.f32 1.0, %v4132_v12  ;;  %v4170_v47 = vmul.f32 %v4169_v42, %v9350_v3 }
 0x3b5   : > { %v4081_v55 = vmul.f32 %v4080_v6, %v9197_v16  ;;  %v4121_v31 = vmul.f32 %v4120_v44, %v9264_v39  ;;  %v9441_v24 = vmin.f32 %v4231_v11, 16.0  ;;  %v4096_v51 = vsub.f32 1.0, %v4095_v7 }
 0x3b6   : > { %v4196_v22 = vadd.f32 0.0036580483, %v4195_v52  ;;  %v5686_v43 = vclamps-f32 %v4068_v41, 1.0  ;;  %v5115_v13 = vadd.f32 1.0, %v5685_v34  ;;  %5980 = vrcp.f32 %v9436_v33 }
 0x3b7   : > { %v4157_v50 = vmul.f32 %v4156_v58, %v9350_v3  ;;  %v4097_v53 = vmul.f32 %v5979_v62, %v4096_v51  ;;  %vm4100_vm0 = vweird.f32 %v5979_v62  ;;  %v4205_v18 = vadd.f32 0.001143296, %v4204_v40 }
 0x3b8   : > { %v4271_v16 = vmul.f32 %v9434_v20, %v9434_v20  ;;  %v5116_v38 = vadd.f32 1.0, %v5686_v43  ;;  %v4105_v39 = vand.u32 2147483648, %v9406_v36  ;;  %v4171_v17 = vadd.f32 0.4994258, %v4170_v47  ;;  %v9483_v40 = vpop.f32.mrf.mxu2 }
 0x3b9   : > { %v4233_v37 = vmul.f32 2.1237322e-06, %v9441_v24  ;;  %v4098_v4 = vadd.f32 %v5979_v62, %v4097_v53  ;;  %vm4099_vm10 = vweird.f32 %v9406_v36  ;;  %v4103_v45 = vand.u32 2147483647, %v9406_v36 }
 0x3ba   : > { %v4197_v61 = vmul.f32 %v4196_v22, %v9383_v14  ;;  %v5147_v57 = vmul.f32 %v5115_v13, %v9106_v28  ;;  %v5148_v26 = vmul.f32 %v5116_v38, %v9122_v0  ;;  %vm9456_vm11 = vmor %vm4099_vm10, %vm4100_vm0  ;;  %v4172_v10 = vmul.f32 %v4171_v17, %v9350_v3 }
 0x3bb   : > { %v4082_v54 = vadd.f32 1.1283791, %v4081_v55  ;;  %v9462_v48 = vadd.f32 %v9141_v2, %v3717_v60  ;;  %v4102_v6 = vsel %vm9456_vm11, %v5979_v62, %v4098_v4  ;;  %v4206_v36 = vmul.f32 %v4205_v18, %v9383_v14 }
 0x3bc   : > { %v5981_v23 = vpop.eup %5980  ;;  %v9468_v28 = vmul.f32 0.5, %v9211_v29  ;;  %v9470_v0 = vmin.f32 %v4271_v16, 16.0  ;;  %v5177_v35 = vpack.c.bf16 %v5148_v26, %v5147_v57  ;;  %v4106_v30 = vor.u32 1.1754944e-38, %v4105_v39 }
 0x3bd   : > { %v4122_v42 = vadd.f32 1.1283791, %v4121_v31  ;;  %v4158_v44 = vadd.f32 0.05243302, %v4157_v50  ;;  %vm4104_vm12 = vcmp.eq.f32.partialorder %v4103_v45, 8.507059e+37  ;;  %v4135_v52 = vmul.f32 %v5981_v23, %v9436_v33 }
 0x3be   : > { %v4198_v60 = vadd.f32 0.05243302, %v4197_v61  ;;  %v4234_v11 = vadd.f32 0.00028619796, %v4233_v37  ;;  %5277 = vmatmul.bf16.gmra.mxu3 %v5177_v35  ;;  %v4107_v32 = vsel %vm4104_vm12, %v4106_v30, %v4102_v6  ;;  %v9473_v62 = vadd.f32 1.0, %v4172_v10 }
 0x3bf   : > { %v4083_v34 = vmul.f32 %v4082_v54, %v9163_v9  ;;  %v9477_v29 = vmul.f32 0.70710677, %v9462_v48  ;;  %v4136_v8 = vsub.f32 1.0, %v4135_v52  ;;  %v4207_v12 = vadd.f32 0.014752088, %v4206_v36 }
 0x3c0   : > { %v4273_v58 = vmul.f32 2.1237322e-06, %v9470_v0  ;;  %v4145_v1 = vand.u32 2147483648, %v9436_v33  ;;  %5982 = vrcp.f32 %v9473_v62  ;;  %v4244_v7 = vmul.f32 3.8918573e-05, %v9441_v24 }
 0x3c1   : > { %v4108_v41 = vmul.f32 %v4107_v32, %v4083_v34  ;;  %v4137_v47 = vmul.f32 %v5981_v23, %v4136_v8  ;;  %vm4140_vm13 = vweird.f32 %v5981_v23  ;;  %v4143_v9 = vand.u32 2147483647, %v9436_v33  ;;  %v9511_v8 = vpop.f32.mrf.mxu2 }
 0x3c2   : > { %v4123_v55 = vmul.f32 %v4122_v42, %v9230_v27  ;;  %v4235_v31 = vmul.f32 %v4234_v11, %v9441_v24  ;;  %v4208_v51 = vmul.f32 %v4207_v12, %v9383_v14  ;;  %v4284_v22 = vmul.f32 3.8918573e-05, %v9470_v0 }
 0x3c3   : > { %v4159_v43 = vmul.f32 %v4158_v44, %v9350_v3  ;;  %v4311_v13 = vmul.f32 %v9477_v29, %v9477_v29  ;;  %v4138_v50 = vadd.f32 %v5981_v23, %v4137_v47  ;;  %vm4139_vm14 = vweird.f32 %v9436_v33 }
 0x3c4   : > { %v4199_v53 = vmul.f32 %v4198_v60, %v9383_v14  ;;  %v4274_v18 = vadd.f32 0.00028619796, %v4273_v58  ;;  %vm4141_vm15 = vmor %vm4139_vm14, %vm4140_vm13  ;;  %v4146_v16 = vor.u32 1.1754944e-38, %v4145_v1  ;;  %v4209_v27 = vadd.f32 0.112945676, %v4208_v51 }
 0x3c5   : > { %v5687_v38 = vclamps-f32 %v4108_v41, 1.0  ;;  %v4142_v39 = vsel %vm4141_vm15, %v5981_v23, %v4138_v50  ;;  %vm4144_vm1 = vcmp.eq.f32.partialorder %v4143_v9, 8.507059e+37  ;;  %v4245_v17 = vadd.f32 0.001143296, %v4244_v7 }
 0x3c6   : > { %v9495_v37 = vpop.eup %5982  ;;  %v4236_v4 = vadd.f32 0.0036580483, %v4235_v31  ;;  %v4147_v45 = vsel %vm4144_vm1, %v4146_v16, %v4142_v39  ;;  %v4210_v61 = vmul.f32 %v4209_v27, %v9383_v14  ;;  %v4285_v57 = vadd.f32 0.001143296, %v4284_v22 }
 0x3c7   : > { %v9498_v26 = vmin.f32 %v4311_v13, 16.0  ;;  %v4148_v33 = vmul.f32 %v4147_v45, %v4123_v55  ;;  %v4175_v46 = vmul.f32 %v9495_v37, %v9473_v62  ;;  %v4246_v10 = vmul.f32 %v4245_v17, %v9441_v24 }
 0x3c8   : > { %v4160_v54 = vadd.f32 0.18741608, %v4159_v43  ;;  %v4200_v6 = vadd.f32 0.18741608, %v4199_v53  ;;  %v4275_v36 = vmul.f32 %v4274_v18, %v9470_v0  ;;  %v4211_v23 = vadd.f32 0.4994258, %v4210_v61 }
 0x3c9   : > { %v5688_v35 = vclamps-f32 %v4148_v33, 1.0  ;;  %v5117_v30 = vadd.f32 1.0, %v5687_v38  ;;  %v4176_v42 = vsub.f32 1.0, %v4175_v46  ;;  %v4247_v44 = vadd.f32 0.014752088, %v4246_v10 }
 0x3ca   : > { %v4237_v52 = vmul.f32 %v4236_v4, %v9441_v24  ;;  %v9507_v60 = vadd.f32 %v9141_v2, %v9445_v5  ;;  %v4212_v11 = vmul.f32 %v4211_v23, %v9383_v14  ;;  %v4286_v32 = vmul.f32 %v4285_v57, %v9470_v0 }
 0x3cb   : > { %v5118_v34 = vadd.f32 1.0, %v5688_v35  ;;  %v4177_v12 = vmul.f32 %v9495_v37, %v4176_v42  ;;  %v4248_v58 = vmul.f32 %v4247_v44, %v9441_v24  ;;  %v4324_v1 = vmul.f32 3.8918573e-05, %v9498_v26 }
 0x3cc   : > { %v4161_v7 = vmul.f32 %v4160_v54, %v9350_v3  ;;  %v4201_v41 = vmul.f32 %v4200_v6, %v9383_v14  ;;  %v9518_v47 = vadd.f32 1.0, %v4212_v11  ;;  %v4276_v5 = vadd.f32 0.0036580483, %v4275_v36  ;;  %v9555_v36 = vpop.f32.mrf.mxu2 }
 0x3cd   : > { %v5149_v9 = vmul.f32 %v5117_v30, %v9420_v19  ;;  %v5150_v55 = vmul.f32 %v5118_v34, %v9468_v28  ;;  %v4249_v31 = vadd.f32 0.112945676, %v4248_v58  ;;  %v4238_v51 = vadd.f32 0.05243302, %v4237_v52 }
 0x3ce   : > { %v9523_v22 = vmul.f32 0.70710677, %v9507_v60  ;;  %5984 = vrcp.f32 %v9518_v47  ;;  %v4287_v43 = vadd.f32 0.014752088, %v4286_v32  ;;  %v4178_v3 = vadd.f32 %v9495_v37, %v4177_v12 }
 0x3cf   : > { %v5178_v13 = vpack.c.bf16 %v5150_v55, %v5149_v9  ;;  %vm4180_vm2 = vweird.f32 %v9495_v37  ;;  %v4325_v14 = vadd.f32 0.001143296, %v4324_v1  ;;  %v4162_v50 = vadd.f32 1.1283791, %v4161_v7 }
 0x3d0   : > { %v4202_v53 = vadd.f32 1.1283791, %v4201_v41  ;;  %v4185_v19 = vand.u32 2147483648, %v9473_v62  ;;  %v4277_v28 = vmul.f32 %v4276_v5, %v9470_v0  ;;  %vm4179_vm3 = vweird.f32 %v9473_v62 }
 0x3d1   : > { %5282 = vmatmul.bf16.gmra.mxu3 %v5178_v13  ;;  %v4183_v18 = vand.u32 2147483647, %v9473_v62  ;;  %v4250_v16 = vmul.f32 %v4249_v31, %v9441_v24  ;;  %v9534_v27 = vmul.f32 0.5, %v9283_v63  ;;  %v4313_v38 = vmul.f32 2.1237322e-06, %v9498_v26  ;;  %vm9539_vm4 = vmor %vm4179_vm3, %vm4180_vm2 }
 0x3d2   : > { %v4351_v39 = vmul.f32 %v9523_v22, %v9523_v22  ;;  %v4288_v4 = vmul.f32 %v4287_v43, %v9470_v0  ;;  %v4239_v45 = vmul.f32 %v4238_v51, %v9441_v24  ;;  %v4182_v62 = vsel %vm9539_vm4, %v9495_v37, %v4178_v3 }
 0x3d3   : > { %v4251_v61 = vadd.f32 0.4994258, %v4250_v16  ;;  %v4326_v63 = vmul.f32 %v4325_v14, %v9498_v26  ;;  %v4163_v33 = vmul.f32 %v4162_v50, %v9323_v59  ;;  %v4203_v46 = vmul.f32 %v4202_v53, %v9358_v56 }
 0x3d4   : > { %v5985_v57 = vpop.eup %5984  ;;  %v9553_v10 = vadd.f32 %v9141_v2, %v9483_v40  ;;  %v4186_v54 = vor.u32 1.1754944e-38, %v4185_v19  ;;  %v4278_v6 = vadd.f32 0.05243302, %v4277_v28  ;;  %vm4184_vm5 = vcmp.eq.f32.partialorder %v4183_v18, 8.507059e+37  ;;  %v9584_v17 = vpop.f32.mrf.mxu2 }
 0x3d5   : > { %v4215_v23 = vmul.f32 %v5985_v57, %v9518_v47  ;;  %v4252_v37 = vmul.f32 %v4251_v61, %v9441_v24  ;;  %v4314_v35 = vadd.f32 0.00028619796, %v4313_v38  ;;  %v9559_v30 = vmin.f32 %v4351_v39, 16.0 }
 0x3d6   : > { %v4187_v42 = vsel %vm4184_vm5, %v4186_v54, %v4182_v62  ;;  %v4289_v59 = vadd.f32 0.112945676, %v4288_v4  ;;  %v4240_v44 = vadd.f32 0.18741608, %v4239_v45  ;;  %v4327_v40 = vadd.f32 0.014752088, %v4326_v63 }
 0x3d7   : > { %v4216_v56 = vsub.f32 1.0, %v4215_v23  ;;  %v9561_v52 = vadd.f32 1.0, %v4252_v37  ;;  %v9564_v11 = vmul.f32 0.70710677, %v9553_v10  ;;  %v4223_v32 = vand.u32 2147483647, %v9518_v47 }
 0x3d8   : > { %v4225_v34 = vand.u32 2147483648, %v9518_v47  ;;  %v4290_v12 = vmul.f32 %v4289_v59, %v9470_v0  ;;  %v4188_v58 = vmul.f32 %v4187_v42, %v4163_v33  ;;  %vm4220_vm6 = vweird.f32 %v5985_v57 }
 0x3d9   : > { %v4217_v1 = vmul.f32 %v5985_v57, %v4216_v56  ;;  %5986 = vrcp.f32 %v9561_v52  ;;  %v4279_v7 = vmul.f32 %v4278_v6, %v9470_v0  ;;  %v4315_v41 = vmul.f32 %v4314_v35, %v9498_v26 }
 0x3da   : > { %v4353_v5 = vmul.f32 2.1237322e-06, %v9559_v30  ;;  %v4328_v9 = vmul.f32 %v4327_v40, %v9498_v26  ;;  %vm4219_vm7 = vweird.f32 %v9518_v47  ;;  %v4291_v31 = vadd.f32 0.4994258, %v4290_v12 }
 0x3db   : > { %v4218_v55 = vadd.f32 %v5985_v57, %v4217_v1  ;;  %v4364_v51 = vmul.f32 3.8918573e-05, %v9559_v30  ;;  %v4391_v43 = vmul.f32 %v9564_v11, %v9564_v11  ;;  %v9580_v13 = vadd.f32 %v9141_v2, %v9511_v8  ;;  %vm4221_vm8 = vmor %vm4219_vm7, %vm4220_vm6 }
 0x3dc   : > { %v4226_v3 = vor.u32 1.1754944e-38, %v4225_v34  ;;  %v4329_v14 = vadd.f32 0.112945676, %v4328_v9  ;;  %v5689_v50 = vclamps-f32 %v4188_v58, 1.0  ;;  %vm4224_vm9 = vcmp.eq.f32.partialorder %v4223_v32, 8.507059e+37 }
 0x3dd   : > { %v4222_v53 = vsel %vm4221_vm8, %v5985_v57, %v4218_v55  ;;  %v4292_v19 = vmul.f32 %v4291_v31, %v9470_v0  ;;  %v4241_v47 = vmul.f32 %v4240_v44, %v9441_v24  ;;  %v4280_v28 = vadd.f32 0.18741608, %v4279_v7 }
 0x3de   : > { %v4354_v18 = vadd.f32 0.00028619796, %v4353_v5  ;;  %v4227_v16 = vsel %vm4224_vm9, %v4226_v3, %v4222_v53  ;;  %v4330_v2 = vmul.f32 %v4329_v14, %v9498_v26  ;;  %v4365_v8 = vadd.f32 0.001143296, %v4364_v51 }
 0x3df   : > { %v5987_v38 = vpop.eup %5986  ;;  %v4228_v39 = vmul.f32 %v4227_v16, %v4203_v46  ;;  %v9586_v4 = vadd.f32 1.0, %v4292_v19  ;;  %v3776_v45 = vmul.f32 0.5, %v9339_v21  ;;  %v4316_v62 = vadd.f32 0.0036580483, %v4315_v41 }
 0x3e0   : > { %v9590_v61 = vmin.f32 %v4391_v43, 16.0  ;;  %v4255_v63 = vmul.f32 %v5987_v38, %v9561_v52  ;;  %v9594_v24 = vmul.f32 0.70710677, %v9580_v13  ;;  %v5119_v33 = vadd.f32 1.0, %v5689_v50 }
 0x3e1   : > { %v5690_v57 = vclamps-f32 %v4228_v39, 1.0  ;;  %5988 = vrcp.f32 %v9586_v4  ;;  %v4242_v46 = vadd.f32 1.1283791, %v4241_v47  ;;  %v4281_v54 = vmul.f32 %v4280_v28, %v9470_v0 }
 0x3e2   : > { %v4355_v6 = vmul.f32 %v4354_v18, %v9559_v30  ;;  %v4256_v23 = vsub.f32 1.0, %v4255_v63  ;;  %v4265_v21 = vand.u32 2147483648, %v9561_v52  ;;  %v4331_v35 = vadd.f32 0.4994258, %v4330_v2 }
 0x3e3   : > { %v5120_v37 = vadd.f32 1.0, %v5690_v57  ;;  %v4366_v42 = vmul.f32 %v4365_v8, %v9559_v30  ;;  %v4317_v59 = vmul.f32 %v4316_v62, %v9498_v26  ;;  %vm4260_vm0 = vweird.f32 %v5987_v38 }
 0x3e4   : > { %v4257_v44 = vmul.f32 %v5987_v38, %v4256_v23  ;;  %v4263_v56 = vand.u32 2147483647, %v9561_v52  ;;  %v4393_v40 = vmul.f32 2.1237322e-06, %v9590_v61  ;;  %v4431_v0 = vmul.f32 %v9594_v24, %v9594_v24 }
 0x3e5   : > { %v5151_v32 = vmul.f32 %v5119_v33, %v9534_v27  ;;  %v5152_v34 = vmul.f32 %v5120_v37, %v3776_v45  ;;  %v4356_v12 = vadd.f32 0.0036580483, %v4355_v6  ;;  %vm4259_vm10 = vweird.f32 %v9561_v52  ;;  %v9613_v52 = vpop.f32.mrf.mxu2 }
 0x3e6   : > { %v4258_v58 = vadd.f32 %v5987_v38, %v4257_v44  ;;  %v4332_v1 = vmul.f32 %v4331_v35, %v9498_v26  ;;  %v4243_v41 = vmul.f32 %v4242_v46, %v9412_v25  ;;  %vm4261_vm11 = vmor %vm4259_vm10, %vm4260_vm0  ;;  %v4266_v9 = vor.u32 1.1754944e-38, %v4265_v21  ;;  %v9619_v25 = vld [vmem:[%s10523_s6] ss:$0 sm:$0xff] }
 0x3e7   : > { %v5989_v7 = vpop.eup %5988  ;;  %v5179_v5 = vpack.c.bf16 %v5152_v34, %v5151_v32  ;;  %v4367_v55 = vadd.f32 0.014752088, %v4366_v42  ;;  %v4282_v31 = vadd.f32 1.1283791, %v4281_v54  ;;  %vm4264_vm12 = vcmp.eq.f32.partialorder %v4263_v56, 8.507059e+37 }
 0x3e8   : > { %v4262_v51 = vsel %vm4261_vm11, %v5987_v38, %v4258_v58  ;;  %v4295_v43 = vmul.f32 %v5989_v7, %v9586_v4  ;;  %v4318_v27 = vadd.f32 0.05243302, %v4317_v59  ;;  %v4394_v3 = vadd.f32 0.00028619796, %v4393_v40 }
 0x3e9   : > { %v9611_v14 = vmin.f32 %v4431_v0, 16.0  ;;  %5287 = vmatmul.bf16.gmra.mxu3 %v5179_v5  ;;  %v4267_v50 = vsel %vm4264_vm12, %v4266_v9, %v4262_v51  ;;  %v4357_v53 = vmul.f32 %v4356_v12, %v9559_v30  ;;  %v9623_v19 = vadd.f32 %v9619_v25, %v9555_v36 }
 0x3ea   : > { %v4296_v47 = vsub.f32 1.0, %v4295_v43  ;;  %v9625_v28 = vadd.f32 1.0, %v4332_v1  ;;  %vm4300_vm13 = vweird.f32 %v5989_v7  ;;  %v4303_v18 = vand.u32 2147483647, %v9586_v4 }
 0x3eb   : > { %v4305_v16 = vand.u32 2147483648, %v9586_v4  ;;  %v4368_v38 = vmul.f32 %v4367_v55, %v9559_v30  ;;  %v4268_v39 = vmul.f32 %v4267_v50, %v4243_v41  ;;  %v4404_v8 = vmul.f32 3.8918573e-05, %v9590_v61 }
 0x3ec   : > { %v4297_v2 = vmul.f32 %v5989_v7, %v4296_v47  ;;  %5990 = vrcp.f32 %v9625_v28  ;;  %v3777_v45 = vmul.f32 0.5, %v9399_v49  ;;  %v3778_v36 = vmul.f32 0.5, %v9424_v15 }
 0x3ed   : > { %v4395_v62 = vmul.f32 %v4394_v3, %v9590_v61  ;;  %v4433_v63 = vmul.f32 2.1237322e-06, %v9611_v14  ;;  %v4283_v57 = vmul.f32 %v4282_v31, %v9434_v20  ;;  %v4358_v33 = vadd.f32 0.05243302, %v4357_v53  ;;  %v9655_v58 = vpop.f32.mrf.mxu2 }
 0x3ee   : > { %v4298_v46 = vadd.f32 %v5989_v7, %v4297_v2  ;;  %vm4299_vm14 = vweird.f32 %v9586_v4  ;;  %v4319_v54 = vmul.f32 %v4318_v27, %v9498_v26  ;;  %v9640_v6 = vmul.f32 0.70710677, %v9623_v19 }
 0x3ef   : > { %vm4301_vm15 = vmor %vm4299_vm14, %vm4300_vm13  ;;  %v4306_v49 = vor.u32 1.1754944e-38, %v4305_v16  ;;  %v4369_v23 = vadd.f32 0.112945676, %v4368_v38  ;;  %v5691_v15 = vclamps-f32 %v4268_v39, 1.0  ;;  %vm4304_vm1 = vcmp.eq.f32.partialorder %v4303_v18, 8.507059e+37 }
 0x3f0   : > { %v4302_v37 = vsel %vm4301_vm15, %v5989_v7, %v4298_v46  ;;  %v4405_v21 = vadd.f32 0.001143296, %v4404_v8  ;;  %v4396_v35 = vadd.f32 0.0036580483, %v4395_v62  ;;  %v4434_v42 = vadd.f32 0.00028619796, %v4433_v63 }
 0x3f1   : > { %v4307_v20 = vsel %vm4304_vm1, %v4306_v49, %v4302_v37  ;;  %v4370_v59 = vmul.f32 %v4369_v23, %v9559_v30  ;;  %v9648_v4 = vadd.f32 %v9619_v25, %v9584_v17  ;;  %v4444_v0 = vmul.f32 3.8918573e-05, %v9611_v14 }
 0x3f2   : > { %v9644_v44 = vpop.eup %5990  ;;  %v4308_v56 = vmul.f32 %v4307_v20, %v4283_v57  ;;  %v4406_v40 = vmul.f32 %v4405_v21, %v9590_v61  ;;  %v4320_v32 = vadd.f32 0.18741608, %v4319_v54  ;;  %v4359_v34 = vmul.f32 %v4358_v33, %v9559_v30 }
 0x3f3   : > { %v4471_v12 = vmul.f32 %v9640_v6, %v9640_v6  ;;  %v4335_v1 = vmul.f32 %v9644_v44, %v9625_v28  ;;  %v5121_v41 = vadd.f32 1.0, %v5691_v15  ;;  %v4371_v17 = vadd.f32 0.4994258, %v4370_v59 }
 0x3f4   : > { %v5692_v7 = vclamps-f32 %v4308_v56, 1.0  ;;  %v4407_v5 = vadd.f32 0.014752088, %v4406_v40  ;;  %v4397_v9 = vmul.f32 %v4396_v35, %v9590_v61  ;;  %v4435_v55 = vmul.f32 %v4434_v42, %v9611_v14 }
 0x3f5   : > { %v4336_v31 = vsub.f32 1.0, %v4335_v1  ;;  %v4445_v51 = vadd.f32 0.001143296, %v4444_v0  ;;  %v9662_v43 = vmul.f32 0.70710677, %v9648_v4  ;;  %v4372_v3 = vmul.f32 %v4371_v17, %v9559_v30  ;;  %v9683_v37 = vpop.f32.mrf.mxu2 }
 0x3f6   : > { %v5122_v27 = vadd.f32 1.0, %v5692_v7  ;;  %v4408_v50 = vmul.f32 %v4407_v5, %v9590_v61  ;;  %v4321_v53 = vmul.f32 %v4320_v32, %v9498_v26  ;;  %v9667_v47 = vmin.f32 %v4471_v12, 16.0 }
 0x3f7   : > { %v4337_v18 = vmul.f32 %v9644_v44, %v4336_v31  ;;  %v4360_v16 = vadd.f32 0.18741608, %v4359_v34  ;;  %v5153_v38 = vmul.f32 %v5121_v41, %v3777_v45  ;;  %v9670_v2 = vadd.f32 1.0, %v4372_v3 }
 0x3f8   : > { %v5154_v39 = vmul.f32 %v5122_v27, %v3778_v36  ;;  %v4398_v8 = vadd.f32 0.05243302, %v4397_v9  ;;  %v4409_v62 = vadd.f32 0.112945676, %v4408_v50  ;;  %v4446_v63 = vmul.f32 %v4445_v51, %v9611_v14 }
 0x3f9   : > { %v4436_v57 = vadd.f32 0.0036580483, %v4435_v55  ;;  %v4511_v33 = vmul.f32 %v9662_v43, %v9662_v43  ;;  %5992 = vrcp.f32 %v9670_v2  ;;  %v4338_v26 = vadd.f32 %v9644_v44, %v4337_v18 }
 0x3fa   : > { %v5180_v46 = vpack.c.bf16 %v5154_v39, %v5153_v38  ;;  %vm4340_vm2 = vweird.f32 %v9644_v44  ;;  %v4484_v45 = vmul.f32 3.8918573e-05, %v9667_v47  ;;  %v4322_v36 = vadd.f32 1.1283791, %v4321_v53 }
 0x3fb   : > { %v4361_v54 = vmul.f32 %v4360_v16, %v9559_v30  ;;  %v4345_v49 = vand.u32 2147483648, %v9625_v28  ;;  %v4410_v23 = vmul.f32 %v4409_v62, %v9590_v61  ;;  %v4399_v15 = vmul.f32 %v4398_v8, %v9590_v61 }
 0x3fc   : > { %5292 = vmatmul.bf16.gmra.mxu3 %v5180_v46  ;;  %vm4339_vm3 = vweird.f32 %v9625_v28  ;;  %v4343_v21 = vand.u32 2147483647, %v9625_v28  ;;  %v4447_v35 = vadd.f32 0.014752088, %v4446_v63  ;;  %v4437_v42 = vmul.f32 %v4436_v57, %v9611_v14 }
 0x3fd   : > { %v9688_v20 = vmin.f32 %v4511_v33, 16.0  ;;  %vm9690_vm4 = vmor %vm4339_vm3, %vm4340_vm2  ;;  %v4411_v59 = vadd.f32 0.4994258, %v4410_v23  ;;  %v4473_v56 = vmul.f32 2.1237322e-06, %v9667_v47  ;;  %v9700_v34 = vmul.f32 0.5, %v9462_v48  ;;  %v9721_v33 = vpop.f32.mrf.mxu2 }
 0x3fe   : > { %v4342_v40 = vsel %vm9690_vm4, %v9644_v44, %v4338_v26  ;;  %v4448_v0 = vmul.f32 %v4447_v35, %v9611_v14  ;;  %v4485_v32 = vadd.f32 0.001143296, %v4484_v45  ;;  %v4323_v12 = vmul.f32 %v4322_v36, %v9477_v29 }
 0x3ff   : > { %v5993_v28 = vpop.eup %5992  ;;  %v4346_v1 = vor.u32 1.1754944e-38, %v4345_v49  ;;  %v4412_v7 = vmul.f32 %v4411_v59, %v9590_v61  ;;  %v4362_v41 = vadd.f32 1.1283791, %v4361_v54  ;;  %v4400_v17 = vadd.f32 0.18741608, %v4399_v15 }
 0x400   : > { %vm4344_vm5 = vcmp.eq.f32.partialorder %v4343_v21, 8.507059e+37  ;;  %v4375_v5 = vmul.f32 %v5993_v28, %v9670_v2  ;;  %v4449_v44 = vadd.f32 0.112945676, %v4448_v0  ;;  %v4524_v31 = vmul.f32 3.8918573e-05, %v9688_v20 }
 0x401   : > { %v4347_v9 = vsel %vm4344_vm5, %v4346_v1, %v4342_v40  ;;  %v9705_v55 = vadd.f32 1.0, %v4412_v7  ;;  %v4438_v51 = vadd.f32 0.05243302, %v4437_v42  ;;  %v4474_v27 = vadd.f32 0.00028619796, %v4473_v56 }
 0x402   : > { %v4376_v48 = vsub.f32 1.0, %v4375_v5  ;;  %v4486_v3 = vmul.f32 %v4485_v32, %v9667_v47  ;;  %v9711_v29 = vadd.f32 %v9619_v25, %v9613_v52  ;;  %v4383_v50 = vand.u32 2147483647, %v9670_v2 }
 0x403   : > { %v4385_v53 = vand.u32 2147483648, %v9670_v2  ;;  %5994 = vrcp.f32 %v9705_v55  ;;  %v4348_v18 = vmul.f32 %v4347_v9, %v4323_v12  ;;  %vm4380_vm6 = vweird.f32 %v5993_v28 }
 0x404   : > { %v4377_v16 = vmul.f32 %v5993_v28, %v4376_v48  ;;  %v4450_v38 = vmul.f32 %v4449_v44, %v9611_v14  ;;  %v4363_v39 = vmul.f32 %v4362_v41, %v9523_v22  ;;  %v4513_v8 = vmul.f32 2.1237322e-06, %v9688_v20 }
 0x405   : > { %v4487_v62 = vadd.f32 0.014752088, %v4486_v3  ;;  %v4525_v63 = vadd.f32 0.001143296, %v4524_v31  ;;  %v4439_v52 = vmul.f32 %v4438_v51, %v9611_v14  ;;  %vm4379_vm7 = vweird.f32 %v9670_v2 }
 0x406   : > { %v4378_v57 = vadd.f32 %v5993_v28, %v4377_v16  ;;  %v4451_v46 = vadd.f32 0.4994258, %v4450_v38  ;;  %v4475_v26 = vmul.f32 %v4474_v27, %v9667_v47  ;;  %v9725_v45 = vmul.f32 0.70710677, %v9711_v29  ;;  %vm4381_vm8 = vmor %vm4379_vm7, %vm4380_vm6 }
 0x407   : > { %v4386_v36 = vor.u32 1.1754944e-38, %v4385_v53  ;;  %v4488_v22 = vmul.f32 %v4487_v62, %v9667_v47  ;;  %v5693_v54 = vclamps-f32 %v4348_v18, 1.0  ;;  %vm4384_vm9 = vcmp.eq.f32.partialorder %v4383_v50, 8.507059e+37  ;;  %v9745_v53 = vpop.f32.mrf.mxu2 }
 0x408   : > { %v4382_v49 = vsel %vm4381_vm8, %v5993_v28, %v4378_v57  ;;  %v4452_v23 = vmul.f32 %v4451_v46, %v9611_v14  ;;  %v3780_v2 = vmul.f32 0.5, %v9507_v60  ;;  %v4514_v21 = vadd.f32 0.00028619796, %v4513_v8 }
 0x409   : > { %v5995_v15 = vpop.eup %5994  ;;  %v4387_v35 = vsel %vm4384_vm9, %v4386_v36, %v4382_v49  ;;  %v4526_v42 = vmul.f32 %v4525_v63, %v9688_v20  ;;  %v4489_v40 = vadd.f32 0.112945676, %v4488_v22  ;;  %v4401_v0 = vmul.f32 %v4400_v17, %v9590_v61 }
 0x40a   : > { %v4388_v30 = vmul.f32 %v4387_v35, %v4363_v39  ;;  %v4415_v59 = vmul.f32 %v5995_v15, %v9705_v55  ;;  %v9732_v56 = vadd.f32 1.0, %v4452_v23  ;;  %v4440_v32 = vadd.f32 0.18741608, %v4439_v52 }
 0x40b   : > { %v4476_v28 = vadd.f32 0.0036580483, %v4475_v26  ;;  %v4551_v12 = vmul.f32 %v9725_v45, %v9725_v45  ;;  %v5123_v7 = vadd.f32 1.0, %v5693_v54  ;;  %v4515_v41 = vmul.f32 %v4514_v21, %v9688_v20 }
 0x40c   : > { %v5694_v1 = vclamps-f32 %v4388_v30, 1.0  ;;  %v4416_v60 = vsub.f32 1.0, %v4415_v59  ;;  %5996 = vrcp.f32 %v9732_v56  ;;  %v4423_v5 = vand.u32 2147483647, %v9705_v55 }
 0x40d   : > { %v4425_v9 = vand.u32 2147483648, %v9705_v55  ;;  %v4527_v44 = vadd.f32 0.014752088, %v4526_v42  ;;  %vm4420_vm0 = vweird.f32 %v5995_v15  ;;  %v4490_v61 = vmul.f32 %v4489_v40, %v9667_v47 }
 0x40e   : > { %v5124_v31 = vadd.f32 1.0, %v5694_v1  ;;  %v4417_v51 = vmul.f32 %v5995_v15, %v4416_v60  ;;  %v4402_v17 = vadd.f32 1.1283791, %v4401_v0  ;;  %v4441_v27 = vmul.f32 %v4440_v32, %v9611_v14 }
 0x40f   : > { %v4477_v48 = vmul.f32 %v4476_v28, %v9667_v47  ;;  %v5155_v3 = vmul.f32 %v5123_v7, %v9700_v34  ;;  %vm4419_vm10 = vweird.f32 %v9705_v55  ;;  %v9748_v16 = vmin.f32 %v4551_v12, 16.0  ;;  %v9769_v1 = vpop.f32.mrf.mxu2 }
 0x410   : > { %v5156_v50 = vmul.f32 %v5124_v31, %v3780_v2  ;;  %v4418_v18 = vadd.f32 %v5995_v15, %v4417_v51  ;;  %vm4421_vm11 = vmor %vm4419_vm10, %vm4420_vm0  ;;  %v4426_v38 = vor.u32 1.1754944e-38, %v4425_v9  ;;  %v4491_v39 = vadd.f32 0.4994258, %v4490_v61 }
 0x411   : > { %v4528_v8 = vmul.f32 %v4527_v44, %v9688_v20  ;;  %v4516_v63 = vadd.f32 0.0036580483, %v4515_v41  ;;  %vm4424_vm12 = vcmp.eq.f32.partialorder %v4423_v5, 8.507059e+37  ;;  %v4403_v46 = vmul.f32 %v4402_v17, %v9564_v11 }
 0x412   : > { %v5997_v62 = vpop.eup %5996  ;;  %v5181_v14 = vpack.c.bf16 %v5156_v50, %v5155_v3  ;;  %v4422_v52 = vsel %vm4421_vm11, %v5995_v15, %v4418_v18  ;;  %v4442_v26 = vadd.f32 1.1283791, %v4441_v27  ;;  %v4478_v36 = vadd.f32 0.05243302, %v4477_v48 }
 0x413   : > { %v4427_v57 = vsel %vm4424_vm12, %v4426_v38, %v4422_v52  ;;  %v4455_v34 = vmul.f32 %v5997_v62, %v9732_v56  ;;  %v4492_v22 = vmul.f32 %v4491_v39, %v9667_v47  ;;  %v4529_v54 = vadd.f32 0.112945676, %v4528_v8  ;;  %v9792_v8 = vld [vmem:[%s10525_s8] ss:$0 sm:$0xff] }
 0x414   : > { %5297 = vmatmul.bf16.gmra.mxu3 %v5181_v14  ;;  %v4564_v49 = vmul.f32 3.8918573e-05, %v9748_v16  ;;  %v4517_v23 = vmul.f32 %v4516_v63, %v9688_v20  ;;  %v4428_v2 = vmul.f32 %v4427_v57, %v4403_v46  ;;  %v4463_v15 = vand.u32 2147483647, %v9732_v56 }
 0x415   : > { %v4456_v55 = vsub.f32 1.0, %v4455_v34  ;;  %v4465_v21 = vand.u32 2147483648, %v9732_v56  ;;  %vm4460_vm13 = vweird.f32 %v5997_v62  ;;  %v9758_v42 = vadd.f32 1.0, %v4492_v22 }
 0x416   : > { %v4530_v11 = vmul.f32 %v4529_v54, %v9688_v20  ;;  %v4479_v30 = vmul.f32 %v4478_v36, %v9667_v47  ;;  %v9764_v59 = vadd.f32 %v9619_v25, %v9655_v58  ;;  %vm4459_vm14 = vweird.f32 %v9732_v56 }
 0x417   : > { %v4457_v35 = vmul.f32 %v5997_v62, %v4456_v55  ;;  %5998 = vrcp.f32 %v9758_v42  ;;  %v4565_v0 = vadd.f32 0.001143296, %v4564_v49  ;;  %v4443_v32 = vmul.f32 %v4442_v26, %v9594_v24  ;;  %vm4461_vm15 = vmor %vm4459_vm14, %vm4460_vm13  ;;  %v3747_v26 = vpop.f32.mrf.mxu2 }
 0x418   : > { %v4518_v28 = vadd.f32 0.05243302, %v4517_v23  ;;  %v4466_v12 = vor.u32 1.1754944e-38, %v4465_v21  ;;  %v5695_v7 = vclamps-f32 %v4428_v2, 1.0  ;;  %vm4464_vm1 = vcmp.eq.f32.partialorder %v4463_v15, 8.507059e+37 }
 0x419   : > { %v4458_v40 = vadd.f32 %v5997_v62, %v4457_v35  ;;  %v4531_v58 = vadd.f32 0.4994258, %v4530_v11  ;;  %v9772_v41 = vmul.f32 0.70710677, %v9764_v59  ;;  %v4480_v56 = vadd.f32 0.18741608, %v4479_v30 }
 0x41a   : > { %v4566_v24 = vmul.f32 %v4565_v0, %v9748_v16  ;;  %v4519_v51 = vmul.f32 %v4518_v28, %v9688_v20  ;;  %v5125_v17 = vadd.f32 1.0, %v5695_v7  ;;  %v3781_v48 = vmul.f32 0.5, %v9553_v10 }
 0x41b   : > { %v4462_v60 = vsel %vm4461_vm15, %v5997_v62, %v4458_v40  ;;  %v4532_v44 = vmul.f32 %v4531_v58, %v9688_v20  ;;  %v3782_v3 = vmul.f32 0.5, %v9580_v13  ;;  %v4591_v50 = vmul.f32 %v9772_v41, %v9772_v41  ;;  %v5268_v62 = vpop.f32.mrf.mxu3 }
 0x41c   : > { %v4467_v5 = vsel %vm4464_vm1, %v4466_v12, %v4462_v60  ;;  %v4481_v38 = vmul.f32 %v4480_v56, %v9667_v47  ;;  %v4567_v63 = vadd.f32 0.014752088, %v4566_v24  ;;  %v4553_v10 = vmul.f32 2.1237322e-06, %v9748_v16 }
 0x41d   : > { %v4468_v9 = vmul.f32 %v4467_v5, %v4443_v32  ;;  %v5999_v31 = vpop.eup %5998  ;;  %v9778_v27 = vadd.f32 1.0, %v4532_v44  ;;  %v9797_v13 = vadd.f32 %v9619_v25, %v9683_v37  ;;  %v4520_v52 = vadd.f32 0.18741608, %v4519_v51 }
 0x41e   : > { %v4495_v18 = vmul.f32 %v5999_v31, %v9758_v42  ;;  %v5157_v57 = vmul.f32 %v5125_v17, %v3781_v48  ;;  %v5269_v34 = vadd.f32 %v9792_v8, %v5268_v62  ;;  %v9800_v46 = vmin.f32 %v4591_v50, 16.0 }
 0x41f   : > { %v5696_v61 = vclamps-f32 %v4468_v9, 1.0  ;;  %6000 = vrcp.f32 %v9778_v27  ;;  %vm4500_vm2 = vweird.f32 %v5999_v31  ;;  %v4505_v55 = vand.u32 2147483648, %v9758_v42 }
 0x420   : > { %v4496_v14 = vsub.f32 1.0, %v4495_v18  ;;  %v4482_v22 = vadd.f32 1.1283791, %v4481_v38  ;;  %v4503_v49 = vand.u32 2147483647, %v9758_v42  ;;  %5348 = vst [vmem:[%s9804_s16] sm:$0xff] %v5269_v34  ;;  %v4568_v37 = vmul.f32 %v4567_v63, %v9748_v16 }
 0x421   : > { %v5126_v39 = vadd.f32 1.0, %v5696_v61  ;;  %v4554_v23 = vadd.f32 0.00028619796, %v4553_v10  ;;  %v9809_v2 = vmul.f32 0.70710677, %v9797_v13  ;;  %vm4499_vm3 = vweird.f32 %v9758_v42 }
 0x422   : > { %v4497_v36 = vmul.f32 %v5999_v31, %v4496_v14  ;;  %v4521_v35 = vmul.f32 %v4520_v52, %v9688_v20  ;;  %v9814_v11 = vadd.f32 %v9619_v25, %v3747_v26  ;;  %vm4501_vm4 = vmor %vm4499_vm3, %vm4500_vm2  ;;  %v4569_v30 = vadd.f32 0.112945676, %v4568_v37 }
 0x423   : > { %v5158_v47 = vmul.f32 %v5126_v39, %v3782_v3  ;;  %v4506_v0 = vor.u32 1.1754944e-38, %v4505_v55  ;;  %v4604_v28 = vmul.f32 3.8918573e-05, %v9800_v46  ;;  %v4483_v12 = vmul.f32 %v4482_v22, %v9640_v6  ;;  %v5270_v42 = vpop.f32.mrf.mxu3 }
 0x424   : > { %v4498_v15 = vadd.f32 %v5999_v31, %v4497_v36  ;;  %vm4504_vm5 = vcmp.eq.f32.partialorder %v4503_v49, 8.507059e+37  ;;  %v4555_v20 = vmul.f32 %v4554_v23, %v9748_v16  ;;  %v4631_v7 = vmul.f32 %v9809_v2, %v9809_v2 }
 0x425   : > { %v5182_v54 = vpack.c.bf16 %v5158_v47, %v5157_v57  ;;  %v6001_v21 = vpop.eup %6000  ;;  %v4522_v5 = vadd.f32 1.1283791, %v4521_v35  ;;  %v4593_v56 = vmul.f32 2.1237322e-06, %v9800_v46  ;;  %v5271_v9 = vadd.f32 %v9792_v8, %v5270_v42 }
 0x426   : > { %v4502_v40 = vsel %vm4501_vm4, %v5999_v31, %v4498_v15  ;;  %v4535_v32 = vmul.f32 %v6001_v21, %v9778_v27  ;;  %v4570_v44 = vmul.f32 %v4569_v30, %v9748_v16  ;;  %v9827_v24 = vmul.f32 0.70710677, %v9814_v11 }
 0x427   : > { %5302 = vmatmul.bf16.gmra.mxu3 %v5182_v54  ;;  %v4507_v60 = vsel %vm4504_vm5, %v4506_v0, %v4502_v40  ;;  %v4545_v31 = vand.u32 2147483648, %v9778_v27  ;;  %v4605_v51 = vadd.f32 0.001143296, %v4604_v28  ;;  %vm4540_vm6 = vweird.f32 %v6001_v21  ;;  %5349 = vst [vmem:[%s9804_s16 + $0x8] sm:$0xff] %v5271_v9 }
 0x428   : > { %v4536_v58 = vsub.f32 1.0, %v4535_v32  ;;  %v4508_v61 = vmul.f32 %v4507_v60, %v4483_v12  ;;  %v4543_v17 = vand.u32 2147483647, %v9778_v27  ;;  %v4571_v48 = vadd.f32 0.4994258, %v4570_v44 }
 0x429   : > { %v4556_v3 = vadd.f32 0.0036580483, %v4555_v20  ;;  %v9832_v50 = vmin.f32 %v4631_v7, 16.0  ;;  %v9836_v18 = vadd.f32 %v9619_v25, %v9721_v33  ;;  %v4523_v38 = vmul.f32 %v4522_v5, %v9662_v43 }
 0x42a   : > { %v4537_v6 = vmul.f32 %v6001_v21, %v4536_v58  ;;  %v4594_v39 = vadd.f32 0.00028619796, %v4593_v56  ;;  %vm4539_vm7 = vweird.f32 %v9778_v27  ;;  %v9842_v63 = vadd.f32 %v9619_v25, %v9745_v53 }
 0x42b   : > { %vm4541_vm8 = vmor %vm4539_vm7, %vm4540_vm6  ;;  %v4546_v10 = vor.u32 1.1754944e-38, %v4545_v31  ;;  %v4572_v14 = vmul.f32 %v4571_v48, %v9748_v16  ;;  %v4606_v52 = vmul.f32 %v4605_v51, %v9800_v46  ;;  %v4791_v33 = vmul.f32 %v9827_v24, %v9827_v24 }
 0x42c   : > { %v4538_v62 = vadd.f32 %v6001_v21, %v4537_v6  ;;  %v5697_v57 = vclamps-f32 %v4508_v61, 1.0  ;;  %vm4544_vm9 = vcmp.eq.f32.partialorder %v4543_v17, 8.507059e+37  ;;  %v4557_v43 = vmul.f32 %v4556_v3, %v9748_v16 }
 0x42d   : > { %v9850_v27 = vmul.f32 0.70710677, %v9836_v18  ;;  %v4644_v53 = vmul.f32 3.8918573e-05, %v9832_v50  ;;  %v4595_v26 = vmul.f32 %v4594_v39, %v9800_v46  ;;  %v9854_v55 = vadd.f32 1.0, %v4572_v14 }
 0x42e   : > { %v4542_v47 = vsel %vm4541_vm8, %v6001_v21, %v4538_v62  ;;  %v9857_v22 = vmul.f32 0.70710677, %v9842_v63  ;;  %v4607_v54 = vadd.f32 0.014752088, %v4606_v52  ;;  %v3783_v49 = vmul.f32 0.5, %v9623_v19  ;;  %v3749_v62 = vpop.f32.mrf.mxu2 }
 0x42f   : > { %v4547_v34 = vsel %vm4544_vm9, %v4546_v10, %v4542_v47  ;;  %v9860_v37 = vmin.f32 %v4791_v33, 16.0  ;;  %v5127_v15 = vadd.f32 1.0, %v5697_v57  ;;  %v4558_v21 = vadd.f32 0.05243302, %v4557_v43 }
 0x430   : > { %v4548_v36 = vmul.f32 %v4547_v34, %v4523_v38  ;;  %v4671_v35 = vmul.f32 %v9850_v27, %v9850_v27  ;;  %6002 = vrcp.f32 %v9854_v55  ;;  %v4645_v30 = vadd.f32 0.001143296, %v4644_v53 }
 0x431   : > { %v3784_v40 = vmul.f32 0.5, %v9648_v4  ;;  %v4596_v0 = vadd.f32 0.0036580483, %v4595_v26  ;;  %v4633_v32 = vmul.f32 2.1237322e-06, %v9832_v50  ;;  %v4711_v19 = vmul.f32 %v9857_v22, %v9857_v22 }
 0x432   : > { %v5698_v23 = vclamps-f32 %v4548_v36, 1.0  ;;  %v9871_v12 = vadd.f32 %v9619_v25, %v9769_v1  ;;  %v4608_v42 = vmul.f32 %v4607_v54, %v9800_v46  ;;  %v4804_v20 = vmul.f32 3.8918573e-05, %v9860_v37 }
 0x433   : > { %v5159_v7 = vmul.f32 %v5127_v15, %v3783_v49  ;;  %v9875_v58 = vmin.f32 %v4671_v35, 16.0  ;;  %v4646_v4 = vmul.f32 %v4645_v30, %v9832_v50  ;;  %v4559_v5 = vmul.f32 %v4558_v21, %v9748_v16  ;;  %v5273_v30 = vpop.f32.mrf.mxu3 }
 0x434   : > { %v5128_v28 = vadd.f32 1.0, %v5698_v23  ;;  %v4597_v56 = vmul.f32 %v4596_v0, %v9800_v46  ;;  %v4634_v9 = vadd.f32 0.00028619796, %v4633_v32  ;;  %v9882_v1 = vmin.f32 %v4711_v19, 16.0 }
 0x435   : > { %v9885_v31 = vmul.f32 0.70710677, %v9871_v12  ;;  %v4609_v51 = vadd.f32 0.112945676, %v4608_v42  ;;  %v4805_v61 = vadd.f32 0.001143296, %v4804_v20  ;;  %v9898_v26 = vadd.f32 %v9619_v25, %v3749_v62 }
 0x436   : > { %v5160_v60 = vmul.f32 %v5128_v28, %v3784_v40  ;;  %v9880_v6 = vpop.eup %6002  ;;  %v4673_v48 = vmul.f32 2.1237322e-06, %v9875_v58  ;;  %v4647_v3 = vadd.f32 0.014752088, %v4646_v4  ;;  %v4560_v38 = vadd.f32 0.18741608, %v4559_v5 }
 0x437   : > { %v4575_v17 = vmul.f32 %v9880_v6, %v9854_v55  ;;  %v4598_v39 = vadd.f32 0.05243302, %v4597_v56  ;;  %v4610_v10 = vmul.f32 %v4609_v51, %v9800_v46  ;;  %v4635_v14 = vmul.f32 %v4634_v9, %v9832_v50 }
 0x438   : > { %v5183_v44 = vpack.c.bf16 %v5160_v60, %v5159_v7  ;;  %v4713_v52 = vmul.f32 2.1237322e-06, %v9882_v1  ;;  %v4751_v33 = vmul.f32 %v9885_v31, %v9885_v31  ;;  %v4793_v57 = vmul.f32 2.1237322e-06, %v9860_v37 }
 0x439   : > { %v4806_v47 = vmul.f32 %v4805_v61, %v9860_v37  ;;  %v4576_v43 = vsub.f32 1.0, %v4575_v17  ;;  %v4611_v34 = vadd.f32 0.4994258, %v4610_v10  ;;  %v4674_v53 = vadd.f32 0.00028619796, %v4673_v48  ;;  %v3752_v48 = vpop.f32.mrf.mxu2 }
 0x43a   : > { %5307 = vmatmul.bf16.gmra.mxu3 %v5183_v44  ;;  %v4648_v36 = vmul.f32 %v4647_v3, %v9832_v50  ;;  %v4561_v54 = vmul.f32 %v4560_v38, %v9748_v16  ;;  %v4599_v49 = vmul.f32 %v4598_v39, %v9800_v46  ;;  %v4636_v15 = vadd.f32 0.0036580483, %v4635_v14 }
 0x43b   : > { %v4612_v23 = vmul.f32 %v4611_v34, %v9800_v46  ;;  %v4714_v21 = vadd.f32 0.00028619796, %v4713_v52  ;;  %v9904_v35 = vmin.f32 %v4751_v33, 16.0  ;;  %v4794_v40 = vadd.f32 0.00028619796, %v4793_v57 }
 0x43c   : > { %v4807_v0 = vadd.f32 0.014752088, %v4806_v47  ;;  %v4577_v32 = vmul.f32 %v9880_v6, %v4576_v43  ;;  %v4675_v28 = vmul.f32 %v4674_v53, %v9875_v58  ;;  %v9909_v19 = vmul.f32 0.70710677, %v9898_v26 }
 0x43d   : > { %v9911_v16 = vadd.f32 1.0, %v4612_v23  ;;  %v4649_v42 = vadd.f32 0.112945676, %v4648_v36  ;;  %v4562_v20 = vadd.f32 1.1283791, %v4561_v54  ;;  %v5274_v60 = vadd.f32 %v9792_v8, %v5273_v30 }
 0x43e   : > { %v4600_v7 = vadd.f32 0.18741608, %v4599_v49  ;;  %v4637_v4 = vmul.f32 %v4636_v15, %v9832_v50  ;;  %v4715_v5 = vmul.f32 %v4714_v21, %v9882_v1  ;;  %v4753_v56 = vmul.f32 2.1237322e-06, %v9904_v35 }
 0x43f   : > { %6004 = vrcp.f32 %v9911_v16  ;;  %v4795_v9 = vmul.f32 %v4794_v40, %v9860_v37  ;;  %v4808_v44 = vmul.f32 %v4807_v0, %v9860_v37  ;;  %v4578_v51 = vadd.f32 %v9880_v6, %v4577_v32  ;;  %5350 = vst [vmem:[%s9804_s16 + $0x10] sm:$0xff] %v5274_v60 }
 0x440   : > { %vm4580_vm0 = vweird.f32 %v9880_v6  ;;  %v4676_v61 = vadd.f32 0.0036580483, %v4675_v28  ;;  %v4831_v17 = vmul.f32 %v9909_v19, %v9909_v19  ;;  %v4585_v3 = vand.u32 2147483648, %v9854_v55 }
 0x441   : > { %v4650_v38 = vmul.f32 %v4649_v42, %v9832_v50  ;;  %v4601_v39 = vmul.f32 %v4600_v7, %v9800_v46  ;;  %vm4579_vm10 = vweird.f32 %v9854_v55  ;;  %v4583_v62 = vand.u32 2147483647, %v9854_v55  ;;  %v5275_v55 = vpop.f32.mrf.mxu3 }
 0x442   : > { %v4563_v10 = vmul.f32 %v4562_v20, %v9725_v45  ;;  %v4716_v14 = vadd.f32 0.0036580483, %v4715_v5  ;;  %v4754_v52 = vadd.f32 0.00028619796, %v4753_v56  ;;  %vm9931_vm11 = vmor %vm4579_vm10, %vm4580_vm0  ;;  %v4638_v57 = vadd.f32 0.05243302, %v4637_v4 }
 0x443   : > { %v4796_v47 = vadd.f32 0.0036580483, %v4795_v9  ;;  %v4809_v43 = vadd.f32 0.112945676, %v4808_v44  ;;  %v4582_v34 = vsel %vm9931_vm11, %v9880_v6, %v4578_v51  ;;  %v4677_v53 = vmul.f32 %v4676_v61, %v9875_v58 }
 0x444   : > { %v9939_v36 = vmin.f32 %v4831_v17, 16.0  ;;  %v4586_v45 = vor.u32 1.1754944e-38, %v4585_v3  ;;  %v4651_v54 = vadd.f32 0.4994258, %v4650_v38  ;;  %v4602_v49 = vadd.f32 1.1283791, %v4601_v39  ;;  %v3754_v17 = vpop.f32.mrf.mxu2 }
 0x445   : > { %v6005_v46 = vpop.eup %6004  ;;  %vm4584_vm12 = vcmp.eq.f32.partialorder %v4583_v62, 8.507059e+37  ;;  %v5276_v15 = vadd.f32 %v9792_v8, %v5275_v55  ;;  %v4717_v21 = vmul.f32 %v4716_v14, %v9882_v1  ;;  %v4755_v30 = vmul.f32 %v4754_v52, %v9904_v35 }
 0x446   : > { %v4615_v23 = vmul.f32 %v6005_v46, %v9911_v16  ;;  %v4587_v6 = vsel %vm4584_vm12, %v4586_v45, %v4582_v34  ;;  %v4684_v40 = vmul.f32 3.8918573e-05, %v9875_v58  ;;  %v4639_v0 = vmul.f32 %v4638_v57, %v9832_v50 }
 0x447   : > { %v4797_v32 = vmul.f32 %v4796_v47, %v9860_v37  ;;  %v4810_v28 = vmul.f32 %v4809_v43, %v9860_v37  ;;  %5351 = vst [vmem:[%s9804_s16 + $0x18] sm:$0xff] %v5276_v15  ;;  %v4678_v20 = vadd.f32 0.05243302, %v4677_v53  ;;  %v4844_v7 = vmul.f32 3.8918573e-05, %v9939_v36 }
 0x448   : > { %v4616_v42 = vsub.f32 1.0, %v4615_v23  ;;  %v4625_v60 = vand.u32 2147483648, %v9911_v16  ;;  %v4652_v4 = vmul.f32 %v4651_v54, %v9832_v50  ;;  %v4588_v5 = vmul.f32 %v4587_v6, %v4563_v10 }
 0x449   : > { %vm4620_vm13 = vweird.f32 %v6005_v46  ;;  %v4623_v9 = vand.u32 2147483647, %v9911_v16  ;;  %v4603_v44 = vmul.f32 %v4602_v49, %v9772_v41  ;;  %v4718_v51 = vadd.f32 0.05243302, %v4717_v21 }
 0x44a   : > { %v4617_v56 = vmul.f32 %v6005_v46, %v4616_v42  ;;  %v4756_v61 = vadd.f32 0.0036580483, %v4755_v30  ;;  %v4685_v3 = vadd.f32 0.001143296, %v4684_v40  ;;  %v4798_v38 = vadd.f32 0.05243302, %v4797_v32 }
 0x44b   : > { %v4811_v39 = vadd.f32 0.4994258, %v4810_v28  ;;  %vm4619_vm14 = vweird.f32 %v9911_v16  ;;  %v4845_v14 = vadd.f32 0.001143296, %v4844_v7  ;;  %v9957_v52 = vadd.f32 %v9619_v25, %v3752_v48 }
 0x44c   : > { %v4618_v62 = vadd.f32 %v6005_v46, %v4617_v56  ;;  %vm4621_vm15 = vmor %vm4619_vm14, %vm4620_vm13  ;;  %v4626_v10 = vor.u32 1.1754944e-38, %v4625_v60  ;;  %v9959_v33 = vadd.f32 1.0, %v4652_v4  ;;  %v5699_v57 = vclamps-f32 %v4588_v5, 1.0 }
 0x44d   : > { %vm4624_vm1 = vcmp.eq.f32.partialorder %v4623_v9, 8.507059e+37  ;;  %v9962_v41 = vadd.f32 %v9619_v25, %v3754_v17  ;;  %v4640_v43 = vadd.f32 0.18741608, %v4639_v0  ;;  %v4679_v34 = vmul.f32 %v4678_v20, %v9875_v58 }
 0x44e   : > { %v4622_v47 = vsel %vm4621_vm15, %v6005_v46, %v4618_v62  ;;  %v4686_v16 = vmul.f32 %v4685_v3, %v9875_v58  ;;  %v4719_v45 = vmul.f32 %v4718_v51, %v9882_v1  ;;  %v4757_v48 = vmul.f32 %v4756_v61, %v9904_v35  ;;  %v3757_v62 = vpop.f32.mrf.mxu2 }
 0x44f   : > { %v4627_v53 = vsel %vm4624_vm1, %v4626_v10, %v4622_v47  ;;  %v4812_v55 = vmul.f32 %v4811_v39, %v9860_v37  ;;  %v4799_v49 = vmul.f32 %v4798_v38, %v9860_v37  ;;  %v4846_v46 = vmul.f32 %v4845_v14, %v9939_v36 }
 0x450   : > { %v4628_v54 = vmul.f32 %v4627_v53, %v4603_v44  ;;  %v9972_v25 = vmul.f32 0.70710677, %v9957_v52  ;;  %6006 = vrcp.f32 %v9959_v33  ;;  %v3785_v23 = vmul.f32 0.5, %v9711_v29 }
 0x451   : > { %v5129_v21 = vadd.f32 1.0, %v5699_v57  ;;  %v9977_v30 = vmul.f32 0.70710677, %v9962_v41  ;;  %v3786_v6 = vmul.f32 0.5, %v9764_v59  ;;  %v4641_v40 = vmul.f32 %v4640_v43, %v9832_v50 }
 0x452   : > { %v5700_v15 = vclamps-f32 %v4628_v54, 1.0  ;;  %v4680_v0 = vadd.f32 0.18741608, %v4679_v34  ;;  %v4687_v32 = vadd.f32 0.014752088, %v4686_v16  ;;  %v9981_v20 = vadd.f32 1.0, %v4812_v55 }
 0x453   : > { %v4720_v28 = vadd.f32 0.18741608, %v4719_v45  ;;  %v4758_v42 = vadd.f32 0.05243302, %v4757_v48  ;;  %v9984_v60 = vmul.f32 0.5, %v9797_v13  ;;  %v4871_v5 = vmul.f32 %v9972_v25, %v9972_v25 }
 0x454   : > { %v5130_v7 = vadd.f32 1.0, %v5700_v15  ;;  %v4800_v29 = vadd.f32 0.18741608, %v4799_v49  ;;  %v4847_v4 = vadd.f32 0.014752088, %v4846_v46  ;;  %v5161_v56 = vmul.f32 %v5129_v21, %v3785_v23 }
 0x455   : > { %v4911_v59 = vmul.f32 %v9977_v30, %v9977_v30  ;;  %v4688_v50 = vmul.f32 %v4687_v32, %v9875_v58  ;;  %v4642_v51 = vadd.f32 1.1283791, %v4641_v40  ;;  %v4681_v61 = vmul.f32 %v4680_v0, %v9875_v58 }
 0x456   : > { %v5162_v9 = vmul.f32 %v5130_v7, %v3786_v6  ;;  %v9991_v44 = vpop.eup %6006  ;;  %v4833_v13 = vmul.f32 2.1237322e-06, %v9939_v36  ;;  %v4724_v17 = vmul.f32 3.8918573e-05, %v9882_v1  ;;  %v4721_v3 = vmul.f32 %v4720_v28, %v9882_v1 }
 0x457   : > { %v4759_v38 = vmul.f32 %v4758_v42, %v9904_v35  ;;  %6008 = vrcp.f32 %v9981_v20  ;;  %v10000_v14 = vmul.f32 0.5, %v9836_v18  ;;  %v10003_v10 = vmul.f32 0.5, %v9842_v63  ;;  %v10036_v42 = vld [vmem:[%s10523_s6] ss:$0 sm:$0xff] }
 0x458   : > { %v5184_v39 = vpack.c.bf16 %v5162_v9, %v5161_v56  ;;  %v4848_v57 = vmul.f32 %v4847_v4, %v9939_v36  ;;  %v10006_v47 = vmin.f32 %v4871_v5, 16.0  ;;  %v4801_v43 = vmul.f32 %v4800_v29, %v9860_v37 }
 0x459   : > { %v10009_v34 = vmin.f32 %v4911_v59, 16.0  ;;  %v4655_v53 = vmul.f32 %v9991_v44, %v9959_v33  ;;  %v4689_v16 = vadd.f32 0.112945676, %v4688_v50  ;;  %v10014_v45 = vmul.f32 %v4642_v51, %v9809_v2 }
 0x45a   : > { %5312 = vmatmul.bf16.gmra.mxu3 %v5184_v39  ;;  %v4682_v18 = vadd.f32 1.1283791, %v4681_v61  ;;  %v4834_v48 = vadd.f32 0.00028619796, %v4833_v13  ;;  %v4725_v63 = vadd.f32 0.001143296, %v4724_v17  ;;  %v10039_v7 = vadd.f32 %v10036_v42, %v3757_v62  ;;  %v5278_v13 = vpop.f32.mrf.mxu3  ;;  %v3759_v17 = vpop.f32.mrf.mxu2 }
 0x45b   : > { %v4722_v55 = vadd.f32 1.1283791, %v4721_v3  ;;  %v10017_v54 = vmul.f32 0.5, %v9871_v12  ;;  %v4760_v49 = vadd.f32 0.18741608, %v4759_v38  ;;  %v4690_v37 = vmul.f32 %v4689_v16, %v9875_v58 }
 0x45c   : > { %v4849_v46 = vadd.f32 0.112945676, %v4848_v57  ;;  %v4884_v23 = vmul.f32 3.8918573e-05, %v10006_v47  ;;  %v4726_v15 = vmul.f32 %v4725_v63, %v9882_v1  ;;  %v4764_v21 = vmul.f32 3.8918573e-05, %v9904_v35 }
 0x45d   : > { %v10023_v6 = vpop.eup %6008  ;;  %v10026_v2 = vmul.f32 0.5, %v9814_v11  ;;  %v4802_v40 = vadd.f32 1.1283791, %v4801_v43  ;;  %v4924_v0 = vmul.f32 3.8918573e-05, %v10009_v34  ;;  %v4656_v12 = vsub.f32 1.0, %v4655_v53 }
 0x45e   : > { %v10030_v32 = vmul.f32 %v4682_v18, %v9850_v27  ;;  %v4835_v28 = vmul.f32 %v4834_v48, %v9939_v36  ;;  %v4691_v29 = vadd.f32 0.4994258, %v4690_v37  ;;  %v10042_v11 = vmul.f32 %v4722_v55, %v9857_v22 }
 0x45f   : > { %v10045_v4 = vmul.f32 %v4760_v49, %v9904_v35  ;;  %v4727_v5 = vadd.f32 0.014752088, %v4726_v15  ;;  %v4765_v27 = vadd.f32 0.001143296, %v4764_v21  ;;  %v4815_v56 = vmul.f32 %v10023_v6, %v9981_v20 }
 0x460   : > { %v4850_v9 = vmul.f32 %v4849_v46, %v9939_v36  ;;  %v4885_v59 = vadd.f32 0.001143296, %v4884_v23  ;;  %v4692_v50 = vmul.f32 %v4691_v29, %v9875_v58  ;;  %v10052_v51 = vmul.f32 %v4802_v40, %v9827_v24 }
 0x461   : > { %v4925_v61 = vadd.f32 0.001143296, %v4924_v0  ;;  %v4657_v22 = vmul.f32 %v9991_v44, %v4656_v12  ;;  %v4728_v3 = vmul.f32 %v4727_v5, %v9882_v1  ;;  %v4836_v38 = vadd.f32 0.0036580483, %v4835_v28 }
 0x462   : > { %v10057_v39 = vmul.f32 0.70710677, %v10039_v7  ;;  %v10059_v62 = vadd.f32 1.0, %v4692_v50  ;;  %v5279_v57 = vadd.f32 %v9792_v8, %v5278_v13  ;;  %v4823_v58 = vand.u32 2147483647, %v9981_v20 }
 0x463   : > { %v10064_v24 = vadd.f32 %v10036_v42, %v3759_v17  ;;  %v4729_v43 = vadd.f32 0.112945676, %v4728_v3  ;;  %v4766_v53 = vmul.f32 %v4765_v27, %v9904_v35  ;;  %v4816_v16 = vsub.f32 1.0, %v4815_v56  ;;  %v5280_v3 = vpop.f32.mrf.mxu3 }
 0x464   : > { %v4825_v18 = vand.u32 2147483648, %v9981_v20  ;;  %v4851_v48 = vadd.f32 0.4994258, %v4850_v9  ;;  %v4886_v63 = vmul.f32 %v4885_v59, %v10006_v47  ;;  %5352 = vst [vmem:[%s9804_s16 + $0x20] sm:$0xff] %v5279_v57  ;;  %v4926_v55 = vmul.f32 %v4925_v61, %v10009_v34 }
 0x465   : > { %v4658_v49 = vadd.f32 %v9991_v44, %v4657_v22  ;;  %vm4660_vm2 = vweird.f32 %v9991_v44  ;;  %6010 = vrcp.f32 %v10059_v62  ;;  %v4837_v37 = vmul.f32 %v4836_v38, %v9939_v36 }
 0x466   : > { %v4951_v46 = vmul.f32 %v10057_v39, %v10057_v39  ;;  %vm4659_vm3 = vweird.f32 %v9959_v33  ;;  %v4665_v23 = vand.u32 2147483648, %v9959_v33  ;;  %vm4819_vm4 = vweird.f32 %v9981_v20 }
 0x467   : > { %v4663_v15 = vand.u32 2147483647, %v9959_v33  ;;  %v10082_v21 = vmul.f32 0.70710677, %v10064_v24  ;;  %v4730_v40 = vmul.f32 %v4729_v43, %v9882_v1  ;;  %v4767_v0 = vadd.f32 0.014752088, %v4766_v53  ;;  %vm10090_vm5 = vmor %vm4659_vm3, %vm4660_vm2 }
 0x468   : > { %v4817_v12 = vmul.f32 %v10023_v6, %v4816_v16  ;;  %v4852_v28 = vmul.f32 %v4851_v48, %v9939_v36  ;;  %v4873_v29 = vmul.f32 2.1237322e-06, %v10006_v47  ;;  %v4887_v5 = vadd.f32 0.014752088, %v4886_v63 }
 0x469   : > { %v4927_v33 = vadd.f32 0.014752088, %v4926_v55  ;;  %v4662_v56 = vsel %vm10090_vm5, %v9991_v44, %v4658_v49  ;;  %v4991_v9 = vmul.f32 %v10082_v21, %v10082_v21  ;;  %v4731_v59 = vadd.f32 0.4994258, %v4730_v40 }
 0x46a   : > { %vm4820_vm6 = vweird.f32 %v10023_v6  ;;  %v4826_v50 = vor.u32 1.1754944e-38, %v4825_v18  ;;  %v10100_v61 = vmin.f32 %v4951_v46, 16.0  ;;  %v4666_v22 = vor.u32 1.1754944e-38, %v4665_v23 }
 0x46b   : > { %v6011_v13 = vpop.eup %6010  ;;  %v4838_v17 = vadd.f32 0.05243302, %v4837_v37  ;;  %vm4664_vm7 = vcmp.eq.f32.partialorder %v4663_v15, 8.507059e+37  ;;  %v4732_v38 = vmul.f32 %v4731_v59, %v9882_v1  ;;  %v4768_v57 = vmul.f32 %v4767_v0, %v9904_v35  ;;  %vm10123_vm8 = vmor %vm4819_vm4, %vm4820_vm6 }
 0x46c   : > { %v4874_v43 = vadd.f32 0.00028619796, %v4873_v29  ;;  %v4667_v44 = vsel %vm4664_vm7, %v4666_v22, %v4662_v56  ;;  %v4695_v53 = vmul.f32 %v6011_v13, %v10059_v62  ;;  %v10105_v16 = vmin.f32 %v4991_v9, 16.0 }
 0x46d   : > { %v4818_v48 = vadd.f32 %v10023_v6, %v4817_v12  ;;  %v10108_v18 = vadd.f32 1.0, %v4852_v28  ;;  %v4888_v63 = vmul.f32 %v4887_v5, %v10006_v47  ;;  %v4928_v55 = vmul.f32 %v4927_v33, %v10009_v34  ;;  %v3762_v5 = vpop.f32.mrf.mxu2 }
 0x46e   : > { %v4964_v49 = vmul.f32 3.8918573e-05, %v10100_v61  ;;  %v4696_v1 = vsub.f32 1.0, %v4695_v53  ;;  %v5281_v37 = vadd.f32 %v9792_v8, %v5280_v3  ;;  %v10114_v46 = vadd.f32 1.0, %v4732_v38 }
 0x46f   : > { %v4668_v23 = vmul.f32 %v4667_v44, %v10014_v45  ;;  %v4703_v15 = vand.u32 2147483647, %v10059_v62  ;;  %v4705_v40 = vand.u32 2147483648, %v10059_v62  ;;  %v4769_v0 = vadd.f32 0.112945676, %v4768_v57 }
 0x470   : > { %v4697_v28 = vmul.f32 %v6011_v13, %v4696_v1  ;;  %vm4700_vm9 = vweird.f32 %v6011_v13  ;;  %v5004_v29 = vmul.f32 3.8918573e-05, %v10105_v16  ;;  %5353 = vst [vmem:[%s9804_s16 + $0x28] sm:$0xff] %v5281_v37  ;;  %6012 = vrcp.f32 %v10114_v46 }
 0x471   : > { %v4822_v45 = vsel %vm10123_vm8, %v10023_v6, %v4818_v48  ;;  %v4839_v27 = vmul.f32 %v4838_v17, %v9939_v36  ;;  %v4875_v33 = vmul.f32 %v4874_v43, %v10006_v47  ;;  %v4889_v56 = vadd.f32 0.112945676, %v4888_v63 }
 0x472   : > { %6014 = vrcp.f32 %v10108_v18  ;;  %v4698_v9 = vadd.f32 %v6011_v13, %v4697_v28  ;;  %vm4699_vm0 = vweird.f32 %v10059_v62  ;;  %v10138_v59 = vadd.f32 %v10036_v42, %v3762_v5 }
 0x473   : > { %v4929_v22 = vadd.f32 0.112945676, %v4928_v55  ;;  %v4965_v3 = vadd.f32 0.001143296, %v4964_v49  ;;  %v5701_v38 = vclamps-f32 %v4668_v23, 1.0  ;;  %vm4701_vm10 = vmor %vm4699_vm0, %vm4700_vm9  ;;  %v4706_v57 = vor.u32 1.1754944e-38, %v4705_v40 }
 0x474   : > { %v4702_v6 = vsel %vm4701_vm10, %v6011_v13, %v4698_v9  ;;  %vm4704_vm11 = vcmp.eq.f32.partialorder %v4703_v15, 8.507059e+37  ;;  %v5005_v17 = vadd.f32 0.001143296, %v5004_v29  ;;  %v4770_v43 = vmul.f32 %v4769_v0, %v9904_v35 }
 0x475   : > { %vm4824_vm12 = vcmp.eq.f32.partialorder %v4823_v58, 8.507059e+37  ;;  %v4840_v44 = vadd.f32 0.18741608, %v4839_v27  ;;  %v4890_v62 = vmul.f32 %v4889_v56, %v10006_v47  ;;  %v4707_v53 = vsel %vm4704_vm11, %v4706_v57, %v4702_v6 }
 0x476   : > { %v10145_v48 = vpop.eup %6012  ;;  %v4827_v63 = vsel %vm4824_vm12, %v4826_v50, %v4822_v45  ;;  %v4876_v55 = vadd.f32 0.0036580483, %v4875_v33  ;;  %v4708_v49 = vmul.f32 %v4707_v53, %v10030_v32  ;;  %v10149_v1 = vmul.f32 0.70710677, %v10138_v59 }
 0x477   : > { %v4930_v13 = vmul.f32 %v4929_v22, %v10009_v34  ;;  %v4966_v37 = vmul.f32 %v4965_v3, %v10100_v61  ;;  %v5131_v23 = vadd.f32 1.0, %v5701_v38  ;;  %v4735_v20 = vmul.f32 %v10145_v48, %v10114_v46 }
 0x478   : > { %v10155_v58 = vpop.eup %6014  ;;  %v4762_v15 = vadd.f32 1.1283791, %v10045_v4  ;;  %v5702_v40 = vclamps-f32 %v4708_v49, 1.0  ;;  %v5006_v50 = vmul.f32 %v5005_v17, %v10105_v16  ;;  %v4771_v0 = vadd.f32 0.4994258, %v4770_v43 }
 0x479   : > { %v4828_v32 = vmul.f32 %v4827_v63, %v10052_v51  ;;  %v4891_v12 = vadd.f32 0.4994258, %v4890_v62  ;;  %v4913_v28 = vmul.f32 2.1237322e-06, %v10009_v34  ;;  %v4736_v29 = vsub.f32 1.0, %v4735_v20 }
 0x47a   : > { %v4841_v5 = vmul.f32 %v4840_v44, %v9939_v36  ;;  %v4877_v45 = vmul.f32 %v4876_v55, %v10006_v47  ;;  %v5132_v27 = vadd.f32 1.0, %v5702_v40  ;;  %v5031_v33 = vmul.f32 %v10149_v1, %v10149_v1 }
 0x47b   : > { %v4855_v4 = vmul.f32 %v10155_v58, %v10108_v18  ;;  %v4931_v56 = vadd.f32 0.4994258, %v4930_v13  ;;  %v4967_v9 = vadd.f32 0.014752088, %v4966_v37  ;;  %v5163_v22 = vmul.f32 %v5131_v23, %v9984_v60 }
 0x47c   : > { %v5164_v51 = vmul.f32 %v5132_v27, %v10000_v14  ;;  %v5007_v3 = vadd.f32 0.014752088, %v5006_v50  ;;  %v4737_v38 = vmul.f32 %v10145_v48, %v4736_v29  ;;  %v4772_v36 = vmul.f32 %v4771_v0, %v9904_v35 }
 0x47d   : > { %v10172_v57 = vmul.f32 %v4762_v15, %v9885_v31  ;;  %v5705_v6 = vclamps-f32 %v4828_v32, 1.0  ;;  %v4892_v17 = vmul.f32 %v4891_v12, %v10006_v47  ;;  %v4914_v43 = vadd.f32 0.00028619796, %v4913_v28  ;;  %v5283_v15 = vpop.f32.mrf.mxu3 }
 0x47e   : > { %v4842_v44 = vadd.f32 1.1283791, %v4841_v5  ;;  %v5185_v62 = vpack.c.bf16 %v5164_v51, %v5163_v22  ;;  %v10175_v53 = vmin.f32 %v5031_v33, 16.0  ;;  %v10177_v63 = vadd.f32 1.0, %v4772_v36 }
 0x47f   : > { %v4856_v60 = vsub.f32 1.0, %v4855_v4  ;;  %v4878_v14 = vadd.f32 0.05243302, %v4877_v45  ;;  %v4932_v55 = vmul.f32 %v4931_v56, %v10009_v34  ;;  %v4968_v49 = vmul.f32 %v4967_v9, %v10100_v61  ;;  %v3764_v56 = vpop.f32.mrf.mxu2 }
 0x480   : > { %5317 = vmatmul.bf16.gmra.mxu3 %v5185_v62  ;;  %v5008_v31 = vmul.f32 %v5007_v3, %v10105_v16  ;;  %v4738_v35 = vadd.f32 %v10145_v48, %v4737_v38  ;;  %vm4740_vm13 = vweird.f32 %v10145_v48  ;;  %6016 = vrcp.f32 %v10177_v63 }
 0x481   : > { %v10186_v13 = vmul.f32 0.5, %v9898_v26  ;;  %v10188_v37 = vadd.f32 1.0, %v4892_v17  ;;  %v4915_v23 = vmul.f32 %v4914_v43, %v10009_v34  ;;  %v4745_v20 = vand.u32 2147483648, %v10114_v46 }
 0x482   : > { %v10192_v40 = vadd.f32 1.0, %v5705_v6  ;;  %v5044_v50 = vmul.f32 3.8918573e-05, %v10175_v53  ;;  %vm4739_vm14 = vweird.f32 %v10114_v46  ;;  %v4743_v0 = vand.u32 2147483647, %v10114_v46 }
 0x483   : > { %v10198_v32 = vmul.f32 %v4842_v44, %v9909_v19  ;;  %v4857_v26 = vmul.f32 %v10155_v58, %v4856_v60  ;;  %v4863_v12 = vand.u32 2147483647, %v10108_v18  ;;  %v4879_v28 = vmul.f32 %v4878_v14, %v10006_v47  ;;  %vm10205_vm15 = vmor %vm4739_vm14, %vm4740_vm13 }
 0x484   : > { %vm4859_vm1 = vweird.f32 %v10108_v18  ;;  %v10210_v5 = vadd.f32 1.0, %v4932_v55  ;;  %v4969_v46 = vadd.f32 0.112945676, %v4968_v49  ;;  %v5009_v45 = vadd.f32 0.112945676, %v5008_v31 }
 0x485   : > { %v4742_v19 = vsel %vm10205_vm15, %v10145_v48, %v4738_v35  ;;  %6018 = vrcp.f32 %v10188_v37  ;;  %v4916_v27 = vadd.f32 0.0036580483, %v4915_v23  ;;  %v4746_v33 = vor.u32 1.1754944e-38, %v4745_v20  ;;  %v5285_v14 = vpop.f32.mrf.mxu3 }
 0x486   : > { %v5284_v4 = vadd.f32 %v9792_v8, %v5283_v15  ;;  %v6017_v9 = vpop.eup %6016  ;;  %v4865_v22 = vand.u32 2147483648, %v10108_v18  ;;  %v5045_v51 = vadd.f32 0.001143296, %v5044_v50  ;;  %vm4744_vm2 = vcmp.eq.f32.partialorder %v4743_v0, 8.507059e+37 }
 0x487   : > { %v10219_v3 = vadd.f32 %v10036_v42, %v3764_v56  ;;  %vm4860_vm3 = vweird.f32 %v10155_v58  ;;  %v4880_v38 = vadd.f32 0.18741608, %v4879_v28  ;;  %v4747_v36 = vsel %vm4744_vm2, %v4746_v33, %v4742_v19 }
 0x488   : > { %v4775_v48 = vmul.f32 %v6017_v9, %v10177_v63  ;;  %5354 = vst [vmem:[%s9804_s16 + $0x30] sm:$0xff] %v5284_v4  ;;  %v4858_v6 = vadd.f32 %v10155_v58, %v4857_v26  ;;  %6020 = vrcp.f32 %v10210_v5  ;;  %v4970_v17 = vmul.f32 %v4969_v46, %v10100_v61  ;;  %vm10252_vm6 = vmor %vm4859_vm1, %vm4860_vm3 }
 0x489   : > { %v5010_v43 = vmul.f32 %v5009_v45, %v10105_v16  ;;  %v4917_v44 = vmul.f32 %v4916_v27, %v10009_v34  ;;  %v4953_v42 = vmul.f32 2.1237322e-06, %v10100_v61  ;;  %v10231_v60 = vmul.f32 0.70710677, %v10219_v3 }
 0x48a   : > { %v4776_v62 = vsub.f32 1.0, %v4775_v48  ;;  %vm10233_vm4 = vcmp.eq.f32.partialorder %v4863_v12, 8.507059e+37  ;;  %v5046_v49 = vmul.f32 %v5045_v51, %v10175_v53  ;;  %v4748_v31 = vmul.f32 %v4747_v36, %v10042_v11 }
 0x48b   : > { %v4785_v35 = vand.u32 2147483648, %v10177_v63  ;;  %v5286_v23 = vadd.f32 %v9792_v8, %v5285_v14  ;;  %v10241_v20 = vpop.eup %6018  ;;  %vm4780_vm5 = vweird.f32 %v6017_v9  ;;  %v4783_v50 = vand.u32 2147483647, %v10177_v63 }
 0x48c   : > { %v4777_v15 = vmul.f32 %v6017_v9, %v4776_v62  ;;  %v5071_v0 = vmul.f32 %v10231_v60, %v10231_v60  ;;  %v4866_v26 = vor.u32 1.1754944e-38, %v4865_v22  ;;  %v4881_v12 = vmul.f32 %v4880_v38, %v10006_v47  ;;  %v10280_v62 = vld [vmem:[%s10525_s8] ss:$0 sm:$0xff] }
 0x48d   : > { %v4971_v28 = vadd.f32 0.4994258, %v4970_v17  ;;  %v5011_v29 = vadd.f32 0.4994258, %v5010_v43  ;;  %5355 = vst [vmem:[%s9804_s16 + $0x38] sm:$0xff] %v5286_v23  ;;  %vm4779_vm7 = vweird.f32 %v10177_v63  ;;  %v4862_v47 = vsel %vm10252_vm6, %v10155_v58, %v4858_v6  ;;  %v5288_v43 = vpop.f32.mrf.mxu3 }
 0x48e   : > { %v4993_v11 = vmul.f32 2.1237322e-06, %v10105_v16  ;;  %v4778_v46 = vadd.f32 %v6017_v9, %v4777_v15  ;;  %v10258_v45 = vmin.f32 %v5071_v0, 16.0  ;;  %v10260_v19 = vpop.eup %6020  ;;  %v4895_v18 = vmul.f32 %v10241_v20, %v10188_v37  ;;  %vm4781_vm8 = vmor %vm4779_vm7, %vm4780_vm5 }
 0x48f   : > { %v5047_v27 = vadd.f32 0.014752088, %v5046_v49  ;;  %v4786_v33 = vor.u32 1.1754944e-38, %v4785_v35  ;;  %v4918_v4 = vadd.f32 0.05243302, %v4917_v44  ;;  %v5703_v56 = vclamps-f32 %v4748_v31, 1.0 }
 0x490   : > { %v4782_v22 = vsel %vm4781_vm8, %v6017_v9, %v4778_v46  ;;  %vm4784_vm9 = vcmp.eq.f32.partialorder %v4783_v50, 8.507059e+37  ;;  %v4954_v63 = vadd.f32 0.00028619796, %v4953_v42  ;;  %v5012_v51 = vmul.f32 %v5011_v29, %v10105_v16 }
 0x491   : > { %v4787_v38 = vsel %vm4784_vm9, %v4786_v33, %v4782_v22  ;;  %v5084_v36 = vmul.f32 3.8918573e-05, %v10258_v45  ;;  %v4935_v58 = vmul.f32 %v10260_v19, %v10210_v5  ;;  %v4972_v48 = vmul.f32 %v4971_v28, %v10100_v61 }
 0x492   : > { %v4994_v6 = vadd.f32 0.00028619796, %v4993_v11  ;;  %v4788_v17 = vmul.f32 %v4787_v38, %v10172_v57  ;;  %v10274_v44 = vadd.f32 1.1283791, %v4881_v12  ;;  %v5048_v9 = vmul.f32 %v5047_v27, %v10175_v53 }
 0x493   : > { %v5085_v42 = vadd.f32 0.001143296, %v5084_v36  ;;  %v5289_v14 = vadd.f32 %v10280_v62, %v5288_v43  ;;  %v4867_v49 = vsel %vm10233_vm4, %v4866_v26, %v4862_v47  ;;  %v4896_v31 = vsub.f32 1.0, %v4895_v18 }
 0x494   : > { %v5704_v35 = vclamps-f32 %v4788_v17, 1.0  ;;  %v5133_v23 = vadd.f32 1.0, %v5703_v56  ;;  %v4919_v57 = vmul.f32 %v4918_v4, %v10009_v34  ;;  %v4955_v15 = vmul.f32 %v4954_v63, %v10100_v61 }
 0x495   : > { %v10287_v50 = vadd.f32 1.0, %v5012_v51  ;;  %v5086_v0 = vmul.f32 %v5085_v42, %v10258_v45  ;;  %5356 = vst [vmem:[%s9804_s16 + $0x40] sm:$0xff] %v5289_v14  ;;  %v4936_v12 = vsub.f32 1.0, %v4935_v58  ;;  %v10291_v28 = vadd.f32 1.0, %v4972_v48 }
 0x496   : > { %v4995_v29 = vmul.f32 %v4994_v6, %v10105_v16  ;;  %v5134_v8 = vadd.f32 1.0, %v5704_v35  ;;  %vm4899_vm0 = vweird.f32 %v10188_v37  ;;  %v4905_v55 = vand.u32 2147483648, %v10188_v37 }
 0x497   : > { %v5049_v26 = vadd.f32 0.112945676, %v5048_v9  ;;  %v5087_v11 = vadd.f32 0.014752088, %v5086_v0  ;;  %v4868_v46 = vmul.f32 %v4867_v49, %v10198_v32  ;;  %v4897_v47 = vmul.f32 %v10241_v20, %v4896_v31  ;;  %v5290_v32 = vpop.f32.mrf.mxu3 }
 0x498   : > { %v5165_v18 = vmul.f32 %v5133_v23, %v10003_v10  ;;  %v5166_v27 = vmul.f32 %v5134_v8, %v10017_v54  ;;  %v4920_v33 = vadd.f32 0.18741608, %v4919_v57  ;;  %v4956_v4 = vadd.f32 0.0036580483, %v4955_v15 }
 0x499   : > { %6022 = vrcp.f32 %v10287_v50  ;;  %v5088_v56 = vmul.f32 %v5087_v11, %v10258_v45  ;;  %v4937_v22 = vmul.f32 %v10260_v19, %v4936_v12  ;;  %v4996_v63 = vadd.f32 0.0036580483, %v4995_v29 }
 0x49a   : > { %6024 = vrcp.f32 %v10291_v28  ;;  %v5186_v51 = vpack.c.bf16 %v5166_v27, %v5165_v18  ;;  %v4903_v38 = vand.u32 2147483647, %v10188_v37  ;;  %v5050_v10 = vmul.f32 %v5049_v26, %v10175_v53 }
 0x49b   : > { %v5089_v36 = vadd.f32 0.112945676, %v5088_v56  ;;  %v5291_v54 = vadd.f32 %v10280_v62, %v5290_v32  ;;  %v5706_v58 = vclamps-f32 %v4868_v46, 1.0  ;;  %v4898_v48 = vadd.f32 %v10241_v20, %v4897_v47 }
 0x49c   : > { %vm4900_vm10 = vweird.f32 %v10241_v20  ;;  %v4906_v6 = vor.u32 1.1754944e-38, %v4905_v55  ;;  %5322 = vmatmul.bf16.gmra.mxu3 %v5186_v51  ;;  %v4921_v17 = vmul.f32 %v4920_v33, %v10009_v34  ;;  %v4945_v43 = vand.u32 2147483648, %v10210_v5 }
 0x49d   : > { %v4957_v9 = vmul.f32 %v4956_v4, %v10100_v61  ;;  %v5090_v42 = vmul.f32 %v5089_v36, %v10258_v45  ;;  %5357 = vst [vmem:[%s9804_s16 + $0x48] sm:$0xff] %v5291_v54  ;;  %v4938_v14 = vadd.f32 %v10260_v19, %v4937_v22  ;;  %vm4940_vm11 = vweird.f32 %v10260_v19  ;;  %vm10322_vm12 = vmor %vm4899_vm0, %vm4900_vm10 }
 0x49e   : > { %v4997_v49 = vmul.f32 %v4996_v63, %v10105_v16  ;;  %v5073_v31 = vmul.f32 2.1237322e-06, %v10258_v45  ;;  %v5033_v23 = vmul.f32 2.1237322e-06, %v10175_v53  ;;  %v5051_v57 = vadd.f32 0.4994258, %v5050_v10 }
 0x49f   : > { %v10318_v35 = vpop.eup %6022  ;;  %v5091_v15 = vadd.f32 0.4994258, %v5090_v42  ;;  %v5136_v12 = vadd.f32 1.0, %v5706_v58  ;;  %v4902_v29 = vsel %vm10322_vm12, %v10241_v20, %v4898_v48  ;;  %vm4939_vm13 = vweird.f32 %v10210_v5 }
 0x4a0   : > { %v10327_v0 = vpop.eup %6024  ;;  %v4943_v8 = vand.u32 2147483647, %v10210_v5  ;;  %v4922_v37 = vadd.f32 1.1283791, %v4921_v17  ;;  %vm10334_vm14 = vmor %vm4939_vm13, %vm4940_vm11  ;;  %v4946_v26 = vor.u32 1.1754944e-38, %v4945_v43  ;;  %v5015_v20 = vmul.f32 %v10318_v35, %v10287_v50  ;;  %v5293_v5 = vpop.f32.mrf.mxu3 }
 0x4a1   : > { %v4958_v11 = vadd.f32 0.05243302, %v4957_v9  ;;  %v5092_v46 = vmul.f32 %v5091_v15, %v10258_v45  ;;  %v4942_v47 = vsel %vm10334_vm14, %v10260_v19, %v4938_v14  ;;  %v4998_v18 = vadd.f32 0.05243302, %v4997_v49 }
 0x4a2   : > { %v5074_v27 = vadd.f32 0.00028619796, %v5073_v31  ;;  %v4975_v33 = vmul.f32 %v10327_v0, %v10291_v28  ;;  %v5034_v4 = vadd.f32 0.00028619796, %v5033_v23  ;;  %v5052_v56 = vmul.f32 %v5051_v57, %v10175_v53 }
 0x4a3   : > { %v5294_v22 = vadd.f32 %v10280_v62, %v5293_v5  ;;  %v5167_v63 = vmul.f32 %v10192_v40, %v10026_v2  ;;  %v5168_v19 = vmul.f32 %v5136_v12, %v10186_v13  ;;  %vm4904_vm15 = vcmp.eq.f32.partialorder %v4903_v38, 8.507059e+37 }
 0x4a4   : > { %vm4944_vm1 = vcmp.eq.f32.partialorder %v4943_v8, 8.507059e+37  ;;  %v4907_v51 = vsel %vm4904_vm15, %v4906_v6, %v4902_v29  ;;  %v4959_v10 = vmul.f32 %v4958_v11, %v10100_v61  ;;  %v10352_v36 = vadd.f32 1.0, %v5092_v46 }
 0x4a5   : > { %v4947_v32 = vsel %vm4944_vm1, %v4946_v26, %v4942_v47  ;;  %5358 = vst [vmem:[%s9804_s16 + $0x50] sm:$0xff] %v5294_v22  ;;  %v4923_v54 = vmul.f32 %v4922_v37, %v9977_v30  ;;  %v4999_v58 = vmul.f32 %v4998_v18, %v10105_v16  ;;  %v5016_v48 = vsub.f32 1.0, %v5015_v20 }
 0x4a6   : > { %v5075_v17 = vmul.f32 %v5074_v27, %v10258_v45  ;;  %v4883_v2 = vmul.f32 %v10274_v44, %v9972_v25  ;;  %v4976_v13 = vsub.f32 1.0, %v4975_v33  ;;  %v5035_v40 = vmul.f32 %v5034_v4, %v10175_v53 }
 0x4a7   : > { %v10361_v38 = vadd.f32 1.0, %v5052_v56  ;;  %v4948_v6 = vmul.f32 %v4947_v32, %v4923_v54  ;;  %v5187_v43 = vpack.c.bf16 %v5168_v19, %v5167_v63  ;;  %v4960_v42 = vadd.f32 0.18741608, %v4959_v10 }
 0x4a8   : > { %v4908_v9 = vmul.f32 %v4907_v51, %v4883_v2  ;;  %6026 = vrcp.f32 %v10352_v36  ;;  %v5000_v30 = vadd.f32 0.18741608, %v4999_v58  ;;  %v5017_v14 = vmul.f32 %v10318_v35, %v5016_v48  ;;  %v5295_v31 = vpop.f32.mrf.mxu3 }
 0x4a9   : > { %v5076_v49 = vadd.f32 0.0036580483, %v5075_v17  ;;  %v4977_v34 = vmul.f32 %v10327_v0, %v4976_v13  ;;  %v5036_v25 = vadd.f32 0.0036580483, %v5035_v40  ;;  %6028 = vrcp.f32 %v10361_v38 }
 0x4aa   : > { %v5296_v44 = vadd.f32 %v10280_v62, %v5295_v31  ;;  %v5708_v23 = vclamps-f32 %v4948_v6, 1.0  ;;  %v3793_v57 = vmul.f32 0.5, %v9957_v52  ;;  %v5707_v15 = vclamps-f32 %v4908_v9, 1.0 }
 0x4ab   : > { %v3794_v12 = vmul.f32 0.5, %v9962_v41  ;;  %v4961_v29 = vmul.f32 %v4960_v42, %v10100_v61  ;;  %v5001_v8 = vmul.f32 %v5000_v30, %v10105_v16  ;;  %v5018_v37 = vadd.f32 %v10318_v35, %v5017_v14 }
 0x4ac   : > { %5327 = vmatmul.bf16.gmra.mxu3 %v5187_v43  ;;  %5359 = vst [vmem:[%s9804_s16 + $0x58] sm:$0xff] %v5296_v44  ;;  %vm5020_vm2 = vweird.f32 %v10318_v35  ;;  %v5077_v55 = vmul.f32 %v5076_v49, %v10258_v45  ;;  %v4978_v11 = vadd.f32 %v10327_v0, %v4977_v34  ;;  %vm4980_vm3 = vweird.f32 %v10327_v0 }
 0x4ad   : > { %v5025_v52 = vand.u32 2147483648, %v10287_v50  ;;  %v5037_v41 = vmul.f32 %v5036_v25, %v10175_v53  ;;  %v5138_v61 = vadd.f32 1.0, %v5708_v23  ;;  %v4985_v46 = vand.u32 2147483648, %v10291_v28 }
 0x4ae   : > { %v10376_v26 = vpop.eup %6026  ;;  %vm5019_vm4 = vweird.f32 %v10287_v50  ;;  %v5023_v16 = vand.u32 2147483647, %v10287_v50  ;;  %v5137_v18 = vadd.f32 1.0, %v5707_v15  ;;  %v4962_v20 = vadd.f32 1.1283791, %v4961_v29 }
 0x4af   : > { %v10385_v47 = vpop.eup %6028  ;;  %vm4979_vm5 = vweird.f32 %v10291_v28  ;;  %v4983_v27 = vand.u32 2147483647, %v10291_v28  ;;  %vm10391_vm6 = vmor %vm5019_vm4, %vm5020_vm2  ;;  %v5002_v4 = vadd.f32 1.1283791, %v5001_v8  ;;  %v5078_v56 = vadd.f32 0.05243302, %v5077_v55 }
 0x4b0   : > { %vm10395_vm7 = vmor %vm4979_vm5, %vm4980_vm3  ;;  %v5022_v50 = vsel %vm10391_vm6, %v10318_v35, %v5018_v37  ;;  %v5095_v28 = vmul.f32 %v10376_v26, %v10352_v36  ;;  %v5298_v22 = vpop.f32.mrf.mxu3  ;;  %v5026_v19 = vor.u32 1.1754944e-38, %v5025_v52  ;;  %v5038_v51 = vadd.f32 0.05243302, %v5037_v41 }
 0x4b1   : > { %v4982_v63 = vsel %vm10395_vm7, %v10327_v0, %v4978_v11  ;;  %v5299_v32 = vadd.f32 %v10280_v62, %v5298_v22  ;;  %v5170_v10 = vmul.f32 %v5138_v61, %v3794_v12  ;;  %v4986_v54 = vor.u32 1.1754944e-38, %v4985_v46 }
 0x4b2   : > { %vm5024_vm8 = vcmp.eq.f32.partialorder %v5023_v16, 8.507059e+37  ;;  %v5055_v58 = vmul.f32 %v10385_v47, %v10361_v38  ;;  %v5169_v35 = vmul.f32 %v5137_v18, %v3793_v57  ;;  %vm4984_vm9 = vcmp.eq.f32.partialorder %v4983_v27, 8.507059e+37 }
 0x4b3   : > { %v5027_v48 = vsel %vm5024_vm8, %v5026_v19, %v5022_v50  ;;  %5360 = vst [vmem:[%s9804_s16 + $0x60] sm:$0xff] %v5299_v32  ;;  %v4987_v17 = vsel %vm4984_vm9, %v4986_v54, %v4982_v63  ;;  %v5003_v2 = vmul.f32 %v5002_v4, %v10082_v21  ;;  %v5079_v13 = vmul.f32 %v5078_v56, %v10258_v45 }
 0x4b4   : > { %v5096_v0 = vsub.f32 1.0, %v5095_v28  ;;  %v4963_v40 = vmul.f32 %v4962_v20, %v10057_v39  ;;  %v5039_v6 = vmul.f32 %v5038_v51, %v10175_v53  ;;  %v5056_v9 = vsub.f32 1.0, %v5055_v58 }
 0x4b5   : > { %v5028_v43 = vmul.f32 %v5027_v48, %v5003_v2  ;;  %v5188_v42 = vpack.c.bf16 %v5170_v10, %v5169_v35  ;;  %v5080_v14 = vadd.f32 0.18741608, %v5079_v13  ;;  %vm5100_vm0 = vweird.f32 %v10376_v26 }
 0x4b6   : > { %v4988_v30 = vmul.f32 %v4987_v17, %v4963_v40  ;;  %v5097_v49 = vmul.f32 %v10376_v26, %v5096_v0  ;;  %v5040_v34 = vadd.f32 0.18741608, %v5039_v6  ;;  %v5057_v44 = vmul.f32 %v10385_v47, %v5056_v9 }
 0x4b7   : > { %v5710_v21 = vclamps-f32 %v5028_v43, 1.0  ;;  %v5081_v39 = vmul.f32 %v5080_v14, %v10258_v45  ;;  %vm5060_vm10 = vweird.f32 %v10385_v47  ;;  %v5105_v12 = vand.u32 2147483648, %v10352_v36 }
 0x4b8   : > { %v5300_v31 = vpop.f32.mrf.mxu3  ;;  %v5709_v23 = vclamps-f32 %v4988_v30, 1.0  ;;  %v5098_v57 = vadd.f32 %v10376_v26, %v5097_v49  ;;  %v5041_v15 = vmul.f32 %v5040_v34, %v10175_v53  ;;  %v5058_v8 = vadd.f32 %v10385_v47, %v5057_v44 }
 0x4b9   : > { %v5301_v25 = vadd.f32 %v10280_v62, %v5300_v31  ;;  %v5140_v29 = vadd.f32 1.0, %v5710_v21  ;;  %vm5099_vm11 = vweird.f32 %v10352_v36  ;;  %v5103_v37 = vand.u32 2147483647, %v10352_v36 }
 0x4ba   : > { %v5139_v55 = vadd.f32 1.0, %v5709_v23  ;;  %v3796_v45 = vmul.f32 0.5, %v10064_v24  ;;  %v5065_v11 = vand.u32 2147483648, %v10361_v38  ;;  %vm10430_vm12 = vmor %vm5099_vm11, %vm5100_vm0  ;;  %vm5059_vm13 = vweird.f32 %v10361_v38 }
 0x4bb   : > { %5361 = vst [vmem:[%s9804_s16 + $0x68] sm:$0xff] %v5301_v25  ;;  %v5063_v53 = vand.u32 2147483647, %v10361_v38  ;;  %v5082_v41 = vadd.f32 1.1283791, %v5081_v39  ;;  %v5102_v61 = vsel %vm10430_vm12, %v10376_v26, %v5098_v57  ;;  %v3795_v46 = vmul.f32 0.5, %v10039_v7  ;;  %vm5061_vm14 = vmor %vm5059_vm13, %vm5060_vm10 }
 0x4bc   : > { %5332 = vmatmul.bf16.gmra.mxu3 %v5188_v42  ;;  %v5106_v24 = vor.u32 1.1754944e-38, %v5105_v12  ;;  %v5172_v18 = vmul.f32 %v5140_v29, %v3796_v45  ;;  %v5042_v20 = vadd.f32 1.1283791, %v5041_v15  ;;  %v5062_v27 = vsel %vm5061_vm14, %v10385_v47, %v5058_v8 }
 0x4bd   : > { %vm5104_vm15 = vcmp.eq.f32.partialorder %v5103_v37, 8.507059e+37  ;;  %v5066_v38 = vor.u32 1.1754944e-38, %v5065_v11  ;;  %v5171_v33 = vmul.f32 %v5139_v55, %v3795_v46  ;;  %vm5064_vm1 = vcmp.eq.f32.partialorder %v5063_v53, 8.507059e+37 }
 0x4be   : > { %v5107_v5 = vsel %vm5104_vm15, %v5106_v24, %v5102_v61  ;;  %v5083_v26 = vmul.f32 %v5082_v41, %v10231_v60  ;;  %v5043_v4 = vmul.f32 %v5042_v20, %v10149_v1  ;;  %v3798_v60 = vmul.f32 0.5, %v10219_v3 }
 0x4bf   : > { %v5067_v7 = vsel %vm5064_vm1, %v5066_v38, %v5062_v27  ;;  %v5189_v56 = vpack.c.bf16 %v5172_v18, %v5171_v33  ;;  %v3797_v54 = vmul.f32 0.5, %v10138_v59 }
 0x4c0   : > { %v5303_v36 = vpop.f32.mrf.mxu3  ;;  %v5108_v50 = vmul.f32 %v5107_v5, %v5083_v26  ;;  %v5068_v28 = vmul.f32 %v5067_v7, %v5043_v4 }
 0x4c1   : > { %v5304_v16 = vadd.f32 %v10280_v62, %v5303_v36 }
 0x4c2   : > { %v5712_v47 = vclamps-f32 %v5108_v50, 1.0  ;;  %v5711_v19 = vclamps-f32 %v5068_v28, 1.0 }
 0x4c3   : > { %5362 = vst [vmem:[%s9804_s16 + $0x70] sm:$0xff] %v5304_v16 }
 0x4c4   : > { %v5142_v51 = vadd.f32 1.0, %v5712_v47  ;;  %v5141_v32 = vadd.f32 1.0, %v5711_v19 }
 0x4c6   : > { %v5174_v58 = vmul.f32 %v5142_v51, %v3798_v60  ;;  %v5173_v35 = vmul.f32 %v5141_v32, %v3797_v54 }
 0x4c8   : > { %v5305_v22 = vpop.f32.mrf.mxu3  ;;  %v5190_v48 = vpack.c.bf16 %v5174_v58, %v5173_v35 }
 0x4c9   : > { %v5306_v63 = vadd.f32 %v10280_v62, %v5305_v22 }
 0x4cb   : > { %5363 = vst [vmem:[%s9804_s16 + $0x78] sm:$0xff] %v5306_v63 }
 0x4cc   : > { %5337 = vmatmul.bf16.gmra.mxu3 %v5189_v56 }
 0x4d0   : > { %v5308_v10 = vpop.f32.mrf.mxu3 }
 0x4d1   : > { %v5309_v1 = vadd.f32 %v10280_v62, %v5308_v10 }
 0x4d3   : > { %5364 = vst [vmem:[%s9804_s16 + $0x80] sm:$0xff] %v5309_v1 }
 0x4d8   : > { %v5310_v17 = vpop.f32.mrf.mxu3 }
 0x4d9   : > { %v5311_v2 = vadd.f32 %v10280_v62, %v5310_v17 }
 0x4db   : > { %5365 = vst [vmem:[%s9804_s16 + $0x88] sm:$0xff] %v5311_v2 }
 0x4dc   : > { %5342 = vmatmul.bf16.gmra.mxu3 %v5190_v48 }
 0x4e0   : > { %v5313_v13 = vpop.f32.mrf.mxu3 }
 0x4e1   : > { %v5314_v3 = vadd.f32 %v10280_v62, %v5313_v13 }
 0x4e3   : > { %5366 = vst [vmem:[%s9804_s16 + $0x90] sm:$0xff] %v5314_v3 }
 0x4e8   : > { %v5315_v0 = vpop.f32.mrf.mxu3 }
 0x4e9   : > { %v5316_v59 = vadd.f32 %v10280_v62, %v5315_v0 }
 0x4eb   : > { %5367 = vst [vmem:[%s9804_s16 + $0x98] sm:$0xff] %v5316_v59 }
 0x503   : > { %v5318_v40 = vpop.f32.mrf.mxu3 }
 0x504   : > { %v5319_v6 = vadd.f32 %v10280_v62, %v5318_v40 }
 0x506   : > { %5368 = vst [vmem:[%s9804_s16 + $0xa0] sm:$0xff] %v5319_v6 }
 0x50b   : > { %v5320_v43 = vpop.f32.mrf.mxu3 }
 0x50c   : > { %v5321_v9 = vadd.f32 %v10280_v62, %v5320_v43 }
 0x50e   : > { %5369 = vst [vmem:[%s9804_s16 + $0xa8] sm:$0xff] %v5321_v9 }
 0x51f   : > { %v5323_v42 = vpop.f32.mrf.mxu3 }
 0x520   : > { %v5324_v30 = vadd.f32 %v10280_v62, %v5323_v42 }
 0x522   : > { %5370 = vst [vmem:[%s9804_s16 + $0xb0] sm:$0xff] %v5324_v30 }
 0x527   : > { %v5325_v14 = vpop.f32.mrf.mxu3 }
 0x528   : > { %v5326_v49 = vadd.f32 %v10280_v62, %v5325_v14 }
 0x52a   : > { %5371 = vst [vmem:[%s9804_s16 + $0xb8] sm:$0xff] %v5326_v49 }
 0x52f   : > { %v5328_v31 = vpop.f32.mrf.mxu3 }
 0x530   : > { %v5329_v34 = vadd.f32 %v10280_v62, %v5328_v31 }
 0x532   : > { %5372 = vst [vmem:[%s9804_s16 + $0xc0] sm:$0xff] %v5329_v34 }
 0x537   : > { %v5330_v25 = vpop.f32.mrf.mxu3 }
 0x538   : > { %v5331_v21 = vadd.f32 %v10280_v62, %v5330_v25 }
 0x53a   : > { %5373 = vst [vmem:[%s9804_s16 + $0xc8] sm:$0xff] %v5331_v21 }
 0x53f   : > { %v5333_v44 = vpop.f32.mrf.mxu3 }
 0x540   : > { %v5334_v23 = vadd.f32 %v10280_v62, %v5333_v44 }
 0x542   : > { %5374 = vst [vmem:[%s9804_s16 + $0xd0] sm:$0xff] %v5334_v23 }
 0x547   : > { %v5335_v39 = vpop.f32.mrf.mxu3 }
 0x548   : > { %v5336_v57 = vadd.f32 %v10280_v62, %v5335_v39 }
 0x54a   : > { %5375 = vst [vmem:[%s9804_s16 + $0xd8] sm:$0xff] %v5336_v57 }
 0x54f   : > { %v5338_v15 = vpop.f32.mrf.mxu3 }
 0x550   : > { %v5339_v12 = vadd.f32 %v10280_v62, %v5338_v15 }
 0x552   : > { %5376 = vst [vmem:[%s9804_s16 + $0xe0] sm:$0xff] %v5339_v12 }
 0x557   : > { %v5340_v29 = vpop.f32.mrf.mxu3 }
 0x558   : > { %v5341_v8 = vadd.f32 %v10280_v62, %v5340_v29 }
 0x55a   : > { %5377 = vst [vmem:[%s9804_s16 + $0xe8] sm:$0xff] %v5341_v8 }
 0x55f   : > { %v5343_v37 = vpop.f32.mrf.mxu3 }
 0x560   : > { %v5344_v55 = vadd.f32 %v10280_v62, %v5343_v37 }
 0x562   : > { %5378 = vst [vmem:[%s9804_s16 + $0xf0] sm:$0xff] %v5344_v55 }
 0x567   : > { %v5345_v45 = vpop.f32.mrf.mxu3 }
 0x568   : > { %v5346_v11 = vadd.f32 %v10280_v62, %v5345_v45 }
 0x56a   : > { %5379 = vst [vmem:[%s9804_s16 + $0xf8] sm:$0xff] %v5346_v11 }
 0x56b   : > { %6066 = shalt.err (!%p6063_p3)
}
 0x56c   : > { %s6103_s26 = smov 128   ;;  %s6104_s16 = smov 8  }
 0x56d   : > { %5793 = dma.vmem_to_hbm [thread:$0]  (%p6193_p5), %s5394_s28, 4096, %s5396_s14, %s5381_s17, %s6103_s26, %s6103_s26, %s6104_s16  }
 0x56e PF: > { %p5799_p4 = scmp.ge.s32.totalorder %s6101_s12, 2  ;;  %s5410_s27 = sand.u32 1, %s6089_s30  }
 0x56f   : > { %s5411_s22 = scalar_lea.sflag [#allocation3], %s5410_s27 }
 0x570   : > { %p5796_p7 = pnand %p5799_p4, %p6197_p6 }
 0x572   : > { %p5797_p8 = pneg %p5796_p7 }
 0x574   : > { %6084 = dma.done.wait (%p5797_p8), %s5411_s22, 4096  }
 0x575   : > { %6086 = vsyncadd (%p5797_p8), %s5411_s22, 4294963200  ;;  %p19_p9 = scmp.ge.s32.totalorder %s6180_s15, 4   ;;  %s10691_s30 = smov %s6093_s10 }
 0x576   : > { %s10692_s10 = smov %s6097_s11  ;;  %s10693_s11 = smov %s6191_s18 }
 0x577   : > { %s10694_s12 = smov %s6180_s15  ;;  %21 = sbr.rel (!%p19_p9) target bundleno = 3 (0x3), region = 91 }
 0x57c   :  { %5417 = vsyncpa [#allocation3], 1 }
 0x57d   :  { %5419 = vsyncpa [#allocation3 + $0x1], 1 }

</bundles_post_ra>
